<compile_context>
chip_gen: v6e
topology: v6e:2x2x1
jax: 0.10.0
libtpu: 0.0.40
codegen_flags: <defaults>
</compile_context>

<pallas_src>
import functools
import math

import numpy as np
import jax
import jax.numpy as jnp
from jax import lax
from jax.experimental import pallas as pl
from jax.experimental.pallas import tpu as pltpu

_GN_EPS = 1e-5


def _gelu(x):
    # TODO(synk): PyTorch nn.GELU / F.gelu default to the exact erf-based GELU;
    # the tanh approximation is used here (max abs deviation ~3e-4) since erf
    # lowering in Mosaic is not guaranteed.
    c = math.sqrt(2.0 / math.pi)
    return 0.5 * x * (1.0 + jnp.tanh(c * (x + 0.044715 * x * x * x)))


# ------------------------------ Pallas kernel ------------------------------ #

def _up_kernel(x_ref, uk_ref, masks_ref,
               w1_ref, g1_ref, b1_ref,
               w2_ref, g2_ref, b2_ref,
               w3_ref, g3_ref, b3_ref,
               w4_ref, g4_ref, b4_ref,
               o_ref, col_ref, *, k, pad, Wo, HoWo):
    masks = masks_ref[...]                                   # (k*k, HoWo) 0/1 f32

    def shift_lanes(a, s):
        # out[:, p] = a[:, p + s]; flat positions that fall outside [0, HoWo)
        # are zero-filled (they are masked out anyway).
        c = a.shape[0]
        if s == 0:
            return a
        if s > 0:
            z = jnp.zeros((c, s), jnp.float32)
            return jnp.concatenate([a[:, s:], z], axis=1)
        z = jnp.zeros((c, -s), jnp.float32)
        return jnp.concatenate([z, a[:, :HoWo + s]], axis=1)

    def conv_gn(inp, w_ref, g_ref, b_ref, gelu_after):
        # inp: (Cin_l, HoWo). Build im2col in VMEM scratch, then ONE MXU matmul:
        #   (Cout_l, k*k*Cin_l) @ (k*k*Cin_l, HoWo)
        cin = inp.shape[0]
        for kh in range(k):
            for kw in range(k):
                tap = kh * k + kw
                s = (kh - pad) * Wo + (kw - pad)
                part = shift_lanes(inp, s) * masks[tap:tap + 1, :]
                col_ref[pl.ds(tap * cin, cin), :] = part
        col = col_ref[pl.ds(0, k * k * cin), :]
        y = jnp.dot(w_ref[...], col, preferred_element_type=jnp.float32)
        # GroupNorm(num_groups=1): normalize over all (C, H, W) of this sample.
        m = jnp.mean(y, keepdims=True)
        v = jnp.mean(jnp.square(y - m), keepdims=True)
        y = (y - m) * lax.rsqrt(v + _GN_EPS)
        y = y * g_ref[...] + b_ref[...]                      # per-channel affine (C, 1)
        return _gelu(y) if gelu_after else y

    # 1) bilinear 2x upsample (align_corners=True) as one MXU matmul.
    x = x_ref[0].astype(jnp.float32)                         # (Cin, H*W)
    u = jnp.dot(x, uk_ref[...], preferred_element_type=jnp.float32)   # (Cin, HoWo)

    # 2) DoubleConv(in, in, residual=True): gelu(u + GN(conv(gelu(GN(conv(u))))))
    h = conv_gn(u, w1_ref, g1_ref, b1_ref, True)
    h = conv_gn(h, w2_ref, g2_ref, b2_ref, False)
    d = _gelu(u + h)

    # 3) DoubleConv(in, out, mid=in//2): GN(conv(gelu(GN(conv(d)))))
    h = conv_gn(d, w3_ref, g3_ref, b3_ref, True)
    y = conv_gn(h, w4_ref, g4_ref, b4_ref, False)

    o_ref[...] = y[None].astype(o_ref.dtype)


# ---------------------------- static host tables ---------------------------- #

def _bilinear_matrix_2x(n_in):
    """1-D matrix of nn.Upsample(scale_factor=2, bilinear, align_corners=True)."""
    n_out = 2 * n_in
    m = np.zeros((n_out, n_in), np.float64)
    if n_in == 1:
        m[:, 0] = 1.0
        return m.astype(np.float32)
    pos = np.arange(n_out, dtype=np.float64) * (n_in - 1) / (n_out - 1)
    lo = np.clip(np.floor(pos).astype(np.int64), 0, n_in - 2)
    t = pos - lo
    m[np.arange(n_out), lo] += 1.0 - t
    m[np.arange(n_out), lo + 1] += t
    return m.astype(np.float32)


def _tap_masks(ho, wo, k, pad):
    """(k*k, ho*wo) 0/1 masks: tap (kh,kw) valid at output (i,j) iff the input
    sample (i+kh-pad, j+kw-pad) is in range (replicates zero padding)."""
    i = np.arange(ho)[:, None]
    j = np.arange(wo)[None, :]
    out = []
    for kh in range(k):
        for kw in range(k):
            dh, dw = kh - pad, kw - pad
            valid = ((i + dh >= 0) & (i + dh < ho) & (j + dw >= 0) & (j + dw < wo))
            out.append(valid.reshape(-1))
    return np.stack(out).astype(np.float32)


def _w_to_col(w):
    """(O, I, kh, kw) torch conv weight -> (O, kh*kw*I) im2col weight
    (column index = tap*I + c with tap = kh*k + kw)."""
    o, i, kh, kw = w.shape
    return jnp.transpose(w, (0, 2, 3, 1)).reshape(o, kh * kw * i)


# ------------------------------- JAX wrapper -------------------------------- #

def up_forward(x, params, *, k=3, pad=1):
    """Up.forward: x (B, Cin, H, W) NCHW -> (B, Cout, 2H, 2W) NCHW."""
    B, cin, H, W = x.shape
    assert 2 * pad == k - 1, "Up uses 'same' convolutions (k=3,pad=1 / k=1,pad=0)"
    Ho, Wo = 2 * H, 2 * W
    HW, HoWo = H * W, Ho * Wo
    kk = k * k

    cout = params["w4"].shape[0]
    layers = [
        (_w_to_col(params["w1"]), params["g1"], params["b1"]),
        (_w_to_col(params["w2"]), params["g2"], params["b2"]),
        (_w_to_col(params["w3"]), params["g3"], params["b3"]),
        (_w_to_col(params["w4"]), params["g4"], params["b4"]),
    ]
    cmax = max(wc.shape[1] // kk for wc, _, _ in layers)     # largest conv input C

    # Compile-time constants: fused 2-D bilinear operator and boundary tap masks.
    ah = _bilinear_matrix_2x(H)
    aw = _bilinear_matrix_2x(W)
    ukron = jnp.asarray(np.einsum("oh,vw->hwov", ah, aw).reshape(HW, HoWo),
                        jnp.float32)
    masks = jnp.asarray(_tap_masks(Ho, Wo, k, pad))

    x2d = x.reshape(B, cin, HW).astype(jnp.float32)

    def rep(arr):   # whole-array block, shared across the batch grid
        return pl.BlockSpec(arr.shape, lambda b: (0,) * arr.ndim)

    in_specs = [pl.BlockSpec((1, cin, HW), lambda b: (b, 0, 0)),
                rep(ukron), rep(masks)]
    args = [x2d, ukron, masks]
    for wc, g, bt in layers:
        g2 = g.reshape(-1, 1).astype(jnp.float32)
        b2 = bt.reshape(-1, 1).astype(jnp.float32)
        in_specs += [rep(wc), rep(g2), rep(b2)]
        args += [wc.astype(jnp.float32), g2, b2]

    flops = 2 * B * HoWo * (cin * HW +
                            sum(wc.shape[0] * wc.shape[1] for wc, _, _ in layers))
    trans = B * HoWo * (layers[0][0].shape[0] + cin + layers[2][0].shape[0])
    bytes_accessed = (sum(int(a.size) * a.dtype.itemsize for a in args)
                      + B * cout * HoWo * 4)

    out = pl.pallas_call(
        functools.partial(_up_kernel, k=k, pad=pad, Wo=Wo, HoWo=HoWo),
        out_shape=jax.ShapeDtypeStruct((B, cout, HoWo), jnp.float32),
        grid=(B,),
        in_specs=in_specs,
        out_specs=pl.BlockSpec((1, cout, HoWo), lambda b: (b, 0, 0)),
        scratch_shapes=[pltpu.VMEM((kk * cmax, HoWo), jnp.float32)],   # im2col scratch
        compiler_params=pltpu.CompilerParams(
            dimension_semantics=("parallel",),          # B=2 -> both v7x TensorCores
            vmem_limit_bytes=32 * 1024 * 1024),         # explicit (v5e default is 16 MiB)
        cost_estimate=pl.CostEstimate(flops=int(flops), transcendentals=int(trans),
                                      bytes_accessed=int(bytes_accessed)),
    )(*args)
    return out.reshape(B, cout, Ho, Wo)


# ------------------------- pure-JAX reference (check) ------------------------ #

def _upsample2x_ref(x):
    B, C, H, W = x.shape
    ah = jnp.asarray(_bilinear_matrix_2x(H))
    aw = jnp.asarray(_bilinear_matrix_2x(W))
    return jnp.einsum("oh,bchw,vw->bcov", ah, x, aw,
                      precision=lax.Precision.HIGHEST)


def _conv_gn_ref(x, w, g, b, pad):
    y = lax.conv_general_dilated(
        x, w, window_strides=(1, 1), padding=[(pad, pad), (pad, pad)],
        dimension_numbers=("NCHW", "OIHW", "NCHW"),
        precision=lax.Precision.HIGHEST)
    m = jnp.mean(y, axis=(1, 2, 3), keepdims=True)
    v = jnp.mean(jnp.square(y - m), axis=(1, 2, 3), keepdims=True)
    y = (y - m) * lax.rsqrt(v + _GN_EPS)
    return y * g[None, :, None, None] + b[None, :, None, None]


def up_reference(x, p, *, pad=1):
    u = _upsample2x_ref(x)
    h = _gelu(_conv_gn_ref(u, p["w1"], p["g1"], p["b1"], pad))
    h = _conv_gn_ref(h, p["w2"], p["g2"], p["b2"], pad)
    d = _gelu(u + h)
    h = _gelu(_conv_gn_ref(d, p["w3"], p["g3"], p["b3"], pad))
    return _conv_gn_ref(h, p["w4"], p["g4"], p["b4"], pad)


# ------------------------------ parameter init ------------------------------ #

def _conv_init(key, cout, cin, k):
    bound = 1.0 / math.sqrt(cin * k * k)
    return jax.random.uniform(key, (cout, cin, k, k), jnp.float32, -bound, bound)


def init_up_params(key, cin, cout, k=3):
    """Up(cin, cout): DoubleConv(cin,cin,residual=True) then
    DoubleConv(cin,cout,mid=cin//2).  GroupNorm affine params are randomized
    (PyTorch inits them to 1/0) so the affine path is exercised by the check."""
    mid1, mid2 = cin, cin // 2
    ks = jax.random.split(key, 12)

    def gn(kg, kb, c):
        return (1.0 + 0.1 * jax.random.normal(kg, (c,), jnp.float32),
                0.1 * jax.random.normal(kb, (c,), jnp.float32))

    p = {}
    p["w1"] = _conv_init(ks[0], mid1, cin, k)
    p["g1"], p["b1"] = gn(ks[1], ks[2], mid1)
    p["w2"] = _conv_init(ks[3], cin, mid1, k)
    p["g2"], p["b2"] = gn(ks[4], ks[5], cin)
    p["w3"] = _conv_init(ks[6], mid2, cin, k)
    p["g3"], p["b3"] = gn(ks[7], ks[8], mid2)
    p["w4"] = _conv_init(ks[9], cout, mid2, k)
    p["g4"], p["b4"] = gn(ks[10], ks[11], cout)
    return p


# ----------------------------------- main ----------------------------------- #

if __name__ == "__main__":
    B, Cin, Cout, H, W = 2, 16, 8, 16, 16
    key = jax.random.PRNGKey(0)
    kx, kp = jax.random.split(key)

    x = jax.random.normal(kx, (B, Cin, H, W), jnp.float32)
    params = init_up_params(kp, Cin, Cout, k=3)

    fwd = jax.jit(functools.partial(up_forward, k=3, pad=1))
    out = jax.block_until_ready(fwd(x, params))

    assert out.shape == (B, Cout, 2 * H, 2 * W), out.shape
    assert bool(jnp.all(jnp.isfinite(out)))

    ref = jax.block_until_ready(up_reference(x, params, pad=1))
    # f32 throughout; tolerance leaves headroom for MXU f32 pass decomposition.
    np.testing.assert_allclose(np.asarray(out), np.asarray(ref),
                               rtol=2e-2, atol=2e-2)
    print("KERNEL_OK")
</pallas_src>

<mosaic_0001>
module attributes {stable_mosaic.version = 11 : i64} {
  func.func @_up_kernel(%arg0: i32, %arg1: memref<1x16x256xf32, #tpu.memory_space<vmem>>, %arg2: memref<256x1024xf32, #tpu.memory_space<vmem>>, %arg3: memref<9x1024xf32, #tpu.memory_space<vmem>>, %arg4: memref<16x144xf32, #tpu.memory_space<vmem>>, %arg5: memref<16x1xf32, #tpu.memory_space<vmem>>, %arg6: memref<16x1xf32, #tpu.memory_space<vmem>>, %arg7: memref<16x144xf32, #tpu.memory_space<vmem>>, %arg8: memref<16x1xf32, #tpu.memory_space<vmem>>, %arg9: memref<16x1xf32, #tpu.memory_space<vmem>>, %arg10: memref<8x144xf32, #tpu.memory_space<vmem>>, %arg11: memref<8x1xf32, #tpu.memory_space<vmem>>, %arg12: memref<8x1xf32, #tpu.memory_space<vmem>>, %arg13: memref<8x72xf32, #tpu.memory_space<vmem>>, %arg14: memref<8x1xf32, #tpu.memory_space<vmem>>, %arg15: memref<8x1xf32, #tpu.memory_space<vmem>>, %arg16: memref<1x8x1024xf32, #tpu.memory_space<vmem>>, %arg17: memref<144x1024xf32, #tpu.memory_space<vmem>>) attributes {dimension_semantics = [#tpu.dimension_semantics<parallel>], iteration_bounds = array<i64: 2>, scalar_prefetch = 0 : i64, scratch_operands = 1 : i64, tpu.core_type = #tpu.core_type<tc>, window_params = [{transform_indices = @transform_0, window_bounds = array<i64: 1, 16, 256>}, {pipeline_mode = #tpu.pipeline_mode<synchronous>, transform_indices = @transform_1, window_bounds = array<i64: 256, 1024>}, {pipeline_mode = #tpu.pipeline_mode<synchronous>, transform_indices = @transform_2, window_bounds = array<i64: 9, 1024>}, {pipeline_mode = #tpu.pipeline_mode<synchronous>, transform_indices = @transform_3, window_bounds = array<i64: 16, 144>}, {pipeline_mode = #tpu.pipeline_mode<synchronous>, transform_indices = @transform_4, window_bounds = array<i64: 16, 1>}, {pipeline_mode = #tpu.pipeline_mode<synchronous>, transform_indices = @transform_5, window_bounds = array<i64: 16, 1>}, {pipeline_mode = #tpu.pipeline_mode<synchronous>, transform_indices = @transform_6, window_bounds = array<i64: 16, 144>}, {pipeline_mode = #tpu.pipeline_mode<synchronous>, transform_indices = @transform_7, window_bounds = array<i64: 16, 1>}, {pipeline_mode = #tpu.pipeline_mode<synchronous>, transform_indices = @transform_8, window_bounds = array<i64: 16, 1>}, {pipeline_mode = #tpu.pipeline_mode<synchronous>, transform_indices = @transform_9, window_bounds = array<i64: 8, 144>}, {pipeline_mode = #tpu.pipeline_mode<synchronous>, transform_indices = @transform_10, window_bounds = array<i64: 8, 1>}, {pipeline_mode = #tpu.pipeline_mode<synchronous>, transform_indices = @transform_11, window_bounds = array<i64: 8, 1>}, {pipeline_mode = #tpu.pipeline_mode<synchronous>, transform_indices = @transform_12, window_bounds = array<i64: 8, 72>}, {pipeline_mode = #tpu.pipeline_mode<synchronous>, transform_indices = @transform_13, window_bounds = array<i64: 8, 1>}, {pipeline_mode = #tpu.pipeline_mode<synchronous>, transform_indices = @transform_14, window_bounds = array<i64: 8, 1>}, {transform_indices = @transform_15, window_bounds = array<i64: 1, 8, 1024>}]} {
    %c0 = arith.constant 0 : index
    %c0_0 = arith.constant 0 : index
    %0 = vector.load %arg3[%c0, %c0_0] : memref<9x1024xf32, #tpu.memory_space<vmem>>, vector<9x1024xf32>
    %c0_1 = arith.constant 0 : index
    %c0_2 = arith.constant 0 : index
    %c0_3 = arith.constant 0 : index
    %1 = vector.load %arg1[%c0_1, %c0_2, %c0_3] : memref<1x16x256xf32, #tpu.memory_space<vmem>>, vector<1x16x256xf32>
    %2 = vector.shape_cast %1 : vector<1x16x256xf32> to vector<16x256xf32>
    %c0_4 = arith.constant 0 : index
    %c0_5 = arith.constant 0 : index
    %3 = vector.load %arg2[%c0_4, %c0_5] : memref<256x1024xf32, #tpu.memory_space<vmem>>, vector<256x1024xf32>
    %cst = arith.constant dense<0.000000e+00> : vector<16x1024xf32>
    %4 = tpu.matmul %2, %3, %cst {dimension_numbers = #tpu.dot_dimension_numbers<[1], [0], [0], [1], [0, 0, 1, 1], [], []>} : vector<16x256xf32>, vector<256x1024xf32>, vector<16x1024xf32> -> vector<16x1024xf32>
    %cst_6 = arith.constant 0.000000e+00 : f32
    %5 = vector.broadcast %cst_6 : f32 to vector<16x33xf32>
    %6 = vector.extract_strided_slice %4 {offsets = [0, 0], sizes = [16, 991], strides = [1, 1]} : vector<16x1024xf32> to vector<16x991xf32>
    %7 = tpu.concatenate %5, %6 in 1 : vector<16x33xf32>, vector<16x991xf32> -> vector<16x1024xf32>
    %8 = vector.extract_strided_slice %0 {offsets = [0, 0], sizes = [1, 1024], strides = [1, 1]} : vector<9x1024xf32> to vector<1x1024xf32>
    %9 = vector.broadcast %8 : vector<1x1024xf32> to vector<16x1024xf32>
    %10 = arith.mulf %7, %9 : vector<16x1024xf32>
    %c0_7 = arith.constant 0 : index
    %c0_8 = arith.constant 0 : index
    %11 = vector.load %arg17[%c0_7, %c0_8] : memref<144x1024xf32, #tpu.memory_space<vmem>>, vector<16x1024xf32>
    tpu.vector_store %arg17[%c0_7, %c0_8], %10 {strides = array<i32>} : memref<144x1024xf32, #tpu.memory_space<vmem>>, vector<16x1024xf32>,
    %cst_9 = arith.constant 0.000000e+00 : f32
    %12 = vector.broadcast %cst_9 : f32 to vector<16x32xf32>
    %13 = vector.extract_strided_slice %4 {offsets = [0, 0], sizes = [16, 992], strides = [1, 1]} : vector<16x1024xf32> to vector<16x992xf32>
    %14 = tpu.concatenate %12, %13 in 1 : vector<16x32xf32>, vector<16x992xf32> -> vector<16x1024xf32>
    %15 = vector.extract_strided_slice %0 {offsets = [1, 0], sizes = [1, 1024], strides = [1, 1]} : vector<9x1024xf32> to vector<1x1024xf32>
    %16 = vector.broadcast %15 : vector<1x1024xf32> to vector<16x1024xf32>
    %17 = arith.mulf %14, %16 : vector<16x1024xf32>
    %c16 = arith.constant 16 : index
    %c0_10 = arith.constant 0 : index
    %18 = vector.load %arg17[%c16, %c0_10] : memref<144x1024xf32, #tpu.memory_space<vmem>>, vector<16x1024xf32>
    tpu.vector_store %arg17[%c16, %c0_10], %17 {strides = array<i32>} : memref<144x1024xf32, #tpu.memory_space<vmem>>, vector<16x1024xf32>,
    %cst_11 = arith.constant 0.000000e+00 : f32
    %19 = vector.broadcast %cst_11 : f32 to vector<16x31xf32>
    %20 = vector.extract_strided_slice %4 {offsets = [0, 0], sizes = [16, 993], strides = [1, 1]} : vector<16x1024xf32> to vector<16x993xf32>
    %21 = tpu.concatenate %19, %20 in 1 : vector<16x31xf32>, vector<16x993xf32> -> vector<16x1024xf32>
    %22 = vector.extract_strided_slice %0 {offsets = [2, 0], sizes = [1, 1024], strides = [1, 1]} : vector<9x1024xf32> to vector<1x1024xf32>
    %23 = vector.broadcast %22 : vector<1x1024xf32> to vector<16x1024xf32>
    %24 = arith.mulf %21, %23 : vector<16x1024xf32>
    %c32 = arith.constant 32 : index
    %c0_12 = arith.constant 0 : index
    %25 = vector.load %arg17[%c32, %c0_12] : memref<144x1024xf32, #tpu.memory_space<vmem>>, vector<16x1024xf32>
    tpu.vector_store %arg17[%c32, %c0_12], %24 {strides = array<i32>} : memref<144x1024xf32, #tpu.memory_space<vmem>>, vector<16x1024xf32>,
    %cst_13 = arith.constant 0.000000e+00 : f32
    %26 = vector.broadcast %cst_13 : f32 to vector<16x1xf32>
    %27 = vector.extract_strided_slice %4 {offsets = [0, 0], sizes = [16, 1023], strides = [1, 1]} : vector<16x1024xf32> to vector<16x1023xf32>
    %28 = tpu.concatenate %26, %27 in 1 : vector<16x1xf32>, vector<16x1023xf32> -> vector<16x1024xf32>
    %29 = vector.extract_strided_slice %0 {offsets = [3, 0], sizes = [1, 1024], strides = [1, 1]} : vector<9x1024xf32> to vector<1x1024xf32>
    %30 = vector.broadcast %29 : vector<1x1024xf32> to vector<16x1024xf32>
    %31 = arith.mulf %28, %30 : vector<16x1024xf32>
    %c48 = arith.constant 48 : index
    %c0_14 = arith.constant 0 : index
    %32 = vector.load %arg17[%c48, %c0_14] : memref<144x1024xf32, #tpu.memory_space<vmem>>, vector<16x1024xf32>
    tpu.vector_store %arg17[%c48, %c0_14], %31 {strides = array<i32>} : memref<144x1024xf32, #tpu.memory_space<vmem>>, vector<16x1024xf32>,
    %33 = vector.extract_strided_slice %0 {offsets = [4, 0], sizes = [1, 1024], strides = [1, 1]} : vector<9x1024xf32> to vector<1x1024xf32>
    %34 = vector.broadcast %33 : vector<1x1024xf32> to vector<16x1024xf32>
    %35 = arith.mulf %4, %34 : vector<16x1024xf32>
    %c64 = arith.constant 64 : index
    %c0_15 = arith.constant 0 : index
    %36 = vector.load %arg17[%c64, %c0_15] : memref<144x1024xf32, #tpu.memory_space<vmem>>, vector<16x1024xf32>
    tpu.vector_store %arg17[%c64, %c0_15], %35 {strides = array<i32>} : memref<144x1024xf32, #tpu.memory_space<vmem>>, vector<16x1024xf32>,
    %cst_16 = arith.constant 0.000000e+00 : f32
    %37 = vector.broadcast %cst_16 : f32 to vector<16x1xf32>
    %38 = vector.extract_strided_slice %4 {offsets = [0, 1], sizes = [16, 1023], strides = [1, 1]} : vector<16x1024xf32> to vector<16x1023xf32>
    %39 = tpu.concatenate %38, %37 in 1 : vector<16x1023xf32>, vector<16x1xf32> -> vector<16x1024xf32>
    %40 = vector.extract_strided_slice %0 {offsets = [5, 0], sizes = [1, 1024], strides = [1, 1]} : vector<9x1024xf32> to vector<1x1024xf32>
    %41 = vector.broadcast %40 : vector<1x1024xf32> to vector<16x1024xf32>
    %42 = arith.mulf %39, %41 : vector<16x1024xf32>
    %c80 = arith.constant 80 : index
    %c0_17 = arith.constant 0 : index
    %43 = vector.load %arg17[%c80, %c0_17] : memref<144x1024xf32, #tpu.memory_space<vmem>>, vector<16x1024xf32>
    tpu.vector_store %arg17[%c80, %c0_17], %42 {strides = array<i32>} : memref<144x1024xf32, #tpu.memory_space<vmem>>, vector<16x1024xf32>,
    %cst_18 = arith.constant 0.000000e+00 : f32
    %44 = vector.broadcast %cst_18 : f32 to vector<16x31xf32>
    %45 = vector.extract_strided_slice %4 {offsets = [0, 31], sizes = [16, 993], strides = [1, 1]} : vector<16x1024xf32> to vector<16x993xf32>
    %46 = tpu.concatenate %45, %44 in 1 : vector<16x993xf32>, vector<16x31xf32> -> vector<16x1024xf32>
    %47 = vector.extract_strided_slice %0 {offsets = [6, 0], sizes = [1, 1024], strides = [1, 1]} : vector<9x1024xf32> to vector<1x1024xf32>
    %48 = vector.broadcast %47 : vector<1x1024xf32> to vector<16x1024xf32>
    %49 = arith.mulf %46, %48 : vector<16x1024xf32>
    %c96 = arith.constant 96 : index
    %c0_19 = arith.constant 0 : index
    %50 = vector.load %arg17[%c96, %c0_19] : memref<144x1024xf32, #tpu.memory_space<vmem>>, vector<16x1024xf32>
    tpu.vector_store %arg17[%c96, %c0_19], %49 {strides = array<i32>} : memref<144x1024xf32, #tpu.memory_space<vmem>>, vector<16x1024xf32>,
    %cst_20 = arith.constant 0.000000e+00 : f32
    %51 = vector.broadcast %cst_20 : f32 to vector<16x32xf32>
    %52 = vector.extract_strided_slice %4 {offsets = [0, 32], sizes = [16, 992], strides = [1, 1]} : vector<16x1024xf32> to vector<16x992xf32>
    %53 = tpu.concatenate %52, %51 in 1 : vector<16x992xf32>, vector<16x32xf32> -> vector<16x1024xf32>
    %54 = vector.extract_strided_slice %0 {offsets = [7, 0], sizes = [1, 1024], strides = [1, 1]} : vector<9x1024xf32> to vector<1x1024xf32>
    %55 = vector.broadcast %54 : vector<1x1024xf32> to vector<16x1024xf32>
    %56 = arith.mulf %53, %55 : vector<16x1024xf32>
    %c112 = arith.constant 112 : index
    %c0_21 = arith.constant 0 : index
    %57 = vector.load %arg17[%c112, %c0_21] : memref<144x1024xf32, #tpu.memory_space<vmem>>, vector<16x1024xf32>
    tpu.vector_store %arg17[%c112, %c0_21], %56 {strides = array<i32>} : memref<144x1024xf32, #tpu.memory_space<vmem>>, vector<16x1024xf32>,
    %cst_22 = arith.constant 0.000000e+00 : f32
    %58 = vector.broadcast %cst_22 : f32 to vector<16x33xf32>
    %59 = vector.extract_strided_slice %4 {offsets = [0, 33], sizes = [16, 991], strides = [1, 1]} : vector<16x1024xf32> to vector<16x991xf32>
    %60 = tpu.concatenate %59, %58 in 1 : vector<16x991xf32>, vector<16x33xf32> -> vector<16x1024xf32>
    %61 = vector.extract_strided_slice %0 {offsets = [8, 0], sizes = [1, 1024], strides = [1, 1]} : vector<9x1024xf32> to vector<1x1024xf32>
    %62 = vector.broadcast %61 : vector<1x1024xf32> to vector<16x1024xf32>
    %63 = arith.mulf %60, %62 : vector<16x1024xf32>
    %c128 = arith.constant 128 : index
    %c0_23 = arith.constant 0 : index
    %64 = vector.load %arg17[%c128, %c0_23] : memref<144x1024xf32, #tpu.memory_space<vmem>>, vector<16x1024xf32>
    tpu.vector_store %arg17[%c128, %c0_23], %63 {strides = array<i32>} : memref<144x1024xf32, #tpu.memory_space<vmem>>, vector<16x1024xf32>,
    %c0_24 = arith.constant 0 : index
    %c0_25 = arith.constant 0 : index
    %65 = vector.load %arg17[%c0_24, %c0_25] : memref<144x1024xf32, #tpu.memory_space<vmem>>, vector<144x1024xf32>
    %c0_26 = arith.constant 0 : index
    %c0_27 = arith.constant 0 : index
    %66 = vector.load %arg4[%c0_26, %c0_27] : memref<16x144xf32, #tpu.memory_space<vmem>>, vector<16x144xf32>
    %cst_28 = arith.constant dense<0.000000e+00> : vector<16x1024xf32>
    %67 = tpu.matmul %66, %65, %cst_28 {dimension_numbers = #tpu.dot_dimension_numbers<[1], [0], [0], [1], [0, 0, 1, 1], [], []>} : vector<16x144xf32>, vector<144x1024xf32>, vector<16x1024xf32> -> vector<16x1024xf32>
    %68 = vector.shape_cast %67 : vector<16x1024xf32> to vector<1x16x1024xf32>
    %cst_29 = arith.constant dense<0.000000e+00> : vector<1xf32>
    %69 = vector.multi_reduction <add>, %68, %cst_29 [1, 2] : vector<1x16x1024xf32> to vector<1xf32>
    %70 = vector.shape_cast %69 : vector<1xf32> to vector<1x1x1xf32>
    %71 = vector.extract %70[0, 0, 0] : f32 from vector<1x1x1xf32>
    %72 = vector.broadcast %71 : f32 to vector<1x1xf32>
    %cst_30 = arith.constant 1.638400e+04 : f32
    %73 = vector.broadcast %cst_30 : f32 to vector<1x1xf32>
    %74 = arith.divf %72, %73 : vector<1x1xf32>
    %75 = vector.broadcast %74 : vector<1x1xf32> to vector<16x1024xf32>
    %76 = arith.subf %67, %75 : vector<16x1024xf32>
    %77 = arith.mulf %76, %76 : vector<16x1024xf32>
    %78 = vector.shape_cast %77 : vector<16x1024xf32> to vector<1x16x1024xf32>
    %cst_31 = arith.constant dense<0.000000e+00> : vector<1xf32>
    %79 = vector.multi_reduction <add>, %78, %cst_31 [1, 2] : vector<1x16x1024xf32> to vector<1xf32>
    %80 = vector.shape_cast %79 : vector<1xf32> to vector<1x1x1xf32>
    %81 = vector.extract %80[0, 0, 0] : f32 from vector<1x1x1xf32>
    %82 = vector.broadcast %81 : f32 to vector<1x1xf32>
    %cst_32 = arith.constant 1.638400e+04 : f32
    %83 = vector.broadcast %cst_32 : f32 to vector<1x1xf32>
    %84 = arith.divf %82, %83 : vector<1x1xf32>
    %85 = vector.broadcast %74 : vector<1x1xf32> to vector<16x1024xf32>
    %86 = arith.subf %67, %85 : vector<16x1024xf32>
    %cst_33 = arith.constant 9.99999974E-6 : f32
    %87 = vector.broadcast %cst_33 : f32 to vector<1x1xf32>
    %88 = arith.addf %84, %87 : vector<1x1xf32>
    %89 = math.rsqrt %88 : vector<1x1xf32>
    %90 = vector.broadcast %89 : vector<1x1xf32> to vector<16x1024xf32>
    %91 = arith.mulf %86, %90 : vector<16x1024xf32>
    %c0_34 = arith.constant 0 : index
    %c0_35 = arith.constant 0 : index
    %92 = vector.load %arg5[%c0_34, %c0_35] : memref<16x1xf32, #tpu.memory_space<vmem>>, vector<16x1xf32>
    %93 = vector.broadcast %92 : vector<16x1xf32> to vector<16x1024xf32>
    %94 = arith.mulf %91, %93 : vector<16x1024xf32>
    %c0_36 = arith.constant 0 : index
    %c0_37 = arith.constant 0 : index
    %95 = vector.load %arg6[%c0_36, %c0_37] : memref<16x1xf32, #tpu.memory_space<vmem>>, vector<16x1xf32>
    %96 = vector.broadcast %95 : vector<16x1xf32> to vector<16x1024xf32>
    %97 = arith.addf %94, %96 : vector<16x1024xf32>
    %cst_38 = arith.constant 5.000000e-01 : f32
    %98 = vector.broadcast %cst_38 : f32 to vector<16x1024xf32>
    %99 = arith.mulf %98, %97 : vector<16x1024xf32>
    %cst_39 = arith.constant 4.471500e-02 : f32
    %100 = vector.broadcast %cst_39 : f32 to vector<16x1024xf32>
    %101 = arith.mulf %100, %97 : vector<16x1024xf32>
    %102 = arith.mulf %101, %97 : vector<16x1024xf32>
    %103 = arith.mulf %102, %97 : vector<16x1024xf32>
    %104 = arith.addf %97, %103 : vector<16x1024xf32>
    %cst_40 = arith.constant 0.797884583 : f32
    %105 = vector.broadcast %cst_40 : f32 to vector<16x1024xf32>
    %106 = arith.mulf %105, %104 : vector<16x1024xf32>
    %107 = math.tanh %106 : vector<16x1024xf32>
    %cst_41 = arith.constant 1.000000e+00 : f32
    %108 = vector.broadcast %cst_41 : f32 to vector<16x1024xf32>
    %109 = arith.addf %108, %107 : vector<16x1024xf32>
    %110 = arith.mulf %99, %109 : vector<16x1024xf32>
    %cst_42 = arith.constant 0.000000e+00 : f32
    %111 = vector.broadcast %cst_42 : f32 to vector<16x33xf32>
    %112 = vector.extract_strided_slice %110 {offsets = [0, 0], sizes = [16, 991], strides = [1, 1]} : vector<16x1024xf32> to vector<16x991xf32>
    %113 = tpu.concatenate %111, %112 in 1 : vector<16x33xf32>, vector<16x991xf32> -> vector<16x1024xf32>
    %114 = vector.extract_strided_slice %0 {offsets = [0, 0], sizes = [1, 1024], strides = [1, 1]} : vector<9x1024xf32> to vector<1x1024xf32>
    %115 = vector.broadcast %114 : vector<1x1024xf32> to vector<16x1024xf32>
    %116 = arith.mulf %113, %115 : vector<16x1024xf32>
    %c0_43 = arith.constant 0 : index
    %c0_44 = arith.constant 0 : index
    %117 = vector.load %arg17[%c0_43, %c0_44] : memref<144x1024xf32, #tpu.memory_space<vmem>>, vector<16x1024xf32>
    tpu.vector_store %arg17[%c0_43, %c0_44], %116 {strides = array<i32>} : memref<144x1024xf32, #tpu.memory_space<vmem>>, vector<16x1024xf32>,
    %cst_45 = arith.constant 0.000000e+00 : f32
    %118 = vector.broadcast %cst_45 : f32 to vector<16x32xf32>
    %119 = vector.extract_strided_slice %110 {offsets = [0, 0], sizes = [16, 992], strides = [1, 1]} : vector<16x1024xf32> to vector<16x992xf32>
    %120 = tpu.concatenate %118, %119 in 1 : vector<16x32xf32>, vector<16x992xf32> -> vector<16x1024xf32>
    %121 = vector.extract_strided_slice %0 {offsets = [1, 0], sizes = [1, 1024], strides = [1, 1]} : vector<9x1024xf32> to vector<1x1024xf32>
    %122 = vector.broadcast %121 : vector<1x1024xf32> to vector<16x1024xf32>
    %123 = arith.mulf %120, %122 : vector<16x1024xf32>
    %c16_46 = arith.constant 16 : index
    %c0_47 = arith.constant 0 : index
    %124 = vector.load %arg17[%c16_46, %c0_47] : memref<144x1024xf32, #tpu.memory_space<vmem>>, vector<16x1024xf32>
    tpu.vector_store %arg17[%c16_46, %c0_47], %123 {strides = array<i32>} : memref<144x1024xf32, #tpu.memory_space<vmem>>, vector<16x1024xf32>,
    %cst_48 = arith.constant 0.000000e+00 : f32
    %125 = vector.broadcast %cst_48 : f32 to vector<16x31xf32>
    %126 = vector.extract_strided_slice %110 {offsets = [0, 0], sizes = [16, 993], strides = [1, 1]} : vector<16x1024xf32> to vector<16x993xf32>
    %127 = tpu.concatenate %125, %126 in 1 : vector<16x31xf32>, vector<16x993xf32> -> vector<16x1024xf32>
    %128 = vector.extract_strided_slice %0 {offsets = [2, 0], sizes = [1, 1024], strides = [1, 1]} : vector<9x1024xf32> to vector<1x1024xf32>
    %129 = vector.broadcast %128 : vector<1x1024xf32> to vector<16x1024xf32>
    %130 = arith.mulf %127, %129 : vector<16x1024xf32>
    %c32_49 = arith.constant 32 : index
    %c0_50 = arith.constant 0 : index
    %131 = vector.load %arg17[%c32_49, %c0_50] : memref<144x1024xf32, #tpu.memory_space<vmem>>, vector<16x1024xf32>
    tpu.vector_store %arg17[%c32_49, %c0_50], %130 {strides = array<i32>} : memref<144x1024xf32, #tpu.memory_space<vmem>>, vector<16x1024xf32>,
    %cst_51 = arith.constant 0.000000e+00 : f32
    %132 = vector.broadcast %cst_51 : f32 to vector<16x1xf32>
    %133 = vector.extract_strided_slice %110 {offsets = [0, 0], sizes = [16, 1023], strides = [1, 1]} : vector<16x1024xf32> to vector<16x1023xf32>
    %134 = tpu.concatenate %132, %133 in 1 : vector<16x1xf32>, vector<16x1023xf32> -> vector<16x1024xf32>
    %135 = vector.extract_strided_slice %0 {offsets = [3, 0], sizes = [1, 1024], strides = [1, 1]} : vector<9x1024xf32> to vector<1x1024xf32>
    %136 = vector.broadcast %135 : vector<1x1024xf32> to vector<16x1024xf32>
    %137 = arith.mulf %134, %136 : vector<16x1024xf32>
    %c48_52 = arith.constant 48 : index
    %c0_53 = arith.constant 0 : index
    %138 = vector.load %arg17[%c48_52, %c0_53] : memref<144x1024xf32, #tpu.memory_space<vmem>>, vector<16x1024xf32>
    tpu.vector_store %arg17[%c48_52, %c0_53], %137 {strides = array<i32>} : memref<144x1024xf32, #tpu.memory_space<vmem>>, vector<16x1024xf32>,
    %139 = vector.extract_strided_slice %0 {offsets = [4, 0], sizes = [1, 1024], strides = [1, 1]} : vector<9x1024xf32> to vector<1x1024xf32>
    %140 = vector.broadcast %139 : vector<1x1024xf32> to vector<16x1024xf32>
    %141 = arith.mulf %110, %140 : vector<16x1024xf32>
    %c64_54 = arith.constant 64 : index
    %c0_55 = arith.constant 0 : index
    %142 = vector.load %arg17[%c64_54, %c0_55] : memref<144x1024xf32, #tpu.memory_space<vmem>>, vector<16x1024xf32>
    tpu.vector_store %arg17[%c64_54, %c0_55], %141 {strides = array<i32>} : memref<144x1024xf32, #tpu.memory_space<vmem>>, vector<16x1024xf32>,
    %cst_56 = arith.constant 0.000000e+00 : f32
    %143 = vector.broadcast %cst_56 : f32 to vector<16x1xf32>
    %144 = vector.extract_strided_slice %110 {offsets = [0, 1], sizes = [16, 1023], strides = [1, 1]} : vector<16x1024xf32> to vector<16x1023xf32>
    %145 = tpu.concatenate %144, %143 in 1 : vector<16x1023xf32>, vector<16x1xf32> -> vector<16x1024xf32>
    %146 = vector.extract_strided_slice %0 {offsets = [5, 0], sizes = [1, 1024], strides = [1, 1]} : vector<9x1024xf32> to vector<1x1024xf32>
    %147 = vector.broadcast %146 : vector<1x1024xf32> to vector<16x1024xf32>
    %148 = arith.mulf %145, %147 : vector<16x1024xf32>
    %c80_57 = arith.constant 80 : index
    %c0_58 = arith.constant 0 : index
    %149 = vector.load %arg17[%c80_57, %c0_58] : memref<144x1024xf32, #tpu.memory_space<vmem>>, vector<16x1024xf32>
    tpu.vector_store %arg17[%c80_57, %c0_58], %148 {strides = array<i32>} : memref<144x1024xf32, #tpu.memory_space<vmem>>, vector<16x1024xf32>,
    %cst_59 = arith.constant 0.000000e+00 : f32
    %150 = vector.broadcast %cst_59 : f32 to vector<16x31xf32>
    %151 = vector.extract_strided_slice %110 {offsets = [0, 31], sizes = [16, 993], strides = [1, 1]} : vector<16x1024xf32> to vector<16x993xf32>
    %152 = tpu.concatenate %151, %150 in 1 : vector<16x993xf32>, vector<16x31xf32> -> vector<16x1024xf32>
    %153 = vector.extract_strided_slice %0 {offsets = [6, 0], sizes = [1, 1024], strides = [1, 1]} : vector<9x1024xf32> to vector<1x1024xf32>
    %154 = vector.broadcast %153 : vector<1x1024xf32> to vector<16x1024xf32>
    %155 = arith.mulf %152, %154 : vector<16x1024xf32>
    %c96_60 = arith.constant 96 : index
    %c0_61 = arith.constant 0 : index
    %156 = vector.load %arg17[%c96_60, %c0_61] : memref<144x1024xf32, #tpu.memory_space<vmem>>, vector<16x1024xf32>
    tpu.vector_store %arg17[%c96_60, %c0_61], %155 {strides = array<i32>} : memref<144x1024xf32, #tpu.memory_space<vmem>>, vector<16x1024xf32>,
    %cst_62 = arith.constant 0.000000e+00 : f32
    %157 = vector.broadcast %cst_62 : f32 to vector<16x32xf32>
    %158 = vector.extract_strided_slice %110 {offsets = [0, 32], sizes = [16, 992], strides = [1, 1]} : vector<16x1024xf32> to vector<16x992xf32>
    %159 = tpu.concatenate %158, %157 in 1 : vector<16x992xf32>, vector<16x32xf32> -> vector<16x1024xf32>
    %160 = vector.extract_strided_slice %0 {offsets = [7, 0], sizes = [1, 1024], strides = [1, 1]} : vector<9x1024xf32> to vector<1x1024xf32>
    %161 = vector.broadcast %160 : vector<1x1024xf32> to vector<16x1024xf32>
    %162 = arith.mulf %159, %161 : vector<16x1024xf32>
    %c112_63 = arith.constant 112 : index
    %c0_64 = arith.constant 0 : index
    %163 = vector.load %arg17[%c112_63, %c0_64] : memref<144x1024xf32, #tpu.memory_space<vmem>>, vector<16x1024xf32>
    tpu.vector_store %arg17[%c112_63, %c0_64], %162 {strides = array<i32>} : memref<144x1024xf32, #tpu.memory_space<vmem>>, vector<16x1024xf32>,
    %cst_65 = arith.constant 0.000000e+00 : f32
    %164 = vector.broadcast %cst_65 : f32 to vector<16x33xf32>
    %165 = vector.extract_strided_slice %110 {offsets = [0, 33], sizes = [16, 991], strides = [1, 1]} : vector<16x1024xf32> to vector<16x991xf32>
    %166 = tpu.concatenate %165, %164 in 1 : vector<16x991xf32>, vector<16x33xf32> -> vector<16x1024xf32>
    %167 = vector.extract_strided_slice %0 {offsets = [8, 0], sizes = [1, 1024], strides = [1, 1]} : vector<9x1024xf32> to vector<1x1024xf32>
    %168 = vector.broadcast %167 : vector<1x1024xf32> to vector<16x1024xf32>
    %169 = arith.mulf %166, %168 : vector<16x1024xf32>
    %c128_66 = arith.constant 128 : index
    %c0_67 = arith.constant 0 : index
    %170 = vector.load %arg17[%c128_66, %c0_67] : memref<144x1024xf32, #tpu.memory_space<vmem>>, vector<16x1024xf32>
    tpu.vector_store %arg17[%c128_66, %c0_67], %169 {strides = array<i32>} : memref<144x1024xf32, #tpu.memory_space<vmem>>, vector<16x1024xf32>,
    %c0_68 = arith.constant 0 : index
    %c0_69 = arith.constant 0 : index
    %171 = vector.load %arg17[%c0_68, %c0_69] : memref<144x1024xf32, #tpu.memory_space<vmem>>, vector<144x1024xf32>
    %c0_70 = arith.constant 0 : index
    %c0_71 = arith.constant 0 : index
    %172 = vector.load %arg7[%c0_70, %c0_71] : memref<16x144xf32, #tpu.memory_space<vmem>>, vector<16x144xf32>
    %cst_72 = arith.constant dense<0.000000e+00> : vector<16x1024xf32>
    %173 = tpu.matmul %172, %171, %cst_72 {dimension_numbers = #tpu.dot_dimension_numbers<[1], [0], [0], [1], [0, 0, 1, 1], [], []>} : vector<16x144xf32>, vector<144x1024xf32>, vector<16x1024xf32> -> vector<16x1024xf32>
    %174 = vector.shape_cast %173 : vector<16x1024xf32> to vector<1x16x1024xf32>
    %cst_73 = arith.constant dense<0.000000e+00> : vector<1xf32>
    %175 = vector.multi_reduction <add>, %174, %cst_73 [1, 2] : vector<1x16x1024xf32> to vector<1xf32>
    %176 = vector.shape_cast %175 : vector<1xf32> to vector<1x1x1xf32>
    %177 = vector.extract %176[0, 0, 0] : f32 from vector<1x1x1xf32>
    %178 = vector.broadcast %177 : f32 to vector<1x1xf32>
    %cst_74 = arith.constant 1.638400e+04 : f32
    %179 = vector.broadcast %cst_74 : f32 to vector<1x1xf32>
    %180 = arith.divf %178, %179 : vector<1x1xf32>
    %181 = vector.broadcast %180 : vector<1x1xf32> to vector<16x1024xf32>
    %182 = arith.subf %173, %181 : vector<16x1024xf32>
    %183 = arith.mulf %182, %182 : vector<16x1024xf32>
    %184 = vector.shape_cast %183 : vector<16x1024xf32> to vector<1x16x1024xf32>
    %cst_75 = arith.constant dense<0.000000e+00> : vector<1xf32>
    %185 = vector.multi_reduction <add>, %184, %cst_75 [1, 2] : vector<1x16x1024xf32> to vector<1xf32>
    %186 = vector.shape_cast %185 : vector<1xf32> to vector<1x1x1xf32>
    %187 = vector.extract %186[0, 0, 0] : f32 from vector<1x1x1xf32>
    %188 = vector.broadcast %187 : f32 to vector<1x1xf32>
    %cst_76 = arith.constant 1.638400e+04 : f32
    %189 = vector.broadcast %cst_76 : f32 to vector<1x1xf32>
    %190 = arith.divf %188, %189 : vector<1x1xf32>
    %191 = vector.broadcast %180 : vector<1x1xf32> to vector<16x1024xf32>
    %192 = arith.subf %173, %191 : vector<16x1024xf32>
    %cst_77 = arith.constant 9.99999974E-6 : f32
    %193 = vector.broadcast %cst_77 : f32 to vector<1x1xf32>
    %194 = arith.addf %190, %193 : vector<1x1xf32>
    %195 = math.rsqrt %194 : vector<1x1xf32>
    %196 = vector.broadcast %195 : vector<1x1xf32> to vector<16x1024xf32>
    %197 = arith.mulf %192, %196 : vector<16x1024xf32>
    %c0_78 = arith.constant 0 : index
    %c0_79 = arith.constant 0 : index
    %198 = vector.load %arg8[%c0_78, %c0_79] : memref<16x1xf32, #tpu.memory_space<vmem>>, vector<16x1xf32>
    %199 = vector.broadcast %198 : vector<16x1xf32> to vector<16x1024xf32>
    %200 = arith.mulf %197, %199 : vector<16x1024xf32>
    %c0_80 = arith.constant 0 : index
    %c0_81 = arith.constant 0 : index
    %201 = vector.load %arg9[%c0_80, %c0_81] : memref<16x1xf32, #tpu.memory_space<vmem>>, vector<16x1xf32>
    %202 = vector.broadcast %201 : vector<16x1xf32> to vector<16x1024xf32>
    %203 = arith.addf %200, %202 : vector<16x1024xf32>
    %204 = arith.addf %4, %203 : vector<16x1024xf32>
    %cst_82 = arith.constant 5.000000e-01 : f32
    %205 = vector.broadcast %cst_82 : f32 to vector<16x1024xf32>
    %206 = arith.mulf %205, %204 : vector<16x1024xf32>
    %cst_83 = arith.constant 4.471500e-02 : f32
    %207 = vector.broadcast %cst_83 : f32 to vector<16x1024xf32>
    %208 = arith.mulf %207, %204 : vector<16x1024xf32>
    %209 = arith.mulf %208, %204 : vector<16x1024xf32>
    %210 = arith.mulf %209, %204 : vector<16x1024xf32>
    %211 = arith.addf %204, %210 : vector<16x1024xf32>
    %cst_84 = arith.constant 0.797884583 : f32
    %212 = vector.broadcast %cst_84 : f32 to vector<16x1024xf32>
    %213 = arith.mulf %212, %211 : vector<16x1024xf32>
    %214 = math.tanh %213 : vector<16x1024xf32>
    %cst_85 = arith.constant 1.000000e+00 : f32
    %215 = vector.broadcast %cst_85 : f32 to vector<16x1024xf32>
    %216 = arith.addf %215, %214 : vector<16x1024xf32>
    %217 = arith.mulf %206, %216 : vector<16x1024xf32>
    %cst_86 = arith.constant 0.000000e+00 : f32
    %218 = vector.broadcast %cst_86 : f32 to vector<16x33xf32>
    %219 = vector.extract_strided_slice %217 {offsets = [0, 0], sizes = [16, 991], strides = [1, 1]} : vector<16x1024xf32> to vector<16x991xf32>
    %220 = tpu.concatenate %218, %219 in 1 : vector<16x33xf32>, vector<16x991xf32> -> vector<16x1024xf32>
    %221 = vector.extract_strided_slice %0 {offsets = [0, 0], sizes = [1, 1024], strides = [1, 1]} : vector<9x1024xf32> to vector<1x1024xf32>
    %222 = vector.broadcast %221 : vector<1x1024xf32> to vector<16x1024xf32>
    %223 = arith.mulf %220, %222 : vector<16x1024xf32>
    %c0_87 = arith.constant 0 : index
    %c0_88 = arith.constant 0 : index
    %224 = vector.load %arg17[%c0_87, %c0_88] : memref<144x1024xf32, #tpu.memory_space<vmem>>, vector<16x1024xf32>
    tpu.vector_store %arg17[%c0_87, %c0_88], %223 {strides = array<i32>} : memref<144x1024xf32, #tpu.memory_space<vmem>>, vector<16x1024xf32>,
    %cst_89 = arith.constant 0.000000e+00 : f32
    %225 = vector.broadcast %cst_89 : f32 to vector<16x32xf32>
    %226 = vector.extract_strided_slice %217 {offsets = [0, 0], sizes = [16, 992], strides = [1, 1]} : vector<16x1024xf32> to vector<16x992xf32>
    %227 = tpu.concatenate %225, %226 in 1 : vector<16x32xf32>, vector<16x992xf32> -> vector<16x1024xf32>
    %228 = vector.extract_strided_slice %0 {offsets = [1, 0], sizes = [1, 1024], strides = [1, 1]} : vector<9x1024xf32> to vector<1x1024xf32>
    %229 = vector.broadcast %228 : vector<1x1024xf32> to vector<16x1024xf32>
    %230 = arith.mulf %227, %229 : vector<16x1024xf32>
    %c16_90 = arith.constant 16 : index
    %c0_91 = arith.constant 0 : index
    %231 = vector.load %arg17[%c16_90, %c0_91] : memref<144x1024xf32, #tpu.memory_space<vmem>>, vector<16x1024xf32>
    tpu.vector_store %arg17[%c16_90, %c0_91], %230 {strides = array<i32>} : memref<144x1024xf32, #tpu.memory_space<vmem>>, vector<16x1024xf32>,
    %cst_92 = arith.constant 0.000000e+00 : f32
    %232 = vector.broadcast %cst_92 : f32 to vector<16x31xf32>
    %233 = vector.extract_strided_slice %217 {offsets = [0, 0], sizes = [16, 993], strides = [1, 1]} : vector<16x1024xf32> to vector<16x993xf32>
    %234 = tpu.concatenate %232, %233 in 1 : vector<16x31xf32>, vector<16x993xf32> -> vector<16x1024xf32>
    %235 = vector.extract_strided_slice %0 {offsets = [2, 0], sizes = [1, 1024], strides = [1, 1]} : vector<9x1024xf32> to vector<1x1024xf32>
    %236 = vector.broadcast %235 : vector<1x1024xf32> to vector<16x1024xf32>
    %237 = arith.mulf %234, %236 : vector<16x1024xf32>
    %c32_93 = arith.constant 32 : index
    %c0_94 = arith.constant 0 : index
    %238 = vector.load %arg17[%c32_93, %c0_94] : memref<144x1024xf32, #tpu.memory_space<vmem>>, vector<16x1024xf32>
    tpu.vector_store %arg17[%c32_93, %c0_94], %237 {strides = array<i32>} : memref<144x1024xf32, #tpu.memory_space<vmem>>, vector<16x1024xf32>,
    %cst_95 = arith.constant 0.000000e+00 : f32
    %239 = vector.broadcast %cst_95 : f32 to vector<16x1xf32>
    %240 = vector.extract_strided_slice %217 {offsets = [0, 0], sizes = [16, 1023], strides = [1, 1]} : vector<16x1024xf32> to vector<16x1023xf32>
    %241 = tpu.concatenate %239, %240 in 1 : vector<16x1xf32>, vector<16x1023xf32> -> vector<16x1024xf32>
    %242 = vector.extract_strided_slice %0 {offsets = [3, 0], sizes = [1, 1024], strides = [1, 1]} : vector<9x1024xf32> to vector<1x1024xf32>
    %243 = vector.broadcast %242 : vector<1x1024xf32> to vector<16x1024xf32>
    %244 = arith.mulf %241, %243 : vector<16x1024xf32>
    %c48_96 = arith.constant 48 : index
    %c0_97 = arith.constant 0 : index
    %245 = vector.load %arg17[%c48_96, %c0_97] : memref<144x1024xf32, #tpu.memory_space<vmem>>, vector<16x1024xf32>
    tpu.vector_store %arg17[%c48_96, %c0_97], %244 {strides = array<i32>} : memref<144x1024xf32, #tpu.memory_space<vmem>>, vector<16x1024xf32>,
    %246 = vector.extract_strided_slice %0 {offsets = [4, 0], sizes = [1, 1024], strides = [1, 1]} : vector<9x1024xf32> to vector<1x1024xf32>
    %247 = vector.broadcast %246 : vector<1x1024xf32> to vector<16x1024xf32>
    %248 = arith.mulf %217, %247 : vector<16x1024xf32>
    %c64_98 = arith.constant 64 : index
    %c0_99 = arith.constant 0 : index
    %249 = vector.load %arg17[%c64_98, %c0_99] : memref<144x1024xf32, #tpu.memory_space<vmem>>, vector<16x1024xf32>
    tpu.vector_store %arg17[%c64_98, %c0_99], %248 {strides = array<i32>} : memref<144x1024xf32, #tpu.memory_space<vmem>>, vector<16x1024xf32>,
    %cst_100 = arith.constant 0.000000e+00 : f32
    %250 = vector.broadcast %cst_100 : f32 to vector<16x1xf32>
    %251 = vector.extract_strided_slice %217 {offsets = [0, 1], sizes = [16, 1023], strides = [1, 1]} : vector<16x1024xf32> to vector<16x1023xf32>
    %252 = tpu.concatenate %251, %250 in 1 : vector<16x1023xf32>, vector<16x1xf32> -> vector<16x1024xf32>
    %253 = vector.extract_strided_slice %0 {offsets = [5, 0], sizes = [1, 1024], strides = [1, 1]} : vector<9x1024xf32> to vector<1x1024xf32>
    %254 = vector.broadcast %253 : vector<1x1024xf32> to vector<16x1024xf32>
    %255 = arith.mulf %252, %254 : vector<16x1024xf32>
    %c80_101 = arith.constant 80 : index
    %c0_102 = arith.constant 0 : index
    %256 = vector.load %arg17[%c80_101, %c0_102] : memref<144x1024xf32, #tpu.memory_space<vmem>>, vector<16x1024xf32>
    tpu.vector_store %arg17[%c80_101, %c0_102], %255 {strides = array<i32>} : memref<144x1024xf32, #tpu.memory_space<vmem>>, vector<16x1024xf32>,
    %cst_103 = arith.constant 0.000000e+00 : f32
    %257 = vector.broadcast %cst_103 : f32 to vector<16x31xf32>
    %258 = vector.extract_strided_slice %217 {offsets = [0, 31], sizes = [16, 993], strides = [1, 1]} : vector<16x1024xf32> to vector<16x993xf32>
    %259 = tpu.concatenate %258, %257 in 1 : vector<16x993xf32>, vector<16x31xf32> -> vector<16x1024xf32>
    %260 = vector.extract_strided_slice %0 {offsets = [6, 0], sizes = [1, 1024], strides = [1, 1]} : vector<9x1024xf32> to vector<1x1024xf32>
    %261 = vector.broadcast %260 : vector<1x1024xf32> to vector<16x1024xf32>
    %262 = arith.mulf %259, %261 : vector<16x1024xf32>
    %c96_104 = arith.constant 96 : index
    %c0_105 = arith.constant 0 : index
    %263 = vector.load %arg17[%c96_104, %c0_105] : memref<144x1024xf32, #tpu.memory_space<vmem>>, vector<16x1024xf32>
    tpu.vector_store %arg17[%c96_104, %c0_105], %262 {strides = array<i32>} : memref<144x1024xf32, #tpu.memory_space<vmem>>, vector<16x1024xf32>,
    %cst_106 = arith.constant 0.000000e+00 : f32
    %264 = vector.broadcast %cst_106 : f32 to vector<16x32xf32>
    %265 = vector.extract_strided_slice %217 {offsets = [0, 32], sizes = [16, 992], strides = [1, 1]} : vector<16x1024xf32> to vector<16x992xf32>
    %266 = tpu.concatenate %265, %264 in 1 : vector<16x992xf32>, vector<16x32xf32> -> vector<16x1024xf32>
    %267 = vector.extract_strided_slice %0 {offsets = [7, 0], sizes = [1, 1024], strides = [1, 1]} : vector<9x1024xf32> to vector<1x1024xf32>
    %268 = vector.broadcast %267 : vector<1x1024xf32> to vector<16x1024xf32>
    %269 = arith.mulf %266, %268 : vector<16x1024xf32>
    %c112_107 = arith.constant 112 : index
    %c0_108 = arith.constant 0 : index
    %270 = vector.load %arg17[%c112_107, %c0_108] : memref<144x1024xf32, #tpu.memory_space<vmem>>, vector<16x1024xf32>
    tpu.vector_store %arg17[%c112_107, %c0_108], %269 {strides = array<i32>} : memref<144x1024xf32, #tpu.memory_space<vmem>>, vector<16x1024xf32>,
    %cst_109 = arith.constant 0.000000e+00 : f32
    %271 = vector.broadcast %cst_109 : f32 to vector<16x33xf32>
    %272 = vector.extract_strided_slice %217 {offsets = [0, 33], sizes = [16, 991], strides = [1, 1]} : vector<16x1024xf32> to vector<16x991xf32>
    %273 = tpu.concatenate %272, %271 in 1 : vector<16x991xf32>, vector<16x33xf32> -> vector<16x1024xf32>
    %274 = vector.extract_strided_slice %0 {offsets = [8, 0], sizes = [1, 1024], strides = [1, 1]} : vector<9x1024xf32> to vector<1x1024xf32>
    %275 = vector.broadcast %274 : vector<1x1024xf32> to vector<16x1024xf32>
    %276 = arith.mulf %273, %275 : vector<16x1024xf32>
    %c128_110 = arith.constant 128 : index
    %c0_111 = arith.constant 0 : index
    %277 = vector.load %arg17[%c128_110, %c0_111] : memref<144x1024xf32, #tpu.memory_space<vmem>>, vector<16x1024xf32>
    tpu.vector_store %arg17[%c128_110, %c0_111], %276 {strides = array<i32>} : memref<144x1024xf32, #tpu.memory_space<vmem>>, vector<16x1024xf32>,
    %c0_112 = arith.constant 0 : index
    %c0_113 = arith.constant 0 : index
    %278 = vector.load %arg17[%c0_112, %c0_113] : memref<144x1024xf32, #tpu.memory_space<vmem>>, vector<144x1024xf32>
    %c0_114 = arith.constant 0 : index
    %c0_115 = arith.constant 0 : index
    %279 = vector.load %arg10[%c0_114, %c0_115] : memref<8x144xf32, #tpu.memory_space<vmem>>, vector<8x144xf32>
    %cst_116 = arith.constant dense<0.000000e+00> : vector<8x1024xf32>
    %280 = tpu.matmul %279, %278, %cst_116 {dimension_numbers = #tpu.dot_dimension_numbers<[1], [0], [0], [1], [0, 0, 1, 1], [], []>} : vector<8x144xf32>, vector<144x1024xf32>, vector<8x1024xf32> -> vector<8x1024xf32>
    %281 = vector.shape_cast %280 : vector<8x1024xf32> to vector<1x8x1024xf32>
    %cst_117 = arith.constant dense<0.000000e+00> : vector<1xf32>
    %282 = vector.multi_reduction <add>, %281, %cst_117 [1, 2] : vector<1x8x1024xf32> to vector<1xf32>
    %283 = vector.shape_cast %282 : vector<1xf32> to vector<1x1x1xf32>
    %284 = vector.extract %283[0, 0, 0] : f32 from vector<1x1x1xf32>
    %285 = vector.broadcast %284 : f32 to vector<1x1xf32>
    %cst_118 = arith.constant 8.192000e+03 : f32
    %286 = vector.broadcast %cst_118 : f32 to vector<1x1xf32>
    %287 = arith.divf %285, %286 : vector<1x1xf32>
    %288 = vector.broadcast %287 : vector<1x1xf32> to vector<8x1024xf32>
    %289 = arith.subf %280, %288 : vector<8x1024xf32>
    %290 = arith.mulf %289, %289 : vector<8x1024xf32>
    %291 = vector.shape_cast %290 : vector<8x1024xf32> to vector<1x8x1024xf32>
    %cst_119 = arith.constant dense<0.000000e+00> : vector<1xf32>
    %292 = vector.multi_reduction <add>, %291, %cst_119 [1, 2] : vector<1x8x1024xf32> to vector<1xf32>
    %293 = vector.shape_cast %292 : vector<1xf32> to vector<1x1x1xf32>
    %294 = vector.extract %293[0, 0, 0] : f32 from vector<1x1x1xf32>
    %295 = vector.broadcast %294 : f32 to vector<1x1xf32>
    %cst_120 = arith.constant 8.192000e+03 : f32
    %296 = vector.broadcast %cst_120 : f32 to vector<1x1xf32>
    %297 = arith.divf %295, %296 : vector<1x1xf32>
    %298 = vector.broadcast %287 : vector<1x1xf32> to vector<8x1024xf32>
    %299 = arith.subf %280, %298 : vector<8x1024xf32>
    %cst_121 = arith.constant 9.99999974E-6 : f32
    %300 = vector.broadcast %cst_121 : f32 to vector<1x1xf32>
    %301 = arith.addf %297, %300 : vector<1x1xf32>
    %302 = math.rsqrt %301 : vector<1x1xf32>
    %303 = vector.broadcast %302 : vector<1x1xf32> to vector<8x1024xf32>
    %304 = arith.mulf %299, %303 : vector<8x1024xf32>
    %c0_122 = arith.constant 0 : index
    %c0_123 = arith.constant 0 : index
    %305 = vector.load %arg11[%c0_122, %c0_123] : memref<8x1xf32, #tpu.memory_space<vmem>>, vector<8x1xf32>
    %306 = vector.broadcast %305 : vector<8x1xf32> to vector<8x1024xf32>
    %307 = arith.mulf %304, %306 : vector<8x1024xf32>
    %c0_124 = arith.constant 0 : index
    %c0_125 = arith.constant 0 : index
    %308 = vector.load %arg12[%c0_124, %c0_125] : memref<8x1xf32, #tpu.memory_space<vmem>>, vector<8x1xf32>
    %309 = vector.broadcast %308 : vector<8x1xf32> to vector<8x1024xf32>
    %310 = arith.addf %307, %309 : vector<8x1024xf32>
    %cst_126 = arith.constant 5.000000e-01 : f32
    %311 = vector.broadcast %cst_126 : f32 to vector<8x1024xf32>
    %312 = arith.mulf %311, %310 : vector<8x1024xf32>
    %cst_127 = arith.constant 4.471500e-02 : f32
    %313 = vector.broadcast %cst_127 : f32 to vector<8x1024xf32>
    %314 = arith.mulf %313, %310 : vector<8x1024xf32>
    %315 = arith.mulf %314, %310 : vector<8x1024xf32>
    %316 = arith.mulf %315, %310 : vector<8x1024xf32>
    %317 = arith.addf %310, %316 : vector<8x1024xf32>
    %cst_128 = arith.constant 0.797884583 : f32
    %318 = vector.broadcast %cst_128 : f32 to vector<8x1024xf32>
    %319 = arith.mulf %318, %317 : vector<8x1024xf32>
    %320 = math.tanh %319 : vector<8x1024xf32>
    %cst_129 = arith.constant 1.000000e+00 : f32
    %321 = vector.broadcast %cst_129 : f32 to vector<8x1024xf32>
    %322 = arith.addf %321, %320 : vector<8x1024xf32>
    %323 = arith.mulf %312, %322 : vector<8x1024xf32>
    %cst_130 = arith.constant 0.000000e+00 : f32
    %324 = vector.broadcast %cst_130 : f32 to vector<8x33xf32>
    %325 = vector.extract_strided_slice %323 {offsets = [0, 0], sizes = [8, 991], strides = [1, 1]} : vector<8x1024xf32> to vector<8x991xf32>
    %326 = tpu.concatenate %324, %325 in 1 : vector<8x33xf32>, vector<8x991xf32> -> vector<8x1024xf32>
    %327 = vector.extract_strided_slice %0 {offsets = [0, 0], sizes = [1, 1024], strides = [1, 1]} : vector<9x1024xf32> to vector<1x1024xf32>
    %328 = vector.broadcast %327 : vector<1x1024xf32> to vector<8x1024xf32>
    %329 = arith.mulf %326, %328 : vector<8x1024xf32>
    %c0_131 = arith.constant 0 : index
    %c0_132 = arith.constant 0 : index
    %330 = vector.load %arg17[%c0_131, %c0_132] : memref<144x1024xf32, #tpu.memory_space<vmem>>, vector<8x1024xf32>
    tpu.vector_store %arg17[%c0_131, %c0_132], %329 {strides = array<i32>} : memref<144x1024xf32, #tpu.memory_space<vmem>>, vector<8x1024xf32>,
    %cst_133 = arith.constant 0.000000e+00 : f32
    %331 = vector.broadcast %cst_133 : f32 to vector<8x32xf32>
    %332 = vector.extract_strided_slice %323 {offsets = [0, 0], sizes = [8, 992], strides = [1, 1]} : vector<8x1024xf32> to vector<8x992xf32>
    %333 = tpu.concatenate %331, %332 in 1 : vector<8x32xf32>, vector<8x992xf32> -> vector<8x1024xf32>
    %334 = vector.extract_strided_slice %0 {offsets = [1, 0], sizes = [1, 1024], strides = [1, 1]} : vector<9x1024xf32> to vector<1x1024xf32>
    %335 = vector.broadcast %334 : vector<1x1024xf32> to vector<8x1024xf32>
    %336 = arith.mulf %333, %335 : vector<8x1024xf32>
    %c8 = arith.constant 8 : index
    %c0_134 = arith.constant 0 : index
    %337 = vector.load %arg17[%c8, %c0_134] : memref<144x1024xf32, #tpu.memory_space<vmem>>, vector<8x1024xf32>
    tpu.vector_store %arg17[%c8, %c0_134], %336 {strides = array<i32>} : memref<144x1024xf32, #tpu.memory_space<vmem>>, vector<8x1024xf32>,
    %cst_135 = arith.constant 0.000000e+00 : f32
    %338 = vector.broadcast %cst_135 : f32 to vector<8x31xf32>
    %339 = vector.extract_strided_slice %323 {offsets = [0, 0], sizes = [8, 993], strides = [1, 1]} : vector<8x1024xf32> to vector<8x993xf32>
    %340 = tpu.concatenate %338, %339 in 1 : vector<8x31xf32>, vector<8x993xf32> -> vector<8x1024xf32>
    %341 = vector.extract_strided_slice %0 {offsets = [2, 0], sizes = [1, 1024], strides = [1, 1]} : vector<9x1024xf32> to vector<1x1024xf32>
    %342 = vector.broadcast %341 : vector<1x1024xf32> to vector<8x1024xf32>
    %343 = arith.mulf %340, %342 : vector<8x1024xf32>
    %c16_136 = arith.constant 16 : index
    %c0_137 = arith.constant 0 : index
    %344 = vector.load %arg17[%c16_136, %c0_137] : memref<144x1024xf32, #tpu.memory_space<vmem>>, vector<8x1024xf32>
    tpu.vector_store %arg17[%c16_136, %c0_137], %343 {strides = array<i32>} : memref<144x1024xf32, #tpu.memory_space<vmem>>, vector<8x1024xf32>,
    %cst_138 = arith.constant 0.000000e+00 : f32
    %345 = vector.broadcast %cst_138 : f32 to vector<8x1xf32>
    %346 = vector.extract_strided_slice %323 {offsets = [0, 0], sizes = [8, 1023], strides = [1, 1]} : vector<8x1024xf32> to vector<8x1023xf32>
    %347 = tpu.concatenate %345, %346 in 1 : vector<8x1xf32>, vector<8x1023xf32> -> vector<8x1024xf32>
    %348 = vector.extract_strided_slice %0 {offsets = [3, 0], sizes = [1, 1024], strides = [1, 1]} : vector<9x1024xf32> to vector<1x1024xf32>
    %349 = vector.broadcast %348 : vector<1x1024xf32> to vector<8x1024xf32>
    %350 = arith.mulf %347, %349 : vector<8x1024xf32>
    %c24 = arith.constant 24 : index
    %c0_139 = arith.constant 0 : index
    %351 = vector.load %arg17[%c24, %c0_139] : memref<144x1024xf32, #tpu.memory_space<vmem>>, vector<8x1024xf32>
    tpu.vector_store %arg17[%c24, %c0_139], %350 {strides = array<i32>} : memref<144x1024xf32, #tpu.memory_space<vmem>>, vector<8x1024xf32>,
    %352 = vector.extract_strided_slice %0 {offsets = [4, 0], sizes = [1, 1024], strides = [1, 1]} : vector<9x1024xf32> to vector<1x1024xf32>
    %353 = vector.broadcast %352 : vector<1x1024xf32> to vector<8x1024xf32>
    %354 = arith.mulf %323, %353 : vector<8x1024xf32>
    %c32_140 = arith.constant 32 : index
    %c0_141 = arith.constant 0 : index
    %355 = vector.load %arg17[%c32_140, %c0_141] : memref<144x1024xf32, #tpu.memory_space<vmem>>, vector<8x1024xf32>
    tpu.vector_store %arg17[%c32_140, %c0_141], %354 {strides = array<i32>} : memref<144x1024xf32, #tpu.memory_space<vmem>>, vector<8x1024xf32>,
    %cst_142 = arith.constant 0.000000e+00 : f32
    %356 = vector.broadcast %cst_142 : f32 to vector<8x1xf32>
    %357 = vector.extract_strided_slice %323 {offsets = [0, 1], sizes = [8, 1023], strides = [1, 1]} : vector<8x1024xf32> to vector<8x1023xf32>
    %358 = tpu.concatenate %357, %356 in 1 : vector<8x1023xf32>, vector<8x1xf32> -> vector<8x1024xf32>
    %359 = vector.extract_strided_slice %0 {offsets = [5, 0], sizes = [1, 1024], strides = [1, 1]} : vector<9x1024xf32> to vector<1x1024xf32>
    %360 = vector.broadcast %359 : vector<1x1024xf32> to vector<8x1024xf32>
    %361 = arith.mulf %358, %360 : vector<8x1024xf32>
    %c40 = arith.constant 40 : index
    %c0_143 = arith.constant 0 : index
    %362 = vector.load %arg17[%c40, %c0_143] : memref<144x1024xf32, #tpu.memory_space<vmem>>, vector<8x1024xf32>
    tpu.vector_store %arg17[%c40, %c0_143], %361 {strides = array<i32>} : memref<144x1024xf32, #tpu.memory_space<vmem>>, vector<8x1024xf32>,
    %cst_144 = arith.constant 0.000000e+00 : f32
    %363 = vector.broadcast %cst_144 : f32 to vector<8x31xf32>
    %364 = vector.extract_strided_slice %323 {offsets = [0, 31], sizes = [8, 993], strides = [1, 1]} : vector<8x1024xf32> to vector<8x993xf32>
    %365 = tpu.concatenate %364, %363 in 1 : vector<8x993xf32>, vector<8x31xf32> -> vector<8x1024xf32>
    %366 = vector.extract_strided_slice %0 {offsets = [6, 0], sizes = [1, 1024], strides = [1, 1]} : vector<9x1024xf32> to vector<1x1024xf32>
    %367 = vector.broadcast %366 : vector<1x1024xf32> to vector<8x1024xf32>
    %368 = arith.mulf %365, %367 : vector<8x1024xf32>
    %c48_145 = arith.constant 48 : index
    %c0_146 = arith.constant 0 : index
    %369 = vector.load %arg17[%c48_145, %c0_146] : memref<144x1024xf32, #tpu.memory_space<vmem>>, vector<8x1024xf32>
    tpu.vector_store %arg17[%c48_145, %c0_146], %368 {strides = array<i32>} : memref<144x1024xf32, #tpu.memory_space<vmem>>, vector<8x1024xf32>,
    %cst_147 = arith.constant 0.000000e+00 : f32
    %370 = vector.broadcast %cst_147 : f32 to vector<8x32xf32>
    %371 = vector.extract_strided_slice %323 {offsets = [0, 32], sizes = [8, 992], strides = [1, 1]} : vector<8x1024xf32> to vector<8x992xf32>
    %372 = tpu.concatenate %371, %370 in 1 : vector<8x992xf32>, vector<8x32xf32> -> vector<8x1024xf32>
    %373 = vector.extract_strided_slice %0 {offsets = [7, 0], sizes = [1, 1024], strides = [1, 1]} : vector<9x1024xf32> to vector<1x1024xf32>
    %374 = vector.broadcast %373 : vector<1x1024xf32> to vector<8x1024xf32>
    %375 = arith.mulf %372, %374 : vector<8x1024xf32>
    %c56 = arith.constant 56 : index
    %c0_148 = arith.constant 0 : index
    %376 = vector.load %arg17[%c56, %c0_148] : memref<144x1024xf32, #tpu.memory_space<vmem>>, vector<8x1024xf32>
    tpu.vector_store %arg17[%c56, %c0_148], %375 {strides = array<i32>} : memref<144x1024xf32, #tpu.memory_space<vmem>>, vector<8x1024xf32>,
    %cst_149 = arith.constant 0.000000e+00 : f32
    %377 = vector.broadcast %cst_149 : f32 to vector<8x33xf32>
    %378 = vector.extract_strided_slice %323 {offsets = [0, 33], sizes = [8, 991], strides = [1, 1]} : vector<8x1024xf32> to vector<8x991xf32>
    %379 = tpu.concatenate %378, %377 in 1 : vector<8x991xf32>, vector<8x33xf32> -> vector<8x1024xf32>
    %380 = vector.extract_strided_slice %0 {offsets = [8, 0], sizes = [1, 1024], strides = [1, 1]} : vector<9x1024xf32> to vector<1x1024xf32>
    %381 = vector.broadcast %380 : vector<1x1024xf32> to vector<8x1024xf32>
    %382 = arith.mulf %379, %381 : vector<8x1024xf32>
    %c64_150 = arith.constant 64 : index
    %c0_151 = arith.constant 0 : index
    %383 = vector.load %arg17[%c64_150, %c0_151] : memref<144x1024xf32, #tpu.memory_space<vmem>>, vector<8x1024xf32>
    tpu.vector_store %arg17[%c64_150, %c0_151], %382 {strides = array<i32>} : memref<144x1024xf32, #tpu.memory_space<vmem>>, vector<8x1024xf32>,
    %c0_152 = arith.constant 0 : index
    %c0_153 = arith.constant 0 : index
    %384 = vector.load %arg17[%c0_152, %c0_153] : memref<144x1024xf32, #tpu.memory_space<vmem>>, vector<72x1024xf32>
    %c0_154 = arith.constant 0 : index
    %c0_155 = arith.constant 0 : index
    %385 = vector.load %arg13[%c0_154, %c0_155] : memref<8x72xf32, #tpu.memory_space<vmem>>, vector<8x72xf32>
    %cst_156 = arith.constant dense<0.000000e+00> : vector<8x1024xf32>
    %386 = tpu.matmul %385, %384, %cst_156 {dimension_numbers = #tpu.dot_dimension_numbers<[1], [0], [0], [1], [0, 0, 1, 1], [], []>} : vector<8x72xf32>, vector<72x1024xf32>, vector<8x1024xf32> -> vector<8x1024xf32>
    %387 = vector.shape_cast %386 : vector<8x1024xf32> to vector<1x8x1024xf32>
    %cst_157 = arith.constant dense<0.000000e+00> : vector<1xf32>
    %388 = vector.multi_reduction <add>, %387, %cst_157 [1, 2] : vector<1x8x1024xf32> to vector<1xf32>
    %389 = vector.shape_cast %388 : vector<1xf32> to vector<1x1x1xf32>
    %390 = vector.extract %389[0, 0, 0] : f32 from vector<1x1x1xf32>
    %391 = vector.broadcast %390 : f32 to vector<1x1xf32>
    %cst_158 = arith.constant 8.192000e+03 : f32
    %392 = vector.broadcast %cst_158 : f32 to vector<1x1xf32>
    %393 = arith.divf %391, %392 : vector<1x1xf32>
    %394 = vector.broadcast %393 : vector<1x1xf32> to vector<8x1024xf32>
    %395 = arith.subf %386, %394 : vector<8x1024xf32>
    %396 = arith.mulf %395, %395 : vector<8x1024xf32>
    %397 = vector.shape_cast %396 : vector<8x1024xf32> to vector<1x8x1024xf32>
    %cst_159 = arith.constant dense<0.000000e+00> : vector<1xf32>
    %398 = vector.multi_reduction <add>, %397, %cst_159 [1, 2] : vector<1x8x1024xf32> to vector<1xf32>
    %399 = vector.shape_cast %398 : vector<1xf32> to vector<1x1x1xf32>
    %400 = vector.extract %399[0, 0, 0] : f32 from vector<1x1x1xf32>
    %401 = vector.broadcast %400 : f32 to vector<1x1xf32>
    %cst_160 = arith.constant 8.192000e+03 : f32
    %402 = vector.broadcast %cst_160 : f32 to vector<1x1xf32>
    %403 = arith.divf %401, %402 : vector<1x1xf32>
    %404 = vector.broadcast %393 : vector<1x1xf32> to vector<8x1024xf32>
    %405 = arith.subf %386, %404 : vector<8x1024xf32>
    %cst_161 = arith.constant 9.99999974E-6 : f32
    %406 = vector.broadcast %cst_161 : f32 to vector<1x1xf32>
    %407 = arith.addf %403, %406 : vector<1x1xf32>
    %408 = math.rsqrt %407 : vector<1x1xf32>
    %409 = vector.broadcast %408 : vector<1x1xf32> to vector<8x1024xf32>
    %410 = arith.mulf %405, %409 : vector<8x1024xf32>
    %c0_162 = arith.constant 0 : index
    %c0_163 = arith.constant 0 : index
    %411 = vector.load %arg14[%c0_162, %c0_163] : memref<8x1xf32, #tpu.memory_space<vmem>>, vector<8x1xf32>
    %412 = vector.broadcast %411 : vector<8x1xf32> to vector<8x1024xf32>
    %413 = arith.mulf %410, %412 : vector<8x1024xf32>
    %c0_164 = arith.constant 0 : index
    %c0_165 = arith.constant 0 : index
    %414 = vector.load %arg15[%c0_164, %c0_165] : memref<8x1xf32, #tpu.memory_space<vmem>>, vector<8x1xf32>
    %415 = vector.broadcast %414 : vector<8x1xf32> to vector<8x1024xf32>
    %416 = arith.addf %413, %415 : vector<8x1024xf32>
    %417 = vector.shape_cast %416 : vector<8x1024xf32> to vector<1x8x1024xf32>
    %c0_166 = arith.constant 0 : index
    %c0_167 = arith.constant 0 : index
    %c0_168 = arith.constant 0 : index
    %418 = vector.load %arg16[%c0_166, %c0_167, %c0_168] : memref<1x8x1024xf32, #tpu.memory_space<vmem>>, vector<1x8x1024xf32>
    tpu.vector_store %arg16[%c0_166, %c0_167, %c0_168], %417 {strides = array<i32>} : memref<1x8x1024xf32, #tpu.memory_space<vmem>>, vector<1x8x1024xf32>,
    return
  }
  func.func @transform_0(%arg0: i32) -> (i32, i32, i32) {
    %c0_i32 = arith.constant 0 : i32
    %c0_i32_0 = arith.constant 0 : i32
    %c0_i32_1 = arith.constant 0 : i32
    return %arg0, %c0_i32, %c0_i32_0 : i32, i32, i32
  }
  func.func @transform_1(%arg0: i32) -> (i32, i32) {
    %c0_i32 = arith.constant 0 : i32
    %c0_i32_0 = arith.constant 0 : i32
    %c0_i32_1 = arith.constant 0 : i32
    return %c0_i32, %c0_i32_0 : i32, i32
  }
  func.func @transform_2(%arg0: i32) -> (i32, i32) {
    %c0_i32 = arith.constant 0 : i32
    %c0_i32_0 = arith.constant 0 : i32
    %c0_i32_1 = arith.constant 0 : i32
    return %c0_i32, %c0_i32_0 : i32, i32
  }
  func.func @transform_3(%arg0: i32) -> (i32, i32) {
    %c0_i32 = arith.constant 0 : i32
    %c0_i32_0 = arith.constant 0 : i32
    %c0_i32_1 = arith.constant 0 : i32
    return %c0_i32, %c0_i32_0 : i32, i32
  }
  func.func @transform_4(%arg0: i32) -> (i32, i32) {
    %c0_i32 = arith.constant 0 : i32
    %c0_i32_0 = arith.constant 0 : i32
    %c0_i32_1 = arith.constant 0 : i32
    return %c0_i32, %c0_i32_0 : i32, i32
  }
  func.func @transform_5(%arg0: i32) -> (i32, i32) {
    %c0_i32 = arith.constant 0 : i32
    %c0_i32_0 = arith.constant 0 : i32
    %c0_i32_1 = arith.constant 0 : i32
    return %c0_i32, %c0_i32_0 : i32, i32
  }
  func.func @transform_6(%arg0: i32) -> (i32, i32) {
    %c0_i32 = arith.constant 0 : i32
    %c0_i32_0 = arith.constant 0 : i32
    %c0_i32_1 = arith.constant 0 : i32
    return %c0_i32, %c0_i32_0 : i32, i32
  }
  func.func @transform_7(%arg0: i32) -> (i32, i32) {
    %c0_i32 = arith.constant 0 : i32
    %c0_i32_0 = arith.constant 0 : i32
    %c0_i32_1 = arith.constant 0 : i32
    return %c0_i32, %c0_i32_0 : i32, i32
  }
  func.func @transform_8(%arg0: i32) -> (i32, i32) {
    %c0_i32 = arith.constant 0 : i32
    %c0_i32_0 = arith.constant 0 : i32
    %c0_i32_1 = arith.constant 0 : i32
    return %c0_i32, %c0_i32_0 : i32, i32
  }
  func.func @transform_9(%arg0: i32) -> (i32, i32) {
    %c0_i32 = arith.constant 0 : i32
    %c0_i32_0 = arith.constant 0 : i32
    %c0_i32_1 = arith.constant 0 : i32
    return %c0_i32, %c0_i32_0 : i32, i32
  }
  func.func @transform_10(%arg0: i32) -> (i32, i32) {
    %c0_i32 = arith.constant 0 : i32
    %c0_i32_0 = arith.constant 0 : i32
    %c0_i32_1 = arith.constant 0 : i32
    return %c0_i32, %c0_i32_0 : i32, i32
  }
  func.func @transform_11(%arg0: i32) -> (i32, i32) {
    %c0_i32 = arith.constant 0 : i32
    %c0_i32_0 = arith.constant 0 : i32
    %c0_i32_1 = arith.constant 0 : i32
    return %c0_i32, %c0_i32_0 : i32, i32
  }
  func.func @transform_12(%arg0: i32) -> (i32, i32) {
    %c0_i32 = arith.constant 0 : i32
    %c0_i32_0 = arith.constant 0 : i32
    %c0_i32_1 = arith.constant 0 : i32
    return %c0_i32, %c0_i32_0 : i32, i32
  }
  func.func @transform_13(%arg0: i32) -> (i32, i32) {
    %c0_i32 = arith.constant 0 : i32
    %c0_i32_0 = arith.constant 0 : i32
    %c0_i32_1 = arith.constant 0 : i32
    return %c0_i32, %c0_i32_0 : i32, i32
  }
  func.func @transform_14(%arg0: i32) -> (i32, i32) {
    %c0_i32 = arith.constant 0 : i32
    %c0_i32_0 = arith.constant 0 : i32
    %c0_i32_1 = arith.constant 0 : i32
    return %c0_i32, %c0_i32_0 : i32, i32
  }
  func.func @transform_15(%arg0: i32) -> (i32, i32, i32) {
    %c0_i32 = arith.constant 0 : i32
    %c0_i32_0 = arith.constant 0 : i32
    %c0_i32_1 = arith.constant 0 : i32
    return %arg0, %c0_i32, %c0_i32_0 : i32, i32, i32
  }
}

</mosaic_0001>

<bundles_post_ra>
// kernel: up_forward.1
= control target key start
LH: loop header
LB: loop body
LE: loop exit
PB: predicated region body
PF: predicated region fallthrough
CT: control target
= control target key end

     0   :  { %s7174_s18 = smov 0   ;;  %s11719_s0 = inlined_call_operand.vmem [shape: f32[2,16,256], index: 0, kind: input, shape index: {}]   ;;  %s11720_s1 = inlined_call_operand.vmem [shape: f32[256,1024], index: 1, kind: input, shape index: {}]   ;;  %s11721_s2 = inlined_call_operand.vmem [shape: f32[9,1024], index: 2, kind: input, shape index: {}]   ;;  %s11722_s3 = inlined_call_operand.vmem [shape: f32[16,144], index: 3, kind: input, shape index: {}]   ;;  %s11723_s4 = inlined_call_operand.vmem [shape: f32[16,1], index: 4, kind: input, shape index: {}]   ;;  %s11724_s5 = inlined_call_operand.vmem [shape: f32[16,1], index: 5, kind: input, shape index: {}]   ;;  %s11725_s6 = inlined_call_operand.vmem [shape: f32[16,144], index: 6, kind: input, shape index: {}]   ;;  %s11726_s7 = inlined_call_operand.vmem [shape: f32[16,1], index: 7, kind: input, shape index: {}]   ;;  %s11727_s8 = inlined_call_operand.vmem [shape: f32[16,1], index: 8, kind: input, shape index: {}]   ;;  %s11728_s9 = inlined_call_operand.vmem [shape: f32[8,144], index: 9, kind: input, shape index: {}]   ;;  %s11729_s10 = inlined_call_operand.vmem [shape: f32[8,1], index: 10, kind: input, shape index: {}]   ;;  %s11730_s11 = inlined_call_operand.vmem [shape: f32[8,1], index: 11, kind: input, shape index: {}]   ;;  %s11731_s12 = inlined_call_operand.vmem [shape: f32[8,72], index: 12, kind: input, shape index: {}]   ;;  %s11732_s13 = inlined_call_operand.vmem [shape: f32[8,1], index: 13, kind: input, shape index: {}]   ;;  %s11733_s14 = inlined_call_operand.vmem [shape: f32[8,1], index: 14, kind: input, shape index: {}]   ;;  %s11734_s15 = inlined_call_operand.vmem [shape: f32[2,8,1024], index: 15, kind: output, shape index: {}]  }
   0x1 LB: > { %s6887_s19 = sadd.s32 4294967295, %s7082_s18   ;;  %p6891_p0 = scmp.ge.s32.totalorder %s7082_s18, 1  ;;  %s7082_s18 = sphi %s7174_s18, %s25_s18  }
   0x2   : > { %p437_p1 = scmp.lt.s32.totalorder %s7082_s18, 3 }
   0x4   : > { %p438_p2 = pnand %p6891_p0, %p437_p1 }
   0x6   : > { %441 = sbr.rel (%p438_p2) target bundleno = 4373 (0x1115), region = 80 }
   0xb   : > { %v636_v0 = vld [vmem:[%s11720_s1 + $0x3c8] sm:$0xff]  ;;  %v638_v1 = vld [vmem:[%s11720_s1 + $0x3d8] sm:$0xff]  ;;  %v635_v2 = vld [vmem:[%s11720_s1 + $0x3c0] sm:$0xff]  ;;  %p7484_p3 = scmp.lt.s32.totalorder %s6887_s19, 1  ;;  %s7084_s17 = smov 96   ;;  %vm2339_vm0 = vcmask 130048  }
   0xc   : > { %771 = vmatprep.subr.mxu0 %v636_v0  ;;  %848 = vmatprep.subr.mxu1 %v638_v1  ;;  %v637_v3 = vld [vmem:[%s11720_s1 + $0x3d0] sm:$0xff]  ;;  %v628_v4 = vld [vmem:[%s11720_s1 + $0x388] sm:$0xff]  ;;  %v630_v5 = vld [vmem:[%s11720_s1 + $0x398] sm:$0xff]  ;;  %s7085_s21 = smov 97   ;;  %s7086_s22 = smov 127   ;;  %vm1965_vm1 = vcmask 785408  }
   0xd   : > { %772 = vmatpush1.msra.mxu0 %v635_v2  ;;  %849 = vmatpush1.msra.mxu1 %v637_v3  ;;  %v627_v6 = vld [vmem:[%s11720_s1 + $0x380] sm:$0xff]  ;;  %v629_v7 = vld [vmem:[%s11720_s1 + $0x390] sm:$0xff]  ;;  %v620_v8 = vld [vmem:[%s11720_s1 + $0x348] sm:$0xff]  ;;  %s12301_s19 = smov (!%p7484_p3, %s6887_s19), 1  ;;  %s7087_s23 = smov 1   ;;  %vm1836_vm2 = vcmask 793600  }
   0xe   : > { %773 = vmatprep.subr.mxu0 %v628_v4  ;;  %850 = vmatprep.subr.mxu1 %v630_v5  ;;  %v622_v9 = vld [vmem:[%s11720_s1 + $0x358] sm:$0xff]  ;;  %v619_v10 = vld [vmem:[%s11720_s1 + $0x340] sm:$0xff]  ;;  %v621_v11 = vld [vmem:[%s11720_s1 + $0x350] sm:$0xff]  ;;  %s6930_s20 = sshll.u32 %s12301_s19, 5  ;;  %s11888_s24 = smov 33   ;;  %vm1707_vm3 = vcmask 1039360  }
   0xf   : > { %774 = vmatpush1.msra.mxu0 %v627_v6  ;;  %851 = vmatpush1.msra.mxu1 %v629_v7  ;;  %v612_v12 = vld [vmem:[%s11720_s1 + $0x308] sm:$0xff]  ;;  %v614_v13 = vld [vmem:[%s11720_s1 + $0x318] sm:$0xff]  ;;  %v611_v14 = vld [vmem:[%s11720_s1 + $0x300] sm:$0xff]  ;;  %s7564_s25 = scalar_lea.vmem %s11719_s0, %s6930_s20  ;;  %s11886_s26 = smov 95   ;;  %vm1514_vm4 = vcmask 7168   ;;  %vm1385_vm5 = vcmask 252928  }
  0x10   : > { %775 = vmatprep.subr.mxu0 %v620_v8  ;;  %852 = vmatprep.subr.mxu1 %v622_v9  ;;  %v613_v15 = vld [vmem:[%s11720_s1 + $0x310] sm:$0xff]  ;;  %v604_v16 = vld [vmem:[%s11720_s1 + $0x2c8] sm:$0xff]  ;;  %v606_v17 = vld [vmem:[%s11720_s1 + $0x2d8] sm:$0xff]  ;;  %s11890_s27 = smov 32   ;;  %vm1256_vm6 = vcmask 261120   ;;  %vm1127_vm7 = vcmask 269312  }
  0x11   : > { %776 = vmatpush1.msra.mxu0 %v619_v10  ;;  %853 = vmatpush1.msra.mxu1 %v621_v11  ;;  %v603_v18 = vld [vmem:[%s11720_s1 + $0x2c0] sm:$0xff]  ;;  %v605_v19 = vld [vmem:[%s11720_s1 + $0x2d0] sm:$0xff]  ;;  %v596_v20 = vld [vmem:[%s11720_s1 + $0x288] sm:$0xff]  ;;  %vm2094_vm8 = vcmask 777216   ;;  %s12157_s29 = smov 95   ;;  %s12211_s20 = smov 31  }
  0x12   : > { %777 = vmatprep.subr.mxu0 %v612_v12  ;;  %854 = vmatprep.subr.mxu1 %v614_v13  ;;  %v598_v21 = vld [vmem:[%s11720_s1 + $0x298] sm:$0xff]  ;;  %v595_v22 = vld [vmem:[%s11720_s1 + $0x280] sm:$0xff]  ;;  %v597_v23 = vld [vmem:[%s11720_s1 + $0x290] sm:$0xff]  ;;  %vm6446_vm9 = vcmask 588800  }
  0x13   : > { %778 = vmatpush1.msra.mxu0 %v611_v14  ;;  %855 = vmatpush1.msra.mxu1 %v613_v15  ;;  %v588_v24 = vld [vmem:[%s11720_s1 + $0x248] sm:$0xff]  ;;  %v590_v25 = vld [vmem:[%s11720_s1 + $0x258] sm:$0xff]  ;;  %v587_v26 = vld [vmem:[%s11720_s1 + $0x240] sm:$0xff] }
  0x14   : > { %779 = vmatprep.subr.mxu0 %v604_v16  ;;  %856 = vmatprep.subr.mxu1 %v606_v17  ;;  %v589_v27 = vld [vmem:[%s11720_s1 + $0x250] sm:$0xff]  ;;  %v580_v28 = vld [vmem:[%s11720_s1 + $0x208] sm:$0xff]  ;;  %v582_v29 = vld [vmem:[%s11720_s1 + $0x218] sm:$0xff] }
  0x15   : > { %780 = vmatpush1.msra.mxu0 %v603_v18  ;;  %857 = vmatpush1.msra.mxu1 %v605_v19  ;;  %v579_v30 = vld [vmem:[%s11720_s1 + $0x200] sm:$0xff]  ;;  %v581_v31 = vld [vmem:[%s11720_s1 + $0x210] sm:$0xff]  ;;  %v572_v32 = vld [vmem:[%s11720_s1 + $0x1c8] sm:$0xff] }
  0x16   : > { %781 = vmatprep.subr.mxu0 %v596_v20  ;;  %858 = vmatprep.subr.mxu1 %v598_v21  ;;  %v574_v33 = vld [vmem:[%s11720_s1 + $0x1d8] sm:$0xff]  ;;  %v571_v34 = vld [vmem:[%s11720_s1 + $0x1c0] sm:$0xff]  ;;  %v573_v35 = vld [vmem:[%s11720_s1 + $0x1d0] sm:$0xff] }
  0x17   : > { %782 = vmatpush1.msra.mxu0 %v595_v22  ;;  %859 = vmatpush1.msra.mxu1 %v597_v23  ;;  %v564_v36 = vld [vmem:[%s11720_s1 + $0x188] sm:$0xff]  ;;  %v566_v37 = vld [vmem:[%s11720_s1 + $0x198] sm:$0xff]  ;;  %v563_v38 = vld [vmem:[%s11720_s1 + $0x180] sm:$0xff] }
  0x18   : > { %783 = vmatprep.subr.mxu0 %v588_v24  ;;  %860 = vmatprep.subr.mxu1 %v590_v25  ;;  %v565_v39 = vld [vmem:[%s11720_s1 + $0x190] sm:$0xff]  ;;  %v556_v40 = vld [vmem:[%s11720_s1 + $0x148] sm:$0xff]  ;;  %v558_v41 = vld [vmem:[%s11720_s1 + $0x158] sm:$0xff] }
  0x19   : > { %784 = vmatpush1.msra.mxu0 %v587_v26  ;;  %861 = vmatpush1.msra.mxu1 %v589_v27  ;;  %v555_v42 = vld [vmem:[%s11720_s1 + $0x140] sm:$0xff]  ;;  %v557_v43 = vld [vmem:[%s11720_s1 + $0x150] sm:$0xff]  ;;  %v548_v44 = vld [vmem:[%s11720_s1 + $0x108] sm:$0xff] }
  0x1a   : > { %785 = vmatprep.subr.mxu0 %v580_v28  ;;  %862 = vmatprep.subr.mxu1 %v582_v29  ;;  %v550_v45 = vld [vmem:[%s11720_s1 + $0x118] sm:$0xff]  ;;  %v547_v46 = vld [vmem:[%s11720_s1 + $0x100] sm:$0xff]  ;;  %v549_v47 = vld [vmem:[%s11720_s1 + $0x110] sm:$0xff] }
  0x1b   : > { %786 = vmatpush1.msra.mxu0 %v579_v30  ;;  %863 = vmatpush1.msra.mxu1 %v581_v31  ;;  %v540_v48 = vld [vmem:[%s11720_s1 + $0xc8] sm:$0xff]  ;;  %v542_v49 = vld [vmem:[%s11720_s1 + $0xd8] sm:$0xff]  ;;  %v539_v50 = vld [vmem:[%s11720_s1 + $0xc0] sm:$0xff] }
  0x1c   : > { %787 = vmatprep.subr.mxu0 %v572_v32  ;;  %864 = vmatprep.subr.mxu1 %v574_v33  ;;  %v541_v51 = vld [vmem:[%s11720_s1 + $0xd0] sm:$0xff]  ;;  %v532_v52 = vld [vmem:[%s11720_s1 + $0x88] sm:$0xff]  ;;  %v534_v53 = vld [vmem:[%s11720_s1 + $0x98] sm:$0xff] }
  0x1d   : > { %788 = vmatpush1.msra.mxu0 %v571_v34  ;;  %865 = vmatpush1.msra.mxu1 %v573_v35  ;;  %v531_v54 = vld [vmem:[%s11720_s1 + $0x80] sm:$0xff]  ;;  %v533_v55 = vld [vmem:[%s11720_s1 + $0x90] sm:$0xff]  ;;  %v524_v56 = vld [vmem:[%s11720_s1 + $0x48] sm:$0xff] }
  0x1e   : > { %789 = vmatprep.subr.mxu0 %v564_v36  ;;  %866 = vmatprep.subr.mxu1 %v566_v37  ;;  %v526_v57 = vld [vmem:[%s11720_s1 + $0x58] sm:$0xff]  ;;  %v523_v58 = vld [vmem:[%s11720_s1 + $0x40] sm:$0xff]  ;;  %v525_v59 = vld [vmem:[%s11720_s1 + $0x50] sm:$0xff] }
  0x1f   : > { %790 = vmatpush1.msra.mxu0 %v563_v38  ;;  %867 = vmatpush1.msra.mxu1 %v565_v39  ;;  %v516_v60 = vld [vmem:[%s11720_s1 + $0x8] sm:$0xff]  ;;  %v518_v61 = vld [vmem:[%s11720_s1 + $0x18] sm:$0xff]  ;;  %v515_v62 = vld [vmem:[%s11720_s1] sm:$0xff] }
  0x20   : > { %791 = vmatprep.subr.mxu0 %v556_v40  ;;  %868 = vmatprep.subr.mxu1 %v558_v41  ;;  %v517_v63 = vld [vmem:[%s11720_s1 + $0x10] sm:$0xff]  ;;  %v764_v0 = vld [vmem:[%s11720_s1 + $0x7c8] sm:$0xff]  ;;  %v766_v1 = vld [vmem:[%s11720_s1 + $0x7d8] sm:$0xff] }
  0x21   : > { %792 = vmatpush1.msra.mxu0 %v555_v42  ;;  %869 = vmatpush1.msra.mxu1 %v557_v43  ;;  %v763_v2 = vld [vmem:[%s11720_s1 + $0x7c0] sm:$0xff]  ;;  %v765_v3 = vld [vmem:[%s11720_s1 + $0x7d0] sm:$0xff]  ;;  %v756_v4 = vld [vmem:[%s11720_s1 + $0x788] sm:$0xff] }
  0x22   : > { %793 = vmatprep.subr.mxu0 %v548_v44  ;;  %870 = vmatprep.subr.mxu1 %v550_v45  ;;  %v758_v5 = vld [vmem:[%s11720_s1 + $0x798] sm:$0xff]  ;;  %v755_v6 = vld [vmem:[%s11720_s1 + $0x780] sm:$0xff]  ;;  %v757_v7 = vld [vmem:[%s11720_s1 + $0x790] sm:$0xff] }
  0x23   : > { %794 = vmatpush1.msra.mxu0 %v547_v46  ;;  %871 = vmatpush1.msra.mxu1 %v549_v47  ;;  %v748_v8 = vld [vmem:[%s11720_s1 + $0x748] sm:$0xff]  ;;  %v750_v9 = vld [vmem:[%s11720_s1 + $0x758] sm:$0xff]  ;;  %v747_v10 = vld [vmem:[%s11720_s1 + $0x740] sm:$0xff] }
  0x24   : > { %795 = vmatprep.subr.mxu0 %v540_v48  ;;  %872 = vmatprep.subr.mxu1 %v542_v49  ;;  %v749_v11 = vld [vmem:[%s11720_s1 + $0x750] sm:$0xff]  ;;  %v740_v12 = vld [vmem:[%s11720_s1 + $0x708] sm:$0xff]  ;;  %v742_v13 = vld [vmem:[%s11720_s1 + $0x718] sm:$0xff] }
  0x25   : > { %796 = vmatpush1.msra.mxu0 %v539_v50  ;;  %873 = vmatpush1.msra.mxu1 %v541_v51  ;;  %v739_v14 = vld [vmem:[%s11720_s1 + $0x700] sm:$0xff]  ;;  %v741_v15 = vld [vmem:[%s11720_s1 + $0x710] sm:$0xff]  ;;  %v732_v16 = vld [vmem:[%s11720_s1 + $0x6c8] sm:$0xff] }
  0x26   : > { %797 = vmatprep.subr.mxu0 %v532_v52  ;;  %874 = vmatprep.subr.mxu1 %v534_v53  ;;  %v734_v17 = vld [vmem:[%s11720_s1 + $0x6d8] sm:$0xff]  ;;  %v731_v18 = vld [vmem:[%s11720_s1 + $0x6c0] sm:$0xff]  ;;  %v733_v19 = vld [vmem:[%s11720_s1 + $0x6d0] sm:$0xff] }
  0x27   : > { %798 = vmatpush1.msra.mxu0 %v531_v54  ;;  %875 = vmatpush1.msra.mxu1 %v533_v55  ;;  %v724_v20 = vld [vmem:[%s11720_s1 + $0x688] sm:$0xff]  ;;  %v726_v21 = vld [vmem:[%s11720_s1 + $0x698] sm:$0xff]  ;;  %v723_v22 = vld [vmem:[%s11720_s1 + $0x680] sm:$0xff] }
  0x28   : > { %799 = vmatprep.subr.mxu0 %v524_v56  ;;  %876 = vmatprep.subr.mxu1 %v526_v57  ;;  %v725_v23 = vld [vmem:[%s11720_s1 + $0x690] sm:$0xff]  ;;  %v716_v24 = vld [vmem:[%s11720_s1 + $0x648] sm:$0xff]  ;;  %v718_v25 = vld [vmem:[%s11720_s1 + $0x658] sm:$0xff] }
  0x29   : > { %800 = vmatpush1.msra.mxu0 %v523_v58  ;;  %877 = vmatpush1.msra.mxu1 %v525_v59  ;;  %v715_v26 = vld [vmem:[%s11720_s1 + $0x640] sm:$0xff]  ;;  %v717_v27 = vld [vmem:[%s11720_s1 + $0x650] sm:$0xff]  ;;  %v708_v28 = vld [vmem:[%s11720_s1 + $0x608] sm:$0xff] }
  0x2a   : > { %801 = vmatprep.subr.mxu0 %v516_v60  ;;  %878 = vmatprep.subr.mxu1 %v518_v61  ;;  %v710_v29 = vld [vmem:[%s11720_s1 + $0x618] sm:$0xff]  ;;  %v707_v30 = vld [vmem:[%s11720_s1 + $0x600] sm:$0xff]  ;;  %v709_v31 = vld [vmem:[%s11720_s1 + $0x610] sm:$0xff] }
  0x2b   : > { %802 = vmatpush1.msra.mxu0 %v515_v62  ;;  %879 = vmatpush1.msra.mxu1 %v517_v63  ;;  %v700_v32 = vld [vmem:[%s11720_s1 + $0x5c8] sm:$0xff]  ;;  %v702_v33 = vld [vmem:[%s11720_s1 + $0x5d8] sm:$0xff]  ;;  %v699_v34 = vld [vmem:[%s11720_s1 + $0x5c0] sm:$0xff] }
  0x2c   : > { %803 = vmatprep.subr.mxu0 %v764_v0  ;;  %880 = vmatprep.subr.mxu1 %v766_v1  ;;  %v701_v35 = vld [vmem:[%s11720_s1 + $0x5d0] sm:$0xff]  ;;  %v692_v36 = vld [vmem:[%s11720_s1 + $0x588] sm:$0xff]  ;;  %v694_v37 = vld [vmem:[%s11720_s1 + $0x598] sm:$0xff] }
  0x2d   : > { %804 = vmatpush2.msra.mxu0 %v763_v2  ;;  %881 = vmatpush2.msra.mxu1 %v765_v3  ;;  %v691_v38 = vld [vmem:[%s11720_s1 + $0x580] sm:$0xff]  ;;  %v693_v39 = vld [vmem:[%s11720_s1 + $0x590] sm:$0xff]  ;;  %v684_v40 = vld [vmem:[%s11720_s1 + $0x548] sm:$0xff] }
  0x2e   : > { %805 = vmatprep.subr.mxu0 %v756_v4  ;;  %882 = vmatprep.subr.mxu1 %v758_v5  ;;  %v686_v41 = vld [vmem:[%s11720_s1 + $0x558] sm:$0xff]  ;;  %v683_v42 = vld [vmem:[%s11720_s1 + $0x540] sm:$0xff]  ;;  %v685_v43 = vld [vmem:[%s11720_s1 + $0x550] sm:$0xff] }
  0x2f   : > { %806 = vmatpush2.msra.mxu0 %v755_v6  ;;  %883 = vmatpush2.msra.mxu1 %v757_v7  ;;  %v676_v44 = vld [vmem:[%s11720_s1 + $0x508] sm:$0xff]  ;;  %v678_v45 = vld [vmem:[%s11720_s1 + $0x518] sm:$0xff]  ;;  %v675_v46 = vld [vmem:[%s11720_s1 + $0x500] sm:$0xff] }
  0x30   : > { %807 = vmatprep.subr.mxu0 %v748_v8  ;;  %884 = vmatprep.subr.mxu1 %v750_v9  ;;  %v677_v47 = vld [vmem:[%s11720_s1 + $0x510] sm:$0xff]  ;;  %v668_v48 = vld [vmem:[%s11720_s1 + $0x4c8] sm:$0xff]  ;;  %v670_v49 = vld [vmem:[%s11720_s1 + $0x4d8] sm:$0xff] }
  0x31   : > { %808 = vmatpush2.msra.mxu0 %v747_v10  ;;  %885 = vmatpush2.msra.mxu1 %v749_v11  ;;  %v667_v50 = vld [vmem:[%s11720_s1 + $0x4c0] sm:$0xff]  ;;  %v669_v51 = vld [vmem:[%s11720_s1 + $0x4d0] sm:$0xff]  ;;  %v660_v52 = vld [vmem:[%s11720_s1 + $0x488] sm:$0xff] }
  0x32   : > { %809 = vmatprep.subr.mxu0 %v740_v12  ;;  %886 = vmatprep.subr.mxu1 %v742_v13  ;;  %v662_v53 = vld [vmem:[%s11720_s1 + $0x498] sm:$0xff]  ;;  %v659_v54 = vld [vmem:[%s11720_s1 + $0x480] sm:$0xff]  ;;  %v661_v55 = vld [vmem:[%s11720_s1 + $0x490] sm:$0xff] }
  0x33   : > { %810 = vmatpush2.msra.mxu0 %v739_v14  ;;  %887 = vmatpush2.msra.mxu1 %v741_v15  ;;  %v652_v56 = vld [vmem:[%s11720_s1 + $0x448] sm:$0xff]  ;;  %v654_v57 = vld [vmem:[%s11720_s1 + $0x458] sm:$0xff]  ;;  %v651_v58 = vld [vmem:[%s11720_s1 + $0x440] sm:$0xff] }
  0x34   : > { %811 = vmatprep.subr.mxu0 %v732_v16  ;;  %888 = vmatprep.subr.mxu1 %v734_v17  ;;  %v653_v59 = vld [vmem:[%s11720_s1 + $0x450] sm:$0xff]  ;;  %v644_v60 = vld [vmem:[%s11720_s1 + $0x408] sm:$0xff]  ;;  %v646_v61 = vld [vmem:[%s11720_s1 + $0x418] sm:$0xff] }
  0x35   : > { %812 = vmatpush2.msra.mxu0 %v731_v18  ;;  %889 = vmatpush2.msra.mxu1 %v733_v19  ;;  %v643_v62 = vld [vmem:[%s11720_s1 + $0x400] sm:$0xff]  ;;  %v7582_v63 = vld [vmem:[%s7564_s25 + $0x8] sm:$0xff]  ;;  %v645_v0 = vld [vmem:[%s11720_s1 + $0x410] sm:$0xff] }
  0x36   : > { %813 = vmatprep.subr.mxu0 %v724_v20  ;;  %890 = vmatprep.subr.mxu1 %v726_v21  ;;  %v7588_v1 = vld [vmem:[%s7564_s25] sm:$0xff]  ;;  %v7592_v2 = vld [vmem:[%s7564_s25 + $0x18] sm:$0xff]  ;;  %v640_v3 = vld [vmem:[%s11720_s1 + $0x3e8] sm:$0xff] }
  0x37   : > { %814 = vmatpush2.msra.mxu0 %v723_v22  ;;  %891 = vmatpush2.msra.mxu1 %v725_v23  ;;  %v639_v4 = vld [vmem:[%s11720_s1 + $0x3e0] sm:$0xff]  ;;  %v632_v5 = vld [vmem:[%s11720_s1 + $0x3a8] sm:$0xff]  ;;  %v642_v6 = vld [vmem:[%s11720_s1 + $0x3f8] sm:$0xff] }
  0x38   : > { %815 = vmatprep.subr.mxu0 %v716_v24  ;;  %892 = vmatprep.subr.mxu1 %v718_v25  ;;  %v7611_v7 = vld [vmem:[%s7564_s25 + $0x10] sm:$0xff]  ;;  %v631_v8 = vld [vmem:[%s11720_s1 + $0x3a0] sm:$0xff]  ;;  %v624_v10 = vld [vmem:[%s11720_s1 + $0x368] sm:$0xff]  ;;  %s11920_s25 = smov 31  }
  0x39   : > { %816 = vmatpush2.msra.mxu0 %v715_v26  ;;  %893 = vmatpush2.msra.mxu1 %v717_v27  ;;  %v641_v9 = vld [vmem:[%s11720_s1 + $0x3f0] sm:$0xff]  ;;  %v634_v11 = vld [vmem:[%s11720_s1 + $0x3b8] sm:$0xff]  ;;  %v623_v12 = vld [vmem:[%s11720_s1 + $0x360] sm:$0xff] }
  0x3a   : > { %817 = vmatprep.subr.mxu0 %v708_v28  ;;  %894 = vmatprep.subr.mxu1 %v710_v29  ;;  %v633_v13 = vld [vmem:[%s11720_s1 + $0x3b0] sm:$0xff]  ;;  %v616_v14 = vld [vmem:[%s11720_s1 + $0x328] sm:$0xff]  ;;  %v626_v15 = vld [vmem:[%s11720_s1 + $0x378] sm:$0xff] }
  0x3b   : > { %818 = vmatpush2.msra.mxu0 %v707_v30  ;;  %895 = vmatpush2.msra.mxu1 %v709_v31  ;;  %v615_v16 = vld [vmem:[%s11720_s1 + $0x320] sm:$0xff]  ;;  %v625_v17 = vld [vmem:[%s11720_s1 + $0x370] sm:$0xff]  ;;  %v608_v18 = vld [vmem:[%s11720_s1 + $0x2e8] sm:$0xff] }
  0x3c   : > { %819 = vmatprep.subr.mxu0 %v700_v32  ;;  %896 = vmatprep.subr.mxu1 %v702_v33  ;;  %v618_v19 = vld [vmem:[%s11720_s1 + $0x338] sm:$0xff]  ;;  %v607_v20 = vld [vmem:[%s11720_s1 + $0x2e0] sm:$0xff]  ;;  %v617_v21 = vld [vmem:[%s11720_s1 + $0x330] sm:$0xff] }
  0x3d   : > { %820 = vmatpush2.msra.mxu0 %v699_v34  ;;  %897 = vmatpush2.msra.mxu1 %v701_v35  ;;  %v600_v22 = vld [vmem:[%s11720_s1 + $0x2a8] sm:$0xff]  ;;  %v610_v23 = vld [vmem:[%s11720_s1 + $0x2f8] sm:$0xff]  ;;  %v599_v24 = vld [vmem:[%s11720_s1 + $0x2a0] sm:$0xff] }
  0x3e   : > { %821 = vmatprep.subr.mxu0 %v692_v36  ;;  %898 = vmatprep.subr.mxu1 %v694_v37  ;;  %v609_v25 = vld [vmem:[%s11720_s1 + $0x2f0] sm:$0xff]  ;;  %v592_v26 = vld [vmem:[%s11720_s1 + $0x268] sm:$0xff]  ;;  %v602_v27 = vld [vmem:[%s11720_s1 + $0x2b8] sm:$0xff] }
  0x3f   : > { %822 = vmatpush2.msra.mxu0 %v691_v38  ;;  %899 = vmatpush2.msra.mxu1 %v693_v39  ;;  %v591_v28 = vld [vmem:[%s11720_s1 + $0x260] sm:$0xff]  ;;  %v601_v29 = vld [vmem:[%s11720_s1 + $0x2b0] sm:$0xff]  ;;  %v584_v30 = vld [vmem:[%s11720_s1 + $0x228] sm:$0xff] }
  0x40   : > { %823 = vmatprep.subr.mxu0 %v684_v40  ;;  %900 = vmatprep.subr.mxu1 %v686_v41  ;;  %v594_v31 = vld [vmem:[%s11720_s1 + $0x278] sm:$0xff]  ;;  %v583_v32 = vld [vmem:[%s11720_s1 + $0x220] sm:$0xff]  ;;  %v593_v33 = vld [vmem:[%s11720_s1 + $0x270] sm:$0xff] }
  0x41   : > { %824 = vmatpush2.msra.mxu0 %v683_v42  ;;  %901 = vmatpush2.msra.mxu1 %v685_v43  ;;  %v576_v34 = vld [vmem:[%s11720_s1 + $0x1e8] sm:$0xff]  ;;  %v586_v35 = vld [vmem:[%s11720_s1 + $0x238] sm:$0xff]  ;;  %v575_v36 = vld [vmem:[%s11720_s1 + $0x1e0] sm:$0xff] }
  0x42   : > { %825 = vmatprep.subr.mxu0 %v676_v44  ;;  %902 = vmatprep.subr.mxu1 %v678_v45  ;;  %v585_v37 = vld [vmem:[%s11720_s1 + $0x230] sm:$0xff]  ;;  %v568_v38 = vld [vmem:[%s11720_s1 + $0x1a8] sm:$0xff]  ;;  %v578_v39 = vld [vmem:[%s11720_s1 + $0x1f8] sm:$0xff] }
  0x43   : > { %826 = vmatpush2.msra.mxu0 %v675_v46  ;;  %903 = vmatpush2.msra.mxu1 %v677_v47  ;;  %v567_v40 = vld [vmem:[%s11720_s1 + $0x1a0] sm:$0xff]  ;;  %v577_v41 = vld [vmem:[%s11720_s1 + $0x1f0] sm:$0xff]  ;;  %v560_v42 = vld [vmem:[%s11720_s1 + $0x168] sm:$0xff] }
  0x44   : > { %827 = vmatprep.subr.mxu0 %v668_v48  ;;  %904 = vmatprep.subr.mxu1 %v670_v49  ;;  %v570_v43 = vld [vmem:[%s11720_s1 + $0x1b8] sm:$0xff]  ;;  %v559_v44 = vld [vmem:[%s11720_s1 + $0x160] sm:$0xff]  ;;  %v569_v45 = vld [vmem:[%s11720_s1 + $0x1b0] sm:$0xff] }
  0x45   : > { %828 = vmatpush2.msra.mxu0 %v667_v50  ;;  %905 = vmatpush2.msra.mxu1 %v669_v51  ;;  %v552_v46 = vld [vmem:[%s11720_s1 + $0x128] sm:$0xff]  ;;  %v562_v47 = vld [vmem:[%s11720_s1 + $0x178] sm:$0xff]  ;;  %v551_v48 = vld [vmem:[%s11720_s1 + $0x120] sm:$0xff] }
  0x46   : > { %829 = vmatprep.subr.mxu0 %v660_v52  ;;  %906 = vmatprep.subr.mxu1 %v662_v53  ;;  %v561_v49 = vld [vmem:[%s11720_s1 + $0x170] sm:$0xff]  ;;  %v544_v50 = vld [vmem:[%s11720_s1 + $0xe8] sm:$0xff]  ;;  %v554_v51 = vld [vmem:[%s11720_s1 + $0x138] sm:$0xff] }
  0x47   : > { %830 = vmatpush2.msra.mxu0 %v659_v54  ;;  %907 = vmatpush2.msra.mxu1 %v661_v55  ;;  %v543_v52 = vld [vmem:[%s11720_s1 + $0xe0] sm:$0xff]  ;;  %v553_v53 = vld [vmem:[%s11720_s1 + $0x130] sm:$0xff]  ;;  %v536_v54 = vld [vmem:[%s11720_s1 + $0xa8] sm:$0xff] }
  0x48   : > { %831 = vmatprep.subr.mxu0 %v652_v56  ;;  %908 = vmatprep.subr.mxu1 %v654_v57  ;;  %v546_v55 = vld [vmem:[%s11720_s1 + $0xf8] sm:$0xff]  ;;  %v535_v56 = vld [vmem:[%s11720_s1 + $0xa0] sm:$0xff]  ;;  %v545_v57 = vld [vmem:[%s11720_s1 + $0xf0] sm:$0xff] }
  0x49   : > { %832 = vmatpush2.msra.mxu0 %v651_v58  ;;  %909 = vmatpush2.msra.mxu1 %v653_v59  ;;  %v528_v58 = vld [vmem:[%s11720_s1 + $0x68] sm:$0xff]  ;;  %v538_v59 = vld [vmem:[%s11720_s1 + $0xb8] sm:$0xff] }
  0x4a   : > { %833 = vmatprep.subr.mxu0 %v644_v60  ;;  %910 = vmatprep.subr.mxu1 %v646_v61  ;;  %v527_v60 = vld [vmem:[%s11720_s1 + $0x60] sm:$0xff]  ;;  %v537_v61 = vld [vmem:[%s11720_s1 + $0xb0] sm:$0xff] }
  0x4b   : > { %834 = vmatpush2.msra.mxu0 %v643_v62  ;;  %835 = vmatprep.mubr.f32.mxu0 %v7582_v63  ;;  %v520_v62 = vld [vmem:[%s11720_s1 + $0x28] sm:$0xff] }
  0x4c   : > { %911 = vmatpush2.msra.mxu1 %v645_v0  ;;  %912 = vmatprep.mubr.f32.mxu1 %v7582_v63  ;;  %v530_v0 = vld [vmem:[%s11720_s1 + $0x78] sm:$0xff] }
  0x4d   : > { %836 = vmatmul.mubr.f32.vlgmr.msra.gmra.mxu0 %v7588_v1  ;;  %913 = vmatmul.mubr.f32.vlgmr.msra.gmra.mxu1 %v7588_v1 }
  0x4e   : > { %918 = vmatprep.mubr.f32.mxu1 %v7592_v2  ;;  %925 = vmatprep.subr.mxu0 %v640_v3  ;;  %v519_v3 = vld [vmem:[%s11720_s1 + $0x20] sm:$0xff] }
  0x4f   : > { %841 = vmatprep.mubr.f32.mxu0 %v7592_v2  ;;  %926 = vmatpush1.msra.mxu0 %v639_v4  ;;  %v529_v4 = vld [vmem:[%s11720_s1 + $0x70] sm:$0xff] }
  0x50   : > { %927 = vmatprep.subr.mxu0 %v632_v5  ;;  %1002 = vmatprep.subr.mxu1 %v642_v6  ;;  %v768_v5 = vld [vmem:[%s11720_s1 + $0x7e8] sm:$0xff]  ;;  %v522_v6 = vld [vmem:[%s11720_s1 + $0x38] sm:$0xff] }
  0x51   : > { %919 = vmatmul.mubr.f32.gmra.mxu1 %v7611_v7  ;;  %842 = vmatmul.mubr.f32.gmra.mxu0 %v7611_v7 }
  0x52   : > { %928 = vmatpush1.msra.mxu0 %v631_v8  ;;  %1003 = vmatpush1.msra.mxu1 %v641_v9  ;;  %v767_v8 = vld [vmem:[%s11720_s1 + $0x7e0] sm:$0xff]  ;;  %v521_v9 = vld [vmem:[%s11720_s1 + $0x30] sm:$0xff] }
  0x53   : > { %929 = vmatprep.subr.mxu0 %v624_v10  ;;  %1004 = vmatprep.subr.mxu1 %v634_v11  ;;  %v760_v10 = vld [vmem:[%s11720_s1 + $0x7a8] sm:$0xff]  ;;  %v770_v11 = vld [vmem:[%s11720_s1 + $0x7f8] sm:$0xff] }
  0x54   : > { %930 = vmatpush1.msra.mxu0 %v623_v12  ;;  %1005 = vmatpush1.msra.mxu1 %v633_v13  ;;  %v759_v12 = vld [vmem:[%s11720_s1 + $0x7a0] sm:$0xff]  ;;  %v769_v13 = vld [vmem:[%s11720_s1 + $0x7f0] sm:$0xff] }
  0x55   : > { %931 = vmatprep.subr.mxu0 %v616_v14  ;;  %1006 = vmatprep.subr.mxu1 %v626_v15  ;;  %v752_v14 = vld [vmem:[%s11720_s1 + $0x768] sm:$0xff]  ;;  %v762_v15 = vld [vmem:[%s11720_s1 + $0x7b8] sm:$0xff] }
  0x56   : > { %932 = vmatpush1.msra.mxu0 %v615_v16  ;;  %1007 = vmatpush1.msra.mxu1 %v625_v17  ;;  %v751_v16 = vld [vmem:[%s11720_s1 + $0x760] sm:$0xff]  ;;  %v761_v17 = vld [vmem:[%s11720_s1 + $0x7b0] sm:$0xff] }
  0x57   : > { %933 = vmatprep.subr.mxu0 %v608_v18  ;;  %1008 = vmatprep.subr.mxu1 %v618_v19  ;;  %v744_v18 = vld [vmem:[%s11720_s1 + $0x728] sm:$0xff]  ;;  %v754_v19 = vld [vmem:[%s11720_s1 + $0x778] sm:$0xff] }
  0x58   : > { %934 = vmatpush1.msra.mxu0 %v607_v20  ;;  %1009 = vmatpush1.msra.mxu1 %v617_v21  ;;  %v743_v20 = vld [vmem:[%s11720_s1 + $0x720] sm:$0xff]  ;;  %v753_v21 = vld [vmem:[%s11720_s1 + $0x770] sm:$0xff] }
  0x59   : > { %935 = vmatprep.subr.mxu0 %v600_v22  ;;  %1010 = vmatprep.subr.mxu1 %v610_v23  ;;  %v736_v22 = vld [vmem:[%s11720_s1 + $0x6e8] sm:$0xff]  ;;  %v746_v23 = vld [vmem:[%s11720_s1 + $0x738] sm:$0xff] }
  0x5a   : > { %936 = vmatpush1.msra.mxu0 %v599_v24  ;;  %1011 = vmatpush1.msra.mxu1 %v609_v25  ;;  %v735_v24 = vld [vmem:[%s11720_s1 + $0x6e0] sm:$0xff]  ;;  %v745_v25 = vld [vmem:[%s11720_s1 + $0x730] sm:$0xff] }
  0x5b   : > { %937 = vmatprep.subr.mxu0 %v592_v26  ;;  %1012 = vmatprep.subr.mxu1 %v602_v27  ;;  %v728_v26 = vld [vmem:[%s11720_s1 + $0x6a8] sm:$0xff]  ;;  %v738_v27 = vld [vmem:[%s11720_s1 + $0x6f8] sm:$0xff] }
  0x5c   : > { %938 = vmatpush1.msra.mxu0 %v591_v28  ;;  %1013 = vmatpush1.msra.mxu1 %v601_v29  ;;  %v727_v28 = vld [vmem:[%s11720_s1 + $0x6a0] sm:$0xff]  ;;  %v737_v29 = vld [vmem:[%s11720_s1 + $0x6f0] sm:$0xff] }
  0x5d   : > { %939 = vmatprep.subr.mxu0 %v584_v30  ;;  %1014 = vmatprep.subr.mxu1 %v594_v31  ;;  %v720_v30 = vld [vmem:[%s11720_s1 + $0x668] sm:$0xff]  ;;  %v730_v31 = vld [vmem:[%s11720_s1 + $0x6b8] sm:$0xff] }
  0x5e   : > { %940 = vmatpush1.msra.mxu0 %v583_v32  ;;  %1015 = vmatpush1.msra.mxu1 %v593_v33  ;;  %v719_v32 = vld [vmem:[%s11720_s1 + $0x660] sm:$0xff]  ;;  %v729_v33 = vld [vmem:[%s11720_s1 + $0x6b0] sm:$0xff] }
  0x5f   : > { %941 = vmatprep.subr.mxu0 %v576_v34  ;;  %1016 = vmatprep.subr.mxu1 %v586_v35  ;;  %v712_v34 = vld [vmem:[%s11720_s1 + $0x628] sm:$0xff]  ;;  %v722_v35 = vld [vmem:[%s11720_s1 + $0x678] sm:$0xff] }
  0x60   : > { %942 = vmatpush1.msra.mxu0 %v575_v36  ;;  %1017 = vmatpush1.msra.mxu1 %v585_v37  ;;  %v711_v36 = vld [vmem:[%s11720_s1 + $0x620] sm:$0xff]  ;;  %v721_v37 = vld [vmem:[%s11720_s1 + $0x670] sm:$0xff] }
  0x61   : > { %943 = vmatprep.subr.mxu0 %v568_v38  ;;  %1018 = vmatprep.subr.mxu1 %v578_v39  ;;  %v704_v38 = vld [vmem:[%s11720_s1 + $0x5e8] sm:$0xff]  ;;  %v714_v39 = vld [vmem:[%s11720_s1 + $0x638] sm:$0xff] }
  0x62   : > { %944 = vmatpush1.msra.mxu0 %v567_v40  ;;  %1019 = vmatpush1.msra.mxu1 %v577_v41  ;;  %v703_v40 = vld [vmem:[%s11720_s1 + $0x5e0] sm:$0xff]  ;;  %v713_v41 = vld [vmem:[%s11720_s1 + $0x630] sm:$0xff] }
  0x63   : > { %945 = vmatprep.subr.mxu0 %v560_v42  ;;  %1020 = vmatprep.subr.mxu1 %v570_v43  ;;  %v696_v42 = vld [vmem:[%s11720_s1 + $0x5a8] sm:$0xff]  ;;  %v706_v43 = vld [vmem:[%s11720_s1 + $0x5f8] sm:$0xff] }
  0x64   : > { %946 = vmatpush1.msra.mxu0 %v559_v44  ;;  %1021 = vmatpush1.msra.mxu1 %v569_v45  ;;  %v695_v44 = vld [vmem:[%s11720_s1 + $0x5a0] sm:$0xff]  ;;  %v705_v45 = vld [vmem:[%s11720_s1 + $0x5f0] sm:$0xff] }
  0x65   : > { %947 = vmatprep.subr.mxu0 %v552_v46  ;;  %1022 = vmatprep.subr.mxu1 %v562_v47  ;;  %v688_v46 = vld [vmem:[%s11720_s1 + $0x568] sm:$0xff]  ;;  %v698_v47 = vld [vmem:[%s11720_s1 + $0x5b8] sm:$0xff] }
  0x66   : > { %948 = vmatpush1.msra.mxu0 %v551_v48  ;;  %1023 = vmatpush1.msra.mxu1 %v561_v49  ;;  %v687_v48 = vld [vmem:[%s11720_s1 + $0x560] sm:$0xff]  ;;  %v697_v49 = vld [vmem:[%s11720_s1 + $0x5b0] sm:$0xff] }
  0x67   : > { %949 = vmatprep.subr.mxu0 %v544_v50  ;;  %1024 = vmatprep.subr.mxu1 %v554_v51  ;;  %v680_v50 = vld [vmem:[%s11720_s1 + $0x528] sm:$0xff]  ;;  %v690_v51 = vld [vmem:[%s11720_s1 + $0x578] sm:$0xff] }
  0x68   : > { %950 = vmatpush1.msra.mxu0 %v543_v52  ;;  %1025 = vmatpush1.msra.mxu1 %v553_v53  ;;  %v679_v52 = vld [vmem:[%s11720_s1 + $0x520] sm:$0xff]  ;;  %v689_v53 = vld [vmem:[%s11720_s1 + $0x570] sm:$0xff] }
  0x69   : > { %951 = vmatprep.subr.mxu0 %v536_v54  ;;  %1026 = vmatprep.subr.mxu1 %v546_v55  ;;  %v672_v54 = vld [vmem:[%s11720_s1 + $0x4e8] sm:$0xff]  ;;  %v682_v55 = vld [vmem:[%s11720_s1 + $0x538] sm:$0xff] }
  0x6a   : > { %952 = vmatpush1.msra.mxu0 %v535_v56  ;;  %1027 = vmatpush1.msra.mxu1 %v545_v57  ;;  %v671_v56 = vld [vmem:[%s11720_s1 + $0x4e0] sm:$0xff]  ;;  %v681_v57 = vld [vmem:[%s11720_s1 + $0x530] sm:$0xff] }
  0x6b   : > { %953 = vmatprep.subr.mxu0 %v528_v58  ;;  %1028 = vmatprep.subr.mxu1 %v538_v59  ;;  %v664_v58 = vld [vmem:[%s11720_s1 + $0x4a8] sm:$0xff]  ;;  %v674_v59 = vld [vmem:[%s11720_s1 + $0x4f8] sm:$0xff] }
  0x6c   : > { %954 = vmatpush1.msra.mxu0 %v527_v60  ;;  %1029 = vmatpush1.msra.mxu1 %v537_v61  ;;  %v663_v60 = vld [vmem:[%s11720_s1 + $0x4a0] sm:$0xff]  ;;  %v673_v61 = vld [vmem:[%s11720_s1 + $0x4f0] sm:$0xff] }
  0x6d   : > { %955 = vmatprep.subr.mxu0 %v520_v62  ;;  %1030 = vmatprep.subr.mxu1 %v530_v0  ;;  %v656_v62 = vld [vmem:[%s11720_s1 + $0x468] sm:$0xff]  ;;  %v666_v0 = vld [vmem:[%s11720_s1 + $0x4b8] sm:$0xff] }
  0x6e   : > { %956 = vmatpush1.msra.mxu0 %v519_v3  ;;  %1031 = vmatpush1.msra.mxu1 %v529_v4  ;;  %v655_v3 = vld [vmem:[%s11720_s1 + $0x460] sm:$0xff]  ;;  %v648_v4 = vld [vmem:[%s11720_s1 + $0x428] sm:$0xff] }
  0x6f   : > { %957 = vmatprep.subr.mxu0 %v768_v5  ;;  %1032 = vmatprep.subr.mxu1 %v522_v6  ;;  %v665_v5 = vld [vmem:[%s11720_s1 + $0x4b0] sm:$0xff]  ;;  %v647_v6 = vld [vmem:[%s11720_s1 + $0x420] sm:$0xff] }
  0x70   : > { %958 = vmatpush2.msra.mxu0 %v767_v8  ;;  %1033 = vmatpush1.msra.mxu1 %v521_v9  ;;  %v658_v8 = vld [vmem:[%s11720_s1 + $0x478] sm:$0xff]  ;;  %v657_v9 = vld [vmem:[%s11720_s1 + $0x470] sm:$0xff] }
  0x71   : > { %959 = vmatprep.subr.mxu0 %v760_v10  ;;  %1034 = vmatprep.subr.mxu1 %v770_v11  ;;  %v650_v10 = vld [vmem:[%s11720_s1 + $0x438] sm:$0xff]  ;;  %v649_v11 = vld [vmem:[%s11720_s1 + $0x430] sm:$0xff] }
  0x72   : > { %960 = vmatpush2.msra.mxu0 %v759_v12  ;;  %1035 = vmatpush2.msra.mxu1 %v769_v13 }
  0x73   : > { %961 = vmatprep.subr.mxu0 %v752_v14  ;;  %1036 = vmatprep.subr.mxu1 %v762_v15 }
  0x74   : > { %962 = vmatpush2.msra.mxu0 %v751_v16  ;;  %1037 = vmatpush2.msra.mxu1 %v761_v17 }
  0x75   : > { %963 = vmatprep.subr.mxu0 %v744_v18  ;;  %1038 = vmatprep.subr.mxu1 %v754_v19 }
  0x76   : > { %964 = vmatpush2.msra.mxu0 %v743_v20  ;;  %1039 = vmatpush2.msra.mxu1 %v753_v21 }
  0x77   : > { %965 = vmatprep.subr.mxu0 %v736_v22  ;;  %1040 = vmatprep.subr.mxu1 %v746_v23 }
  0x78   : > { %966 = vmatpush2.msra.mxu0 %v735_v24  ;;  %1041 = vmatpush2.msra.mxu1 %v745_v25 }
  0x79   : > { %967 = vmatprep.subr.mxu0 %v728_v26  ;;  %1042 = vmatprep.subr.mxu1 %v738_v27 }
  0x7a   : > { %968 = vmatpush2.msra.mxu0 %v727_v28  ;;  %1043 = vmatpush2.msra.mxu1 %v737_v29 }
  0x7b   : > { %969 = vmatprep.subr.mxu0 %v720_v30  ;;  %1044 = vmatprep.subr.mxu1 %v730_v31 }
  0x7c   : > { %970 = vmatpush2.msra.mxu0 %v719_v32  ;;  %1045 = vmatpush2.msra.mxu1 %v729_v33 }
  0x7d   : > { %971 = vmatprep.subr.mxu0 %v712_v34  ;;  %1046 = vmatprep.subr.mxu1 %v722_v35 }
  0x7e   : > { %972 = vmatpush2.msra.mxu0 %v711_v36  ;;  %1047 = vmatpush2.msra.mxu1 %v721_v37 }
  0x7f   : > { %973 = vmatprep.subr.mxu0 %v704_v38  ;;  %1048 = vmatprep.subr.mxu1 %v714_v39 }
  0x80   : > { %974 = vmatpush2.msra.mxu0 %v703_v40  ;;  %1049 = vmatpush2.msra.mxu1 %v713_v41 }
  0x81   : > { %975 = vmatprep.subr.mxu0 %v696_v42  ;;  %1050 = vmatprep.subr.mxu1 %v706_v43 }
  0x82   : > { %976 = vmatpush2.msra.mxu0 %v695_v44  ;;  %1051 = vmatpush2.msra.mxu1 %v705_v45 }
  0x83   : > { %977 = vmatprep.subr.mxu0 %v688_v46  ;;  %1052 = vmatprep.subr.mxu1 %v698_v47 }
  0x84   : > { %978 = vmatpush2.msra.mxu0 %v687_v48  ;;  %1053 = vmatpush2.msra.mxu1 %v697_v49 }
  0x85   : > { %979 = vmatprep.subr.mxu0 %v680_v50  ;;  %1054 = vmatprep.subr.mxu1 %v690_v51 }
  0x86   : > { %980 = vmatpush2.msra.mxu0 %v679_v52  ;;  %1055 = vmatpush2.msra.mxu1 %v689_v53 }
  0x87   : > { %981 = vmatprep.subr.mxu0 %v672_v54  ;;  %1056 = vmatprep.subr.mxu1 %v682_v55 }
  0x88   : > { %982 = vmatpush2.msra.mxu0 %v671_v56  ;;  %1057 = vmatpush2.msra.mxu1 %v681_v57 }
  0x89   : > { %983 = vmatprep.subr.mxu0 %v664_v58  ;;  %1058 = vmatprep.subr.mxu1 %v674_v59 }
  0x8a   : > { %984 = vmatpush2.msra.mxu0 %v663_v60  ;;  %1059 = vmatpush2.msra.mxu1 %v673_v61 }
  0x8b   : > { %985 = vmatprep.subr.mxu0 %v656_v62  ;;  %1060 = vmatprep.subr.mxu1 %v666_v0 }
  0x8c   : > { %986 = vmatpush2.msra.mxu0 %v655_v3  ;;  %989 = vmatprep.mubr.f32.mxu0 %v7582_v63  ;;  %v8309_v3 = vld [vmem:[%s11722_s3 + $0x8] sm:$0xff] }
  0x8d   : > { %987 = vmatprep.subr.mxu0 %v648_v4  ;;  %1061 = vmatpush2.msra.mxu1 %v665_v5  ;;  %12011 = vst [vmem:[#allocation29_spill] sm:$0xff] %v8309_v3 }
  0x8e   : > { %988 = vmatpush2.msra.mxu0 %v647_v6  ;;  %1062 = vmatprep.subr.mxu1 %v658_v8 }
  0x8f   : > { %990 = vmatmul.mubr.f32.vlgmr.msra.gmra.mxu0 %v7588_v1  ;;  %1063 = vmatpush2.msra.mxu1 %v657_v9 }
  0x90   : > { %1064 = vmatprep.subr.mxu1 %v650_v10  ;;  %1066 = vmatprep.mubr.f32.mxu1 %v7582_v63 }
  0x91   : > { %1065 = vmatpush2.msra.mxu1 %v649_v11  ;;  %995 = vmatprep.mubr.f32.mxu0 %v7592_v2 }
  0x92   : > { %1067 = vmatmul.mubr.f32.vlgmr.msra.gmra.mxu1 %v7588_v1 }
  0x93   : > { %996 = vmatmul.mubr.f32.gmra.mxu0 %v7611_v7  ;;  %1072 = vmatprep.mubr.f32.mxu1 %v7592_v2 }
  0x94   : > { %6904 = vmatprep.mubr.msk.f32.mxu0 %vm2339_vm0, %v8309_v3 }
  0x96   : > { %1073 = vmatmul.mubr.f32.gmra.mxu1 %v7611_v7 }
  0x97   : > { %6906 = vmatprep.mubr.msk.f32.mxu1 %vm2339_vm0, %v8309_v3 }
 0x10d   : > { %v7996_v12 = vpop.f32.mrf.mxu0  ;;  %v7998_v13 = vpop.f32.mrf.mxu1 }
 0x10e   : > { %11985 = vst [vmem:[#allocation3_spill] sm:$0xff] %v7996_v12  ;;  %11986 = vst [vmem:[#allocation4_spill] sm:$0xff] %v7998_v13  ;;  %1937 = vrot.lane.b32.xlu0 %v7998_v13, %s7084_s17  ;;  %1933 = vrot.lane.b32.xlu1 %v7996_v12, %s7084_s17 }
 0x10f   : > { %v8020_v63 = vpop.f32.mrf.mxu0  ;;  %v8030_v1 = vpop.f32.mrf.mxu1 }
 0x110   : > { %11987 = vst [vmem:[#allocation5_spill] sm:$0xff] %v8020_v63  ;;  %11988 = vst [vmem:[#allocation6_spill] sm:$0xff] %v8030_v1 }
 0x111   : > { %v8060_v2 = vpop.f32.mrf.mxu1  ;;  %v8066_v7 = vpop.f32.mrf.mxu0 }
 0x112   : > { %1808 = vrot.lane.b32.xlu0 %v7998_v13, %s7085_s21  ;;  %1804 = vrot.lane.b32.xlu1 %v7996_v12, %s7085_s21  ;;  %11989 = vst [vmem:[#allocation7_spill] sm:$0xff] %v8060_v2  ;;  %11990 = vst [vmem:[#allocation8_spill] sm:$0xff] %v8066_v7 }
 0x113   : > { %v8096_v14 = vpop.f32.mrf.mxu0  ;;  %v8106_v15 = vpop.f32.mrf.mxu1 }
 0x114   : > { %11991 = vst [vmem:[#allocation9_spill] sm:$0xff] %v8096_v14  ;;  %11992 = vst [vmem:[#allocation10_spill] sm:$0xff] %v8106_v15 }
 0x116   : > { %1679 = vrot.lane.b32.xlu0 %v7998_v13, %s7086_s22  ;;  %1675 = vrot.lane.b32.xlu1 %v7996_v12, %s7086_s22 }
 0x11a   : > { %1482 = vrot.lane.b32.xlu0 %v7996_v12, %s7087_s23  ;;  %1099 = vrot.lane.b32.xlu1 %v7998_v13, %s11888_s24 }
 0x11e   : > { %1353 = vrot.lane.b32.xlu0 %v7996_v12, %s11920_s25  ;;  %2062 = vrot.lane.b32.xlu1 %v7996_v12, %s11886_s26 }
 0x122   : > { %1486 = vrot.lane.b32.xlu0 %v7998_v13, %s7087_s23  ;;  %1935 = vrot.lane.b32.xlu1 %v8020_v63, %s7084_s17 }
 0x126   : > { %1224 = vrot.lane.b32.xlu0 %v7996_v12, %s11890_s27  ;;  %1806 = vrot.lane.b32.xlu1 %v8020_v63, %s7085_s21 }
 0x12a   : > { %1357 = vrot.lane.b32.xlu0 %v7998_v13, %s11920_s25  ;;  %1939 = vrot.lane.b32.xlu1 %v8030_v1, %s7084_s17 }
 0x12e   : > { %1095 = vrot.lane.b32.xlu0 %v7996_v12, %s11888_s24  ;;  %1677 = vrot.lane.b32.xlu1 %v8020_v63, %s7086_s22 }
 0x132   : > { %1228 = vrot.lane.b32.xlu0 %v7998_v13, %s11890_s27  ;;  %1810 = vrot.lane.b32.xlu1 %v8030_v1, %s7085_s21 }
 0x136   : > { %2066 = vrot.lane.b32.xlu0 %v7998_v13, %s11886_s26  ;;  %1484 = vrot.lane.b32.xlu1 %v8020_v63, %s7087_s23 }
 0x13a   : > { %1681 = vrot.lane.b32.xlu0 %v8030_v1, %s7086_s22  ;;  %1355 = vrot.lane.b32.xlu1 %v8020_v63, %s11920_s25 }
 0x13e   : > { %1101 = vrot.lane.b32.xlu0 %v8030_v1, %s11888_s24  ;;  %1488 = vrot.lane.b32.xlu1 %v8030_v1, %s7087_s23 }
 0x142   : > { %2068 = vrot.lane.b32.xlu0 %v8030_v1, %s11886_s26  ;;  %1226 = vrot.lane.b32.xlu1 %v8020_v63, %s11890_s27 }
 0x146   : > { %1953 = vrot.lane.b32.xlu0 %v8060_v2, %s7084_s17  ;;  %1359 = vrot.lane.b32.xlu1 %v8030_v1, %s11920_s25 }
 0x14a   : > { %1097 = vrot.lane.b32.xlu1 %v8020_v63, %s11888_s24  ;;  %1820 = vrot.lane.b32.xlu0 %v8066_v7, %s7085_s21 }
 0x14e   : > { %1230 = vrot.lane.b32.xlu1 %v8030_v1, %s11890_s27  ;;  %1691 = vrot.lane.b32.xlu0 %v8066_v7, %s7086_s22 }
 0x14f   : > { %v8136_v18 = vpop.f32.mrf.mxu0 }
 0x150   : > { %11993 = vst [vmem:[#allocation11_spill] sm:$0xff] %v8136_v18 }
 0x151   : > { %v8168_v28 = vpop.f32.mrf.mxu0 }
 0x152   : > { %2064 = vrot.lane.b32.xlu1 %v8020_v63, %s11886_s26  ;;  %1498 = vrot.lane.b32.xlu0 %v8066_v7, %s7087_s23  ;;  %v8146_v21 = vpop.f32.mrf.mxu1  ;;  %11996 = vst [vmem:[#allocation14_spill] sm:$0xff] %v8168_v28 }
 0x153   : > { %11994 = vst [vmem:[#allocation12_spill] sm:$0xff] %v8146_v21  ;;  %v8256_v50 = vpop.f32.mrf.mxu0 }
 0x154   : > { %v8178_v31 = vpop.f32.mrf.mxu1  ;;  %12007 = vst [vmem:[#allocation25_spill] sm:$0xff] %v8256_v50 }
 0x155   : > { %11998 = vst [vmem:[#allocation16_spill] sm:$0xff] %v8178_v31  ;;  %v8335_v11 = vpop.f32.mrf.mxu0 }
 0x156   : > { %1369 = vrot.lane.b32.xlu0 %v8066_v7, %s11920_s25  ;;  %1949 = vrot.lane.b32.xlu1 %v8066_v7, %s7084_s17  ;;  %v8284_v59 = vpop.f32.mrf.mxu1  ;;  %12014 = vst [vmem:[#allocation32_spill] sm:$0xff] %v8335_v11 }
 0x157   : > { %12009 = vst [vmem:[#allocation27_spill] sm:$0xff] %v8284_v59 }
 0x15a   : > { %1502 = vrot.lane.b32.xlu0 %v8060_v2, %s7087_s23  ;;  %1824 = vrot.lane.b32.xlu1 %v8060_v2, %s7085_s21 }
 0x15e   : > { %1240 = vrot.lane.b32.xlu0 %v8066_v7, %s11890_s27  ;;  %1695 = vrot.lane.b32.xlu1 %v8060_v2, %s7086_s22 }
 0x162   : > { %1373 = vrot.lane.b32.xlu0 %v8060_v2, %s11920_s25  ;;  %2082 = vrot.lane.b32.xlu1 %v8060_v2, %s11886_s26 }
 0x166   : > { %1111 = vrot.lane.b32.xlu0 %v8066_v7, %s11888_s24  ;;  %1500 = vrot.lane.b32.xlu1 %v8096_v14, %s7087_s23 }
 0x16a   : > { %1244 = vrot.lane.b32.xlu0 %v8060_v2, %s11890_s27  ;;  %1371 = vrot.lane.b32.xlu1 %v8096_v14, %s11920_s25 }
 0x16e   : > { %1115 = vrot.lane.b32.xlu0 %v8060_v2, %s11888_s24  ;;  %1504 = vrot.lane.b32.xlu1 %v8106_v15, %s7087_s23 }
 0x172   : > { %2078 = vrot.lane.b32.xlu0 %v8066_v7, %s11886_s26  ;;  %1242 = vrot.lane.b32.xlu1 %v8096_v14, %s11890_s27 }
 0x176   : > { %1375 = vrot.lane.b32.xlu1 %v8106_v15, %s11920_s25  ;;  %1951 = vrot.lane.b32.xlu0 %v8096_v14, %s7084_s17 }
 0x17a   : > { %1113 = vrot.lane.b32.xlu1 %v8096_v14, %s11888_s24  ;;  %1822 = vrot.lane.b32.xlu0 %v8096_v14, %s7085_s21 }
 0x17e   : > { %1246 = vrot.lane.b32.xlu1 %v8106_v15, %s11890_s27  ;;  %1955 = vrot.lane.b32.xlu0 %v8106_v15, %s7084_s17 }
 0x180   : > { %v8128_v16 = vpop.permute.xlu0 %1937  ;;  %v8130_v17 = vpop.permute.xlu1 %1933 }
 0x182   : > { %1117 = vrot.lane.b32.xlu1 %v8106_v15, %s11888_s24  ;;  %1693 = vrot.lane.b32.xlu0 %v8096_v14, %s7086_s22 }
 0x184   : > { %v8138_v19 = vpop.permute.xlu0 %1808  ;;  %v8140_v20 = vpop.permute.xlu1 %1804 }
 0x186   : > { %1826 = vrot.lane.b32.xlu0 %v8106_v15, %s7085_s21  ;;  %1683 = vrot.lane.b32.xlu1 %v8136_v18, %s7086_s22 }
 0x188   : > { %v8148_v22 = vpop.permute.xlu0 %1679  ;;  %v8150_v23 = vpop.permute.xlu1 %1675 }
 0x18a   : > { %1697 = vrot.lane.b32.xlu0 %v8106_v15, %s7086_s22  ;;  %1945 = vrot.lane.b32.xlu1 %v8146_v21, %s7084_s17 }
 0x18c   : > { %v8156_v24 = vpop.permute.xlu0 %1482  ;;  %v8158_v25 = vpop.permute.xlu1 %1099 }
 0x18d   : > { %11995 = vst [vmem:[#allocation13_spill] sm:$0xff] %v8158_v25 }
 0x18e   : > { %2080 = vrot.lane.b32.xlu0 %v8096_v14, %s11886_s26  ;;  %2070 = vrot.lane.b32.xlu1 %v8136_v18, %s11886_s26 }
 0x190   : > { %v8164_v26 = vpop.permute.xlu0 %1353  ;;  %v8166_v27 = vpop.permute.xlu1 %2062 }
 0x192   : > { %2084 = vrot.lane.b32.xlu0 %v8106_v15, %s11886_s26  ;;  %1814 = vrot.lane.b32.xlu1 %v8168_v28, %s7085_s21 }
 0x194   : > { %v8174_v29 = vpop.permute.xlu0 %1486  ;;  %v8176_v30 = vpop.permute.xlu1 %1935 }
 0x195   : > { %11997 = vst [vmem:[#allocation15_spill] sm:$0xff] %v8174_v29 }
 0x196   : > { %1941 = vrot.lane.b32.xlu0 %v8136_v18, %s7084_s17  ;;  %1947 = vrot.lane.b32.xlu1 %v8178_v31, %s7084_s17 }
 0x198   : > { %v8184_v32 = vpop.permute.xlu0 %1224  ;;  %v8186_v33 = vpop.permute.xlu1 %1806 }
 0x19a   : > { %1812 = vrot.lane.b32.xlu0 %v8136_v18, %s7085_s21  ;;  %1685 = vrot.lane.b32.xlu1 %v8168_v28, %s7086_s22 }
 0x19c   : > { %v8192_v34 = vpop.permute.xlu0 %1357  ;;  %v8194_v35 = vpop.permute.xlu1 %1939 }
 0x19d   : > { %11999 = vst [vmem:[#allocation17_spill] sm:$0xff] %v8192_v34 }
 0x19e   : > { %1816 = vrot.lane.b32.xlu0 %v8146_v21, %s7085_s21  ;;  %1818 = vrot.lane.b32.xlu1 %v8178_v31, %s7085_s21 }
 0x1a0   : > { %v8200_v36 = vpop.permute.xlu0 %1095  ;;  %v8202_v37 = vpop.permute.xlu1 %1677 }
 0x1a2   : > { %1687 = vrot.lane.b32.xlu0 %v8146_v21, %s7086_s22  ;;  %1689 = vrot.lane.b32.xlu1 %v8178_v31, %s7086_s22 }
 0x1a4   : > { %v8208_v38 = vpop.permute.xlu0 %1228  ;;  %v8210_v39 = vpop.permute.xlu1 %1810 }
 0x1a5   : > { %12000 = vst [vmem:[#allocation18_spill] sm:$0xff] %v8208_v38  ;;  %12001 = vst [vmem:[#allocation19_spill] sm:$0xff] %v8210_v39 }
 0x1a6   : > { %1490 = vrot.lane.b32.xlu0 %v8136_v18, %s7087_s23  ;;  %1492 = vrot.lane.b32.xlu1 %v8168_v28, %s7087_s23 }
 0x1a8   : > { %v8216_v40 = vpop.permute.xlu0 %2066  ;;  %v8218_v41 = vpop.permute.xlu1 %1484 }
 0x1aa   : > { %1361 = vrot.lane.b32.xlu0 %v8136_v18, %s11920_s25  ;;  %1363 = vrot.lane.b32.xlu1 %v8168_v28, %s11920_s25 }
 0x1ac   : > { %v8224_v42 = vpop.permute.xlu0 %1681  ;;  %v8226_v43 = vpop.permute.xlu1 %1355 }
 0x1ad   : > { %12002 = vst [vmem:[#allocation20_spill] sm:$0xff] %v8224_v42 }
 0x1ae   : > { %1494 = vrot.lane.b32.xlu0 %v8146_v21, %s7087_s23  ;;  %1496 = vrot.lane.b32.xlu1 %v8178_v31, %s7087_s23 }
 0x1b0   : > { %v8232_v44 = vpop.permute.xlu0 %1101  ;;  %v8234_v45 = vpop.permute.xlu1 %1488 }
 0x1b1   : > { %12003 = vst [vmem:[#allocation21_spill] sm:$0xff] %v8232_v44  ;;  %12004 = vst [vmem:[#allocation22_spill] sm:$0xff] %v8234_v45  ;;  %v1967_v45 = vsel %vm1965_vm1, %v8176_v30, %v8128_v16 }
 0x1b2   : > { %1232 = vrot.lane.b32.xlu0 %v8136_v18, %s11890_s27  ;;  %1234 = vrot.lane.b32.xlu1 %v8168_v28, %s11890_s27 }
 0x1b4   : > { %v8240_v46 = vpop.permute.xlu0 %2068  ;;  %v8242_v47 = vpop.permute.xlu1 %1226 }
 0x1b5   : > { %12005 = vst [vmem:[#allocation23_spill] sm:$0xff] %v8240_v46  ;;  %v1160_v46 = vlaneseq }
 0x1b6   : > { %1365 = vrot.lane.b32.xlu0 %v8146_v21, %s11920_s25  ;;  %1367 = vrot.lane.b32.xlu1 %v8178_v31, %s11920_s25 }
 0x1b8   : > { %v8248_v48 = vpop.permute.xlu0 %1953  ;;  %v8250_v49 = vpop.permute.xlu1 %1359 }
 0x1b9   : > { %12006 = vst [vmem:[#allocation24_spill] sm:$0xff] %v8250_v49 }
 0x1ba   : > { %1103 = vrot.lane.b32.xlu0 %v8136_v18, %s11888_s24  ;;  %1105 = vrot.lane.b32.xlu1 %v8168_v28, %s11888_s24 }
 0x1bc   : > { %v8258_v51 = vpop.permute.xlu1 %1097  ;;  %v8260_v52 = vpop.permute.xlu0 %1820 }
 0x1be   : > { %1943 = vrot.lane.b32.xlu0 %v8168_v28, %s7084_s17  ;;  %1957 = vrot.lane.b32.xlu1 %v8256_v50, %s7084_s17 }
 0x1c0   : > { %v8266_v53 = vpop.permute.xlu1 %1230  ;;  %v8268_v54 = vpop.permute.xlu0 %1691 }
 0x1c1   : > { %12008 = vst [vmem:[#allocation26_spill] sm:$0xff] %v8266_v53 }
 0x1c2   : > { %1506 = vrot.lane.b32.xlu0 %v8256_v50, %s7087_s23  ;;  %1828 = vrot.lane.b32.xlu1 %v8256_v50, %s7085_s21 }
 0x1c4   : > { %v8274_v55 = vpop.permute.xlu1 %2064  ;;  %v8276_v56 = vpop.permute.xlu0 %1498 }
 0x1c6   : > { %1377 = vrot.lane.b32.xlu0 %v8256_v50, %s11920_s25  ;;  %1699 = vrot.lane.b32.xlu1 %v8256_v50, %s7086_s22 }
 0x1c8   : > { %v8282_v57 = vpop.permute.xlu0 %1369  ;;  %v1950_v58 = vpop.permute.xlu1 %1949 }
 0x1ca   : > { %1510 = vrot.lane.b32.xlu0 %v8284_v59, %s7087_s23  ;;  %1961 = vrot.lane.b32.xlu1 %v8284_v59, %s7084_s17 }
 0x1cc   : > { %v8290_v60 = vpop.permute.xlu0 %1502  ;;  %v8292_v61 = vpop.permute.xlu1 %1824 }
 0x1cd   : > { %12010 = vst [vmem:[#allocation28_spill] sm:$0xff] %v8290_v60  ;;  %v1966_v60 = vsel %vm1965_vm1, %v8130_v17, %v8176_v30 }
 0x1ce   : > { %1248 = vrot.lane.b32.xlu0 %v8256_v50, %s11890_s27  ;;  %2086 = vrot.lane.b32.xlu1 %v8256_v50, %s11886_s26 }
 0x1d0   : > { %v8298_v62 = vpop.permute.xlu0 %1240  ;;  %v8300_v0 = vpop.permute.xlu1 %1695 }
 0x1d2   : > { %1381 = vrot.lane.b32.xlu0 %v8284_v59, %s11920_s25  ;;  %1832 = vrot.lane.b32.xlu1 %v8284_v59, %s7085_s21 }
 0x1d4   : > { %v8311_v4 = vpop.permute.xlu0 %1373  ;;  %v8313_v5 = vpop.permute.xlu1 %2082 }
 0x1d5   : > { %12012 = vst [vmem:[#allocation30_spill] sm:$0xff] %v8311_v4 }
 0x1d6   : > { %1119 = vrot.lane.b32.xlu0 %v8256_v50, %s11888_s24  ;;  %1703 = vrot.lane.b32.xlu1 %v8284_v59, %s7086_s22  ;;  %v8345_v50 = vshrl.u32 %v1160_v46, 7  ;;  %v8367_v46 = vld [vmem:[%s11721_s2] sm:$0xff] }
 0x1d8   : > { %v8323_v6 = vpop.permute.xlu0 %1111  ;;  %v8325_v8 = vpop.permute.xlu1 %1500  ;;  %v8352_v18 = vsub.s32 7, %v8345_v50  ;;  %v8379_v49 = vsub.s32 6, %v8345_v50 }
 0x1da   : > { %1252 = vrot.lane.b32.xlu0 %v8284_v59, %s11890_s27  ;;  %1238 = vrot.lane.b32.xlu1 %v8178_v31, %s11890_s27  ;;  %v8376_v34 = vrot.slane %v8367_v46, %v8352_v18 }
 0x1dc   : > { %v8331_v9 = vpop.permute.xlu0 %1244  ;;  %v8333_v10 = vpop.permute.xlu1 %1371  ;;  %12018 = vst [vmem:[#allocation36_spill] sm:$0xff] %v8376_v34  ;;  %v2030_v30 = vmul.f32 %v8376_v34, %v1966_v60 }
 0x1dd   : > { %12013 = vst [vmem:[#allocation31_spill] sm:$0xff] %v8331_v9  ;;  %v8358_v9 = vpop.f32.mrf.mxu1 }
 0x1de   : > { %2090 = vrot.lane.b32.xlu1 %v8284_v59, %s11886_s26  ;;  %1959 = vrot.lane.b32.xlu0 %v8335_v11, %s7084_s17  ;;  %12017 = vst [vmem:[#allocation35_spill] sm:$0xff] %v8358_v9 }
 0x1e0   : > { %v8341_v25 = vpop.permute.xlu0 %1115  ;;  %v8343_v44 = vpop.permute.xlu1 %1504 }
 0x1e1   : > { %12015 = vst [vmem:[#allocation33_spill] sm:$0xff] %v8341_v25  ;;  %12016 = vst [vmem:[#allocation34_spill] sm:$0xff] %v8343_v44  ;;  %v8372_v25 = vld [vmem:[%s11721_s2 + $0x8] sm:$0xff] }
 0x1e2   : > { %1109 = vrot.lane.b32.xlu1 %v8178_v31, %s11888_s24  ;;  %1830 = vrot.lane.b32.xlu0 %v8335_v11, %s7085_s21  ;;  %v8385_v29 = vrot.slane %v8372_v25, %v8352_v18 }
 0x1e4   : > { %v8354_v38 = vpop.permute.xlu0 %2078  ;;  %v8356_v53 = vpop.permute.xlu1 %1242  ;;  %12020 = vst [vmem:[#allocation38_spill] sm:$0xff] %v8385_v29  ;;  %v2031_v17 = vmul.f32 %v8385_v29, %v1967_v45 }
 0x1e6   : > { %1508 = vrot.lane.b32.xlu1 %v8335_v11, %s7087_s23  ;;  %1963 = vrot.lane.b32.xlu0 %v8358_v9, %s7084_s17 }
 0x1e8   : > { %v8381_v4 = vpop.permute.xlu1 %1375  ;;  %v1952_v13 = vpop.permute.xlu0 %1951 }
 0x1e9   : > { %12019 = vst [vmem:[#allocation37_spill] sm:$0xff] %v8381_v4  ;;  %v1973_v1 = vsel %vm1965_vm1, %v1950_v58, %v1952_v13  ;;  %v1974_v2 = vsel %vm1965_vm1, %v1952_v13, %v8248_v48  ;;  %v8404_v58 = vrot.slane %v8367_v46, %v8379_v49 }
 0x1ea   : > { %v2038_v4 = vmul.f32 %v8376_v34, %v1973_v1  ;;  %1379 = vrot.lane.b32.xlu1 %v8335_v11, %s11920_s25  ;;  %1701 = vrot.lane.b32.xlu0 %v8335_v11, %s7086_s22  ;;  %v2039_v44 = vmul.f32 %v8385_v29, %v1974_v2  ;;  %v8411_v1 = vrot.slane %v8372_v25, %v8379_v49 }
 0x1eb   : > { %12021 = vst [vmem:[#allocation39_spill] sm:$0xff] %v8404_v58  ;;  %v1838_v2 = vsel %vm1836_vm2, %v8186_v33, %v8138_v19  ;;  %v1393_v29 = vsel %vm1385_vm5, %v8282_v57, %v8333_v10 }
 0x1ec   : > { %v8406_v13 = vpop.permute.xlu1 %1113  ;;  %2346 = vmatprep.subr.mxu0 %v2039_v44  ;;  %v1823_v15 = vpop.permute.xlu0 %1822  ;;  %12022 = vst [vmem:[#allocation40_spill] sm:$0xff] %v8411_v1  ;;  %v1837_v44 = vsel %vm1836_vm2, %v8140_v20, %v8186_v33  ;;  %v1902_v20 = vmul.f32 %v8411_v1, %v1838_v2  ;;  %v1709_v2 = vsel %vm1707_vm3, %v8202_v37, %v8148_v22 }
 0x1ed   : > { %v1844_v42 = vsel %vm1836_vm2, %v8260_v52, %v1823_v15  ;;  %v1845_v39 = vsel %vm1836_vm2, %v1823_v15, %v8292_v61  ;;  %2347 = vmatpush1.msra.mxu0 %v2038_v4  ;;  %v8431_v52 = vsub.s32 5, %v8345_v50  ;;  %v1901_v33 = vmul.f32 %v8404_v58, %v1837_v44 }
 0x1ee   : > { %v1909_v45 = vmul.f32 %v8404_v58, %v1844_v42  ;;  %2348 = vmatprep.subr.mxu0 %v2031_v17  ;;  %1512 = vrot.lane.b32.xlu1 %v8358_v9, %s7087_s23  ;;  %v1910_v60 = vmul.f32 %v8411_v1, %v1845_v39  ;;  %v8468_v58 = vsub.s32 4, %v8345_v50 }
 0x1ef   : > { %1834 = vrot.lane.b32.xlu0 %v8358_v9, %s7085_s21  ;;  %2349 = vmatpush1.msra.mxu0 %v2030_v30  ;;  %v8445_v39 = vrot.slane %v8367_v46, %v8431_v52  ;;  %v8451_v30 = vrot.slane %v8372_v25, %v8431_v52 }
 0x1f0   : > { %v8433_v15 = vpop.permute.xlu1 %1246  ;;  %2350 = vmatprep.subr.mxu0 %v1910_v60  ;;  %v8435_v4 = vpop.permute.xlu0 %1955  ;;  %v1708_v60 = vsel %vm1707_vm3, %v8150_v23, %v8202_v37  ;;  %v8479_v37 = vrot.slane %v8372_v25, %v8468_v58  ;;  %v8487_v1 = vrot.slane %v8367_v46, %v8468_v58 }
 0x1f1   : > { %12023 = vst [vmem:[#allocation41_spill] sm:$0xff] %v8433_v15  ;;  %2351 = vmatpush1.msra.mxu0 %v1909_v45  ;;  %12024 = vst [vmem:[#allocation42_spill] sm:$0xff] %v8445_v39  ;;  %v1773_v23 = vmul.f32 %v8451_v30, %v1709_v2 }
 0x1f2   : > { %2352 = vmatprep.subr.mxu0 %v1902_v20  ;;  %1250 = vrot.lane.b32.xlu1 %v8335_v11, %s11890_s27  ;;  %12026 = vst [vmem:[#allocation44_spill] sm:$0xff] %v8451_v30  ;;  %12027 = vst [vmem:[#allocation45_spill] sm:$0xff] %v8479_v37  ;;  %v1652_v2 = vmul.f32 %v8479_v37, %v8096_v14  ;;  %v1644_v14 = vmul.f32 %v8479_v37, %v8020_v63  ;;  %v1545_v63 = vsel %vm1514_vm4, 0.0, %v8156_v24 }
 0x1f3   : > { %1705 = vrot.lane.b32.xlu0 %v8358_v9, %s7086_s22  ;;  %2353 = vmatpush1.msra.mxu0 %v1901_v33  ;;  %12028 = vst [vmem:[#allocation46_spill] sm:$0xff] %v8487_v1 }
 0x1f4   : > { %v8447_v42 = vpop.permute.xlu1 %1117  ;;  %v1694_v17 = vpop.permute.xlu0 %1693 }
 0x1f5   : > { %12025 = vst [vmem:[#allocation43_spill] sm:$0xff] %v8447_v42  ;;  %v1715_v44 = vsel %vm1707_vm3, %v8268_v54, %v1694_v17  ;;  %v1716_v45 = vsel %vm1707_vm3, %v1694_v17, %v8300_v0 }
 0x1f6   : > { %v1780_v20 = vmul.f32 %v8445_v39, %v1715_v44  ;;  %1383 = vrot.lane.b32.xlu1 %v8358_v9, %s11920_s25  ;;  %v1781_v33 = vmul.f32 %v8451_v30, %v1716_v45  ;;  %v8482_v44 = vsub.s32 3, %v8345_v50  ;;  %v1772_v45 = vmul.f32 %v8445_v39, %v1708_v60 }
 0x1f7   : > { %1236 = vrot.lane.b32.xlu0 %v8146_v21, %s11890_s27  ;;  %v1651_v60 = vmul.f32 %v8487_v1, %v8066_v7  ;;  %v8517_v7 = vsub.s32 2, %v8345_v50 }
 0x1f8   : > { %2354 = vmatprep.subr.mxu0 %v1781_v33  ;;  %v8472_v54 = vpop.permute.xlu0 %1826  ;;  %v8474_v17 = vpop.permute.xlu1 %1683  ;;  %v1522_v33 = vsel %vm1514_vm4, %v8276_v56, %v8325_v8  ;;  %v8510_v30 = vrot.slane %v8372_v25, %v8482_v44 }
 0x1f9   : > { %2355 = vmatpush1.msra.mxu0 %v1780_v20  ;;  %v1546_v20 = vsel %vm1514_vm4, 0.0, %v8276_v56  ;;  %v1515_v56 = vsel %vm1514_vm4, %v8156_v24, %v8218_v41  ;;  %v1417_v24 = vsel %vm1385_vm5, 0.0, %v8282_v57  ;;  %v1386_v57 = vsel %vm1385_vm5, %v8164_v26, %v8226_v43 }
 0x1fa   : > { %2356 = vmatprep.subr.mxu0 %v1773_v23  ;;  %1121 = vrot.lane.b32.xlu1 %v8335_v11, %s11888_s24  ;;  %12030 = vst [vmem:[#allocation48_spill] sm:$0xff] %v8510_v30  ;;  %v1588_v37 = vmul.f32 %v8510_v30, %v1522_v33  ;;  %v8542_v33 = vrot.slane %v8372_v25, %v8517_v7 }
 0x1fb   : > { %1123 = vrot.lane.b32.xlu0 %v8284_v59, %s11888_s24  ;;  %2357 = vmatpush1.msra.mxu0 %v1772_v45  ;;  %v8514_v45 = vrot.slane %v8367_v46, %v8482_v44 }
 0x1fc   : > { %v8502_v23 = vpop.permute.xlu0 %1697  ;;  %2358 = vmatprep.subr.mxu0 %v1652_v2  ;;  %v8504_v39 = vpop.permute.xlu1 %1945  ;;  %v1643_v2 = vmul.f32 %v8487_v1, %v7996_v12  ;;  %v1580_v12 = vmul.f32 %v8510_v30, %v1515_v56  ;;  %12032 = vst [vmem:[#allocation50_spill] sm:$0xff] %v8542_v33  ;;  %v8547_v1 = vrot.slane %v8367_v46, %v8517_v7 }
 0x1fd   : > { %12029 = vst [vmem:[#allocation47_spill] sm:$0xff] %v8504_v39  ;;  %12031 = vst [vmem:[#allocation49_spill] sm:$0xff] %v8514_v45  ;;  %2359 = vmatpush1.msra.mxu0 %v1651_v60  ;;  %v1587_v34 = vmul.f32 %v8514_v45, %v1546_v20  ;;  %v1579_v20 = vmul.f32 %v8514_v45, %v1545_v63  ;;  %v1459_v63 = vmul.f32 %v8542_v33, %v1393_v29 }
 0x1fe   : > { %2360 = vmatprep.subr.mxu0 %v1644_v14  ;;  %1254 = vrot.lane.b32.xlu1 %v8358_v9, %s11890_s27  ;;  %12033 = vst [vmem:[#allocation51_spill] sm:$0xff] %v8547_v1  ;;  %v1458_v56 = vmul.f32 %v8547_v1, %v1417_v24  ;;  %v1264_v45 = vsel %vm1256_vm6, %v8298_v62, %v8356_v53  ;;  %s12155_s27 = smov 33  }
 0x1ff   : > { %1107 = vrot.lane.b32.xlu0 %v8146_v21, %s11888_s24  ;;  %2361 = vmatpush1.msra.mxu0 %v1643_v2  ;;  %v8550_v2 = vsub.s32 1, %v8345_v50  ;;  %v1451_v29 = vmul.f32 %v8542_v33, %v1386_v57  ;;  %v1287_v57 = vsel %vm1256_vm6, 0.0, %v8184_v32 }
 0x200   : > { %v2081_v60 = vpop.permute.xlu0 %2080  ;;  %2362 = vmatprep.subr.mxu0 %v1588_v37  ;;  %v8537_v14 = vpop.permute.xlu1 %2070  ;;  %v1416_v37 = vsel %vm1385_vm5, 0.0, %v8164_v26  ;;  %v1288_v26 = vsel %vm1256_vm6, 0.0, %v8298_v62  ;;  %v1257_v62 = vsel %vm1256_vm6, %v8184_v32, %v8242_v47  ;;  %v1159_v32 = vsel %vm1127_vm7, 0.0, %v8323_v6 }
 0x201   : > { %12034 = vst [vmem:[#allocation52_spill] sm:$0xff] %v8550_v2  ;;  %2363 = vmatpush1.msra.mxu0 %v1587_v34  ;;  %v8575_v24 = vrot.slane %v8372_v25, %v8550_v2  ;;  %v1450_v30 = vmul.f32 %v8547_v1, %v1416_v37  ;;  %v8580_v39 = vrot.slane %v8367_v46, %v8550_v2 }
 0x202   : > { %2364 = vmatprep.subr.mxu0 %v1580_v12  ;;  %1125 = vrot.lane.b32.xlu1 %v8358_v9, %s11888_s24 }
 0x203   : > { %2072 = vrot.lane.b32.xlu0 %v8168_v28, %s11886_s26  ;;  %2365 = vmatpush1.msra.mxu0 %v1579_v20  ;;  %12035 = vst [vmem:[#allocation53_spill] sm:$0xff] %v8575_v24  ;;  %12036 = vst [vmem:[#allocation54_spill] sm:$0xff] %v8580_v39  ;;  %v8583_v20 = vsub.s32 0, %v8345_v50  ;;  %v1330_v37 = vmul.f32 %v8575_v24, %v1264_v45  ;;  %v1135_v50 = vsel %vm1127_vm7, %v8323_v6, %v8406_v13 }
 0x204   : > { %v8568_v34 = vpop.permute.xlu0 %2084  ;;  %2366 = vmatprep.subr.mxu0 %v1459_v63  ;;  %v8570_v12 = vpop.permute.xlu1 %1814  ;;  %v1329_v63 = vmul.f32 %v8580_v39, %v1288_v26  ;;  %v1322_v45 = vmul.f32 %v8575_v24, %v1257_v62  ;;  %v1321_v1 = vmul.f32 %v8580_v39, %v1287_v57  ;;  %v1128_v6 = vsel %vm1127_vm7, %v8200_v36, %v8258_v51 }
 0x205   : > { %2367 = vmatpush1.msra.mxu0 %v1458_v56  ;;  %v8608_v26 = vrot.slane %v8372_v25, %v8583_v20  ;;  %v8613_v33 = vrot.slane %v8367_v46, %v8583_v20  ;;  %v2103_v46 = vsel %vm2094_vm8, %v2081_v60, %v8313_v5  ;;  %v2102_v57 = vsel %vm2094_vm8, %v8354_v38, %v2081_v60  ;;  %v6896_v38 = vld [vmem:[%s11721_s2 + $0x40] ss:$0 sm:$0xff] }
 0x206   : > { %2368 = vmatprep.subr.mxu0 %v1451_v29  ;;  %2074 = vrot.lane.b32.xlu1 %v8146_v21, %s11886_s26  ;;  %v2095_v60 = vsel %vm2094_vm8, %v8166_v27, %v8274_v55  ;;  %v8660_v27 = vld [vmem:[%s11722_s3 + $0x18] sm:$0xff] }
 0x207   : > { %2088 = vrot.lane.b32.xlu0 %v8335_v11, %s11886_s26  ;;  %2369 = vmatpush1.msra.mxu0 %v1450_v30  ;;  %12037 = vst [vmem:[#allocation55_spill] sm:$0xff] %v8608_v26  ;;  %12038 = vst [vmem:[#allocation56_spill] sm:$0xff] %v8613_v33  ;;  %v1158_v30 = vsel %vm1127_vm7, 0.0, %v8200_v36  ;;  %v1201_v25 = vmul.f32 %v8608_v26, %v1135_v50  ;;  %v1200_v62 = vmul.f32 %v8613_v33, %v1159_v32 }
 0x208   : > { %2370 = vmatprep.subr.mxu0 %v1330_v37  ;;  %v8601_v56 = vpop.permute.xlu0 %1941  ;;  %v8603_v29 = vpop.permute.xlu1 %1947  ;;  %v1192_v50 = vmul.f32 %v8613_v33, %v1158_v30  ;;  %v2096_v32 = vsel %vm2094_vm8, %v8274_v55, %v8216_v40  ;;  %v2159_v33 = vmul.f32 %v6896_v38, %v2095_v60 }
 0x209   : > { %2371 = vmatpush1.msra.mxu0 %v1329_v63  ;;  %v1193_v63 = vmul.f32 %v8608_v26, %v1128_v6  ;;  %v2167_v6 = vmul.f32 %v6896_v38, %v2102_v57  ;;  %v8655_v26 = vld [vmem:[%s11722_s3] sm:$0xff]  ;;  %v8672_v57 = vld [vmem:[%s11722_s3 + $0x10] sm:$0xff] }
 0x20a   : > { %2372 = vmatprep.subr.mxu0 %v1322_v45  ;;  %2076 = vrot.lane.b32.xlu1 %v8178_v31, %s11886_s26 }
 0x20b   : > { %2092 = vrot.lane.b32.xlu0 %v8358_v9, %s11886_s26  ;;  %2373 = vmatpush1.msra.mxu0 %v1321_v1  ;;  %v6897_v1 = vld [vmem:[%s11721_s2 + $0x48] ss:$0 sm:$0xff]  ;;  %s12154_s26 = smov 32  }
 0x20c   : > { %2374 = vmatprep.subr.mxu0 %v1201_v25  ;;  %v8630_v36 = vpop.permute.xlu0 %1812  ;;  %v8632_v37 = vpop.permute.xlu1 %1685  ;;  %v2168_v45 = vmul.f32 %v6897_v1, %v2103_v46 }
 0x20d   : > { %2375 = vmatpush1.msra.mxu0 %v1200_v62  ;;  %v2160_v62 = vmul.f32 %v6897_v1, %v2096_v32 }
 0x20e   : > { %2376 = vmatprep.subr.mxu0 %v1193_v63 }
 0x20f   : > { %2377 = vmatpush1.msra.mxu0 %v1192_v50 }
 0x210   : > { %2406 = vmatprep.subr.mxu0 %v2168_v45  ;;  %v8648_v30 = vpop.permute.xlu0 %1816  ;;  %v8650_v25 = vpop.permute.xlu1 %1818 }
 0x211   : > { %12039 = vst [vmem:[#allocation57_spill] sm:$0xff] %v8650_v25  ;;  %2407 = vmatpush2.msra.mxu0 %v2167_v6 }
 0x212   : > { %2408 = vmatprep.subr.mxu0 %v2160_v62 }
 0x213   : > { %2409 = vmatpush2.msra.mxu0 %v2159_v33 }
 0x214   : > { %v8662_v55 = vpop.permute.xlu0 %1687  ;;  %v8664_v46 = vpop.permute.xlu1 %1689  ;;  %2411 = vmatmul.mubr.f32.vlgmr.msra.gmra.mxu0 %v8655_v26 }
 0x215   : > { %12040 = vst [vmem:[#allocation58_spill] sm:$0xff] %v8664_v46  ;;  %6905 = vmatprep.mubr.msk.f32.mxu0 %vm2339_vm0, %v8660_v27 }
 0x218   : > { %v8674_v63 = vpop.permute.xlu0 %1490  ;;  %v8676_v50 = vpop.permute.xlu1 %1492  ;;  %2417 = vmatmul.mubr.f32.gmra.mxu0 %v8672_v57 }
 0x219   : > { %12041 = vst [vmem:[#allocation59_spill] sm:$0xff] %v8674_v63  ;;  %12042 = vst [vmem:[#allocation60_spill] sm:$0xff] %v8676_v50  ;;  %6908 = vmatprep.mubr.msk.f32.mxu0 %vm2339_vm0, %v8309_v3  ;;  %v1846_v63 = vsel %vm1836_vm2, %v8292_v61, %v8472_v54 }
 0x21c   : > { %v8681_v33 = vpop.permute.xlu0 %1361  ;;  %v8683_v32 = vpop.permute.xlu1 %1363 }
 0x21d   : > { %12043 = vst [vmem:[#allocation61_spill] sm:$0xff] %v8681_v33  ;;  %12044 = vst [vmem:[#allocation62_spill] sm:$0xff] %v8683_v32  ;;  %v8704_v32 = vld [vmem:[%s11721_s2 + $0x18] sm:$0xff] }
 0x220   : > { %v8685_v1 = vpop.permute.xlu0 %1494  ;;  %v8687_v38 = vpop.permute.xlu1 %1496 }
 0x221   : > { %12045 = vst [vmem:[#allocation63_spill] sm:$0xff] %v8685_v1  ;;  %12046 = vst [vmem:[#allocation64_spill] sm:$0xff] %v8687_v38  ;;  %v8709_v38 = vld [vmem:[%s11721_s2 + $0x10] sm:$0xff]  ;;  %v1968_v1 = vsel %vm1965_vm1, %v8128_v16, %v8194_v35 }
 0x224   : > { %v8689_v60 = vpop.permute.xlu0 %1232  ;;  %v8691_v45 = vpop.permute.xlu1 %1234 }
 0x225   : > { %12047 = vst [vmem:[#allocation65_spill] sm:$0xff] %v8689_v60  ;;  %12048 = vst [vmem:[#allocation66_spill] sm:$0xff] %v8691_v45  ;;  %v1969_v45 = vsel %vm1965_vm1, %v8194_v35, %v8601_v56  ;;  %v8752_v35 = vrot.slane %v8709_v38, %v8379_v49 }
 0x227   : > { %12057 = vst [vmem:[#allocation75_spill] sm:$0xff] %v8752_v35 }
 0x228   : > { %v8693_v6 = vpop.permute.xlu0 %1365  ;;  %v8695_v62 = vpop.permute.xlu1 %1367 }
 0x229   : > { %12049 = vst [vmem:[#allocation67_spill] sm:$0xff] %v8693_v6  ;;  %12050 = vst [vmem:[#allocation68_spill] sm:$0xff] %v8695_v62  ;;  %v1975_v6 = vsel %vm1965_vm1, %v8248_v48, %v8435_v4 }
 0x22c   : > { %v8697_v39 = vpop.permute.xlu0 %1103  ;;  %v8699_v24 = vpop.permute.xlu1 %1105 }
 0x22d   : > { %12051 = vst [vmem:[#allocation69_spill] sm:$0xff] %v8697_v39  ;;  %12052 = vst [vmem:[#allocation70_spill] sm:$0xff] %v8699_v24  ;;  %v8720_v39 = vrot.slane %v8704_v32, %v8352_v18  ;;  %v8724_v24 = vrot.slane %v8709_v38, %v8352_v18 }
 0x22f   : > { %12053 = vst [vmem:[#allocation71_spill] sm:$0xff] %v8720_v39  ;;  %12054 = vst [vmem:[#allocation72_spill] sm:$0xff] %v8724_v24  ;;  %v2040_v50 = vmul.f32 %v8724_v24, %v1975_v6  ;;  %v2033_v3 = vmul.f32 %v8720_v39, %v1969_v45  ;;  %v2032_v16 = vmul.f32 %v8724_v24, %v1968_v1  ;;  %v12058_v6 = vld [vmem:[#allocation19_spill] sm:$0xff] }
 0x230   : > { %v8714_v60 = vpop.permute.xlu0 %1943  ;;  %v8716_v62 = vpop.permute.xlu1 %1957  ;;  %v1840_v61 = vsel %vm1836_vm2, %v12058_v6, %v8630_v36  ;;  %v1839_v45 = vsel %vm1836_vm2, %v8138_v19, %v12058_v6  ;;  %v1717_v24 = vsel %vm1707_vm3, %v8300_v0, %v8502_v23  ;;  %v8775_v19 = vrot.slane %v8704_v32, %v8431_v52 }
 0x231   : > { %v1976_v48 = vsel %vm1965_vm1, %v8435_v4, %v8716_v62  ;;  %v8747_v4 = vrot.slane %v8704_v32, %v8379_v49 }
 0x232   : > { %v2041_v33 = vmul.f32 %v8720_v39, %v1976_v48  ;;  %v1911_v48 = vmul.f32 %v8752_v35, %v1846_v63  ;;  %12060 = vst [vmem:[#allocation76_spill] sm:$0xff] %v8775_v19  ;;  %v8780_v63 = vrot.slane %v8709_v38, %v8431_v52 }
 0x233   : > { %12056 = vst [vmem:[#allocation74_spill] sm:$0xff] %v8747_v4 }
 0x234   : > { %v8740_v46 = vpop.permute.xlu0 %1506  ;;  %2423 = vmatprep.subr.mxu1 %v2041_v33  ;;  %v8742_v25 = vpop.permute.xlu1 %1828  ;;  %12061 = vst [vmem:[#allocation77_spill] sm:$0xff] %v8780_v63 }
 0x235   : > { %12055 = vst [vmem:[#allocation73_spill] sm:$0xff] %v8740_v46  ;;  %v1847_v33 = vsel %vm1836_vm2, %v8472_v54, %v8742_v25  ;;  %2424 = vmatpush1.msra.mxu1 %v2040_v50  ;;  %v1904_v54 = vmul.f32 %v8747_v4, %v1840_v61  ;;  %v12062_v50 = vld [vmem:[#allocation20_spill] sm:$0xff] }
 0x236   : > { %2425 = vmatprep.subr.mxu1 %v2033_v3  ;;  %v1912_v1 = vmul.f32 %v8747_v4, %v1847_v33  ;;  %v1903_v3 = vmul.f32 %v8752_v35, %v1839_v45  ;;  %v1711_v0 = vsel %vm1707_vm3, %v12062_v50, %v8474_v17  ;;  %v1710_v6 = vsel %vm1707_vm3, %v8148_v22, %v12062_v50  ;;  %v12068_v50 = vld [vmem:[#allocation28_spill] sm:$0xff]  ;;  %v12075_v4 = vld [vmem:[#allocation15_spill] sm:$0xff] }
 0x237   : > { %2426 = vmatpush1.msra.mxu1 %v2032_v16  ;;  %v1782_v33 = vmul.f32 %v8780_v63, %v1717_v24  ;;  %v1775_v35 = vmul.f32 %v8775_v19, %v1711_v0  ;;  %v8805_v22 = vrot.slane %v8709_v38, %v8468_v58  ;;  %v12066_v24 = vld [vmem:[#allocation10_spill] sm:$0xff]  ;;  %v12069_v0 = vld [vmem:[#allocation7_spill] sm:$0xff] }
 0x238   : > { %v8768_v39 = vpop.permute.xlu0 %1377  ;;  %2427 = vmatprep.subr.mxu1 %v1912_v1  ;;  %v8770_v46 = vpop.permute.xlu1 %1699 }
 0x239   : > { %12059 = vst [vmem:[#allocation19_spill] sm:$0xff] %v8768_v39  ;;  %v1718_v16 = vsel %vm1707_vm3, %v8502_v23, %v8770_v46  ;;  %2428 = vmatpush1.msra.mxu1 %v1911_v48  ;;  %v8800_v23 = vrot.slane %v8704_v32, %v8468_v58  ;;  %v1774_v48 = vmul.f32 %v8780_v63, %v1710_v6  ;;  %12065 = vst [vmem:[#allocation79_spill] sm:$0xff] %v8805_v22  ;;  %v12078_v39 = vld [vmem:[#allocation30_spill] sm:$0xff] }
 0x23a   : > { %2429 = vmatprep.subr.mxu1 %v1904_v54  ;;  %v1783_v61 = vmul.f32 %v8775_v19, %v1718_v16  ;;  %v1523_v6 = vsel %vm1514_vm4, %v8325_v8, %v12068_v50  ;;  %v8825_v19 = vrot.slane %v8704_v32, %v8482_v44 }
 0x23b   : > { %2430 = vmatpush1.msra.mxu1 %v1903_v3  ;;  %12064 = vst [vmem:[#allocation78_spill] sm:$0xff] %v8800_v23  ;;  %v1654_v54 = vmul.f32 %v8800_v23, %v12066_v24  ;;  %v12067_v3 = vld [vmem:[#allocation34_spill] sm:$0xff] }
 0x23c   : > { %v8793_v45 = vpop.permute.xlu0 %1510  ;;  %2431 = vmatprep.subr.mxu1 %v1783_v61  ;;  %v8795_v1 = vpop.permute.xlu1 %1961  ;;  %v1524_v16 = vsel %vm1514_vm4, %v12068_v50, %v12067_v3  ;;  %v1653_v61 = vmul.f32 %v8805_v22, %v12069_v0  ;;  %12072 = vst [vmem:[#allocation80_spill] sm:$0xff] %v8825_v19  ;;  %v12074_v0 = vld [vmem:[#allocation22_spill] sm:$0xff]  ;;  %v12076_v50 = vld [vmem:[#allocation4_spill] sm:$0xff] }
 0x23d   : > { %12063 = vst [vmem:[#allocation20_spill] sm:$0xff] %v8793_v45  ;;  %2432 = vmatpush1.msra.mxu1 %v1782_v33  ;;  %v1517_v8 = vsel %vm1514_vm4, %v12075_v4, %v12074_v0 }
 0x23e   : > { %2433 = vmatprep.subr.mxu1 %v1775_v35  ;;  %v12071_v35 = vld [vmem:[#allocation6_spill] sm:$0xff] }
 0x23f   : > { %2434 = vmatpush1.msra.mxu1 %v1774_v48  ;;  %v1646_v24 = vmul.f32 %v8800_v23, %v12071_v35  ;;  %v8829_v48 = vrot.slane %v8709_v38, %v8482_v44  ;;  %v1516_v35 = vsel %vm1514_vm4, %v8218_v41, %v12075_v4  ;;  %v1590_v23 = vmul.f32 %v8825_v19, %v1524_v16 }
 0x240   : > { %v8817_v33 = vpop.permute.xlu0 %1248  ;;  %2435 = vmatprep.subr.mxu1 %v1654_v54  ;;  %v8819_v63 = vpop.permute.xlu1 %2086  ;;  %v1645_v54 = vmul.f32 %v8805_v22, %v12076_v50  ;;  %v8850_v50 = vld [vmem:[%s11721_s2 + $0x20] sm:$0xff]  ;;  %v8859_v16 = vrot.slane %v8704_v32, %v8517_v7 }
 0x241   : > { %12070 = vst [vmem:[#allocation28_spill] sm:$0xff] %v8817_v33  ;;  %12073 = vst [vmem:[#allocation81_spill] sm:$0xff] %v8829_v48  ;;  %2436 = vmatpush1.msra.mxu1 %v1653_v61  ;;  %v1589_v45 = vmul.f32 %v8829_v48, %v1523_v6  ;;  %v12077_v33 = vld [vmem:[#allocation37_spill] sm:$0xff]  ;;  %v1394_v61 = vsel %vm1385_vm5, %v8333_v10, %v12078_v39  ;;  %v8864_v10 = vld [vmem:[%s11721_s2 + $0x28] sm:$0xff]  ;;  %v8869_v6 = vrot.slane %v8709_v38, %v8517_v7 }
 0x242   : > { %2437 = vmatprep.subr.mxu1 %v1646_v24  ;;  %v1395_v3 = vsel %vm1385_vm5, %v12078_v39, %v12077_v33  ;;  %v1582_v24 = vmul.f32 %v8825_v19, %v1517_v8  ;;  %12080 = vst [vmem:[#allocation30_spill] sm:$0xff] %v8859_v16  ;;  %v1581_v39 = vmul.f32 %v8829_v48, %v1516_v35  ;;  %v8877_v8 = vld [vmem:[%s11721_s2 + $0x30] sm:$0xff]  ;;  %v8885_v35 = vld [vmem:[%s11721_s2 + $0x38] sm:$0xff]  ;;  %v12084_v33 = vld [vmem:[#allocation31_spill] sm:$0xff] }
 0x243   : > { %2438 = vmatpush1.msra.mxu1 %v1645_v54  ;;  %12081 = vst [vmem:[#allocation82_spill] sm:$0xff] %v8869_v6  ;;  %v12083_v54 = vld [vmem:[#allocation17_spill] sm:$0xff]  ;;  %v1461_v48 = vmul.f32 %v8859_v16, %v1395_v3 }
 0x244   : > { %v8852_v41 = vpop.permute.xlu0 %1381  ;;  %2439 = vmatprep.subr.mxu1 %v1590_v23  ;;  %v8854_v4 = vpop.permute.xlu1 %1832  ;;  %v12082_v23 = vld [vmem:[#allocation24_spill] sm:$0xff]  ;;  %v1387_v19 = vsel %vm1385_vm5, %v8226_v43, %v12083_v54  ;;  %v8898_v43 = vrot.slane %v8850_v50, %v8468_v58 }
 0x245   : > { %12079 = vst [vmem:[#allocation15_spill] sm:$0xff] %v8852_v41  ;;  %v1388_v22 = vsel %vm1385_vm5, %v12083_v54, %v12082_v23  ;;  %2440 = vmatpush1.msra.mxu1 %v1589_v45  ;;  %v1460_v41 = vmul.f32 %v8869_v6, %v1394_v61  ;;  %v1266_v23 = vsel %vm1256_vm6, %v12084_v33, %v8433_v15 }
 0x246   : > { %2441 = vmatprep.subr.mxu1 %v1582_v24  ;;  %v8894_v45 = vrot.slane %v8864_v10, %v8468_v58  ;;  %12086 = vst [vmem:[#allocation31_spill] sm:$0xff] %v8898_v43  ;;  %v1265_v24 = vsel %vm1256_vm6, %v8356_v53, %v12084_v33  ;;  %v1453_v54 = vmul.f32 %v8859_v16, %v1388_v22  ;;  %v12091_v33 = vld [vmem:[#allocation26_spill] sm:$0xff] }
 0x247   : > { %2442 = vmatpush1.msra.mxu1 %v1581_v39  ;;  %v8910_v39 = vrot.slane %v8704_v32, %v8550_v2  ;;  %v8914_v15 = vrot.slane %v8877_v8, %v8468_v58  ;;  %v1452_v0 = vmul.f32 %v8869_v6, %v1387_v19  ;;  %v8919_v53 = vrot.slane %v8709_v38, %v8550_v2 }
 0x248   : > { %12085 = vst [vmem:[#allocation17_spill] sm:$0xff] %v8894_v45  ;;  %v8903_v3 = vpop.permute.xlu0 %1119  ;;  %2443 = vmatprep.subr.mxu1 %v1461_v48  ;;  %v8905_v61 = vpop.permute.xlu1 %1703  ;;  %v12092_v48 = vld [vmem:[#allocation18_spill] sm:$0xff]  ;;  %v8926_v22 = vrot.slane %v8885_v35, %v8468_v58  ;;  %v8933_v19 = vrot.slane %v8709_v38, %v8583_v20  ;;  %v8938_v2 = vrot.slane %v8704_v32, %v8583_v20  ;;  %v12096_v58 = vld [vmem:[#allocation33_spill] sm:$0xff]  ;;  %v12098_v38 = vld [vmem:[#allocation11_spill] sm:$0xff] }
 0x249   : > { %12087 = vst [vmem:[#allocation83_spill] sm:$0xff] %v8903_v3  ;;  %12088 = vst [vmem:[#allocation84_spill] sm:$0xff] %v8910_v39  ;;  %v1259_v3 = vsel %vm1256_vm6, %v12092_v48, %v12091_v33  ;;  %2444 = vmatpush1.msra.mxu1 %v1460_v41  ;;  %v1258_v16 = vsel %vm1256_vm6, %v8242_v47, %v12092_v48  ;;  %v1332_v6 = vmul.f32 %v8910_v39, %v1266_v23 }
 0x24a   : > { %12089 = vst [vmem:[#allocation85_spill] sm:$0xff] %v8914_v15  ;;  %12090 = vst [vmem:[#allocation86_spill] sm:$0xff] %v8919_v53  ;;  %2445 = vmatprep.subr.mxu1 %v1453_v54  ;;  %v1331_v41 = vmul.f32 %v8919_v53, %v1265_v24  ;;  %v1137_v33 = vsel %vm1127_vm7, %v12096_v58, %v8447_v42  ;;  %v8946_v47 = vmul.f32 %v8894_v45, %v8168_v28 }
 0x24b   : > { %12093 = vst [vmem:[#allocation18_spill] sm:$0xff] %v8926_v22  ;;  %12094 = vst [vmem:[#allocation87_spill] sm:$0xff] %v8933_v19  ;;  %2446 = vmatpush1.msra.mxu1 %v1452_v0  ;;  %v8950_v54 = vmul.f32 %v8898_v43, %v12098_v38  ;;  %v1136_v32 = vsel %vm1127_vm7, %v8406_v13, %v12096_v58  ;;  %v1324_v48 = vmul.f32 %v8910_v39, %v1259_v3  ;;  %v12100_v0 = vld [vmem:[#allocation25_spill] sm:$0xff] }
 0x24c   : > { %12095 = vst [vmem:[#allocation88_spill] sm:$0xff] %v8938_v2  ;;  %12097 = vst [vmem:[#allocation33_spill] sm:$0xff] %v8946_v47  ;;  %v8955_v23 = vpop.permute.xlu0 %1252  ;;  %2447 = vmatprep.subr.mxu1 %v1332_v6  ;;  %v8957_v24 = vpop.permute.xlu1 %1238  ;;  %v8962_v42 = vmul.f32 %v8898_v43, %v12100_v0  ;;  %v8966_v28 = vmul.f32 %v8914_v15, %v8146_v21  ;;  %v12101_v38 = vld [vmem:[#allocation21_spill] sm:$0xff]  ;;  %v1323_v13 = vmul.f32 %v8919_v53, %v1258_v16  ;;  %v12106_v43 = vld [vmem:[#allocation47_spill] sm:$0xff] }
 0x24d   : > { %12099 = vst [vmem:[#allocation89_spill] sm:$0xff] %v8950_v54  ;;  %v12102_v54 = vld [vmem:[#allocation13_spill] sm:$0xff]  ;;  %2448 = vmatpush1.msra.mxu1 %v1331_v41  ;;  %v8977_v3 = vmul.f32 %v8926_v22, %v8178_v31  ;;  %v1203_v58 = vmul.f32 %v8938_v2, %v1137_v33  ;;  %v8982_v21 = vmul.f32 %v8894_v45, %v8335_v11  ;;  %v12105_v31 = vld [vmem:[#allocation23_spill] sm:$0xff] }
 0x24e   : > { %v1130_v47 = vsel %vm1127_vm7, %v12102_v54, %v12101_v38  ;;  %v1129_v6 = vsel %vm1127_vm7, %v8258_v51, %v12102_v54  ;;  %2449 = vmatprep.subr.mxu1 %v1324_v48  ;;  %v8986_v0 = vmul.f32 %v8926_v22, %v8358_v9  ;;  %v8990_v16 = vmul.f32 %v8914_v15, %v8284_v59  ;;  %v6898_v48 = vld [vmem:[%s11721_s2 + $0x50] ss:$0 sm:$0xff] }
 0x24f   : > { %v1202_v51 = vmul.f32 %v8933_v19, %v1136_v32  ;;  %v8995_v41 = vrot.slane %v8850_v50, %v8352_v18  ;;  %v2105_v33 = vsel %vm2094_vm8, %v8568_v34, %v8819_v63  ;;  %2450 = vmatpush1.msra.mxu1 %v1323_v13  ;;  %v9002_v54 = vrot.slane %v8864_v10, %v8352_v18 }
 0x250   : > { %v2097_v32 = vsel %vm2094_vm8, %v8216_v40, %v12105_v31  ;;  %v1194_v9 = vmul.f32 %v8933_v19, %v1129_v6  ;;  %v2104_v11 = vsel %vm2094_vm8, %v8313_v5, %v8568_v34  ;;  %2451 = vmatprep.subr.mxu1 %v1203_v58  ;;  %v9014_v13 = vpop.permute.xlu1 %2090  ;;  %v1960_v59 = vpop.permute.xlu0 %1959  ;;  %v1195_v15 = vmul.f32 %v8938_v2, %v1130_v47  ;;  %v6899_v34 = vld [vmem:[%s11721_s2 + $0x58] ss:$0 sm:$0xff] }
 0x251   : > { %12103 = vst [vmem:[#allocation21_spill] sm:$0xff] %v8995_v41  ;;  %12104 = vst [vmem:[#allocation13_spill] sm:$0xff] %v9002_v54  ;;  %v2098_v22 = vsel %vm2094_vm8, %v12105_v31, %v8537_v14  ;;  %v1971_v40 = vsel %vm1965_vm1, %v8714_v60, %v12106_v43  ;;  %v1977_v6 = vsel %vm1965_vm1, %v8716_v62, %v1960_v59  ;;  %2452 = vmatpush1.msra.mxu1 %v1202_v51 }
 0x252   : > { %v1978_v5 = vsel %vm1965_vm1, %v1960_v59, %v8795_v1  ;;  %v1970_v47 = vsel %vm1965_vm1, %v8601_v56, %v8714_v60  ;;  %v2042_v31 = vmul.f32 %v8995_v41, %v1977_v6  ;;  %2453 = vmatprep.subr.mxu1 %v1195_v15  ;;  %v2170_v58 = vmul.f32 %v6899_v34, %v2105_v33 }
 0x253   : > { %v2043_v45 = vmul.f32 %v9002_v54, %v1978_v5  ;;  %v2161_v19 = vmul.f32 %v6898_v48, %v2097_v32  ;;  %v2169_v62 = vmul.f32 %v6898_v48, %v2104_v11  ;;  %v9037_v59 = vrot.slane %v8850_v50, %v8379_v49  ;;  %2454 = vmatpush1.msra.mxu1 %v1194_v9 }
 0x254   : > { %v9041_v51 = vrot.slane %v8864_v10, %v8379_v49  ;;  %v1842_v56 = vsel %vm1836_vm2, %v8570_v12, %v8648_v30  ;;  %2483 = vmatprep.subr.mxu1 %v2170_v58  ;;  %v9046_v15 = vpop.permute.xlu1 %1109  ;;  %v1831_v60 = vpop.permute.xlu0 %1830  ;;  %v2162_v33 = vmul.f32 %v6899_v34, %v2098_v22  ;;  %v2035_v11 = vmul.f32 %v9002_v54, %v1971_v40 }
 0x255   : > { %12107 = vst [vmem:[#allocation23_spill] sm:$0xff] %v9037_v59  ;;  %2500 = vmatprep.subr.mxu0 %v2043_v45  ;;  %v2034_v48 = vmul.f32 %v8995_v41, %v1970_v47  ;;  %v1848_v9 = vsel %vm1836_vm2, %v8742_v25, %v1831_v60  ;;  %v1849_v32 = vsel %vm1836_vm2, %v1831_v60, %v8854_v4  ;;  %v12133_v41 = vld [vmem:[#allocation19_spill] sm:$0xff] }
 0x256   : > { %12108 = vst [vmem:[#allocation47_spill] sm:$0xff] %v9041_v51  ;;  %2484 = vmatpush2.msra.mxu1 %v2169_v62  ;;  %2501 = vmatpush1.msra.mxu0 %v2042_v31  ;;  %v1841_v6 = vsel %vm1836_vm2, %v8630_v36, %v8570_v12  ;;  %v1913_v45 = vmul.f32 %v9037_v59, %v1848_v9 }
 0x257   : > { %2485 = vmatprep.subr.mxu1 %v2162_v33  ;;  %2502 = vmatprep.subr.mxu0 %v2035_v11  ;;  %v1914_v22 = vmul.f32 %v9041_v51, %v1849_v32  ;;  %v9061_v40 = vrot.slane %v8877_v8, %v8352_v18  ;;  %v9065_v25 = vrot.slane %v8850_v50, %v8431_v52 }
 0x258   : > { %2486 = vmatpush2.msra.mxu1 %v2161_v19  ;;  %2503 = vmatpush1.msra.mxu0 %v2034_v48  ;;  %v9069_v5 = vrot.slane %v8885_v35, %v8352_v18  ;;  %v9073_v12 = vrot.slane %v8877_v8, %v8379_v49  ;;  %v9075_v36 = vpop.permute.xlu1 %1508  ;;  %v1964_v34 = vpop.permute.xlu0 %1963  ;;  %v1906_v47 = vmul.f32 %v9041_v51, %v1842_v56  ;;  %v1996_v18 = vsel %vm1965_vm1, %v8603_v29, 0.0 }
 0x259   : > { %12109 = vst [vmem:[#allocation90_spill] sm:$0xff] %v9061_v40  ;;  %12110 = vst [vmem:[#allocation91_spill] sm:$0xff] %v9065_v25  ;;  %2504 = vmatprep.subr.mxu0 %v1914_v22  ;;  %2488 = vmatmul.mubr.f32.vlgmr.msra.gmra.mxu1 %v8655_v26  ;;  %v9081_v19 = vrot.slane %v8885_v35, %v8379_v49  ;;  %v1905_v31 = vmul.f32 %v9037_v59, %v1841_v6  ;;  %v1997_v62 = vsel %vm1965_vm1, %v1964_v34, 0.0 }
 0x25a   : > { %12111 = vst [vmem:[#allocation92_spill] sm:$0xff] %v9069_v5  ;;  %12112 = vst [vmem:[#allocation93_spill] sm:$0xff] %v9073_v12  ;;  %v1979_v58 = vsel %vm1965_vm1, %v8795_v1, %v1964_v34  ;;  %2505 = vmatpush1.msra.mxu0 %v1913_v45  ;;  %6907 = vmatprep.mubr.msk.f32.mxu1 %vm2339_vm0, %v8660_v27  ;;  %v1972_v56 = vsel %vm1965_vm1, %v12106_v43, %v8603_v29 }
 0x25b   : > { %12113 = vst [vmem:[#allocation94_spill] sm:$0xff] %v9081_v19  ;;  %v9096_v49 = vrot.slane %v8877_v8, %v8431_v52  ;;  %v2044_v60 = vmul.f32 %v9061_v40, %v1979_v58  ;;  %2506 = vmatprep.subr.mxu0 %v1906_v47  ;;  %v2045_v33 = vmul.f32 %v9069_v5, %v1997_v62 }
 0x25c   : > { %v9102_v1 = vrot.slane %v8850_v50, %v8482_v44  ;;  %2507 = vmatpush1.msra.mxu0 %v1905_v31  ;;  %v9106_v11 = vrot.slane %v8864_v10, %v8431_v52  ;;  %v9110_v29 = vrot.slane %v8885_v35, %v8431_v52  ;;  %v9114_v43 = vrot.slane %v8864_v10, %v8482_v44  ;;  %v9120_v9 = vpop.permute.xlu1 %1379  ;;  %v1702_v32 = vpop.permute.xlu0 %1701 }
 0x25d   : > { %v9118_v48 = vrot.slane %v8850_v50, %v8517_v7  ;;  %2577 = vmatprep.subr.mxu1 %v2045_v33  ;;  %v2037_v6 = vmul.f32 %v9069_v5, %v1996_v18  ;;  %v9125_v45 = vrot.slane %v8864_v10, %v8517_v7  ;;  %2494 = vmatmul.mubr.f32.gmra.mxu1 %v8672_v57  ;;  %v12131_v5 = vld [vmem:[#allocation24_spill] sm:$0xff] }
 0x25e   : > { %12114 = vst [vmem:[#allocation95_spill] sm:$0xff] %v9106_v11  ;;  %v2036_v52 = vmul.f32 %v9061_v40, %v1972_v56  ;;  %v1713_v22 = vsel %vm1707_vm3, %v8632_v37, %v8662_v55  ;;  %v1719_v34 = vsel %vm1707_vm3, %v8770_v46, %v1702_v32  ;;  %v1720_v47 = vsel %vm1707_vm3, %v1702_v32, %v8905_v61  ;;  %v12116_v56 = vld [vmem:[#allocation52_spill] sm:$0xff] }
 0x25f   : > { %12115 = vst [vmem:[#allocation96_spill] sm:$0xff] %v9118_v48  ;;  %2578 = vmatpush1.msra.mxu1 %v2044_v60  ;;  %v1712_v18 = vsel %vm1707_vm3, %v8474_v17, %v8632_v37  ;;  %v9141_v31 = vrot.slane %v8877_v8, %v8482_v44  ;;  %v1784_v58 = vmul.f32 %v9065_v25, %v1719_v34  ;;  %v12117_v37 = vld [vmem:[#allocation29_spill] sm:$0xff] }
 0x260   : > { %2579 = vmatprep.subr.mxu1 %v2037_v6  ;;  %v1785_v62 = vmul.f32 %v9106_v11, %v1720_v47  ;;  %v9147_v46 = vrot.slane %v8885_v35, %v8482_v44  ;;  %v9151_v60 = vrot.slane %v8850_v50, %v12116_v56  ;;  %v9155_v17 = vrot.slane %v8864_v10, %v12116_v56  ;;  %v9171_v6 = vpop.permute.xlu1 %1512  ;;  %v12120_v47 = vld [vmem:[#allocation57_spill] sm:$0xff] }
 0x261   : > { %2580 = vmatpush1.msra.mxu1 %v2036_v52  ;;  %6910 = vmatprep.mubr.msk.f32.mxu1 %vm2339_vm0, %v12117_v37  ;;  %v9161_v33 = vrot.slane %v8877_v8, %v8517_v7  ;;  %v9165_v44 = vrot.slane %v8885_v35, %v8517_v7  ;;  %v9169_v32 = vrot.slane %v8850_v50, %v8583_v20  ;;  %v1867_v59 = vsel %vm1836_vm2, %v12120_v47, 0.0  ;;  %v12121_v7 = vld [vmem:[#allocation58_spill] sm:$0xff]  ;;  %v1835_v50 = vpop.permute.xlu0 %1834 }
 0x262   : > { %2508 = vmatprep.subr.mxu0 %v1785_v62  ;;  %v1777_v52 = vmul.f32 %v9106_v11, %v1713_v22  ;;  %v1776_v34 = vmul.f32 %v9065_v25, %v1712_v18  ;;  %v1843_v37 = vsel %vm1836_vm2, %v8648_v30, %v12120_v47  ;;  %v1714_v51 = vsel %vm1707_vm3, %v8662_v55, %v12121_v7  ;;  %v12124_v47 = vld [vmem:[#allocation73_spill] sm:$0xff]  ;;  %v12125_v25 = vld [vmem:[#allocation34_spill] sm:$0xff] }
 0x263   : > { %12118 = vst [vmem:[#allocation52_spill] sm:$0xff] %v9165_v44  ;;  %12119 = vst [vmem:[#allocation29_spill] sm:$0xff] %v9169_v32  ;;  %2509 = vmatpush1.msra.mxu0 %v1784_v58  ;;  %v1850_v62 = vsel %vm1836_vm2, %v8854_v4, %v1835_v50  ;;  %v1868_v22 = vsel %vm1836_vm2, %v1835_v50, 0.0  ;;  %v9188_v18 = vrot.slane %v8877_v8, %v12116_v56 }
 0x264   : > { %2510 = vmatprep.subr.mxu0 %v1777_v52  ;;  %v9192_v30 = vrot.slane %v8864_v10, %v8583_v20  ;;  %v1525_v55 = vsel %vm1514_vm4, %v12125_v25, %v12124_v47  ;;  %v1526_v58 = vsel %vm1514_vm4, %v12124_v47, %v9075_v36  ;;  %v1915_v4 = vmul.f32 %v9073_v12, %v1850_v62  ;;  %v9204_v40 = vpop.permute.xlu1 %1250  ;;  %v12128_v47 = vld [vmem:[#allocation22_spill] sm:$0xff] }
 0x265   : > { %12122 = vst [vmem:[#allocation57_spill] sm:$0xff] %v9188_v18  ;;  %2511 = vmatpush1.msra.mxu0 %v1776_v34  ;;  %v1916_v52 = vmul.f32 %v9081_v19, %v1868_v22  ;;  %v1907_v50 = vmul.f32 %v9073_v12, %v1843_v37  ;;  %v1778_v11 = vmul.f32 %v9096_v49, %v1714_v51  ;;  %v1738_v62 = vsel %vm1707_vm3, %v12121_v7, 0.0  ;;  %v12127_v34 = vld [vmem:[#allocation59_spill] sm:$0xff]  ;;  %v12129_v37 = vld [vmem:[#allocation60_spill] sm:$0xff]  ;;  %v12130_v12 = vld [vmem:[#allocation61_spill] sm:$0xff] }
 0x266   : > { %12123 = vst [vmem:[#allocation58_spill] sm:$0xff] %v9192_v30  ;;  %2512 = vmatprep.subr.mxu0 %v8982_v21  ;;  %v1908_v10 = vmul.f32 %v9081_v19, %v1867_v59  ;;  %v9210_v25 = vrot.slane %v8885_v35, %v12116_v56  ;;  %v1518_v22 = vsel %vm1514_vm4, %v12128_v47, %v12127_v34  ;;  %v1706_v59 = vpop.permute.xlu0 %1705  ;;  %v12132_v47 = vld [vmem:[#allocation33_spill] sm:$0xff] }
 0x267   : > { %v1519_v51 = vsel %vm1514_vm4, %v12127_v34, %v12129_v37  ;;  %v1389_v21 = vsel %vm1385_vm5, %v12131_v5, %v12130_v12  ;;  %2581 = vmatprep.subr.mxu1 %v1916_v52  ;;  %2513 = vmatpush1.msra.mxu0 %v8962_v42  ;;  %v1591_v56 = vmul.f32 %v9102_v1, %v1525_v55  ;;  %v1739_v19 = vsel %vm1707_vm3, %v1706_v59, 0.0  ;;  %v12134_v42 = vld [vmem:[#allocation89_spill] sm:$0xff] }
 0x268   : > { %12126 = vst [vmem:[#allocation73_spill] sm:$0xff] %v9210_v25  ;;  %v1721_v7 = vsel %vm1707_vm3, %v8905_v61, %v1706_v59  ;;  %2582 = vmatpush1.msra.mxu1 %v1915_v4  ;;  %2514 = vmatprep.subr.mxu0 %v12132_v47  ;;  %v1592_v34 = vmul.f32 %v9114_v43, %v1526_v58  ;;  %v12135_v61 = vld [vmem:[#allocation37_spill] sm:$0xff]  ;;  %v1384_v4 = vpop.permute.xlu1 %1383 }
 0x269   : > { %v1397_v5 = vsel %vm1385_vm5, %v12133_v41, %v9120_v9  ;;  %v1786_v52 = vmul.f32 %v9096_v49, %v1721_v7  ;;  %2583 = vmatprep.subr.mxu1 %v1908_v10  ;;  %2515 = vmatpush1.msra.mxu0 %v12134_v42  ;;  %v1787_v55 = vmul.f32 %v9110_v29, %v1739_v19  ;;  %v12136_v10 = vld [vmem:[#allocation62_spill] sm:$0xff] }
 0x26a   : > { %v1396_v59 = vsel %vm1385_vm5, %v12135_v61, %v12133_v41  ;;  %2584 = vmatpush1.msra.mxu1 %v1907_v50  ;;  %2516 = vmatprep.subr.mxu0 %v1592_v34  ;;  %v1584_v58 = vmul.f32 %v9114_v43, %v1519_v51  ;;  %v1779_v47 = vmul.f32 %v9110_v29, %v1738_v62  ;;  %v9246_v19 = vpop.permute.xlu0 %1236  ;;  %v12137_v41 = vld [vmem:[#allocation63_spill] sm:$0xff]  ;;  %v12138_v34 = vld [vmem:[#allocation64_spill] sm:$0xff]  ;;  %v12139_v51 = vld [vmem:[#allocation66_spill] sm:$0xff] }
 0x26b   : > { %v1583_v54 = vmul.f32 %v9102_v1, %v1518_v22  ;;  %v1454_v7 = vmul.f32 %v9118_v48, %v1389_v21  ;;  %v1390_v42 = vsel %vm1385_vm5, %v12130_v12, %v12136_v10  ;;  %2585 = vmatprep.subr.mxu1 %v1787_v55  ;;  %2517 = vmatpush1.msra.mxu0 %v1591_v56  ;;  %v12140_v21 = vld [vmem:[#allocation65_spill] sm:$0xff]  ;;  %v12141_v56 = vld [vmem:[#allocation28_spill] sm:$0xff] }
 0x26c   : > { %v1520_v50 = vsel %vm1514_vm4, %v12129_v37, %v12137_v41  ;;  %v1521_v62 = vsel %vm1514_vm4, %v12137_v41, %v12138_v34  ;;  %2586 = vmatpush1.msra.mxu1 %v1786_v52  ;;  %2518 = vmatprep.subr.mxu0 %v1584_v58  ;;  %v1463_v22 = vmul.f32 %v9125_v45, %v1397_v5  ;;  %v12142_v37 = vld [vmem:[#allocation41_spill] sm:$0xff]  ;;  %v12143_v52 = vld [vmem:[#allocation20_spill] sm:$0xff]  ;;  %v9268_v58 = vpop.permute.xlu1 %1121 }
 0x26d   : > { %v1261_v12 = vsel %vm1256_vm6, %v12140_v21, %v12139_v51  ;;  %v1462_v55 = vmul.f32 %v9118_v48, %v1396_v59  ;;  %v1268_v61 = vsel %vm1256_vm6, %v12141_v56, %v9204_v40  ;;  %2587 = vmatprep.subr.mxu1 %v1779_v47  ;;  %2519 = vmatpush1.msra.mxu0 %v1583_v54 }
 0x26e   : > { %v1267_v41 = vsel %vm1256_vm6, %v12142_v37, %v12141_v56  ;;  %v1528_v5 = vsel %vm1514_vm4, %v12143_v52, %v9171_v6  ;;  %2588 = vmatpush1.msra.mxu1 %v1778_v11  ;;  %2520 = vmatprep.subr.mxu0 %v1463_v22  ;;  %v1455_v59 = vmul.f32 %v9125_v45, %v1390_v42  ;;  %v9277_v47 = vpop.permute.xlu0 %1123  ;;  %v12144_v11 = vld [vmem:[#allocation26_spill] sm:$0xff]  ;;  %v12147_v56 = vld [vmem:[#allocation15_spill] sm:$0xff] }
 0x26f   : > { %v1585_v34 = vmul.f32 %v9141_v31, %v1520_v50  ;;  %v1586_v48 = vmul.f32 %v9147_v46, %v1521_v62  ;;  %v1527_v54 = vsel %vm1514_vm4, %v9075_v36, %v12143_v52  ;;  %2589 = vmatprep.subr.mxu1 %v8986_v0  ;;  %2521 = vmatpush1.msra.mxu0 %v1462_v55  ;;  %v12145_v0 = vld [vmem:[#allocation83_spill] sm:$0xff]  ;;  %v12149_v52 = vld [vmem:[#allocation69_spill] sm:$0xff] }
 0x270   : > { %v1260_v6 = vsel %vm1256_vm6, %v12144_v11, %v12140_v21  ;;  %2590 = vmatpush1.msra.mxu1 %v8990_v16  ;;  %2522 = vmatprep.subr.mxu0 %v1455_v59  ;;  %v1334_v42 = vmul.f32 %v9155_v17, %v1268_v61  ;;  %v1326_v50 = vmul.f32 %v9155_v17, %v1261_v12  ;;  %v12146_v21 = vld [vmem:[#allocation43_spill] sm:$0xff]  ;;  %v1255_v61 = vpop.permute.xlu1 %1254  ;;  %v12150_v59 = vld [vmem:[#allocation68_spill] sm:$0xff] }
 0x271   : > { %v1333_v62 = vmul.f32 %v9151_v60, %v1267_v41  ;;  %v1594_v36 = vmul.f32 %v9147_v46, %v1528_v5  ;;  %v1139_v22 = vsel %vm1127_vm7, %v12145_v0, %v9268_v58  ;;  %2591 = vmatprep.subr.mxu1 %v8977_v3  ;;  %2523 = vmatpush1.msra.mxu0 %v1454_v7  ;;  %v12148_v41 = vld [vmem:[#allocation70_spill] sm:$0xff] }
 0x272   : > { %v1138_v16 = vsel %vm1127_vm7, %v12146_v21, %v12145_v0  ;;  %v1593_v55 = vmul.f32 %v9141_v31, %v1527_v54  ;;  %v1399_v12 = vsel %vm1385_vm5, %v12147_v56, %v1384_v4  ;;  %2592 = vmatpush1.msra.mxu1 %v8966_v28  ;;  %2524 = vmatprep.subr.mxu0 %v1334_v42  ;;  %v1108_v5 = vpop.permute.xlu0 %1107  ;;  %v12151_v54 = vld [vmem:[#allocation67_spill] sm:$0xff] }
 0x273   : > { %v1325_v37 = vmul.f32 %v9151_v60, %v1260_v6  ;;  %v1132_v3 = vsel %vm1127_vm7, %v12149_v52, %v12148_v41  ;;  %v1398_v7 = vsel %vm1385_vm5, %v9120_v9, %v12147_v56  ;;  %2593 = vmatprep.subr.mxu1 %v1594_v36  ;;  %2525 = vmatpush1.msra.mxu0 %v1333_v62 }
 0x274   : > { %v1392_v4 = vsel %vm1385_vm5, %v12151_v54, %v12150_v59  ;;  %v1131_v28 = vsel %vm1127_vm7, %v12101_v38, %v12149_v52  ;;  %2594 = vmatpush1.msra.mxu1 %v1593_v55  ;;  %2526 = vmatprep.subr.mxu0 %v1326_v50  ;;  %v1205_v11 = vmul.f32 %v9192_v30, %v1139_v22  ;;  %v1126_v38 = vpop.permute.xlu1 %1125  ;;  %v6900_v52 = vld [vmem:[%s11721_s2 + $0x60] ss:$0 sm:$0xff] }
 0x275   : > { %v1391_v6 = vsel %vm1385_vm5, %v12136_v10, %v12151_v54  ;;  %v1204_v9 = vmul.f32 %v9169_v32, %v1138_v16  ;;  %v1465_v42 = vmul.f32 %v9165_v44, %v1399_v12  ;;  %2595 = vmatprep.subr.mxu1 %v1586_v48  ;;  %2527 = vmatpush1.msra.mxu0 %v1325_v37  ;;  %v6902_v54 = vld [vmem:[%s11721_s2 + $0x70] ss:$0 sm:$0xff] }
 0x276   : > { %v1464_v62 = vmul.f32 %v9161_v33, %v1398_v7  ;;  %v1270_v36 = vsel %vm1256_vm6, %v8955_v23, %v1255_v61  ;;  %2596 = vmatpush1.msra.mxu1 %v1585_v34  ;;  %2528 = vmatprep.subr.mxu0 %v1205_v11  ;;  %v1197_v50 = vmul.f32 %v9192_v30, %v1132_v3  ;;  %v2073_v48 = vpop.permute.xlu0 %2072 }
 0x277   : > { %v1457_v0 = vmul.f32 %v9165_v44, %v1392_v4  ;;  %v1196_v10 = vmul.f32 %v9169_v32, %v1131_v28  ;;  %v1269_v22 = vsel %vm1256_vm6, %v9204_v40, %v8955_v23  ;;  %2597 = vmatprep.subr.mxu1 %v1465_v42  ;;  %2529 = vmatpush1.msra.mxu0 %v1204_v9  ;;  %v6903_v4 = vld [vmem:[%s11721_s2 + $0x78] ss:$0 sm:$0xff] }
 0x278   : > { %v1456_v21 = vmul.f32 %v9161_v33, %v1391_v6  ;;  %v1262_v34 = vsel %vm1256_vm6, %v12139_v51, %v9246_v19  ;;  %v1263_v16 = vsel %vm1256_vm6, %v9246_v19, %v8957_v24  ;;  %2598 = vmatpush1.msra.mxu1 %v1464_v62  ;;  %2530 = vmatprep.subr.mxu0 %v1197_v50  ;;  %v2075_v24 = vpop.permute.xlu1 %2074  ;;  %v6901_v19 = vld [vmem:[%s11721_s2 + $0x68] ss:$0 sm:$0xff] }
 0x279   : > { %v1336_v55 = vmul.f32 %v9210_v25, %v1270_v36  ;;  %2599 = vmatprep.subr.mxu1 %v1457_v0  ;;  %2531 = vmatpush1.msra.mxu0 %v1196_v10  ;;  %v1335_v23 = vmul.f32 %v9188_v18, %v1269_v22  ;;  %v9337_v40 = vrot.slane %v8877_v8, %v8583_v20 }
 0x27a   : > { %v9341_v56 = vrot.slane %v8885_v35, %v8583_v20  ;;  %v1141_v51 = vsel %vm1127_vm7, %v9277_v47, %v1126_v38  ;;  %2600 = vmatpush1.msra.mxu1 %v1456_v21  ;;  %v1327_v12 = vmul.f32 %v9188_v18, %v1262_v34  ;;  %v1140_v8 = vsel %vm1127_vm7, %v9268_v58, %v9277_v47  ;;  %v2089_v20 = vpop.permute.xlu0 %2088 }
 0x27b   : > { %12152 = vst [vmem:[#allocation34_spill] sm:$0xff] %v9337_v40  ;;  %v1133_v61 = vsel %vm1127_vm7, %v12148_v41, %v1108_v5  ;;  %2601 = vmatprep.subr.mxu1 %v1336_v55  ;;  %v1328_v35 = vmul.f32 %v9210_v25, %v1263_v16  ;;  %v1134_v37 = vsel %vm1127_vm7, %v1108_v5, %v9046_v15 }
 0x27c   : > { %12153 = vst [vmem:[#allocation59_spill] sm:$0xff] %v9341_v56  ;;  %v2100_v3 = vsel %vm2094_vm8, %v2073_v48, %v2075_v24  ;;  %v2106_v7 = vsel %vm2094_vm8, %v8819_v63, %v2089_v20  ;;  %v2107_v58 = vsel %vm2094_vm8, %v2089_v20, %v9014_v13  ;;  %2602 = vmatpush1.msra.mxu1 %v1335_v23  ;;  %v2077_v63 = vpop.permute.xlu1 %2076 }
 0x27d   : > { %v1207_v47 = vmul.f32 %v9341_v56, %v1141_v51  ;;  %v2099_v41 = vsel %vm2094_vm8, %v8537_v14, %v2073_v48  ;;  %v2171_v59 = vmul.f32 %v6900_v52, %v2106_v7  ;;  %2603 = vmatprep.subr.mxu1 %v1328_v35  ;;  %v2172_v15 = vmul.f32 %v6901_v19, %v2107_v58 }
 0x27e   : > { %v1206_v5 = vmul.f32 %v9337_v40, %v1140_v8  ;;  %2604 = vmatpush1.msra.mxu1 %v1327_v12  ;;  %v1198_v28 = vmul.f32 %v9337_v40, %v1133_v61  ;;  %v2093_v11 = vpop.permute.xlu0 %2092  ;;  %v2164_v14 = vmul.f32 %v6901_v19, %v2100_v3  ;;  %v1199_v6 = vmul.f32 %v9341_v56, %v1134_v37 }
 0x27f   : > { %2605 = vmatprep.subr.mxu1 %v1207_v47  ;;  %2560 = vmatprep.subr.mxu0 %v2172_v15  ;;  %v2163_v9 = vmul.f32 %v6900_v52, %v2099_v41  ;;  %v2125_v42 = vsel %vm2094_vm8, %v2077_v63, 0.0  ;;  %v2108_v62 = vsel %vm2094_vm8, %v9014_v13, %v2093_v11  ;;  %v2126_v36 = vsel %vm2094_vm8, %v2093_v11, 0.0 }
 0x280   : > { %2561 = vmatpush2.msra.mxu0 %v2171_v59  ;;  %2606 = vmatpush1.msra.mxu1 %v1206_v5  ;;  %v2101_v38 = vsel %vm2094_vm8, %v2075_v24, %v2077_v63  ;;  %v2173_v50 = vmul.f32 %v6902_v54, %v2108_v62  ;;  %v2174_v0 = vmul.f32 %v6903_v4, %v2126_v36  ;;  %v7092_v11 = vmov 0  }
 0x281   : > { %2562 = vmatprep.subr.mxu0 %v2164_v14  ;;  %2607 = vmatprep.subr.mxu1 %v1199_v6  ;;  %v2166_v10 = vmul.f32 %v6903_v4, %v2125_v42  ;;  %v2165_v22 = vmul.f32 %v6902_v54, %v2101_v38  ;;  %v2786_v14 = vld [vmem:[%s11724_s5 + $0x8] sm:$0xff]  ;;  %v2785_v6 = vld [vmem:[%s11724_s5] sm:$0xff] }
 0x282   : > { %2563 = vmatpush2.msra.mxu0 %v2163_v9  ;;  %2608 = vmatpush1.msra.mxu1 %v1198_v28  ;;  %v2757_v28 = vld [vmem:[%s11723_s4] sm:$0xff]  ;;  %v2758_v9 = vld [vmem:[%s11723_s4 + $0x8] sm:$0xff] }
 0x283   : > { %2565 = vmatmul.mubr.f32.vlgmr.msra.gmra.mxu0 %v8655_v26  ;;  %2637 = vmatprep.subr.mxu1 %v2174_v0 }
 0x284   : > { %2638 = vmatpush2.msra.mxu1 %v2173_v50  ;;  %6909 = vmatprep.mubr.msk.f32.mxu0 %vm2339_vm0, %v8660_v27 }
 0x285   : > { %2639 = vmatprep.subr.mxu1 %v2166_v10  ;;  %6967 = vset.pattern.permute.xlu1 %v7092_v11 }
 0x286   : > { %2640 = vmatpush2.msra.mxu1 %v2165_v22  ;;  %6966 = vset.pattern.permute.xlu0 %v7092_v11 }
 0x287   : > { %2642 = vmatmul.mubr.f32.vlgmr.msra.gmra.mxu1 %v8655_v26  ;;  %2571 = vmatmul.mubr.f32.gmra.mxu0 %v8672_v57 }
 0x288   : > { %6911 = vmatprep.mubr.msk.f32.mxu1 %vm2339_vm0, %v8660_v27  ;;  %2761 = vperm.xlu1 %6967, %v2757_v28  }
 0x28b   : > { %2648 = vmatmul.mubr.f32.gmra.mxu1 %v8672_v57 }
 0x28c   : > { %2794 = vperm.xlu1 %6967, %v2786_v14  }
 0x290   : > { %2789 = vperm.xlu1 %6967, %v2785_v6  }
 0x2d4   : > { %v2412_v13 = vpop.f32.mrf.mxu0 }
 0x2d6   : > { %v2414_v48 = vpop.f32.mrf.mxu0 }
 0x2d7   : > { %v2654_v21 = vadd.f32 %v2414_v48, %v2412_v13 }
 0x2d8   : > { %v9390_v16 = vpop.f32.mrf.mxu0 }
 0x2da   : > { %v9392_v51 = vpop.f32.mrf.mxu0 }
 0x319   : > { %v2489_v34 = vpop.f32.mrf.mxu1 }
 0x31a   : > { %v2655_v55 = vadd.f32 %v2654_v21, %v2489_v34 }
 0x31b   : > { %v2491_v23 = vpop.f32.mrf.mxu1 }
 0x31c   : > { %v2656_v26 = vadd.f32 %v2655_v55, %v2491_v23 }
 0x31d   : > { %v9394_v24 = vpop.f32.mrf.mxu1 }
 0x31f   : > { %v9396_v8 = vpop.f32.mrf.mxu1 }
 0x343   : > { %v2566_v19 = vpop.f32.mrf.mxu0 }
 0x344   : > { %v2657_v12 = vadd.f32 %v2656_v26, %v2566_v19 }
 0x345   : > { %v2568_v27 = vpop.f32.mrf.mxu0 }
 0x346   : > { %v2658_v61 = vadd.f32 %v2657_v12, %v2568_v27 }
 0x347   : > { %v2643_v57 = vpop.f32.mrf.mxu1  ;;  %v2572_v58 = vpop.f32.mrf.mxu0 }
 0x348   : > { %v2659_v20 = vadd.f32 %v2658_v61, %v2643_v57 }
 0x349   : > { %v2645_v35 = vpop.f32.mrf.mxu1  ;;  %v2574_v59 = vpop.f32.mrf.mxu0 }
 0x34a   : > { %v2660_v37 = vadd.f32 %v2659_v20, %v2645_v35 }
 0x34b   : > { %v9402_v15 = vpop.f32.mrf.mxu1 }
 0x34c   : > { %v2661_v52 = vadd.f32 %v2660_v37, %v9390_v16 }
 0x34d   : > { %v9405_v63 = vpop.f32.mrf.mxu1 }
 0x34e   : > { %v2662_v3 = vadd.f32 %v2661_v52, %v9392_v51 }
 0x350   : > { %v2663_v7 = vadd.f32 %v2662_v3, %v9394_v24 }
 0x352   : > { %v2664_v47 = vadd.f32 %v2663_v7, %v9396_v8 }
 0x354   : > { %v2665_v41 = vadd.f32 %v2664_v47, %v2572_v58 }
 0x356   : > { %v2666_v5 = vadd.f32 %v2665_v41, %v2574_v59 }
 0x358   : > { %v2667_v54 = vadd.f32 %v2666_v5, %v9402_v15 }
 0x35a   : > { %v2668_v4 = vadd.f32 %v2667_v54, %v9405_v63 }
 0x35c   : > { %2669 = vadd.xlane.f32.xlu0 %v2668_v4 }
 0x372   : > { %2766 = vperm.xlu0 %6966, %v2758_v9  }
 0x3e5   : > { %v2670_v42 = vpop.xlane.xlu0 %2669 }
 0x3e6   : > { %v2671_v62 = vrot.slane %v2670_v42, 4 }
 0x3e8   : > { %v2672_v36 = vadd.f32 %v2671_v62, %v2670_v42 }
 0x3ea   : > { %v2673_v38 = vrot.slane %v2672_v36, 2 }
 0x3ec   : > { %v2674_v50 = vadd.f32 %v2673_v38, %v2672_v36 }
 0x3ee   : > { %v2675_v0 = vrot.slane %v2674_v50, 1 }
 0x3f0   : > { %v2676_v10 = vadd.f32 %v2675_v0, %v2674_v50 }
 0x3f2   : > { %6932 = vpush %v2676_v10 }
 0x423   : > { %s6933_s28 = spop %6932 }
 0x424   : > { %v2678_v22 = vstv %s6933_s28 }
 0x425   : > { %v2680_v21 = vmul.f32 6.1035156e-05, %v2678_v22 }
 0x427   : > { %v9420_v55 = vsub.f32 %v2412_v13, %v2680_v21  ;;  %v9422_v26 = vsub.f32 %v2414_v48, %v2680_v21  ;;  %v9424_v12 = vsub.f32 %v2489_v34, %v2680_v21  ;;  %v9430_v37 = vsub.f32 %v2491_v23, %v2680_v21 }
 0x428   : > { %v9432_v52 = vsub.f32 %v2566_v19, %v2680_v21  ;;  %v9436_v13 = vsub.f32 %v2568_v27, %v2680_v21  ;;  %v9440_v47 = vsub.f32 %v2643_v57, %v2680_v21  ;;  %v9444_v23 = vsub.f32 %v2645_v35, %v2680_v21 }
 0x429   : > { %v2697_v61 = vmul.f32 %v9420_v55, %v9420_v55  ;;  %v2698_v20 = vmul.f32 %v9422_v26, %v9422_v26  ;;  %v2699_v3 = vmul.f32 %v9424_v12, %v9424_v12  ;;  %v2700_v48 = vmul.f32 %v9430_v37, %v9430_v37 }
 0x42a   : > { %v2701_v41 = vmul.f32 %v9432_v52, %v9432_v52  ;;  %v2702_v19 = vmul.f32 %v9436_v13, %v9436_v13  ;;  %v2689_v4 = vsub.f32 %v9390_v16, %v2680_v21  ;;  %v2703_v27 = vmul.f32 %v9440_v47, %v9440_v47 }
 0x42b   : > { %v2713_v7 = vadd.f32 %v2698_v20, %v2697_v61  ;;  %v2690_v11 = vsub.f32 %v9392_v51, %v2680_v21  ;;  %v2704_v57 = vmul.f32 %v9444_v23, %v9444_v23  ;;  %v2691_v6 = vsub.f32 %v9394_v24, %v2680_v21 }
 0x42c   : > { %v2705_v35 = vmul.f32 %v2689_v4, %v2689_v4  ;;  %v2692_v42 = vsub.f32 %v9396_v8, %v2680_v21  ;;  %v2693_v38 = vsub.f32 %v2572_v58, %v2680_v21  ;;  %v9456_v0 = vsub.f32 %v2574_v59, %v2680_v21 }
 0x42d   : > { %v2714_v34 = vadd.f32 %v2713_v7, %v2699_v3  ;;  %v2706_v62 = vmul.f32 %v2690_v11, %v2690_v11  ;;  %v2707_v16 = vmul.f32 %v2691_v6, %v2691_v6  ;;  %v9459_v51 = vsub.f32 %v9402_v15, %v2680_v21  ;;  %v9470_v15 = vpop.permute.xlu1 %2761 }
 0x42e   : > { %v2708_v10 = vmul.f32 %v2692_v42, %v2692_v42  ;;  %v2709_v61 = vmul.f32 %v2693_v38, %v2693_v38  ;;  %v9462_v24 = vsub.f32 %v9405_v63, %v2680_v21  ;;  %v2710_v8 = vmul.f32 %v9456_v0, %v9456_v0 }
 0x42f   : > { %v2715_v5 = vadd.f32 %v2714_v34, %v2700_v48  ;;  %v2711_v58 = vmul.f32 %v9459_v51, %v9459_v51 }
 0x430   : > { %v2712_v59 = vmul.f32 %v9462_v24, %v9462_v24 }
 0x431   : > { %v2716_v54 = vadd.f32 %v2715_v5, %v2701_v41  ;;  %v9472_v41 = vpop.permute.xlu1 %2794 }
 0x433   : > { %v2717_v28 = vadd.f32 %v2716_v54, %v2702_v19 }
 0x435   : > { %v2718_v14 = vadd.f32 %v2717_v28, %v2703_v27  ;;  %v9474_v63 = vpop.permute.xlu1 %2789 }
 0x437   : > { %v2719_v9 = vadd.f32 %v2718_v14, %v2704_v57 }
 0x439   : > { %v2720_v36 = vadd.f32 %v2719_v9, %v2705_v35 }
 0x43b   : > { %v2721_v50 = vadd.f32 %v2720_v36, %v2706_v62  ;;  %v9478_v36 = vpop.permute.xlu0 %2766 }
 0x43d   : > { %v2722_v22 = vadd.f32 %v2721_v50, %v2707_v16 }
 0x43f   : > { %v2723_v20 = vadd.f32 %v2722_v22, %v2708_v10 }
 0x441   : > { %v2724_v3 = vadd.f32 %v2723_v20, %v2709_v61 }
 0x443   : > { %v2725_v7 = vadd.f32 %v2724_v3, %v2710_v8 }
 0x445   : > { %v2726_v48 = vadd.f32 %v2725_v7, %v2711_v58 }
 0x447   : > { %v2727_v34 = vadd.f32 %v2726_v48, %v2712_v59 }
 0x449   : > { %2728 = vadd.xlane.f32.xlu1 %v2727_v34 }
 0x4d2   : > { %v2729_v21 = vpop.xlane.xlu1 %2728 }
 0x4d3   : > { %v2730_v5 = vrot.slane %v2729_v21, 4 }
 0x4d5   : > { %v2731_v19 = vadd.f32 %v2730_v5, %v2729_v21 }
 0x4d7   : > { %v2732_v54 = vrot.slane %v2731_v19, 2 }
 0x4d9   : > { %v2733_v27 = vadd.f32 %v2732_v54, %v2731_v19 }
 0x4db   : > { %v2734_v28 = vrot.slane %v2733_v27, 1 }
 0x4dd   : > { %v2735_v57 = vadd.f32 %v2734_v28, %v2733_v27 }
 0x4df   : > { %6934 = vpush %v2735_v57 }
 0x510   : > { %s6935_s24 = spop %6934 }
 0x511   : > { %v2737_v14 = vstv %s6935_s24 }
 0x512   : > { %v2738_v35 = vmul.f32 6.1035156e-05, %v2737_v14 }
 0x514   : > { %v2739_v9 = vadd.f32 1e-05, %v2738_v35 }
 0x516   : > { %6968 = vrsqrt.f32 %v2739_v9 }
 0x523   : > { %v9476_v62 = vpop.eup %6968 }
 0x524   : > { %v2749_v16 = vmul.f32 %v9476_v62, %v2689_v4  ;;  %v2750_v50 = vmul.f32 %v9476_v62, %v2690_v11  ;;  %v2751_v10 = vmul.f32 %v9476_v62, %v2691_v6  ;;  %v2752_v22 = vmul.f32 %v9476_v62, %v2692_v42 }
 0x525   : > { %v2753_v59 = vmul.f32 %v9476_v62, %v2693_v38  ;;  %v2743_v38 = vmul.f32 %v9476_v62, %v9424_v12 }
 0x526   : > { %v2777_v61 = vmul.f32 %v9478_v36, %v2749_v16  ;;  %v2778_v20 = vmul.f32 %v9478_v36, %v2750_v50  ;;  %v2779_v8 = vmul.f32 %v9478_v36, %v2751_v10  ;;  %v2780_v11 = vmul.f32 %v9478_v36, %v2752_v22 }
 0x527   : > { %v2781_v27 = vmul.f32 %v9478_v36, %v2753_v59  ;;  %v2742_v16 = vmul.f32 %v9476_v62, %v9422_v26  ;;  %v2745_v26 = vmul.f32 %v9476_v62, %v9432_v52 }
 0x528   : > { %v9488_v3 = vadd.f32 %v9472_v41, %v2777_v61  ;;  %v9491_v58 = vadd.f32 %v9472_v41, %v2778_v20  ;;  %v9494_v4 = vadd.f32 %v9472_v41, %v2779_v8  ;;  %v9502_v48 = vadd.f32 %v9472_v41, %v2780_v11 }
 0x529   : > { %v9520_v10 = vadd.f32 %v9472_v41, %v2781_v27  ;;  %v2771_v61 = vmul.f32 %v9470_v15, %v2743_v38  ;;  %v2770_v11 = vmul.f32 %v9470_v15, %v2742_v16 }
 0x52a   : > { %v2837_v6 = vmul.f32 0.044715, %v9488_v3  ;;  %v2838_v42 = vmul.f32 0.044715, %v9491_v58  ;;  %v2839_v7 = vmul.f32 0.044715, %v9494_v4 }
 0x52b   : > { %v2840_v57 = vmul.f32 0.044715, %v9502_v48  ;;  %v9525_v8 = vadd.f32 %v9474_v63, %v2771_v61 }
 0x52c   : > { %v2853_v34 = vmul.f32 %v2837_v6, %v9488_v3  ;;  %v2854_v21 = vmul.f32 %v2838_v42, %v9491_v58  ;;  %v2855_v5 = vmul.f32 %v2839_v7, %v9494_v4  ;;  %v2741_v6 = vmul.f32 %v9476_v62, %v9420_v55 }
 0x52d   : > { %v2856_v12 = vmul.f32 %v2840_v57, %v9502_v48  ;;  %v2744_v42 = vmul.f32 %v9476_v62, %v9430_v37  ;;  %v2841_v7 = vmul.f32 0.044715, %v9520_v10  ;;  %v2831_v59 = vmul.f32 0.044715, %v9525_v8 }
 0x52e   : > { %v2869_v19 = vmul.f32 %v2853_v34, %v9488_v3  ;;  %v2870_v54 = vmul.f32 %v2854_v21, %v9491_v58  ;;  %v2871_v28 = vmul.f32 %v2855_v5, %v9494_v4  ;;  %v9537_v34 = vadd.f32 %v9474_v63, %v2770_v11 }
 0x52f   : > { %v2769_v21 = vmul.f32 %v9470_v15, %v2741_v6  ;;  %v2773_v5 = vmul.f32 %v9470_v15, %v2745_v26  ;;  %v2772_v55 = vmul.f32 %v9470_v15, %v2744_v42  ;;  %v2847_v52 = vmul.f32 %v2831_v59, %v9525_v8 }
 0x530   : > { %v2885_v14 = vadd.f32 %v2869_v19, %v9488_v3  ;;  %v2886_v35 = vadd.f32 %v2870_v54, %v9491_v58  ;;  %v2887_v9 = vadd.f32 %v2871_v28, %v9494_v4  ;;  %v2872_v19 = vmul.f32 %v2856_v12, %v9502_v48 }
 0x531   : > { %v2830_v37 = vmul.f32 0.044715, %v9537_v34  ;;  %v9546_v54 = vadd.f32 %v9474_v63, %v2769_v21  ;;  %v9549_v27 = vadd.f32 %v9474_v63, %v2773_v5  ;;  %v2857_v28 = vmul.f32 %v2841_v7, %v9520_v10 }
 0x532   : > { %v2902_v50 = vmul.f32 0.7978846, %v2886_v35  ;;  %v2903_v22 = vmul.f32 0.7978846, %v2887_v9  ;;  %v2901_v20 = vmul.f32 0.7978846, %v2885_v14  ;;  %v2863_v38 = vmul.f32 %v2847_v52, %v9525_v8 }
 0x533   : > { %v2846_v57 = vmul.f32 %v2830_v37, %v9537_v34  ;;  %v9555_v14 = vadd.f32 %v9474_v63, %v2772_v55  ;;  %v2829_v35 = vmul.f32 0.044715, %v9546_v54  ;;  %v2888_v9 = vadd.f32 %v2872_v19, %v9502_v48 }
 0x534   : > { %6970 = vtanh.f32 %v2902_v50  ;;  %v2879_v16 = vadd.f32 %v2863_v38, %v9525_v8  ;;  %v2873_v12 = vmul.f32 %v2857_v28, %v9520_v10  ;;  %v2822_v5 = vmul.f32 0.5, %v9491_v58 }
 0x535   : > { %6972 = vtanh.f32 %v2903_v22  ;;  %v2862_v50 = vmul.f32 %v2846_v57, %v9537_v34  ;;  %v2833_v22 = vmul.f32 0.044715, %v9549_v27  ;;  %v2845_v61 = vmul.f32 %v2829_v35, %v9546_v54 }
 0x536   : > { %6974 = vtanh.f32 %v2901_v20  ;;  %v2895_v20 = vmul.f32 0.7978846, %v2879_v16  ;;  %v2832_v6 = vmul.f32 0.044715, %v9555_v14  ;;  %v2904_v42 = vmul.f32 0.7978846, %v2888_v9 }
 0x537   : > { %v2878_v11 = vadd.f32 %v2862_v50, %v9537_v34  ;;  %v2861_v26 = vmul.f32 %v2845_v61, %v9546_v54  ;;  %v2849_v59 = vmul.f32 %v2833_v22, %v9549_v27  ;;  %v2889_v52 = vadd.f32 %v2873_v12, %v9520_v10 }
 0x538   : > { %6976 = vtanh.f32 %v2895_v20  ;;  %v2848_v28 = vmul.f32 %v2832_v6, %v9555_v14  ;;  %v2823_v58 = vmul.f32 0.5, %v9494_v4 }
 0x539   : > { %v2894_v7 = vmul.f32 0.7978846, %v2878_v11  ;;  %v2877_v55 = vadd.f32 %v2861_v26, %v9546_v54  ;;  %v2865_v9 = vmul.f32 %v2849_v59, %v9549_v27  ;;  %v2905_v50 = vmul.f32 0.7978846, %v2889_v52 }
 0x53a   : > { %v2864_v22 = vmul.f32 %v2848_v28, %v9555_v14  ;;  %v2821_v11 = vmul.f32 0.5, %v9488_v3  ;;  %v2814_v3 = vmul.f32 0.5, %v9537_v34 }
 0x53b   : > { %6978 = vtanh.f32 %v2894_v7  ;;  %v2893_v38 = vmul.f32 0.7978846, %v2877_v55  ;;  %v2881_v20 = vadd.f32 %v2865_v9, %v9549_v27  ;;  %v2815_v7 = vmul.f32 0.5, %v9525_v8 }
 0x53c   : > { %6980 = vtanh.f32 %v2904_v42  ;;  %v2880_v6 = vadd.f32 %v2864_v22, %v9555_v14  ;;  %v2824_v9 = vmul.f32 0.5, %v9502_v48  ;;  %v2825_v22 = vmul.f32 0.5, %v9520_v10 }
 0x53d   : > { %6982 = vtanh.f32 %v2893_v38  ;;  %v2897_v26 = vmul.f32 0.7978846, %v2881_v20 }
 0x53e   : > { %6984 = vtanh.f32 %v2905_v50 }
 0x53f   : > { %6986 = vtanh.f32 %v2897_v26  ;;  %v2816_v26 = vmul.f32 0.5, %v9555_v14 }
 0x541   : > { %v6971_v21 = vpop.eup %6970 }
 0x542   : > { %v6973_v19 = vpop.eup %6972  ;;  %v2934_v37 = vadd.f32 1.0, %v6971_v21  ;;  %v2896_v21 = vmul.f32 0.7978846, %v2880_v6 }
 0x543   : > { %v2935_v35 = vadd.f32 1.0, %v6973_v19  ;;  %v6975_v16 = vpop.eup %6974 }
 0x544   : > { %v9572_v57 = vmul.f32 %v2934_v37, %v2822_v5  ;;  %v2933_v12 = vadd.f32 1.0, %v6975_v16  ;;  %6988 = vtanh.f32 %v2896_v21 }
 0x545   : > { %v9579_v61 = vmul.f32 %v2935_v35, %v2823_v58  ;;  %v6977_v42 = vpop.eup %6976  ;;  %v2813_v35 = vmul.f32 0.5, %v9546_v54 }
 0x546   : > { %3599 = vrot.lane.b32.xlu1 %v9572_v57, %s7084_s17  ;;  %v9586_v4 = vmul.f32 %v2933_v12, %v2821_v11  ;;  %v2927_v59 = vadd.f32 1.0, %v6977_v42  ;;  %v2817_v11 = vmul.f32 0.5, %v9549_v27  ;;  %v2754_v27 = vmul.f32 %v9476_v62, %v9456_v0 }
 0x547   : > { %v2746_v0 = vmul.f32 %v9476_v62, %v9436_v13  ;;  %v2747_v13 = vmul.f32 %v9476_v62, %v9440_v47 }
 0x548   : > { %v6979_v5 = vpop.eup %6978  ;;  %v9591_v55 = vmul.f32 %v2927_v59, %v2815_v7  ;;  %v2782_v14 = vmul.f32 %v9478_v36, %v2754_v27  ;;  %v2755_v7 = vmul.f32 %v9476_v62, %v9459_v51 }
 0x549   : > { %v2926_v19 = vadd.f32 1.0, %v6979_v5  ;;  %v6981_v52 = vpop.eup %6980  ;;  %v2774_v51 = vmul.f32 %v9470_v15, %v2746_v0 }
 0x54a   : > { %3601 = vrot.lane.b32.xlu1 %v9579_v61, %s7084_s17  ;;  %v6983_v37 = vpop.eup %6982  ;;  %3585 = vrot.lane.b32.xlu0 %v9591_v55, %s7084_s17  ;;  %v2936_v38 = vadd.f32 1.0, %v6981_v52  ;;  %v9699_v59 = vadd.f32 %v9472_v41, %v2782_v14  ;;  %v2783_v21 = vmul.f32 %v9478_v36, %v2755_v7  ;;  %v2748_v14 = vmul.f32 %v9476_v62, %v9444_v23 }
 0x54b   : > { %v9596_v28 = vmul.f32 %v2926_v19, %v2814_v3  ;;  %v2925_v8 = vadd.f32 1.0, %v6983_v37  ;;  %v6985_v16 = vpop.eup %6984  ;;  %v9723_v52 = vadd.f32 %v9474_v63, %v2774_v51  ;;  %v12156_v51 = vld [vmem:[#allocation38_spill] sm:$0xff] }
 0x54c   : > { %v9606_v58 = vmul.f32 %v2936_v38, %v2824_v9  ;;  %v2937_v50 = vadd.f32 1.0, %v6985_v16  ;;  %v6987_v48 = vpop.eup %6986  ;;  %v2842_v5 = vmul.f32 0.044715, %v9699_v59  ;;  %v9713_v3 = vadd.f32 %v9472_v41, %v2783_v21 }
 0x54d   : > { %v9604_v34 = vmul.f32 %v2925_v8, %v2813_v35  ;;  %v2929_v20 = vadd.f32 1.0, %v6987_v48  ;;  %v2775_v8 = vmul.f32 %v9470_v15, %v2747_v13  ;;  %v2756_v38 = vmul.f32 %v9476_v62, %v9462_v24 }
 0x54e   : > { %3597 = vrot.lane.b32.xlu1 %v9586_v4, %s7084_s17  ;;  %3503 = vrot.lane.b32.xlu0 %v9572_v57, %s7085_s21  ;;  %v9617_v54 = vmul.f32 %v2937_v50, %v2825_v22  ;;  %v2858_v19 = vmul.f32 %v2842_v5, %v9699_v59  ;;  %v2843_v37 = vmul.f32 0.044715, %v9713_v3  ;;  %v2834_v35 = vmul.f32 0.044715, %v9723_v52 }
 0x54f   : > { %v9624_v6 = vmul.f32 %v2929_v20, %v2817_v11  ;;  %v9739_v16 = vadd.f32 %v9474_v63, %v2775_v8  ;;  %v2784_v50 = vmul.f32 %v9478_v36, %v2756_v38  ;;  %v2776_v23 = vmul.f32 %v9470_v15, %v2748_v14 }
 0x550   : > { %v2874_v47 = vmul.f32 %v2858_v19, %v9699_v59  ;;  %v2859_v9 = vmul.f32 %v2843_v37, %v9713_v3  ;;  %v2850_v24 = vmul.f32 %v2834_v35, %v9723_v52 }
 0x551   : > { %v6989_v12 = vpop.eup %6988  ;;  %v9751_v20 = vadd.f32 %v9472_v41, %v2784_v50  ;;  %v9781_v15 = vadd.f32 %v9474_v63, %v2776_v23 }
 0x552   : > { %3583 = vrot.lane.b32.xlu1 %v9596_v28, %s7084_s17  ;;  %3603 = vrot.lane.b32.xlu0 %v9606_v58, %s7084_s17  ;;  %v2928_v10 = vadd.f32 1.0, %v6989_v12  ;;  %v2890_v22 = vadd.f32 %v2874_v47, %v9699_v59  ;;  %v2875_v48 = vmul.f32 %v2859_v9, %v9713_v3  ;;  %v2835_v12 = vmul.f32 0.044715, %v9739_v16  ;;  %v12158_v47 = vld [vmem:[#allocation36_spill] sm:$0xff] }
 0x553   : > { %v2844_v41 = vmul.f32 0.044715, %v9751_v20 }
 0x554   : > { %v9631_v42 = vmul.f32 %v2928_v10, %v2816_v26  ;;  %v2906_v11 = vmul.f32 0.7978846, %v2890_v22  ;;  %v2866_v10 = vmul.f32 %v2850_v24, %v9723_v52  ;;  %v2891_v26 = vadd.f32 %v2875_v48, %v9713_v3 }
 0x555   : > { %v2851_v27 = vmul.f32 %v2835_v12, %v9739_v16  ;;  %v2860_v62 = vmul.f32 %v2844_v41, %v9751_v20  ;;  %v2836_v12 = vmul.f32 0.044715, %v9781_v15 }
 0x556   : > { %3581 = vrot.lane.b32.xlu1 %v9604_v34, %s7084_s17  ;;  %3501 = vrot.lane.b32.xlu0 %v9586_v4, %s7085_s21  ;;  %6990 = vtanh.f32 %v2906_v11  ;;  %v2882_v0 = vadd.f32 %v2866_v10, %v9723_v52  ;;  %v2907_v5 = vmul.f32 0.7978846, %v2891_v26 }
 0x557   : > { %v2867_v19 = vmul.f32 %v2851_v27, %v9739_v16  ;;  %v2876_v50 = vmul.f32 %v2860_v62, %v9751_v20  ;;  %v2852_v14 = vmul.f32 %v2836_v12, %v9781_v15  ;;  %v12160_v12 = vld [vmem:[#allocation39_spill] sm:$0xff] }
 0x558   : > { %v2898_v8 = vmul.f32 0.7978846, %v2882_v0  ;;  %6992 = vtanh.f32 %v2907_v5 }
 0x559   : > { %v2883_v9 = vadd.f32 %v2867_v19, %v9739_v16  ;;  %v2892_v11 = vadd.f32 %v2876_v50, %v9751_v20  ;;  %v2826_v19 = vmul.f32 0.5, %v9699_v59  ;;  %v2868_v62 = vmul.f32 %v2852_v14, %v9781_v15  ;;  %v12159_v59 = vld [vmem:[#allocation40_spill] sm:$0xff] }
 0x55a   : > { %3505 = vrot.lane.b32.xlu1 %v9579_v61, %s7085_s21  ;;  %3489 = vrot.lane.b32.xlu0 %v9591_v55, %s7085_s21  ;;  %6994 = vtanh.f32 %v2898_v8  ;;  %v2827_v14 = vmul.f32 0.5, %v9713_v3 }
 0x55b   : > { %v2899_v48 = vmul.f32 0.7978846, %v2883_v9  ;;  %v2908_v0 = vmul.f32 0.7978846, %v2892_v11 }
 0x55d   : > { %6996 = vtanh.f32 %v2899_v48 }
 0x55e   : > { %3605 = vrot.lane.b32.xlu1 %v9617_v54, %s7084_s17  ;;  %3589 = vrot.lane.b32.xlu0 %v9624_v6, %s7084_s17  ;;  %6998 = vtanh.f32 %v2908_v0 }
 0x562   : > { %3487 = vrot.lane.b32.xlu1 %v9596_v28, %s7085_s21  ;;  %3407 = vrot.lane.b32.xlu0 %v9572_v57, %s7086_s22 }
 0x563   : > { %v6991_v26 = vpop.eup %6990 }
 0x564   : > { %v2938_v5 = vadd.f32 1.0, %v6991_v26  ;;  %v2884_v26 = vadd.f32 %v2868_v62, %v9781_v15 }
 0x566   : > { %3587 = vrot.lane.b32.xlu1 %v9631_v42, %s7084_s17  ;;  %3507 = vrot.lane.b32.xlu0 %v9606_v58, %s7085_s21  ;;  %v2900_v3 = vmul.f32 0.7978846, %v2884_v26 }
 0x568   : > { %7000 = vtanh.f32 %v2900_v3 }
 0x56a   : > { %3485 = vrot.lane.b32.xlu1 %v9604_v34, %s7085_s21  ;;  %3405 = vrot.lane.b32.xlu0 %v9586_v4, %s7086_s22 }
 0x56e   : > { %3409 = vrot.lane.b32.xlu1 %v9579_v61, %s7086_s22  ;;  %3393 = vrot.lane.b32.xlu0 %v9591_v55, %s7086_s22 }
 0x572   : > { %3509 = vrot.lane.b32.xlu1 %v9617_v54, %s7085_s21  ;;  %3493 = vrot.lane.b32.xlu0 %v9624_v6, %s7085_s21 }
 0x576   : > { %3391 = vrot.lane.b32.xlu1 %v9596_v28, %s7086_s22  ;;  %3411 = vrot.lane.b32.xlu0 %v9606_v58, %s7086_s22 }
 0x57a   : > { %3491 = vrot.lane.b32.xlu1 %v9631_v42, %s7085_s21  ;;  %3395 = vrot.lane.b32.xlu0 %v9631_v42, %s7086_s22 }
 0x57e   : > { %3389 = vrot.lane.b32.xlu1 %v9604_v34, %s7086_s22  ;;  %3277 = vrot.lane.b32.xlu0 %v9586_v4, %s7087_s23 }
 0x582   : > { %3413 = vrot.lane.b32.xlu1 %v9617_v54, %s7086_s22  ;;  %3261 = vrot.lane.b32.xlu0 %v9604_v34, %s7087_s23 }
 0x586   : > { %3397 = vrot.lane.b32.xlu1 %v9624_v6, %s7086_s22  ;;  %3181 = vrot.lane.b32.xlu0 %v9586_v4, %s11920_s25 }
 0x58a   : > { %3279 = vrot.lane.b32.xlu1 %v9572_v57, %s7087_s23  ;;  %3281 = vrot.lane.b32.xlu0 %v9579_v61, %s7087_s23 }
 0x58e   : > { %3263 = vrot.lane.b32.xlu1 %v9596_v28, %s7087_s23  ;;  %3165 = vrot.lane.b32.xlu0 %v9604_v34, %s11920_s25 }
 0x592   : > { %3183 = vrot.lane.b32.xlu1 %v9572_v57, %s11920_s25  ;;  %3265 = vrot.lane.b32.xlu0 %v9591_v55, %s7087_s23 }
 0x596   : > { %3283 = vrot.lane.b32.xlu1 %v9606_v58, %s7087_s23  ;;  %3085 = vrot.lane.b32.xlu0 %v9586_v4, %s12154_s26 }
 0x59a   : > { %3167 = vrot.lane.b32.xlu1 %v9596_v28, %s11920_s25  ;;  %3185 = vrot.lane.b32.xlu0 %v9579_v61, %s11920_s25 }
 0x59e   : > { %3267 = vrot.lane.b32.xlu1 %v9631_v42, %s7087_s23  ;;  %3069 = vrot.lane.b32.xlu0 %v9604_v34, %s12154_s26 }
 0x5a2   : > { %3087 = vrot.lane.b32.xlu1 %v9572_v57, %s12154_s26  ;;  %3169 = vrot.lane.b32.xlu0 %v9591_v55, %s11920_s25 }
 0x5a6   : > { %3187 = vrot.lane.b32.xlu1 %v9606_v58, %s11920_s25  ;;  %2989 = vrot.lane.b32.xlu0 %v9586_v4, %s12155_s27 }
 0x5aa   : > { %3071 = vrot.lane.b32.xlu1 %v9596_v28, %s12154_s26  ;;  %3089 = vrot.lane.b32.xlu0 %v9579_v61, %s12154_s26 }
 0x5ae   : > { %3171 = vrot.lane.b32.xlu1 %v9631_v42, %s11920_s25  ;;  %2973 = vrot.lane.b32.xlu0 %v9604_v34, %s12155_s27 }
 0x5b2   : > { %2991 = vrot.lane.b32.xlu1 %v9572_v57, %s12155_s27  ;;  %3073 = vrot.lane.b32.xlu0 %v9591_v55, %s12154_s26 }
 0x5b6   : > { %3091 = vrot.lane.b32.xlu1 %v9606_v58, %s12154_s26  ;;  %2993 = vrot.lane.b32.xlu0 %v9579_v61, %s12155_s27 }
 0x5b8   : > { %v3600_v36 = vpop.permute.xlu1 %3599 }
 0x5ba   : > { %2975 = vrot.lane.b32.xlu1 %v9596_v28, %s12155_s27  ;;  %3695 = vrot.lane.b32.xlu0 %v9572_v57, %s12157_s29 }
 0x5bc   : > { %v3602_v7 = vpop.permute.xlu1 %3601  ;;  %v9784_v22 = vpop.permute.xlu0 %3585 }
 0x5bd   : > { %v3621_v21 = vsel %vm1965_vm1, %v3600_v36, %v3602_v7 }
 0x5be   : > { %v3654_v13 = vmul.f32 %v3621_v21, %v12156_v51  ;;  %3075 = vrot.lane.b32.xlu1 %v9631_v42, %s12154_s26  ;;  %3693 = vrot.lane.b32.xlu0 %v9586_v4, %s12157_s29 }
 0x5c0   : > { %3927 = vmatprep.subr.mxu0 %v3654_v13  ;;  %v3598_v37 = vpop.permute.xlu1 %3597 }
 0x5c1   : > { %v3620_v38 = vsel %vm1965_vm1, %v3598_v37, %v3600_v36  ;;  %v3504_v36 = vpop.permute.xlu0 %3503  ;;  %v6993_v37 = vpop.eup %6992 }
 0x5c2   : > { %v3653_v35 = vmul.f32 %v3620_v38, %v12158_v47  ;;  %2995 = vrot.lane.b32.xlu1 %v9606_v58, %s12155_s27  ;;  %2979 = vrot.lane.b32.xlu0 %v9631_v42, %s12155_s27  ;;  %v6995_v50 = vpop.eup %6994 }
 0x5c4   : > { %3928 = vmatpush1.msra.mxu0 %v3653_v35  ;;  %v3584_v24 = vpop.permute.xlu1 %3583  ;;  %v9812_v35 = vmul.f32 %v2938_v5, %v2826_v19  ;;  %v12162_v5 = vld [vmem:[#allocation72_spill] sm:$0xff]  ;;  %v2818_v19 = vmul.f32 0.5, %v9723_v52 }
 0x5c5   : > { %v3614_v63 = vsel %vm1965_vm1, %v3584_v24, %v9784_v22  ;;  %v3604_v21 = vpop.permute.xlu0 %3603 }
 0x5c6   : > { %3697 = vrot.lane.b32.xlu1 %v9579_v61, %s12157_s29  ;;  %v3646_v10 = vmul.f32 %v3614_v63, %v12156_v51  ;;  %3681 = vrot.lane.b32.xlu0 %v9591_v55, %s12157_s29  ;;  %v3622_v48 = vsel %vm1965_vm1, %v3602_v7, %v3604_v21  ;;  %v12161_v7 = vld [vmem:[#allocation71_spill] sm:$0xff] }
 0x5c8   : > { %v3582_v27 = vpop.permute.xlu1 %3581  ;;  %3929 = vmatprep.subr.mxu0 %v3646_v10  ;;  %v2939_v10 = vadd.f32 1.0, %v6993_v37  ;;  %v9842_v37 = vld [vmem:[%s11725_s6 + $0x8] sm:$0xff] }
 0x5c9   : > { %v3613_v41 = vsel %vm1965_vm1, %v3582_v27, %v3584_v24  ;;  %v3502_v38 = vpop.permute.xlu0 %3501  ;;  %6912 = vmatprep.mubr.msk.f32.mxu0 %vm2339_vm0, %v9842_v37  ;;  %6914 = vmatprep.mubr.msk.f32.mxu1 %vm2339_vm0, %v9842_v37 }
 0x5ca   : > { %v3645_v13 = vmul.f32 %v3613_v41, %v12158_v47  ;;  %2977 = vrot.lane.b32.xlu1 %v9591_v55, %s12155_s27  ;;  %v3524_v24 = vsel %vm1836_vm2, %v3502_v38, %v3504_v36  ;;  %3607 = vrot.lane.b32.xlu0 %v9812_v35, %s7084_s17 }
 0x5cb   : > { %v3557_v63 = vmul.f32 %v3524_v24, %v12160_v12 }
 0x5cc   : > { %v9807_v23 = vpop.permute.xlu1 %3505  ;;  %3930 = vmatpush1.msra.mxu0 %v3645_v13  ;;  %v3655_v13 = vmul.f32 %v3622_v48, %v12162_v5 }
 0x5cd   : > { %v3525_v8 = vsel %vm1836_vm2, %v3504_v36, %v9807_v23  ;;  %v9828_v41 = vpop.permute.xlu0 %3489  ;;  %v2930_v36 = vadd.f32 1.0, %v6995_v50 }
 0x5ce   : > { %3679 = vrot.lane.b32.xlu1 %v9596_v28, %s12157_s29  ;;  %v3558_v9 = vmul.f32 %v3525_v8, %v12159_v59  ;;  %3699 = vrot.lane.b32.xlu0 %v9606_v58, %s12157_s29  ;;  %v6997_v8 = vpop.eup %6996 }
 0x5cf   : > { %v9850_v52 = vmul.f32 %v2930_v36, %v2818_v19  ;;  %v2931_v48 = vadd.f32 1.0, %v6997_v8  ;;  %v2819_v36 = vmul.f32 0.5, %v9739_v16  ;;  %v2828_v16 = vmul.f32 0.5, %v9751_v20 }
 0x5d0   : > { %v9822_v11 = vpop.permute.xlu1 %3605  ;;  %3931 = vmatprep.subr.mxu0 %v3558_v9 }
 0x5d1   : > { %v3623_v27 = vsel %vm1965_vm1, %v3604_v21, %v9822_v11  ;;  %3932 = vmatpush1.msra.mxu0 %v3557_v63  ;;  %v9837_v21 = vmul.f32 %v2939_v10, %v2827_v14  ;;  %v9848_v9 = vpop.permute.xlu0 %3589 }
 0x5d2   : > { %3677 = vrot.lane.b32.xlu1 %v9604_v34, %s12157_s29  ;;  %v3656_v0 = vmul.f32 %v3623_v27, %v12161_v7  ;;  %3591 = vrot.lane.b32.xlu0 %v9850_v52, %s7084_s17 }
 0x5d4   : > { %v3488_v62 = vpop.permute.xlu1 %3487  ;;  %4004 = vmatprep.subr.mxu1 %v3656_v0  ;;  %v6999_v0 = vpop.eup %6998 }
 0x5d5   : > { %v3518_v38 = vsel %vm1836_vm2, %v3488_v62, %v9828_v41  ;;  %4005 = vmatpush1.msra.mxu1 %v3655_v13  ;;  %v3408_v26 = vpop.permute.xlu0 %3407  ;;  %v2940_v8 = vadd.f32 1.0, %v6999_v0 }
 0x5d6   : > { %3609 = vrot.lane.b32.xlu1 %v9837_v21, %s7084_s17  ;;  %v3550_v50 = vmul.f32 %v3518_v38, %v12159_v59  ;;  %3683 = vrot.lane.b32.xlu0 %v9631_v42, %s12157_s29 }
 0x5d8   : > { %v3588_v24 = vpop.permute.xlu1 %3587  ;;  %3933 = vmatprep.subr.mxu0 %v3550_v50 }
 0x5d9   : > { %v3615_v63 = vsel %vm1965_vm1, %v9784_v22, %v3588_v24  ;;  %v3616_v10 = vsel %vm1965_vm1, %v3588_v24, %v9848_v9  ;;  %v9870_v22 = vmul.f32 %v2931_v48, %v2819_v36  ;;  %v3508_v3 = vpop.permute.xlu0 %3507 }
 0x5da   : > { %v3647_v27 = vmul.f32 %v3615_v63, %v12162_v5  ;;  %3701 = vrot.lane.b32.xlu1 %v9617_v54, %s12157_s29  ;;  %v3648_v14 = vmul.f32 %v3616_v10, %v12161_v7  ;;  %3511 = vrot.lane.b32.xlu0 %v9812_v35, %s7085_s21  ;;  %v9880_v63 = vmul.f32 %v2940_v8, %v2828_v16 }
 0x5db   : > { %v3526_v20 = vsel %vm1836_vm2, %v9807_v23, %v3508_v3  ;;  %v12166_v23 = vld [vmem:[#allocation75_spill] sm:$0xff] }
 0x5dc   : > { %v3486_v13 = vpop.permute.xlu1 %3485  ;;  %4006 = vmatprep.subr.mxu1 %v3648_v14  ;;  %v12164_v14 = vld [vmem:[#allocation42_spill] sm:$0xff]  ;;  %v3559_v16 = vmul.f32 %v3526_v20, %v12166_v23 }
 0x5dd   : > { %v3517_v19 = vsel %vm1836_vm2, %v3486_v13, %v3488_v62  ;;  %4007 = vmatpush1.msra.mxu1 %v3647_v27  ;;  %v3406_v48 = vpop.permute.xlu0 %3405  ;;  %v12163_v62 = vld [vmem:[#allocation44_spill] sm:$0xff]  ;;  %v7001_v13 = vpop.eup %7000 }
 0x5de   : > { %v3549_v38 = vmul.f32 %v3517_v19, %v12160_v12  ;;  %3593 = vrot.lane.b32.xlu1 %v9870_v22, %s7084_s17  ;;  %v3428_v27 = vsel %vm1707_vm3, %v3406_v48, %v3408_v26  ;;  %3611 = vrot.lane.b32.xlu0 %v9880_v63, %s7084_s17  ;;  %v2932_v48 = vadd.f32 1.0, %v7001_v13 }
 0x5df   : > { %v3461_v36 = vmul.f32 %v3428_v27, %v12164_v14 }
 0x5e0   : > { %v3410_v50 = vpop.permute.xlu1 %3409  ;;  %3934 = vmatpush1.msra.mxu0 %v3549_v38 }
 0x5e1   : > { %v3429_v24 = vsel %vm1707_vm3, %v3408_v26, %v3410_v50  ;;  %v3394_v8 = vpop.permute.xlu0 %3393  ;;  %v12165_v26 = vld [vmem:[#allocation74_spill] sm:$0xff] }
 0x5e2   : > { %3685 = vrot.lane.b32.xlu1 %v9624_v6, %s12157_s29  ;;  %v3462_v10 = vmul.f32 %v3429_v24, %v12163_v62  ;;  %3497 = vrot.lane.b32.xlu0 %v9870_v22, %s7085_s21 }
 0x5e4   : > { %v9891_v0 = vpop.permute.xlu1 %3509  ;;  %3935 = vmatprep.subr.mxu0 %v3462_v10 }
 0x5e5   : > { %v3527_v19 = vsel %vm1836_vm2, %v3508_v3, %v9891_v0  ;;  %3936 = vmatpush1.msra.mxu0 %v3461_v36  ;;  %v9902_v27 = vpop.permute.xlu0 %3493  ;;  %v2820_v36 = vmul.f32 0.5, %v9781_v15 }
 0x5e6   : > { %3513 = vrot.lane.b32.xlu1 %v9837_v21, %s7085_s21  ;;  %v3560_v38 = vmul.f32 %v3527_v19, %v12165_v26  ;;  %3415 = vrot.lane.b32.xlu0 %v9812_v35, %s7086_s22 }
 0x5e7   : > { %v9910_v19 = vmul.f32 %v2932_v48, %v2820_v36  ;;  %v12167_v36 = vld [vmem:[#allocation45_spill] sm:$0xff] }
 0x5e8   : > { %v3392_v24 = vpop.permute.xlu1 %3391  ;;  %4008 = vmatprep.subr.mxu1 %v3560_v38 }
 0x5e9   : > { %v3422_v10 = vsel %vm1707_vm3, %v3392_v24, %v3394_v8  ;;  %4009 = vmatpush1.msra.mxu1 %v3559_v16  ;;  %v3412_v16 = vpop.permute.xlu0 %3411 }
 0x5ea   : > { %3495 = vrot.lane.b32.xlu1 %v9850_v52, %s7085_s21  ;;  %v3454_v3 = vmul.f32 %v3422_v10, %v12163_v62  ;;  %3515 = vrot.lane.b32.xlu0 %v9880_v63, %s7085_s21 }
 0x5ec   : > { %v3492_v20 = vpop.permute.xlu1 %3491  ;;  %3937 = vmatprep.subr.mxu0 %v3454_v3 }
 0x5ed   : > { %v3519_v13 = vsel %vm1836_vm2, %v9828_v41, %v3492_v20  ;;  %v3520_v38 = vsel %vm1836_vm2, %v3492_v20, %v9902_v27  ;;  %v3396_v41 = vpop.permute.xlu0 %3395  ;;  %v3366_v20 = vmul.f32 %v9572_v57, %v12167_v36 }
 0x5ee   : > { %v3551_v12 = vmul.f32 %v3519_v13, %v12166_v23  ;;  %3595 = vrot.lane.b32.xlu1 %v9910_v19, %s7084_s17  ;;  %v3552_v15 = vmul.f32 %v3520_v38, %v12165_v26  ;;  %3401 = vrot.lane.b32.xlu0 %v9870_v22, %s7086_s22  ;;  %v12168_v38 = vld [vmem:[#allocation46_spill] sm:$0xff]  ;;  %v3423_v26 = vsel %vm1707_vm3, %v3394_v8, %v3396_v41 }
 0x5ef   : > { %v3357_v57 = vmul.f32 %v9604_v34, %v12168_v38 }
 0x5f0   : > { %v3390_v10 = vpop.permute.xlu1 %3389  ;;  %4010 = vmatprep.subr.mxu1 %v3552_v15  ;;  %v3365_v15 = vmul.f32 %v9586_v4, %v12168_v38  ;;  %v12170_v4 = vld [vmem:[#allocation77_spill] sm:$0xff] }
 0x5f1   : > { %v3421_v48 = vsel %vm1707_vm3, %v3390_v10, %v3392_v24  ;;  %4011 = vmatpush1.msra.mxu1 %v3551_v12  ;;  %v3430_v12 = vsel %vm1707_vm3, %v3410_v50, %v3412_v16  ;;  %v3358_v10 = vmul.f32 %v9596_v28, %v12167_v36 }
 0x5f2   : > { %v3453_v3 = vmul.f32 %v3421_v48, %v12164_v14  ;;  %3417 = vrot.lane.b32.xlu1 %v9837_v21, %s7086_s22  ;;  %v3278_v48 = vpop.permute.xlu0 %3277  ;;  %v3463_v50 = vmul.f32 %v3430_v12, %v12170_v4  ;;  %3419 = vrot.lane.b32.xlu0 %v9880_v63, %s7086_s22 }
 0x5f3   : > { %v3324_v8 = vsel %vm1514_vm4, 0.0, %v3278_v48 }
 0x5f4   : > { %v9930_v13 = vpop.permute.xlu1 %3413  ;;  %3938 = vmatpush1.msra.mxu0 %v3453_v3  ;;  %v12169_v3 = vld [vmem:[#allocation76_spill] sm:$0xff] }
 0x5f5   : > { %v3431_v24 = vsel %vm1707_vm3, %v3412_v16, %v9930_v13  ;;  %3939 = vmatprep.subr.mxu0 %v3366_v20 }
 0x5f6   : > { %3399 = vrot.lane.b32.xlu1 %v9850_v52, %s7086_s22  ;;  %3940 = vmatpush1.msra.mxu0 %v3365_v15  ;;  %v3464_v14 = vmul.f32 %v3431_v24, %v12169_v3  ;;  %v3262_v20 = vpop.permute.xlu0 %3261  ;;  %v3455_v15 = vmul.f32 %v3423_v26, %v12170_v4  ;;  %v12171_v24 = vld [vmem:[#allocation78_spill] sm:$0xff]  ;;  %v12173_v26 = vld [vmem:[#allocation48_spill] sm:$0xff] }
 0x5f7   : > { %3941 = vmatprep.subr.mxu0 %v3358_v10  ;;  %3285 = vrot.lane.b32.xlu0 %v9617_v54, %s7087_s23  ;;  %v12172_v10 = vld [vmem:[#allocation79_spill] sm:$0xff] }
 0x5f8   : > { %v9948_v16 = vpop.permute.xlu1 %3397  ;;  %3942 = vmatpush1.msra.mxu0 %v3357_v57  ;;  %4012 = vmatprep.subr.mxu1 %v3464_v14  ;;  %v3367_v57 = vmul.f32 %v9579_v61, %v12172_v10  ;;  %v3359_v61 = vmul.f32 %v9591_v55, %v12172_v10 }
 0x5f9   : > { %v3424_v28 = vsel %vm1707_vm3, %v3396_v41, %v9948_v16  ;;  %4013 = vmatpush1.msra.mxu1 %v3463_v50  ;;  %v3368_v41 = vmul.f32 %v9606_v58, %v12171_v24  ;;  %v3323_v58 = vsel %vm1514_vm4, 0.0, %v3262_v20 }
 0x5fa   : > { %3499 = vrot.lane.b32.xlu1 %v9910_v19, %s7085_s21  ;;  %v3456_v34 = vmul.f32 %v3424_v28, %v12169_v3  ;;  %v3182_v50 = vpop.permute.xlu0 %3181  ;;  %v12174_v3 = vld [vmem:[#allocation49_spill] sm:$0xff] }
 0x5fb   : > { %v3333_v4 = vmul.f32 %v3324_v8, %v12174_v3  ;;  %3269 = vrot.lane.b32.xlu0 %v9624_v6, %s7087_s23  ;;  %v3325_v8 = vmul.f32 %v3323_v58, %v12174_v3 }
 0x5fc   : > { %v3280_v12 = vpop.permute.xlu1 %3279  ;;  %4014 = vmatprep.subr.mxu1 %v3456_v34  ;;  %v3360_v34 = vmul.f32 %v9631_v42, %v12171_v24 }
 0x5fd   : > { %v3300_v14 = vsel %vm1514_vm4, %v3278_v48, %v3280_v12  ;;  %4015 = vmatpush1.msra.mxu1 %v3455_v15 }
 0x5fe   : > { %3403 = vrot.lane.b32.xlu1 %v9910_v19, %s7086_s22  ;;  %4016 = vmatprep.subr.mxu1 %v3368_v41  ;;  %v3334_v28 = vmul.f32 %v3300_v14, %v12173_v26  ;;  %v3282_v41 = vpop.permute.xlu0 %3281  ;;  %v3228_v14 = vsel %vm1385_vm5, 0.0, %v3182_v50 }
 0x5ff   : > { %4017 = vmatpush1.msra.mxu1 %v3367_v57  ;;  %3189 = vrot.lane.b32.xlu0 %v9617_v54, %s11920_s25  ;;  %v3301_v58 = vsel %vm1514_vm4, %v3280_v12, %v3282_v41 }
 0x600   : > { %v3264_v48 = vpop.permute.xlu1 %3263  ;;  %3943 = vmatprep.subr.mxu0 %v3334_v28  ;;  %4018 = vmatprep.subr.mxu1 %v3360_v34  ;;  %v12176_v34 = vld [vmem:[#allocation51_spill] sm:$0xff] }
 0x601   : > { %v3293_v15 = vsel %vm1514_vm4, %v3262_v20, %v3264_v48  ;;  %3944 = vmatpush1.msra.mxu0 %v3333_v4  ;;  %4019 = vmatpush1.msra.mxu1 %v3359_v61  ;;  %v12175_v20 = vld [vmem:[#allocation50_spill] sm:$0xff]  ;;  %v3237_v61 = vmul.f32 %v3228_v14, %v12176_v34 }
 0x602   : > { %3287 = vrot.lane.b32.xlu1 %v9812_v35, %s7087_s23  ;;  %v3326_v42 = vmul.f32 %v3293_v15, %v12173_v26  ;;  %v3166_v4 = vpop.permute.xlu0 %3165  ;;  %v12178_v26 = vld [vmem:[#allocation81_spill] sm:$0xff] }
 0x603   : > { %3289 = vrot.lane.b32.xlu0 %v9837_v21, %s7087_s23  ;;  %v3335_v14 = vmul.f32 %v3301_v58, %v12178_v26  ;;  %v3227_v12 = vsel %vm1385_vm5, 0.0, %v3166_v4 }
 0x604   : > { %v3184_v57 = vpop.permute.xlu1 %3183  ;;  %3945 = vmatprep.subr.mxu0 %v3326_v42 }
 0x605   : > { %v3204_v55 = vsel %vm1385_vm5, %v3182_v50, %v3184_v57  ;;  %3946 = vmatpush1.msra.mxu0 %v3325_v8  ;;  %v12177_v8 = vld [vmem:[#allocation80_spill] sm:$0xff] }
 0x606   : > { %3271 = vrot.lane.b32.xlu1 %v9850_v52, %s7087_s23  ;;  %v3238_v28 = vmul.f32 %v3204_v55, %v12175_v20  ;;  %v3266_v42 = vpop.permute.xlu0 %3265 }
 0x607   : > { %3173 = vrot.lane.b32.xlu0 %v9624_v6, %s11920_s25  ;;  %v3294_v58 = vsel %vm1514_vm4, %v3264_v48, %v3266_v42 }
 0x608   : > { %v9991_v15 = vpop.permute.xlu1 %3283  ;;  %3947 = vmatprep.subr.mxu0 %v3238_v28 }
 0x609   : > { %v3302_v50 = vsel %vm1514_vm4, %v3282_v41, %v9991_v15  ;;  %3948 = vmatpush1.msra.mxu0 %v3237_v61 }
 0x60a   : > { %3191 = vrot.lane.b32.xlu1 %v9812_v35, %s11920_s25  ;;  %v3336_v55 = vmul.f32 %v3302_v50, %v12177_v8  ;;  %v3086_v41 = vpop.permute.xlu0 %3085  ;;  %v3229_v50 = vmul.f32 %v3227_v12, %v12176_v34  ;;  %v3327_v12 = vmul.f32 %v3294_v58, %v12178_v26  ;;  %v12180_v34 = vld [vmem:[#allocation54_spill] sm:$0xff] }
 0x60b   : > { %3273 = vrot.lane.b32.xlu0 %v9870_v22, %s7087_s23  ;;  %v3132_v48 = vsel %vm1256_vm6, 0.0, %v3086_v41  ;;  %v12182_v26 = vld [vmem:[#allocation82_spill] sm:$0xff] }
 0x60c   : > { %v3168_v3 = vpop.permute.xlu1 %3167  ;;  %4020 = vmatprep.subr.mxu1 %v3336_v55 }
 0x60d   : > { %v3197_v28 = vsel %vm1385_vm5, %v3166_v4, %v3168_v3  ;;  %4021 = vmatpush1.msra.mxu1 %v3335_v14 }
 0x60e   : > { %3291 = vrot.lane.b32.xlu1 %v9880_v63, %s7087_s23  ;;  %v3230_v61 = vmul.f32 %v3197_v28, %v12175_v20  ;;  %v3186_v55 = vpop.permute.xlu0 %3185 }
 0x60f   : > { %3093 = vrot.lane.b32.xlu0 %v9617_v54, %s12154_s26  ;;  %v3205_v58 = vsel %vm1385_vm5, %v3184_v57, %v3186_v55 }
 0x610   : > { %v10010_v10 = vpop.permute.xlu1 %3267  ;;  %3949 = vmatprep.subr.mxu0 %v3230_v61 }
 0x611   : > { %v3295_v4 = vsel %vm1514_vm4, %v3266_v42, %v10010_v10  ;;  %3950 = vmatpush1.msra.mxu0 %v3229_v50  ;;  %v12179_v50 = vld [vmem:[#allocation53_spill] sm:$0xff] }
 0x612   : > { %3175 = vrot.lane.b32.xlu1 %v9850_v52, %s11920_s25  ;;  %v3328_v14 = vmul.f32 %v3295_v4, %v12177_v8  ;;  %v3070_v42 = vpop.permute.xlu0 %3069  ;;  %v3141_v4 = vmul.f32 %v3132_v48, %v12180_v34  ;;  %v3239_v48 = vmul.f32 %v3205_v58, %v12182_v26 }
 0x613   : > { %3193 = vrot.lane.b32.xlu0 %v9837_v21, %s11920_s25  ;;  %v3131_v57 = vsel %vm1256_vm6, 0.0, %v3070_v42 }
 0x614   : > { %v3088_v28 = vpop.permute.xlu1 %3087  ;;  %4022 = vmatprep.subr.mxu1 %v3328_v14 }
 0x615   : > { %v3108_v61 = vsel %vm1256_vm6, %v3086_v41, %v3088_v28  ;;  %4023 = vmatpush1.msra.mxu1 %v3327_v12  ;;  %v12181_v12 = vld [vmem:[#allocation30_spill] sm:$0xff] }
 0x616   : > { %3275 = vrot.lane.b32.xlu1 %v9910_v19, %s7087_s23  ;;  %v3142_v20 = vmul.f32 %v3108_v61, %v12179_v50  ;;  %v3170_v14 = vpop.permute.xlu0 %3169 }
 0x617   : > { %3077 = vrot.lane.b32.xlu0 %v9624_v6, %s12154_s26  ;;  %v3198_v58 = vsel %vm1385_vm5, %v3168_v3, %v3170_v14 }
 0x618   : > { %v10029_v8 = vpop.permute.xlu1 %3187  ;;  %3951 = vmatprep.subr.mxu0 %v3142_v20 }
 0x619   : > { %v3206_v41 = vsel %vm1385_vm5, %v3186_v55, %v10029_v8  ;;  %3952 = vmatpush1.msra.mxu0 %v3141_v4 }
 0x61a   : > { %3095 = vrot.lane.b32.xlu1 %v9812_v35, %s12154_s26  ;;  %v3240_v61 = vmul.f32 %v3206_v41, %v12181_v12  ;;  %v2990_v55 = vpop.permute.xlu0 %2989  ;;  %v3133_v41 = vmul.f32 %v3131_v57, %v12180_v34  ;;  %v3231_v57 = vmul.f32 %v3198_v58, %v12182_v26  ;;  %v12184_v34 = vld [vmem:[#allocation56_spill] sm:$0xff] }
 0x61b   : > { %3177 = vrot.lane.b32.xlu0 %v9870_v22, %s11920_s25  ;;  %v3036_v3 = vsel %vm1127_vm7, 0.0, %v2990_v55 }
 0x61c   : > { %v3072_v24 = vpop.permute.xlu1 %3071  ;;  %4024 = vmatprep.subr.mxu1 %v3240_v61 }
 0x61d   : > { %v3101_v20 = vsel %vm1256_vm6, %v3070_v42, %v3072_v24  ;;  %4025 = vmatpush1.msra.mxu1 %v3239_v48 }
 0x61e   : > { %3195 = vrot.lane.b32.xlu1 %v9880_v63, %s11920_s25  ;;  %v3134_v4 = vmul.f32 %v3101_v20, %v12179_v50  ;;  %v3090_v61 = vpop.permute.xlu0 %3089 }
 0x61f   : > { %2997 = vrot.lane.b32.xlu0 %v9617_v54, %s12155_s27  ;;  %v3109_v58 = vsel %vm1256_vm6, %v3088_v28, %v3090_v61 }
 0x620   : > { %v10048_v38 = vpop.permute.xlu1 %3171  ;;  %3953 = vmatprep.subr.mxu0 %v3134_v4 }
 0x621   : > { %v3199_v42 = vsel %vm1385_vm5, %v3170_v14, %v10048_v38  ;;  %3954 = vmatpush1.msra.mxu0 %v3133_v41  ;;  %v12183_v41 = vld [vmem:[#allocation55_spill] sm:$0xff] }
 0x622   : > { %3079 = vrot.lane.b32.xlu1 %v9850_v52, %s12154_s26  ;;  %v3232_v48 = vmul.f32 %v3199_v42, %v12181_v12  ;;  %v2974_v14 = vpop.permute.xlu0 %2973  ;;  %v3045_v42 = vmul.f32 %v3036_v3, %v12184_v34  ;;  %v3143_v3 = vmul.f32 %v3109_v58, %v8919_v53 }
 0x623   : > { %3097 = vrot.lane.b32.xlu0 %v9837_v21, %s12154_s26  ;;  %v3035_v28 = vsel %vm1127_vm7, 0.0, %v2974_v14 }
 0x624   : > { %v2992_v20 = vpop.permute.xlu1 %2991  ;;  %4026 = vmatprep.subr.mxu1 %v3232_v48 }
 0x625   : > { %v3012_v4 = vsel %vm1127_vm7, %v2990_v55, %v2992_v20  ;;  %4027 = vmatpush1.msra.mxu1 %v3231_v57 }
 0x626   : > { %3179 = vrot.lane.b32.xlu1 %v9910_v19, %s11920_s25  ;;  %v3046_v50 = vmul.f32 %v3012_v4, %v12183_v41  ;;  %v3074_v48 = vpop.permute.xlu0 %3073 }
 0x627   : > { %2981 = vrot.lane.b32.xlu0 %v9624_v6, %s12155_s27  ;;  %v3102_v58 = vsel %vm1256_vm6, %v3072_v24, %v3074_v48 }
 0x628   : > { %v10067_v12 = vpop.permute.xlu1 %3091  ;;  %3955 = vmatprep.subr.mxu0 %v3046_v50 }
 0x629   : > { %v3110_v55 = vsel %vm1256_vm6, %v3090_v61, %v10067_v12  ;;  %3956 = vmatpush1.msra.mxu0 %v3045_v42 }
 0x62a   : > { %2999 = vrot.lane.b32.xlu1 %v9812_v35, %s12155_s27  ;;  %v3144_v57 = vmul.f32 %v3110_v55, %v8910_v39  ;;  %v2994_v61 = vpop.permute.xlu0 %2993  ;;  %v3037_v55 = vmul.f32 %v3035_v28, %v12184_v34  ;;  %v3135_v28 = vmul.f32 %v3102_v58, %v8919_v53 }
 0x62b   : > { %3081 = vrot.lane.b32.xlu0 %v9870_v22, %s12154_s26  ;;  %v3013_v24 = vsel %vm1127_vm7, %v2992_v20, %v2994_v61 }
 0x62c   : > { %v2976_v4 = vpop.permute.xlu1 %2975  ;;  %4028 = vmatprep.subr.mxu1 %v3144_v57 }
 0x62d   : > { %v3005_v50 = vsel %vm1127_vm7, %v2974_v14, %v2976_v4  ;;  %4029 = vmatpush1.msra.mxu1 %v3143_v3 }
 0x62e   : > { %3099 = vrot.lane.b32.xlu1 %v9880_v63, %s12154_s26  ;;  %v3038_v42 = vmul.f32 %v3005_v50, %v12183_v41  ;;  %v3696_v57 = vpop.permute.xlu0 %3695 }
 0x62f   : > { %3001 = vrot.lane.b32.xlu0 %v9837_v21, %s12155_s27 }
 0x630   : > { %v10086_v26 = vpop.permute.xlu1 %3075  ;;  %3957 = vmatprep.subr.mxu0 %v3038_v42 }
 0x631   : > { %v3103_v14 = vsel %vm1256_vm6, %v3074_v48, %v10086_v26  ;;  %3958 = vmatpush1.msra.mxu0 %v3037_v55 }
 0x632   : > { %2983 = vrot.lane.b32.xlu1 %v9850_v52, %s12155_s27  ;;  %v3136_v3 = vmul.f32 %v3103_v14, %v8910_v39  ;;  %v3694_v42 = vpop.permute.xlu0 %3693  ;;  %v12185_v14 = vld [vmem:[#allocation87_spill] sm:$0xff] }
 0x633   : > { %v3047_v58 = vmul.f32 %v3013_v24, %v12185_v14  ;;  %v3716_v20 = vsel %vm2094_vm8, %v3694_v42, %v3696_v57  ;;  %3703 = vrot.lane.b32.xlu0 %v9812_v35, %s12157_s29 }
 0x634   : > { %v10097_v50 = vpop.permute.xlu1 %2995  ;;  %4030 = vmatprep.subr.mxu1 %v3136_v3 }
 0x635   : > { %v3014_v48 = vsel %vm1127_vm7, %v2994_v61, %v10097_v50  ;;  %4031 = vmatpush1.msra.mxu1 %v3135_v28  ;;  %v7056_v28 = vld [vmem:[%s11721_s2 + $0x48] ss:$0 sm:$0xff] }
 0x636   : > { %3083 = vrot.lane.b32.xlu1 %v9910_v19, %s12154_s26  ;;  %v3048_v55 = vmul.f32 %v3014_v48, %v8938_v2  ;;  %v10109_v61 = vpop.permute.xlu0 %2979  ;;  %v7057_v48 = vld [vmem:[%s11721_s2 + $0x40] ss:$0 sm:$0xff] }
 0x637   : > { %v3749_v42 = vmul.f32 %v7057_v48, %v3716_v20  ;;  %2985 = vrot.lane.b32.xlu0 %v9870_v22, %s12155_s27 }
 0x638   : > { %v3698_v39 = vpop.permute.xlu1 %3697  ;;  %4032 = vmatprep.subr.mxu1 %v3048_v55 }
 0x639   : > { %v3717_v3 = vsel %vm2094_vm8, %v3696_v57, %v3698_v39  ;;  %4033 = vmatpush1.msra.mxu1 %v3047_v58 }
 0x63a   : > { %3003 = vrot.lane.b32.xlu1 %v9880_v63, %s12155_s27  ;;  %v3750_v24 = vmul.f32 %v7056_v28, %v3717_v3  ;;  %v3682_v53 = vpop.permute.xlu0 %3681 }
 0x63b   : > { %3687 = vrot.lane.b32.xlu0 %v9850_v52, %s12157_s29 }
 0x63c   : > { %v2978_v57 = vpop.permute.xlu1 %2977  ;;  %3987 = vmatprep.subr.mxu0 %v3750_v24 }
 0x63d   : > { %v3006_v55 = vsel %vm1127_vm7, %v2976_v4, %v2978_v57  ;;  %v3007_v58 = vsel %vm1127_vm7, %v2978_v57, %v10109_v61  ;;  %3988 = vmatpush2.msra.mxu0 %v3749_v42 }
 0x63e   : > { %v3039_v41 = vmul.f32 %v3006_v55, %v12185_v14  ;;  %3705 = vrot.lane.b32.xlu1 %v9837_v21, %s12157_s29  ;;  %v3040_v3 = vmul.f32 %v3007_v58, %v8938_v2  ;;  %v3608_v4 = vpop.permute.xlu0 %3607 }
 0x63f   : > { %3707 = vrot.lane.b32.xlu0 %v9880_v63, %s12157_s29 }
 0x640   : > { %v3680_v20 = vpop.permute.xlu1 %3679  ;;  %4034 = vmatprep.subr.mxu1 %v3040_v3  ;;  %v3624_v3 = vsel %vm1965_vm1, %v9822_v11, %v3608_v4  ;;  %v4337_v11 = vld [vmem:[%s11726_s7] sm:$0xff] }
 0x641   : > { %v3710_v24 = vsel %vm2094_vm8, %v3680_v20, %v3682_v53  ;;  %4035 = vmatpush1.msra.mxu1 %v3039_v41  ;;  %v10141_v41 = vld [vmem:[%s11725_s6] sm:$0xff] }
 0x642   : > { %2987 = vrot.lane.b32.xlu1 %v9910_v19, %s12155_s27  ;;  %v3742_v42 = vmul.f32 %v7056_v28, %v3710_v24  ;;  %v3700_v58 = vpop.permute.xlu0 %3699  ;;  %v10146_v28 = vld [vmem:[%s11725_s6 + $0x18] sm:$0xff] }
 0x644   : > { %v3678_v57 = vpop.permute.xlu1 %3677  ;;  %3989 = vmatprep.subr.mxu0 %v3742_v42  ;;  %v12186_v42 = vld [vmem:[#allocation13_spill] sm:$0xff] }
 0x645   : > { %v3709_v55 = vsel %vm2094_vm8, %v3678_v57, %v3680_v20 }
 0x646   : > { %v3741_v2 = vmul.f32 %v7057_v48, %v3709_v55  ;;  %3689 = vrot.lane.b32.xlu1 %v9870_v22, %s12157_s29  ;;  %v3592_v20 = vpop.permute.xlu0 %3591  ;;  %v12187_v55 = vld [vmem:[#allocation21_spill] sm:$0xff] }
 0x647   : > { %v3657_v14 = vmul.f32 %v3624_v3, %v12187_v55  ;;  %v7058_v3 = vld [vmem:[%s11721_s2 + $0x58] ss:$0 sm:$0xff] }
 0x648   : > { %v3610_v24 = vpop.permute.xlu1 %3609  ;;  %3990 = vmatpush2.msra.mxu0 %v3741_v2  ;;  %v10164_v2 = vld [vmem:[%s11725_s6 + $0x10] sm:$0xff] }
 0x649   : > { %v3625_v48 = vsel %vm1965_vm1, %v3608_v4, %v3610_v24  ;;  %3992 = vmatmul.mubr.f32.vlgmr.msra.gmra.mxu0 %v10141_v41  ;;  %v3718_v4 = vsel %vm2094_vm8, %v3698_v39, %v3700_v58  ;;  %v7059_v39 = vld [vmem:[%s11721_s2 + $0x50] ss:$0 sm:$0xff] }
 0x64a   : > { %3691 = vrot.lane.b32.xlu1 %v9910_v19, %s12157_s29  ;;  %v3658_v57 = vmul.f32 %v3625_v48, %v12186_v42  ;;  %6913 = vmatprep.mubr.msk.f32.mxu0 %vm2339_vm0, %v10146_v28  ;;  %v3684_v36 = vpop.permute.xlu0 %3683  ;;  %v3751_v62 = vmul.f32 %v7059_v39, %v3718_v4 }
 0x64b   : > { %v3711_v5 = vsel %vm2094_vm8, %v3682_v53, %v3684_v36  ;;  %v12188_v53 = vld [vmem:[#allocation92_spill] sm:$0xff] }
 0x64c   : > { %v10167_v34 = vpop.permute.xlu1 %3701  ;;  %4081 = vmatprep.subr.mxu0 %v3658_v57  ;;  %v4365_v57 = vld [vmem:[%s11727_s8] sm:$0xff]  ;;  %v3743_v51 = vmul.f32 %v7059_v39, %v3711_v5 }
 0x64d   : > { %v3719_v48 = vsel %vm2094_vm8, %v3700_v58, %v10167_v34  ;;  %4082 = vmatpush1.msra.mxu0 %v3657_v14  ;;  %v3617_v14 = vsel %vm1965_vm1, %v9848_v9, %v3592_v20 }
 0x64e   : > { %4341 = vperm.xlu1 %6967, %v4337_v11   ;;  %v3752_v23 = vmul.f32 %v7058_v3, %v3719_v48  ;;  %3998 = vmatmul.mubr.f32.gmra.mxu0 %v10164_v2  ;;  %v3512_v48 = vpop.permute.xlu0 %3511  ;;  %v3649_v4 = vmul.f32 %v3617_v14, %v12187_v55 }
 0x64f   : > { %6916 = vmatprep.mubr.msk.f32.mxu0 %vm2339_vm0, %v9842_v37 }
 0x650   : > { %v3594_v58 = vpop.permute.xlu1 %3593  ;;  %4064 = vmatprep.subr.mxu1 %v3752_v23 }
 0x651   : > { %v3618_v11 = vsel %vm1965_vm1, %v3592_v20, %v3594_v58  ;;  %4065 = vmatpush2.msra.mxu1 %v3751_v62 }
 0x652   : > { %4369 = vperm.xlu1 %6967, %v4365_v57   ;;  %v3650_v7 = vmul.f32 %v3618_v11, %v12186_v42  ;;  %v3612_v9 = vpop.permute.xlu0 %3611  ;;  %v3528_v57 = vsel %vm1836_vm2, %v9891_v0, %v3512_v48  ;;  %v12189_v42 = vld [vmem:[#allocation90_spill] sm:$0xff] }
 0x653   : > { %v3626_v62 = vsel %vm1965_vm1, %v3610_v24, %v3612_v9  ;;  %v3644_v20 = vsel %vm1965_vm1, %v3612_v9, 0.0  ;;  %v12191_v24 = vld [vmem:[#allocation23_spill] sm:$0xff] }
 0x654   : > { %v10189_v59 = vpop.permute.xlu1 %3685  ;;  %4083 = vmatprep.subr.mxu0 %v3650_v7  ;;  %v3660_v11 = vmul.f32 %v3644_v20, %v12188_v53  ;;  %v3659_v7 = vmul.f32 %v3626_v62, %v12189_v42 }
 0x655   : > { %v3712_v47 = vsel %vm2094_vm8, %v3684_v36, %v10189_v59  ;;  %4084 = vmatpush1.msra.mxu0 %v3649_v4 }
 0x656   : > { %v3744_v23 = vmul.f32 %v7058_v3, %v3712_v47  ;;  %v3498_v36 = vpop.permute.xlu0 %3497  ;;  %v12190_v47 = vld [vmem:[#allocation47_spill] sm:$0xff]  ;;  %v3561_v3 = vmul.f32 %v3528_v57, %v12191_v24 }
 0x658   : > { %v3514_v14 = vpop.permute.xlu1 %3513  ;;  %4066 = vmatprep.subr.mxu1 %v3744_v23 }
 0x659   : > { %v3529_v55 = vsel %vm1836_vm2, %v3512_v48, %v3514_v14  ;;  %4067 = vmatpush2.msra.mxu1 %v3743_v51 }
 0x65a   : > { %4158 = vmatprep.subr.mxu1 %v3660_v11  ;;  %4069 = vmatmul.mubr.f32.vlgmr.msra.gmra.mxu1 %v10141_v41  ;;  %v3562_v5 = vmul.f32 %v3529_v55, %v12190_v47  ;;  %v3416_v51 = vpop.permute.xlu0 %3415 }
 0x65b   : > { %4159 = vmatpush1.msra.mxu1 %v3659_v7  ;;  %6915 = vmatprep.mubr.msk.f32.mxu1 %vm2339_vm0, %v10146_v28 }
 0x65c   : > { %v3496_v0 = vpop.permute.xlu1 %3495  ;;  %4085 = vmatprep.subr.mxu0 %v3562_v5  ;;  %v3432_v5 = vsel %vm1707_vm3, %v9930_v13, %v3416_v51 }
 0x65d   : > { %v3521_v39 = vsel %vm1836_vm2, %v9902_v27, %v3496_v0  ;;  %v3522_v48 = vsel %vm1836_vm2, %v3496_v0, %v3498_v36  ;;  %4086 = vmatpush1.msra.mxu0 %v3561_v3  ;;  %v12192_v3 = vld [vmem:[#allocation94_spill] sm:$0xff] }
 0x65e   : > { %v3553_v4 = vmul.f32 %v3521_v39, %v12191_v24  ;;  %v3554_v9 = vmul.f32 %v3522_v48, %v12190_v47  ;;  %4075 = vmatmul.mubr.f32.gmra.mxu1 %v10164_v2  ;;  %v3516_v27 = vpop.permute.xlu0 %3515 }
 0x65f   : > { %6918 = vmatprep.mubr.msk.f32.mxu1 %vm2339_vm0, %v9842_v37  ;;  %v3530_v11 = vsel %vm1836_vm2, %v3514_v14, %v3516_v27  ;;  %v3548_v7 = vsel %vm1836_vm2, %v3516_v27, 0.0 }
 0x660   : > { %v3596_v55 = vpop.permute.xlu1 %3595  ;;  %4087 = vmatprep.subr.mxu0 %v3554_v9  ;;  %v3564_v0 = vmul.f32 %v3548_v7, %v12192_v3  ;;  %v12194_v9 = vld [vmem:[#allocation95_spill] sm:$0xff]  ;;  %v12196_v7 = vld [vmem:[#allocation17_spill] sm:$0xff] }
 0x661   : > { %v3619_v23 = vsel %vm1965_vm1, %v3594_v58, %v3596_v55  ;;  %v3643_v62 = vsel %vm1965_vm1, %v3596_v55, 0.0  ;;  %4088 = vmatpush1.msra.mxu0 %v3553_v4  ;;  %v12193_v58 = vld [vmem:[#allocation93_spill] sm:$0xff] }
 0x662   : > { %v3651_v20 = vmul.f32 %v3619_v23, %v12189_v42  ;;  %v3652_v57 = vmul.f32 %v3643_v62, %v12188_v53  ;;  %v3563_v39 = vmul.f32 %v3530_v11, %v12193_v58  ;;  %v3402_v4 = vpop.permute.xlu0 %3401  ;;  %v12195_v23 = vld [vmem:[#allocation91_spill] sm:$0xff] }
 0x663   : > { %v3465_v14 = vmul.f32 %v3432_v5, %v12195_v23 }
 0x664   : > { %v3418_v37 = vpop.permute.xlu1 %3417  ;;  %4160 = vmatprep.subr.mxu1 %v3652_v57 }
 0x665   : > { %v3433_v48 = vsel %vm1707_vm3, %v3416_v51, %v3418_v37  ;;  %4161 = vmatpush1.msra.mxu1 %v3651_v20 }
 0x666   : > { %4162 = vmatprep.subr.mxu1 %v3564_v0  ;;  %v3466_v55 = vmul.f32 %v3433_v48, %v12194_v9  ;;  %v3420_v57 = vpop.permute.xlu0 %3419  ;;  %v3370_v0 = vmul.f32 %v9812_v35, %v12196_v7 }
 0x667   : > { %4163 = vmatpush1.msra.mxu1 %v3563_v39  ;;  %v3452_v5 = vsel %vm1707_vm3, %v3420_v57, 0.0 }
 0x668   : > { %v3400_v62 = vpop.permute.xlu1 %3399  ;;  %4089 = vmatprep.subr.mxu0 %v3466_v55 }
 0x669   : > { %v3425_v13 = vsel %vm1707_vm3, %v9948_v16, %v3400_v62  ;;  %v3426_v27 = vsel %vm1707_vm3, %v3400_v62, %v3402_v4  ;;  %4090 = vmatpush1.msra.mxu0 %v3465_v14  ;;  %v12197_v16 = vld [vmem:[#allocation31_spill] sm:$0xff]  ;;  %v3434_v14 = vsel %vm1707_vm3, %v3418_v37, %v3420_v57 }
 0x66a   : > { %v3457_v11 = vmul.f32 %v3425_v13, %v12195_v23  ;;  %v3458_v51 = vmul.f32 %v3426_v27, %v12194_v9  ;;  %v3369_v55 = vmul.f32 %v9617_v54, %v12197_v16  ;;  %v3286_v62 = vpop.permute.xlu0 %3285  ;;  %v3362_v27 = vmul.f32 %v9850_v52, %v12196_v7 }
 0x66b   : > { %v3468_v54 = vmul.f32 %v3452_v5, %v9110_v29  ;;  %v3467_v37 = vmul.f32 %v3434_v14, %v9096_v49  ;;  %v12198_v5 = vld [vmem:[#allocation18_spill] sm:$0xff] }
 0x66c   : > { %v3500_v20 = vpop.permute.xlu1 %3499  ;;  %4091 = vmatprep.subr.mxu0 %v3458_v51 }
 0x66d   : > { %v3523_v39 = vsel %vm1836_vm2, %v3498_v36, %v3500_v20  ;;  %v3547_v48 = vsel %vm1836_vm2, %v3500_v20, 0.0  ;;  %4092 = vmatpush1.msra.mxu0 %v3457_v11  ;;  %v3361_v36 = vmul.f32 %v9624_v6, %v12197_v16  ;;  %v3303_v6 = vsel %vm1514_vm4, %v9991_v15, %v3286_v62 }
 0x66e   : > { %v3555_v13 = vmul.f32 %v3523_v39, %v12193_v58  ;;  %4093 = vmatprep.subr.mxu0 %v3370_v0  ;;  %v3556_v35 = vmul.f32 %v3547_v48, %v12192_v3  ;;  %v3270_v52 = vpop.permute.xlu0 %3269  ;;  %v3372_v48 = vmul.f32 %v9880_v63, %v12198_v5  ;;  %v3337_v15 = vmul.f32 %v3303_v6, %v9102_v1 }
 0x66f   : > { %4094 = vmatpush1.msra.mxu0 %v3369_v55  ;;  %v12199_v55 = vld [vmem:[#allocation85_spill] sm:$0xff]  ;;  %v3296_v63 = vsel %vm1514_vm4, %v10010_v10, %v3270_v52 }
 0x670   : > { %v3404_v51 = vpop.permute.xlu1 %3403  ;;  %4095 = vmatprep.subr.mxu0 %v3362_v27  ;;  %4164 = vmatprep.subr.mxu1 %v3556_v35  ;;  %v3371_v14 = vmul.f32 %v9837_v21, %v12199_v55  ;;  %v3364_v35 = vmul.f32 %v9910_v19, %v12198_v5  ;;  %v3329_v19 = vmul.f32 %v3296_v63, %v9102_v1 }
 0x671   : > { %v3427_v57 = vsel %vm1707_vm3, %v3402_v4, %v3404_v51  ;;  %v3451_v11 = vsel %vm1707_vm3, %v3404_v51, 0.0  ;;  %4096 = vmatpush1.msra.mxu0 %v3361_v36  ;;  %4165 = vmatpush1.msra.mxu1 %v3555_v13  ;;  %v3363_v36 = vmul.f32 %v9870_v22, %v12199_v55 }
 0x672   : > { %v3459_v20 = vmul.f32 %v3427_v57, %v9096_v49  ;;  %4166 = vmatprep.subr.mxu1 %v3468_v54  ;;  %v3460_v0 = vmul.f32 %v3451_v11, %v9110_v29  ;;  %v3190_v13 = vpop.permute.xlu0 %3189 }
 0x673   : > { %4167 = vmatpush1.msra.mxu1 %v3467_v37  ;;  %v3207_v37 = vsel %vm1385_vm5, %v10029_v8, %v3190_v13 }
 0x674   : > { %v3288_v39 = vpop.permute.xlu1 %3287  ;;  %4168 = vmatprep.subr.mxu1 %v3460_v0 }
 0x675   : > { %v3304_v4 = vsel %vm1514_vm4, %v3286_v62, %v3288_v39  ;;  %4169 = vmatpush1.msra.mxu1 %v3459_v20  ;;  %v12200_v20 = vld [vmem:[#allocation96_spill] sm:$0xff] }
 0x676   : > { %4170 = vmatprep.subr.mxu1 %v3372_v48  ;;  %v3338_v27 = vmul.f32 %v3304_v4, %v9114_v43  ;;  %v3290_v51 = vpop.permute.xlu0 %3289 }
 0x677   : > { %4171 = vmatpush1.msra.mxu1 %v3371_v14  ;;  %v3305_v0 = vsel %vm1514_vm4, %v3288_v39, %v3290_v51 }
 0x678   : > { %v3272_v62 = vpop.permute.xlu1 %3271  ;;  %4097 = vmatprep.subr.mxu0 %v3338_v27  ;;  %4172 = vmatprep.subr.mxu1 %v3364_v35  ;;  %v3339_v14 = vmul.f32 %v3305_v0, %v9141_v31 }
 0x679   : > { %v3297_v21 = vsel %vm1514_vm4, %v3270_v52, %v3272_v62  ;;  %4098 = vmatpush1.msra.mxu0 %v3337_v15  ;;  %4173 = vmatpush1.msra.mxu1 %v3363_v36  ;;  %v3241_v52 = vmul.f32 %v3207_v37, %v12200_v20 }
 0x67a   : > { %v3330_v54 = vmul.f32 %v3297_v21, %v9114_v43  ;;  %v3174_v10 = vpop.permute.xlu0 %3173 }
 0x67c   : > { %v3192_v57 = vpop.permute.xlu1 %3191  ;;  %4099 = vmatprep.subr.mxu0 %v3330_v54 }
 0x67d   : > { %v3208_v22 = vsel %vm1385_vm5, %v3190_v13, %v3192_v57  ;;  %4100 = vmatpush1.msra.mxu0 %v3329_v19  ;;  %v3200_v13 = vsel %vm1385_vm5, %v10048_v38, %v3174_v10 }
 0x67e   : > { %v3242_v11 = vmul.f32 %v3208_v22, %v9125_v45  ;;  %v3274_v4 = vpop.permute.xlu0 %3273  ;;  %v3233_v36 = vmul.f32 %v3200_v13, %v12200_v20 }
 0x67f   : > { %v3298_v63 = vsel %vm1514_vm4, %v3272_v62, %v3274_v4 }
 0x680   : > { %v3292_v6 = vpop.permute.xlu1 %3291  ;;  %4101 = vmatprep.subr.mxu0 %v3242_v11  ;;  %v3331_v19 = vmul.f32 %v3298_v63, %v9141_v31 }
 0x681   : > { %v3306_v48 = vsel %vm1514_vm4, %v3290_v51, %v3292_v6  ;;  %4102 = vmatpush1.msra.mxu0 %v3241_v52 }
 0x682   : > { %v3340_v8 = vmul.f32 %v3306_v48, %v9147_v46  ;;  %v3094_v15 = vpop.permute.xlu0 %3093 }
 0x683   : > { %v3111_v37 = vsel %vm1256_vm6, %v10067_v12, %v3094_v15 }
 0x684   : > { %v3176_v27 = vpop.permute.xlu1 %3175  ;;  %4174 = vmatprep.subr.mxu1 %v3340_v8  ;;  %v3145_v52 = vmul.f32 %v3111_v37, %v9151_v60 }
 0x685   : > { %v3201_v35 = vsel %vm1385_vm5, %v3174_v10, %v3176_v27  ;;  %4175 = vmatpush1.msra.mxu1 %v3339_v14 }
 0x686   : > { %v3234_v39 = vmul.f32 %v3201_v35, %v9125_v45  ;;  %v3194_v54 = vpop.permute.xlu0 %3193 }
 0x687   : > { %v3209_v0 = vsel %vm1385_vm5, %v3192_v57, %v3194_v54 }
 0x688   : > { %v3276_v21 = vpop.permute.xlu1 %3275  ;;  %4103 = vmatprep.subr.mxu0 %v3234_v39  ;;  %v3243_v8 = vmul.f32 %v3209_v0, %v9161_v33 }
 0x689   : > { %v3299_v51 = vsel %vm1514_vm4, %v3274_v4, %v3276_v21  ;;  %4104 = vmatpush1.msra.mxu0 %v3233_v36 }
 0x68a   : > { %v3332_v38 = vmul.f32 %v3299_v51, %v9147_v46  ;;  %v3078_v11 = vpop.permute.xlu0 %3077 }
 0x68b   : > { %v3104_v14 = vsel %vm1256_vm6, %v10086_v26, %v3078_v11 }
 0x68c   : > { %v3096_v22 = vpop.permute.xlu1 %3095  ;;  %4176 = vmatprep.subr.mxu1 %v3332_v38  ;;  %v3137_v39 = vmul.f32 %v3104_v14, %v9151_v60 }
 0x68d   : > { %v3112_v10 = vsel %vm1256_vm6, %v3094_v15, %v3096_v22  ;;  %4177 = vmatpush1.msra.mxu1 %v3331_v19 }
 0x68e   : > { %v3146_v62 = vmul.f32 %v3112_v10, %v9155_v17  ;;  %v3178_v4 = vpop.permute.xlu0 %3177 }
 0x68f   : > { %v3202_v36 = vsel %vm1385_vm5, %v3176_v27, %v3178_v4 }
 0x690   : > { %v3196_v6 = vpop.permute.xlu1 %3195  ;;  %4105 = vmatprep.subr.mxu0 %v3146_v62 }
 0x691   : > { %v3210_v48 = vsel %vm1385_vm5, %v3194_v54, %v3196_v6  ;;  %4106 = vmatpush1.msra.mxu0 %v3145_v52  ;;  %v3235_v54 = vmul.f32 %v3202_v36, %v9161_v33 }
 0x692   : > { %v3244_v12 = vmul.f32 %v3210_v48, %v9165_v44  ;;  %v2998_v15 = vpop.permute.xlu0 %2997 }
 0x693   : > { %v3015_v38 = vsel %vm1127_vm7, %v10097_v50, %v2998_v15 }
 0x694   : > { %v3080_v13 = vpop.permute.xlu1 %3079  ;;  %4178 = vmatprep.subr.mxu1 %v3244_v12 }
 0x695   : > { %v3105_v35 = vsel %vm1256_vm6, %v3078_v11, %v3080_v13  ;;  %4179 = vmatpush1.msra.mxu1 %v3243_v8  ;;  %v3049_v11 = vmul.f32 %v3015_v38, %v9169_v32 }
 0x696   : > { %v3138_v57 = vmul.f32 %v3105_v35, %v9155_v17  ;;  %v3098_v51 = vpop.permute.xlu0 %3097 }
 0x697   : > { %v3113_v62 = vsel %vm1256_vm6, %v3096_v22, %v3098_v51 }
 0x698   : > { %v3180_v63 = vpop.permute.xlu1 %3179  ;;  %4107 = vmatprep.subr.mxu0 %v3138_v57  ;;  %v3147_v48 = vmul.f32 %v3113_v62, %v9188_v18 }
 0x699   : > { %v3203_v21 = vsel %vm1385_vm5, %v3178_v4, %v3180_v63  ;;  %4108 = vmatpush1.msra.mxu0 %v3137_v39 }
 0x69a   : > { %v3236_v26 = vmul.f32 %v3203_v21, %v9165_v44  ;;  %v2982_v10 = vpop.permute.xlu0 %2981 }
 0x69b   : > { %v3008_v4 = vsel %vm1127_vm7, %v10109_v61, %v2982_v10 }
 0x69c   : > { %v3000_v19 = vpop.permute.xlu1 %2999  ;;  %4180 = vmatprep.subr.mxu1 %v3236_v26  ;;  %v3041_v35 = vmul.f32 %v3008_v4, %v9169_v32 }
 0x69d   : > { %v3016_v37 = vsel %vm1127_vm7, %v2998_v15, %v3000_v19  ;;  %4181 = vmatpush1.msra.mxu1 %v3235_v54 }
 0x69e   : > { %v3050_v27 = vmul.f32 %v3016_v37, %v9192_v30  ;;  %v3082_v6 = vpop.permute.xlu0 %3081 }
 0x69f   : > { %v3106_v15 = vsel %vm1256_vm6, %v3080_v13, %v3082_v6 }
 0x6a0   : > { %v3100_v52 = vpop.permute.xlu1 %3099  ;;  %4109 = vmatprep.subr.mxu0 %v3050_v27  ;;  %v3139_v63 = vmul.f32 %v3106_v15, %v9188_v18 }
 0x6a1   : > { %v3114_v0 = vsel %vm1256_vm6, %v3098_v51, %v3100_v52  ;;  %4110 = vmatpush1.msra.mxu0 %v3049_v11  ;;  %v7061_v52 = vld [vmem:[%s11721_s2 + $0x60] ss:$0 sm:$0xff] }
 0x6a2   : > { %v3148_v50 = vmul.f32 %v3114_v0, %v9210_v25  ;;  %v3002_v14 = vpop.permute.xlu0 %3001 }
 0x6a3   : > { %v3017_v21 = vsel %vm1127_vm7, %v3000_v19, %v3002_v14  ;;  %v7060_v19 = vld [vmem:[%s11721_s2 + $0x68] ss:$0 sm:$0xff] }
 0x6a4   : > { %v2984_v12 = vpop.permute.xlu1 %2983  ;;  %4182 = vmatprep.subr.mxu1 %v3148_v50  ;;  %v3051_v38 = vmul.f32 %v3017_v21, %v9337_v40 }
 0x6a5   : > { %v3009_v8 = vsel %vm1127_vm7, %v2982_v10, %v2984_v12  ;;  %4183 = vmatpush1.msra.mxu1 %v3147_v48 }
 0x6a6   : > { %v3042_v22 = vmul.f32 %v3009_v8, %v9192_v30  ;;  %v3704_v36 = vpop.permute.xlu0 %3703 }
 0x6a7   : > { %v3720_v37 = vsel %vm2094_vm8, %v10167_v34, %v3704_v36 }
 0x6a8   : > { %v3084_v57 = vpop.permute.xlu1 %3083  ;;  %4111 = vmatprep.subr.mxu0 %v3042_v22  ;;  %v3753_v0 = vmul.f32 %v7061_v52, %v3720_v37 }
 0x6a9   : > { %v3107_v39 = vsel %vm1256_vm6, %v3082_v6, %v3084_v57  ;;  %4112 = vmatpush1.msra.mxu0 %v3041_v35 }
 0x6aa   : > { %v3140_v61 = vmul.f32 %v3107_v39, %v9210_v25  ;;  %v2986_v54 = vpop.permute.xlu0 %2985  ;;  %v7063_v39 = vld [vmem:[%s11721_s2 + $0x70] ss:$0 sm:$0xff] }
 0x6ab   : > { %v3010_v6 = vsel %vm1127_vm7, %v2984_v12, %v2986_v54  ;;  %v7062_v12 = vld [vmem:[%s11721_s2 + $0x78] ss:$0 sm:$0xff] }
 0x6ac   : > { %v3004_v51 = vpop.permute.xlu1 %3003  ;;  %4184 = vmatprep.subr.mxu1 %v3140_v61  ;;  %v3043_v8 = vmul.f32 %v3010_v6, %v9337_v40 }
 0x6ad   : > { %v3018_v26 = vsel %vm1127_vm7, %v3002_v14, %v3004_v51  ;;  %4185 = vmatpush1.msra.mxu1 %v3139_v63 }
 0x6ae   : > { %v3052_v13 = vmul.f32 %v3018_v26, %v9341_v56  ;;  %v3688_v11 = vpop.permute.xlu0 %3687 }
 0x6af   : > { %v3713_v35 = vsel %vm2094_vm8, %v10189_v59, %v3688_v11 }
 0x6b0   : > { %v3706_v10 = vpop.permute.xlu1 %3705  ;;  %4186 = vmatprep.subr.mxu1 %v3052_v13  ;;  %v3745_v21 = vmul.f32 %v7061_v52, %v3713_v35 }
 0x6b1   : > { %v3721_v27 = vsel %vm2094_vm8, %v3704_v36, %v3706_v10  ;;  %4187 = vmatpush1.msra.mxu1 %v3051_v38 }
 0x6b2   : > { %v3754_v62 = vmul.f32 %v7060_v19, %v3721_v27  ;;  %v3708_v48 = vpop.permute.xlu0 %3707 }
 0x6b3   : > { %v3740_v14 = vsel %vm2094_vm8, %v3708_v48, 0.0  ;;  %v3722_v22 = vsel %vm2094_vm8, %v3706_v10, %v3708_v48 }
 0x6b4   : > { %v2988_v50 = vpop.permute.xlu1 %2987  ;;  %4141 = vmatprep.subr.mxu0 %v3754_v62  ;;  %v3756_v57 = vmul.f32 %v7062_v12, %v3740_v14  ;;  %v3755_v36 = vmul.f32 %v7063_v39, %v3722_v22 }
 0x6b5   : > { %v3011_v34 = vsel %vm1127_vm7, %v2986_v54, %v2988_v50  ;;  %4142 = vmatpush2.msra.mxu0 %v3753_v0 }
 0x6b6   : > { %v3044_v4 = vmul.f32 %v3011_v34, %v9341_v56 }
 0x6b8   : > { %v3690_v15 = vpop.permute.xlu1 %3689  ;;  %4188 = vmatprep.subr.mxu1 %v3044_v4 }
 0x6b9   : > { %v3714_v61 = vsel %vm2094_vm8, %v3688_v11, %v3690_v15  ;;  %4189 = vmatpush1.msra.mxu1 %v3043_v8 }
 0x6ba   : > { %4218 = vmatprep.subr.mxu1 %v3756_v57  ;;  %v3746_v63 = vmul.f32 %v7060_v19, %v3714_v61 }
 0x6bb   : > { %4219 = vmatpush2.msra.mxu1 %v3755_v36 }
 0x6bc   : > { %v3692_v59 = vpop.permute.xlu1 %3691  ;;  %4143 = vmatprep.subr.mxu0 %v3746_v63 }
 0x6bd   : > { %v3715_v51 = vsel %vm2094_vm8, %v3690_v15, %v3692_v59  ;;  %v3739_v26 = vsel %vm2094_vm8, %v3692_v59, 0.0  ;;  %4144 = vmatpush2.msra.mxu0 %v3745_v21 }
 0x6be   : > { %v3747_v54 = vmul.f32 %v7063_v39, %v3715_v51  ;;  %4146 = vmatmul.mubr.f32.vlgmr.msra.gmra.mxu0 %v10141_v41  ;;  %v3748_v13 = vmul.f32 %v7062_v12, %v3739_v26  ;;  %v4338_v26 = vld [vmem:[%s11726_s7 + $0x8] sm:$0xff] }
 0x6bf   : > { %6917 = vmatprep.mubr.msk.f32.mxu0 %vm2339_vm0, %v10146_v28 }
 0x6c0   : > { %4220 = vmatprep.subr.mxu1 %v3748_v13 }
 0x6c1   : > { %4221 = vmatpush2.msra.mxu1 %v3747_v54  ;;  %v4366_v54 = vld [vmem:[%s11727_s8 + $0x8] sm:$0xff] }
 0x6c2   : > { %4223 = vmatmul.mubr.f32.vlgmr.msra.gmra.mxu1 %v10141_v41  ;;  %4152 = vmatmul.mubr.f32.gmra.mxu0 %v10164_v2 }
 0x6c3   : > { %6919 = vmatprep.mubr.msk.f32.mxu1 %vm2339_vm0, %v10146_v28 }
 0x6c6   : > { %4229 = vmatmul.mubr.f32.gmra.mxu1 %v10164_v2 }
 0x709   : > { %v3993_v38 = vpop.f32.mrf.mxu0 }
 0x70b   : > { %v3995_v37 = vpop.f32.mrf.mxu0 }
 0x70c   : > { %v4235_v10 = vadd.f32 %v3995_v37, %v3993_v38 }
 0x70e   : > { %v3999_v11 = vpop.f32.mrf.mxu0 }
 0x710   : > { %v4001_v52 = vpop.f32.mrf.mxu0 }
 0x71a   : > { %v4070_v27 = vpop.f32.mrf.mxu1 }
 0x71b   : > { %v4236_v19 = vadd.f32 %v4235_v10, %v4070_v27 }
 0x71c   : > { %v4072_v62 = vpop.f32.mrf.mxu1 }
 0x71d   : > { %v4237_v6 = vadd.f32 %v4236_v19, %v4072_v62 }
 0x71e   : > { %v10361_v0 = vpop.f32.mrf.mxu1 }
 0x720   : > { %v4078_v34 = vpop.f32.mrf.mxu1 }
 0x77e   : > { %v4147_v50 = vpop.f32.mrf.mxu0 }
 0x77f   : > { %v4238_v41 = vadd.f32 %v4237_v6, %v4147_v50 }
 0x780   : > { %v4149_v48 = vpop.f32.mrf.mxu0 }
 0x781   : > { %v4239_v4 = vadd.f32 %v4238_v41, %v4149_v48 }
 0x782   : > { %v4224_v8 = vpop.f32.mrf.mxu1  ;;  %v4153_v12 = vpop.f32.mrf.mxu0 }
 0x783   : > { %v4240_v28 = vadd.f32 %v4239_v4, %v4224_v8 }
 0x784   : > { %v4226_v14 = vpop.f32.mrf.mxu1  ;;  %v4155_v36 = vpop.f32.mrf.mxu0 }
 0x785   : > { %v4241_v2 = vadd.f32 %v4240_v28, %v4226_v14 }
 0x786   : > { %v4230_v61 = vpop.f32.mrf.mxu1 }
 0x787   : > { %v4242_v22 = vadd.f32 %v4241_v2, %v3999_v11 }
 0x788   : > { %v4232_v59 = vpop.f32.mrf.mxu1 }
 0x789   : > { %v4243_v35 = vadd.f32 %v4242_v22, %v4001_v52 }
 0x78b   : > { %v4244_v15 = vadd.f32 %v4243_v35, %v10361_v0 }
 0x78d   : > { %v4245_v57 = vadd.f32 %v4244_v15, %v4078_v34 }
 0x78f   : > { %v4246_v39 = vadd.f32 %v4245_v57, %v4153_v12 }
 0x791   : > { %v4247_v63 = vadd.f32 %v4246_v39, %v4155_v36 }
 0x793   : > { %v4248_v21 = vadd.f32 %v4247_v63, %v4230_v61 }
 0x795   : > { %v4249_v51 = vadd.f32 %v4248_v21, %v4232_v59 }
 0x797   : > { %4250 = vadd.xlane.f32.xlu0 %v4249_v51 }
 0x7ad   : > { %4346 = vperm.xlu0 %6966, %v4338_v26  }
 0x7b1   : > { %4374 = vperm.xlu0 %6966, %v4366_v54  }
 0x820   : > { %v4251_v13 = vpop.xlane.xlu0 %4250 }
 0x821   : > { %v4252_v10 = vrot.slane %v4251_v13, 4 }
 0x823   : > { %v4253_v19 = vadd.f32 %v4252_v10, %v4251_v13 }
 0x825   : > { %v4254_v6 = vrot.slane %v4253_v19, 2 }
 0x827   : > { %v4255_v41 = vadd.f32 %v4254_v6, %v4253_v19 }
 0x829   : > { %v4256_v4 = vrot.slane %v4255_v41, 1 }
 0x82b   : > { %v4257_v28 = vadd.f32 %v4256_v4, %v4255_v41 }
 0x82d   : > { %6936 = vpush %v4257_v28 }
 0x85e   : > { %s6937_s25 = spop %6936 }
 0x85f   : > { %v4259_v2 = vstv %s6937_s25 }
 0x860   : > { %v4260_v22 = vmul.f32 6.1035156e-05, %v4259_v2 }
 0x862   : > { %v10370_v35 = vsub.f32 %v3993_v38, %v4260_v22  ;;  %v10372_v15 = vsub.f32 %v3995_v37, %v4260_v22  ;;  %v10374_v57 = vsub.f32 %v4070_v27, %v4260_v22  ;;  %v10380_v21 = vsub.f32 %v4072_v62, %v4260_v22 }
 0x863   : > { %v10382_v51 = vsub.f32 %v4147_v50, %v4260_v22  ;;  %v10386_v38 = vsub.f32 %v4149_v48, %v4260_v22  ;;  %v10390_v13 = vsub.f32 %v4224_v8, %v4260_v22  ;;  %v10394_v62 = vsub.f32 %v4226_v14, %v4260_v22 }
 0x864   : > { %v4277_v39 = vmul.f32 %v10370_v35, %v10370_v35  ;;  %v4278_v63 = vmul.f32 %v10372_v15, %v10372_v15  ;;  %v4279_v26 = vmul.f32 %v10374_v57, %v10374_v57  ;;  %v4280_v37 = vmul.f32 %v10380_v21, %v10380_v21 }
 0x865   : > { %v4281_v10 = vmul.f32 %v10382_v51, %v10382_v51  ;;  %v4282_v50 = vmul.f32 %v10386_v38, %v10386_v38  ;;  %v4269_v41 = vsub.f32 %v3999_v11, %v4260_v22  ;;  %v4283_v48 = vmul.f32 %v10390_v13, %v10390_v13 }
 0x866   : > { %v4293_v54 = vadd.f32 %v4278_v63, %v4277_v39  ;;  %v4270_v28 = vsub.f32 %v4001_v52, %v4260_v22  ;;  %v4284_v8 = vmul.f32 %v10394_v62, %v10394_v62  ;;  %v4271_v39 = vsub.f32 %v10361_v0, %v4260_v22 }
 0x867   : > { %v4285_v63 = vmul.f32 %v4269_v41, %v4269_v41  ;;  %v4272_v14 = vsub.f32 %v4078_v34, %v4260_v22  ;;  %v10403_v11 = vsub.f32 %v4155_v36, %v4260_v22  ;;  %v10407_v25 = vsub.f32 %v4232_v59, %v4260_v22 }
 0x868   : > { %v4294_v27 = vadd.f32 %v4293_v54, %v4279_v26  ;;  %v4286_v54 = vmul.f32 %v4270_v28, %v4270_v28  ;;  %v4287_v56 = vmul.f32 %v4271_v39, %v4271_v39 }
 0x869   : > { %v4290_v0 = vmul.f32 %v10403_v11, %v10403_v11  ;;  %v4292_v36 = vmul.f32 %v10407_v25, %v10407_v25 }
 0x86a   : > { %v4295_v19 = vadd.f32 %v4294_v27, %v4280_v37  ;;  %v4273_v27 = vsub.f32 %v4153_v12, %v4260_v22 }
 0x86c   : > { %v4296_v6 = vadd.f32 %v4295_v19, %v4281_v10  ;;  %v4288_v19 = vmul.f32 %v4272_v14, %v4272_v14  ;;  %v4289_v52 = vmul.f32 %v4273_v27, %v4273_v27 }
 0x86e   : > { %v4297_v4 = vadd.f32 %v4296_v6, %v4282_v50  ;;  %v10405_v50 = vsub.f32 %v4230_v61, %v4260_v22 }
 0x870   : > { %v4298_v2 = vadd.f32 %v4297_v4, %v4283_v48  ;;  %v4291_v34 = vmul.f32 %v10405_v50, %v10405_v50 }
 0x872   : > { %v4299_v26 = vadd.f32 %v4298_v2, %v4284_v8 }
 0x874   : > { %v4300_v37 = vadd.f32 %v4299_v26, %v4285_v63 }
 0x876   : > { %v4301_v10 = vadd.f32 %v4300_v37, %v4286_v54 }
 0x878   : > { %v4302_v40 = vadd.f32 %v4301_v10, %v4287_v56  ;;  %v10415_v56 = vpop.permute.xlu1 %4341 }
 0x87a   : > { %v4303_v6 = vadd.f32 %v4302_v40, %v4288_v19 }
 0x87c   : > { %v4304_v48 = vadd.f32 %v4303_v6, %v4289_v52  ;;  %v10417_v61 = vpop.permute.xlu1 %4369  ;;  %v10419_v52 = vpop.permute.xlu0 %4346 }
 0x87e   : > { %v4305_v12 = vadd.f32 %v4304_v48, %v4290_v0 }
 0x880   : > { %v4306_v4 = vadd.f32 %v4305_v12, %v4291_v34 }
 0x882   : > { %v4307_v8 = vadd.f32 %v4306_v4, %v4292_v36 }
 0x884   : > { %4308 = vadd.xlane.f32.xlu1 %v4307_v8 }
 0x90d   : > { %v4309_v40 = vpop.xlane.xlu1 %4308 }
 0x90e   : > { %v4310_v59 = vrot.slane %v4309_v40, 4 }
 0x910   : > { %v4311_v22 = vadd.f32 %v4310_v59, %v4309_v40 }
 0x912   : > { %v4312_v2 = vrot.slane %v4311_v22, 2 }
 0x914   : > { %v4313_v63 = vadd.f32 %v4312_v2, %v4311_v22  ;;  %v10438_v22 = vpop.permute.xlu0 %4374 }
 0x916   : > { %v4314_v26 = vrot.slane %v4313_v63, 1 }
 0x918   : > { %v4315_v54 = vadd.f32 %v4314_v26, %v4313_v63 }
 0x91a   : > { %6938 = vpush %v4315_v54 }
 0x94b   : > { %s6939_s24 = spop %6938 }
 0x94c   : > { %v4317_v37 = vstv %s6939_s24 }
 0x94d   : > { %v4318_v10 = vmul.f32 6.1035156e-05, %v4317_v37 }
 0x94f   : > { %v4319_v19 = vadd.f32 1e-05, %v4318_v10 }
 0x951   : > { %7002 = vrsqrt.f32 %v4319_v19  ;;  %v12201_v19 = vld [vmem:[#allocation7_spill] sm:$0xff] }
 0x95e   : > { %v10421_v6 = vpop.eup %7002 }
 0x95f   : > { %v4331_v0 = vmul.f32 %v10421_v6, %v4271_v39  ;;  %v4330_v48 = vmul.f32 %v10421_v6, %v4270_v28  ;;  %v4322_v34 = vmul.f32 %v10421_v6, %v10372_v15  ;;  %v4329_v12 = vmul.f32 %v10421_v6, %v4269_v41 }
 0x960   : > { %v4321_v36 = vmul.f32 %v10421_v6, %v10370_v35  ;;  %v4323_v4 = vmul.f32 %v10421_v6, %v10374_v57  ;;  %v4333_v8 = vmul.f32 %v10421_v6, %v4273_v27  ;;  %v4332_v40 = vmul.f32 %v10421_v6, %v4272_v14 }
 0x961   : > { %v4359_v59 = vmul.f32 %v10419_v52, %v4331_v0  ;;  %v4358_v39 = vmul.f32 %v10419_v52, %v4330_v48  ;;  %v4350_v28 = vmul.f32 %v10415_v56, %v4322_v34  ;;  %v4357_v15 = vmul.f32 %v10419_v52, %v4329_v12  ;;  %v12202_v48 = vld [vmem:[#allocation9_spill] sm:$0xff] }
 0x962   : > { %v4349_v41 = vmul.f32 %v10415_v56, %v4321_v36  ;;  %v4351_v35 = vmul.f32 %v10415_v56, %v4323_v4  ;;  %v4361_v57 = vmul.f32 %v10419_v52, %v4333_v8  ;;  %v4360_v27 = vmul.f32 %v10419_v52, %v4332_v40  ;;  %v12203_v12 = vld [vmem:[#allocation5_spill] sm:$0xff]  ;;  %v12204_v4 = vld [vmem:[#allocation8_spill] sm:$0xff]  ;;  %v12205_v40 = vld [vmem:[#allocation3_spill] sm:$0xff] }
 0x963   : > { %v4387_v14 = vadd.f32 %v10438_v22, %v4359_v59  ;;  %v4386_v2 = vadd.f32 %v10438_v22, %v4358_v39  ;;  %v4378_v63 = vadd.f32 %v10417_v61, %v4350_v28  ;;  %v4385_v26 = vadd.f32 %v10438_v22, %v4357_v15  ;;  %v12206_v39 = vld [vmem:[#allocation4_spill] sm:$0xff] }
 0x964   : > { %v4377_v54 = vadd.f32 %v10417_v61, %v4349_v41  ;;  %v4379_v37 = vadd.f32 %v10417_v61, %v4351_v35  ;;  %v4389_v10 = vadd.f32 %v10438_v22, %v4361_v57  ;;  %v4388_v35 = vadd.f32 %v10438_v22, %v4360_v27 }
 0x965   : > { %v10452_v0 = vadd.f32 %v4387_v14, %v12201_v19  ;;  %v10455_v34 = vadd.f32 %v4386_v2, %v12202_v48  ;;  %v10458_v36 = vadd.f32 %v4378_v63, %v12203_v12  ;;  %v10461_v8 = vadd.f32 %v4385_v26, %v12204_v4  ;;  %v12207_v2 = vld [vmem:[#allocation25_spill] sm:$0xff] }
 0x966   : > { %v10464_v59 = vadd.f32 %v4377_v54, %v12205_v40  ;;  %v10467_v28 = vadd.f32 %v4379_v37, %v12206_v39  ;;  %v10475_v63 = vadd.f32 %v4389_v10, %v12207_v2  ;;  %v12208_v10 = vld [vmem:[#allocation10_spill] sm:$0xff] }
 0x967   : > { %v4435_v15 = vmul.f32 0.044715, %v10452_v0  ;;  %v4434_v41 = vmul.f32 0.044715, %v10455_v34  ;;  %v4426_v57 = vmul.f32 0.044715, %v10458_v36  ;;  %v10487_v39 = vadd.f32 %v4388_v35, %v12208_v10 }
 0x968   : > { %v4433_v14 = vmul.f32 0.044715, %v10461_v8  ;;  %v4425_v37 = vmul.f32 0.044715, %v10464_v59  ;;  %v4427_v12 = vmul.f32 0.044715, %v10467_v28 }
 0x969   : > { %v4451_v26 = vmul.f32 %v4435_v15, %v10452_v0  ;;  %v4450_v54 = vmul.f32 %v4434_v41, %v10455_v34  ;;  %v4442_v19 = vmul.f32 %v4426_v57, %v10458_v36  ;;  %v4437_v57 = vmul.f32 0.044715, %v10475_v63 }
 0x96a   : > { %v4449_v48 = vmul.f32 %v4433_v14, %v10461_v8  ;;  %v4441_v40 = vmul.f32 %v4425_v37, %v10464_v59  ;;  %v4443_v2 = vmul.f32 %v4427_v12, %v10467_v28  ;;  %v4436_v30 = vmul.f32 0.044715, %v10487_v39 }
 0x96b   : > { %v4467_v27 = vmul.f32 %v4451_v26, %v10452_v0  ;;  %v4466_v4 = vmul.f32 %v4450_v54, %v10455_v34  ;;  %v4458_v15 = vmul.f32 %v4442_v19, %v10458_v36  ;;  %v4453_v19 = vmul.f32 %v4437_v57, %v10475_v63 }
 0x96c   : > { %v4465_v41 = vmul.f32 %v4449_v48, %v10461_v8  ;;  %v4457_v26 = vmul.f32 %v4441_v40, %v10464_v59  ;;  %v4459_v35 = vmul.f32 %v4443_v2, %v10467_v28  ;;  %v4324_v2 = vmul.f32 %v10421_v6, %v10380_v21 }
 0x96d   : > { %v4483_v14 = vadd.f32 %v4467_v27, %v10452_v0  ;;  %v4482_v18 = vadd.f32 %v4466_v4, %v10455_v34  ;;  %v4474_v54 = vadd.f32 %v4458_v15, %v10458_v36  ;;  %v4469_v40 = vmul.f32 %v4453_v19, %v10475_v63  ;;  %v12209_v19 = vld [vmem:[#allocation6_spill] sm:$0xff] }
 0x96e   : > { %v4481_v37 = vadd.f32 %v4465_v41, %v10461_v8  ;;  %v4473_v12 = vadd.f32 %v4457_v26, %v10464_v59  ;;  %v4475_v4 = vadd.f32 %v4459_v35, %v10467_v28  ;;  %v4452_v41 = vmul.f32 %v4436_v30, %v10487_v39 }
 0x96f   : > { %v4499_v10 = vmul.f32 0.7978846, %v4483_v14  ;;  %v4498_v48 = vmul.f32 0.7978846, %v4482_v18  ;;  %v4490_v32 = vmul.f32 0.7978846, %v4474_v54  ;;  %v4325_v18 = vmul.f32 %v10421_v6, %v10382_v51 }
 0x970   : > { %v4497_v27 = vmul.f32 0.7978846, %v4481_v37  ;;  %v4489_v15 = vmul.f32 0.7978846, %v4473_v12  ;;  %v4491_v57 = vmul.f32 0.7978846, %v4475_v4  ;;  %v4468_v14 = vmul.f32 %v4452_v41, %v10487_v39 }
 0x971   : > { %7004 = vtanh.f32 %v4499_v10  ;;  %v4352_v26 = vmul.f32 %v10415_v56, %v4324_v2  ;;  %v4353_v54 = vmul.f32 %v10415_v56, %v4325_v18  ;;  %v4485_v37 = vadd.f32 %v4469_v40, %v10475_v63 }
 0x972   : > { %7006 = vtanh.f32 %v4498_v48  ;;  %v4484_v21 = vadd.f32 %v4468_v14, %v10487_v39  ;;  %v4419_v14 = vmul.f32 0.5, %v10452_v0  ;;  %v4410_v0 = vmul.f32 0.5, %v10458_v36 }
 0x973   : > { %7008 = vtanh.f32 %v4490_v32  ;;  %v4380_v30 = vadd.f32 %v10417_v61, %v4352_v26  ;;  %v4381_v35 = vadd.f32 %v10417_v61, %v4353_v54  ;;  %v12210_v32 = vld [vmem:[#allocation11_spill] sm:$0xff]  ;;  %v4501_v48 = vmul.f32 0.7978846, %v4485_v37 }
 0x974   : > { %7010 = vtanh.f32 %v4497_v27  ;;  %v4500_v27 = vmul.f32 0.7978846, %v4484_v21  ;;  %v4411_v36 = vmul.f32 0.5, %v10467_v28  ;;  %v4421_v28 = vmul.f32 0.5, %v10475_v63 }
 0x975   : > { %7012 = vtanh.f32 %v4489_v15  ;;  %v10517_v51 = vadd.f32 %v4380_v30, %v12209_v19  ;;  %v10520_v10 = vadd.f32 %v4381_v35, %v12210_v32  ;;  %v4418_v30 = vmul.f32 0.5, %v10455_v34 }
 0x976   : > { %7014 = vtanh.f32 %v4491_v57  ;;  %v4417_v34 = vmul.f32 0.5, %v10461_v8 }
 0x977   : > { %v4428_v12 = vmul.f32 0.044715, %v10517_v51  ;;  %v4429_v4 = vmul.f32 0.044715, %v10520_v10  ;;  %7016 = vtanh.f32 %v4501_v48  ;;  %v4412_v63 = vmul.f32 0.5, %v10517_v51 }
 0x978   : > { %7018 = vtanh.f32 %v4500_v27 }
 0x979   : > { %v4444_v40 = vmul.f32 %v4428_v12, %v10517_v51  ;;  %v4445_v15 = vmul.f32 %v4429_v4, %v10520_v10 }
 0x97b   : > { %v4460_v41 = vmul.f32 %v4444_v40, %v10517_v51  ;;  %v4461_v57 = vmul.f32 %v4445_v15, %v10520_v10 }
 0x97d   : > { %v4476_v54 = vadd.f32 %v4460_v41, %v10517_v51  ;;  %v4477_v40 = vadd.f32 %v4461_v57, %v10520_v10  ;;  %v4409_v57 = vmul.f32 0.5, %v10464_v59  ;;  %v4335_v51 = vmul.f32 %v10421_v6, %v10405_v50 }
 0x97e   : > { %v7005_v2 = vpop.eup %7004 }
 0x97f   : > { %v7007_v18 = vpop.eup %7006  ;;  %v4531_v26 = vadd.f32 1.0, %v7005_v2  ;;  %v4492_v48 = vmul.f32 0.7978846, %v4476_v54 }
 0x980   : > { %v7009_v37 = vpop.eup %7008  ;;  %v4530_v21 = vadd.f32 1.0, %v7007_v18 }
 0x981   : > { %v7011_v35 = vpop.eup %7010  ;;  %v10531_v19 = vmul.f32 %v4531_v26, %v4419_v14  ;;  %v4522_v32 = vadd.f32 1.0, %v7009_v37  ;;  %7020 = vtanh.f32 %v4492_v48  ;;  %v4493_v26 = vmul.f32 0.7978846, %v4477_v40 }
 0x982   : > { %v7013_v12 = vpop.eup %7012  ;;  %v10533_v4 = vmul.f32 %v4530_v21, %v4418_v30  ;;  %v4529_v27 = vadd.f32 1.0, %v7011_v35  ;;  %v4420_v35 = vmul.f32 0.5, %v10487_v39 }
 0x983   : > { %v7015_v15 = vpop.eup %7014  ;;  %5197 = vrot.lane.b32.xlu1 %v10531_v19, %s7084_s17  ;;  %v10542_v41 = vmul.f32 %v4522_v32, %v4410_v0  ;;  %v4521_v2 = vadd.f32 1.0, %v7013_v12  ;;  %7022 = vtanh.f32 %v4493_v26  ;;  %v4413_v0 = vmul.f32 0.5, %v10520_v10 }
 0x984   : > { %5195 = vrot.lane.b32.xlu0 %v10533_v4, %s7084_s17  ;;  %v10544_v18 = vmul.f32 %v4529_v27, %v4417_v34  ;;  %v4523_v14 = vadd.f32 1.0, %v7015_v15  ;;  %v7017_v8 = vpop.eup %7016  ;;  %v4334_v10 = vmul.f32 %v10421_v6, %v10403_v11  ;;  %v4327_v11 = vmul.f32 %v10421_v6, %v10390_v13 }
 0x985   : > { %v10552_v54 = vmul.f32 %v4521_v2, %v4409_v57  ;;  %v7019_v30 = vpop.eup %7018  ;;  %v4533_v21 = vadd.f32 1.0, %v7017_v8  ;;  %v4363_v2 = vmul.f32 %v10419_v52, %v4335_v51  ;;  %v4326_v57 = vmul.f32 %v10421_v6, %v10386_v38 }
 0x986   : > { %v10554_v37 = vmul.f32 %v4523_v14, %v4411_v36  ;;  %v4532_v59 = vadd.f32 1.0, %v7019_v30  ;;  %v4362_v14 = vmul.f32 %v10419_v52, %v4334_v10  ;;  %v12212_v36 = vld [vmem:[#allocation27_spill] sm:$0xff]  ;;  %v4355_v30 = vmul.f32 %v10415_v56, %v4327_v11 }
 0x987   : > { %5179 = vrot.lane.b32.xlu1 %v10542_v41, %s7084_s17  ;;  %v10566_v32 = vmul.f32 %v4533_v21, %v4421_v28  ;;  %v4391_v50 = vadd.f32 %v10438_v22, %v4363_v2  ;;  %v12213_v21 = vld [vmem:[#allocation32_spill] sm:$0xff]  ;;  %v4354_v13 = vmul.f32 %v10415_v56, %v4326_v57  ;;  %v4336_v10 = vmul.f32 %v10421_v6, %v10407_v25 }
 0x988   : > { %5193 = vrot.lane.b32.xlu0 %v10544_v18, %s7084_s17  ;;  %v10568_v12 = vmul.f32 %v4532_v59, %v4420_v35  ;;  %v4390_v26 = vadd.f32 %v10438_v22, %v4362_v14  ;;  %v4383_v28 = vadd.f32 %v10417_v61, %v4355_v30 }
 0x989   : > { %v10665_v8 = vadd.f32 %v4391_v50, %v12212_v36  ;;  %v4328_v50 = vmul.f32 %v10421_v6, %v10394_v62  ;;  %v4364_v57 = vmul.f32 %v10419_v52, %v4336_v10 }
 0x98a   : > { %v10669_v59 = vadd.f32 %v4390_v26, %v12213_v21 }
 0x98b   : > { %5177 = vrot.lane.b32.xlu1 %v10552_v54, %s7084_s17  ;;  %v4439_v38 = vmul.f32 0.044715, %v10665_v8  ;;  %v4356_v30 = vmul.f32 %v10415_v56, %v4328_v50  ;;  %v4392_v21 = vadd.f32 %v10438_v22, %v4364_v57 }
 0x98c   : > { %5181 = vrot.lane.b32.xlu0 %v10554_v37, %s7084_s17  ;;  %v4438_v35 = vmul.f32 0.044715, %v10669_v59 }
 0x98e   : > { %v7021_v48 = vpop.eup %7020 }
 0x98f   : > { %5101 = vrot.lane.b32.xlu1 %v10531_v19, %s7085_s21  ;;  %v4524_v27 = vadd.f32 1.0, %v7021_v48  ;;  %v4382_v48 = vadd.f32 %v10417_v61, %v4354_v13 }
 0x990   : > { %5099 = vrot.lane.b32.xlu0 %v10533_v4, %s7085_s21  ;;  %v7023_v40 = vpop.eup %7022 }
 0x991   : > { %v10579_v39 = vmul.f32 %v4524_v27, %v4412_v63  ;;  %v4525_v15 = vadd.f32 1.0, %v7023_v40  ;;  %v4455_v27 = vmul.f32 %v4439_v38, %v10665_v8  ;;  %v12214_v40 = vld [vmem:[#allocation12_spill] sm:$0xff]  ;;  %v4384_v38 = vadd.f32 %v10417_v61, %v4356_v30 }
 0x992   : > { %v10686_v63 = vadd.f32 %v4383_v28, %v12214_v40  ;;  %v12217_v40 = vld [vmem:[#allocation16_spill] sm:$0xff] }
 0x993   : > { %5201 = vrot.lane.b32.xlu1 %v10566_v32, %s7084_s17  ;;  %v10586_v34 = vmul.f32 %v4525_v15, %v4413_v0  ;;  %v4454_v15 = vmul.f32 %v4438_v35, %v10669_v59  ;;  %v12215_v0 = vld [vmem:[#allocation14_spill] sm:$0xff]  ;;  %v4471_v2 = vmul.f32 %v4455_v27, %v10665_v8  ;;  %v12216_v35 = vld [vmem:[#allocation35_spill] sm:$0xff] }
 0x994   : > { %5199 = vrot.lane.b32.xlu0 %v10568_v12, %s7084_s17  ;;  %v10690_v51 = vadd.f32 %v4382_v48, %v12215_v0  ;;  %v4431_v14 = vmul.f32 0.044715, %v10686_v63  ;;  %v10723_v48 = vadd.f32 %v4392_v21, %v12216_v35 }
 0x995   : > { %v4470_v11 = vmul.f32 %v4454_v15, %v10669_v59  ;;  %v4487_v25 = vadd.f32 %v4471_v2, %v10665_v8  ;;  %v10731_v15 = vadd.f32 %v4384_v38, %v12217_v40 }
 0x996   : > { %v4430_v26 = vmul.f32 0.044715, %v10690_v51  ;;  %v4447_v36 = vmul.f32 %v4431_v14, %v10686_v63  ;;  %v4440_v10 = vmul.f32 0.044715, %v10723_v48  ;;  %v12218_v14 = vld [vmem:[#allocation38_spill] sm:$0xff] }
 0x997   : > { %5083 = vrot.lane.b32.xlu1 %v10542_v41, %s7085_s21  ;;  %v4486_v62 = vadd.f32 %v4470_v11, %v10669_v59  ;;  %v4503_v52 = vmul.f32 0.7978846, %v4487_v25  ;;  %v4432_v57 = vmul.f32 0.044715, %v10731_v15 }
 0x998   : > { %5097 = vrot.lane.b32.xlu0 %v10544_v18, %s7085_s21  ;;  %v4446_v6 = vmul.f32 %v4430_v26, %v10690_v51  ;;  %v4463_v13 = vmul.f32 %v4447_v36, %v10686_v63  ;;  %v4456_v30 = vmul.f32 %v4440_v10, %v10723_v48 }
 0x999   : > { %v4502_v28 = vmul.f32 0.7978846, %v4486_v62  ;;  %7024 = vtanh.f32 %v4503_v52 }
 0x99a   : > { %v4462_v56 = vmul.f32 %v4446_v6, %v10690_v51  ;;  %v4479_v27 = vadd.f32 %v4463_v13, %v10686_v63  ;;  %v12219_v6 = vld [vmem:[#allocation36_spill] sm:$0xff]  ;;  %v4448_v13 = vmul.f32 %v4432_v57, %v10731_v15 }
 0x99b   : > { %5183 = vrot.lane.b32.xlu1 %v10579_v39, %s7084_s17  ;;  %7026 = vtanh.f32 %v4502_v28 }
 0x99c   : > { %5085 = vrot.lane.b32.xlu0 %v10554_v37, %s7085_s21  ;;  %v4478_v0 = vadd.f32 %v4462_v56, %v10690_v51  ;;  %v4495_v26 = vmul.f32 0.7978846, %v4479_v27  ;;  %v4472_v56 = vmul.f32 %v4456_v30, %v10723_v48  ;;  %v4464_v10 = vmul.f32 %v4448_v13, %v10731_v15 }
 0x99e   : > { %v4494_v36 = vmul.f32 0.7978846, %v4478_v0  ;;  %7028 = vtanh.f32 %v4495_v26 }
 0x99f   : > { %5081 = vrot.lane.b32.xlu1 %v10552_v54, %s7085_s21 }
 0x9a0   : > { %5185 = vrot.lane.b32.xlu0 %v10586_v34, %s7084_s17  ;;  %7030 = vtanh.f32 %v4494_v36 }
 0x9a3   : > { %5005 = vrot.lane.b32.xlu1 %v10531_v19, %s7086_s22 }
 0x9a4   : > { %5003 = vrot.lane.b32.xlu0 %v10533_v4, %s7086_s22 }
 0x9a7   : > { %5105 = vrot.lane.b32.xlu1 %v10566_v32, %s7085_s21 }
 0x9a8   : > { %5103 = vrot.lane.b32.xlu0 %v10568_v12, %s7085_s21 }
 0x9ab   : > { %4987 = vrot.lane.b32.xlu1 %v10542_v41, %s7086_s22 }
 0x9ac   : > { %5001 = vrot.lane.b32.xlu0 %v10544_v18, %s7086_s22 }
 0x9af   : > { %5087 = vrot.lane.b32.xlu1 %v10579_v39, %s7085_s21 }
 0x9b0   : > { %4989 = vrot.lane.b32.xlu0 %v10554_v37, %s7086_s22 }
 0x9b3   : > { %4985 = vrot.lane.b32.xlu1 %v10552_v54, %s7086_s22 }
 0x9b4   : > { %5089 = vrot.lane.b32.xlu0 %v10586_v34, %s7085_s21 }
 0x9b7   : > { %5009 = vrot.lane.b32.xlu1 %v10566_v32, %s7086_s22 }
 0x9b8   : > { %5007 = vrot.lane.b32.xlu0 %v10568_v12, %s7086_s22 }
 0x9bb   : > { %4993 = vrot.lane.b32.xlu1 %v10586_v34, %s7086_s22 }
 0x9bc   : > { %4991 = vrot.lane.b32.xlu0 %v10579_v39, %s7086_s22 }
 0x9bf   : > { %4875 = vrot.lane.b32.xlu1 %v10533_v4, %s7087_s23 }
 0x9c0   : > { %4873 = vrot.lane.b32.xlu0 %v10544_v18, %s7087_s23 }
 0x9c3   : > { %4859 = vrot.lane.b32.xlu1 %v10542_v41, %s7087_s23 }
 0x9c4   : > { %4857 = vrot.lane.b32.xlu0 %v10552_v54, %s7087_s23 }
 0x9c7   : > { %4779 = vrot.lane.b32.xlu1 %v10533_v4, %s12211_s20 }
 0x9c8   : > { %4777 = vrot.lane.b32.xlu0 %v10544_v18, %s12211_s20 }
 0x9cb   : > { %4879 = vrot.lane.b32.xlu1 %v10568_v12, %s7087_s23 }
 0x9cc   : > { %4877 = vrot.lane.b32.xlu0 %v10531_v19, %s7087_s23 }
 0x9cf   : > { %4763 = vrot.lane.b32.xlu1 %v10542_v41, %s12211_s20 }
 0x9d0   : > { %4761 = vrot.lane.b32.xlu0 %v10552_v54, %s12211_s20 }
 0x9d3   : > { %4863 = vrot.lane.b32.xlu1 %v10579_v39, %s7087_s23 }
 0x9d4   : > { %4861 = vrot.lane.b32.xlu0 %v10554_v37, %s7087_s23 }
 0x9d7   : > { %4683 = vrot.lane.b32.xlu1 %v10533_v4, %s12154_s26 }
 0x9d8   : > { %4681 = vrot.lane.b32.xlu0 %v10544_v18, %s12154_s26 }
 0x9db   : > { %4783 = vrot.lane.b32.xlu1 %v10568_v12, %s12211_s20 }
 0x9dc   : > { %4781 = vrot.lane.b32.xlu0 %v10531_v19, %s12211_s20 }
 0x9df   : > { %4667 = vrot.lane.b32.xlu1 %v10542_v41, %s12154_s26 }
 0x9e0   : > { %4665 = vrot.lane.b32.xlu0 %v10552_v54, %s12154_s26 }
 0x9e3   : > { %4767 = vrot.lane.b32.xlu1 %v10579_v39, %s12211_s20 }
 0x9e4   : > { %4765 = vrot.lane.b32.xlu0 %v10554_v37, %s12211_s20 }
 0x9e7   : > { %4587 = vrot.lane.b32.xlu1 %v10533_v4, %s12155_s27 }
 0x9e8   : > { %4585 = vrot.lane.b32.xlu0 %v10544_v18, %s12155_s27 }
 0x9eb   : > { %4687 = vrot.lane.b32.xlu1 %v10568_v12, %s12154_s26 }
 0x9ec   : > { %4685 = vrot.lane.b32.xlu0 %v10531_v19, %s12154_s26 }
 0x9ef   : > { %4571 = vrot.lane.b32.xlu1 %v10542_v41, %s12155_s27 }
 0x9f0   : > { %4569 = vrot.lane.b32.xlu0 %v10552_v54, %s12155_s27 }
 0x9f3   : > { %4671 = vrot.lane.b32.xlu1 %v10579_v39, %s12154_s26 }
 0x9f4   : > { %4669 = vrot.lane.b32.xlu0 %v10554_v37, %s12154_s26 }
 0x9f5   : > { %v5198_v22 = vpop.permute.xlu1 %5197 }
 0x9f6   : > { %v5196_v61 = vpop.permute.xlu0 %5195 }
 0x9f7   : > { %v5217_v2 = vsel %vm1965_vm1, %v5196_v61, %v5198_v22  ;;  %4591 = vrot.lane.b32.xlu1 %v10568_v12, %s12155_s27 }
 0x9f8   : > { %4589 = vrot.lane.b32.xlu0 %v10531_v19, %s12155_s27  ;;  %v5250_v50 = vmul.f32 %v5217_v2, %v12218_v14  ;;  %v7025_v2 = vpop.eup %7024 }
 0x9f9   : > { %v5180_v11 = vpop.permute.xlu1 %5179  ;;  %v7027_v26 = vpop.eup %7026 }
 0x9fa   : > { %5518 = vmatprep.subr.mxu0 %v5250_v50  ;;  %v5194_v25 = vpop.permute.xlu0 %5193  ;;  %v4534_v13 = vadd.f32 1.0, %v7027_v26  ;;  %v4422_v26 = vmul.f32 0.5, %v10669_v59 }
 0x9fb   : > { %v5216_v62 = vsel %vm1965_vm1, %v5194_v25, %v5196_v61  ;;  %5293 = vrot.lane.b32.xlu1 %v10531_v19, %s12157_s29  ;;  %v10765_v61 = vld [vmem:[%s11728_s9 + $0x8] sm:$0xff] }
 0x9fc   : > { %v5249_v21 = vmul.f32 %v5216_v62, %v12219_v6  ;;  %5291 = vrot.lane.b32.xlu0 %v10533_v4, %s12157_s29  ;;  %6920 = vmatprep.mubr.msk.f32.mxu0 %vm2339_vm0, %v10765_v61  ;;  %v12220_v25 = vld [vmem:[#allocation40_spill] sm:$0xff]  ;;  %v4535_v62 = vadd.f32 1.0, %v7025_v2 }
 0x9fd   : > { %v5178_v52 = vpop.permute.xlu1 %5177  ;;  %6921 = vmatprep.mubr.msk.f32.mxu1 %vm2339_vm0, %v10765_v61 }
 0x9fe   : > { %v5209_v38 = vsel %vm1965_vm1, %v5178_v52, %v5180_v11  ;;  %5519 = vmatpush1.msra.mxu0 %v5249_v21  ;;  %v10751_v28 = vpop.permute.xlu0 %5181  ;;  %v4480_v21 = vadd.f32 %v4464_v10, %v10731_v15  ;;  %v12222_v10 = vld [vmem:[#allocation71_spill] sm:$0xff] }
 0x9ff   : > { %v5241_v35 = vmul.f32 %v5209_v38, %v12219_v6  ;;  %v5210_v27 = vsel %vm1965_vm1, %v5180_v11, %v10751_v28  ;;  %4573 = vrot.lane.b32.xlu1 %v10554_v37, %s12155_s27  ;;  %v4488_v11 = vadd.f32 %v4472_v56, %v10723_v48  ;;  %v10798_v6 = vmul.f32 %v4534_v13, %v4422_v26 }
 0xa00   : > { %5289 = vrot.lane.b32.xlu0 %v10544_v18, %s12157_s29  ;;  %v5242_v40 = vmul.f32 %v5210_v27, %v12218_v14  ;;  %v4423_v27 = vmul.f32 0.5, %v10665_v8  ;;  %v7029_v14 = vpop.eup %7028 }
 0xa01   : > { %v10767_v0 = vpop.permute.xlu1 %5101  ;;  %v4504_v38 = vmul.f32 0.7978846, %v4488_v11  ;;  %v7031_v8 = vpop.eup %7030 }
 0xa02   : > { %5520 = vmatprep.subr.mxu0 %v5242_v40  ;;  %v5100_v50 = vpop.permute.xlu0 %5099  ;;  %v12221_v40 = vld [vmem:[#allocation72_spill] sm:$0xff]  ;;  %v4526_v13 = vadd.f32 1.0, %v7031_v8 }
 0xa03   : > { %v5121_v57 = vsel %vm1836_vm2, %v5100_v50, %v10767_v0  ;;  %5521 = vmatpush1.msra.mxu0 %v5241_v35  ;;  %5275 = vrot.lane.b32.xlu1 %v10542_v41, %s12157_s29  ;;  %7032 = vtanh.f32 %v4504_v38 }
 0xa04   : > { %4575 = vrot.lane.b32.xlu0 %v10579_v39, %s12155_s27  ;;  %v5154_v36 = vmul.f32 %v5121_v57, %v12220_v25 }
 0xa05   : > { %v10782_v30 = vpop.permute.xlu1 %5201 }
 0xa06   : > { %5522 = vmatprep.subr.mxu0 %v5154_v36  ;;  %v5200_v52 = vpop.permute.xlu0 %5199  ;;  %v10796_v36 = vmul.f32 %v4535_v62, %v4423_v27  ;;  %v4527_v62 = vadd.f32 1.0, %v7029_v14  ;;  %v4414_v14 = vmul.f32 0.5, %v10690_v51 }
 0xa07   : > { %v5218_v56 = vsel %vm1965_vm1, %v5198_v22, %v5200_v52  ;;  %v5219_v35 = vsel %vm1965_vm1, %v5200_v52, %v10782_v30  ;;  %5273 = vrot.lane.b32.xlu1 %v10552_v54, %s12157_s29  ;;  %v4496_v22 = vmul.f32 0.7978846, %v4480_v21 }
 0xa08   : > { %v5251_v57 = vmul.f32 %v5218_v56, %v12221_v40  ;;  %5277 = vrot.lane.b32.xlu0 %v10554_v37, %s12157_s29  ;;  %v5252_v2 = vmul.f32 %v5219_v35, %v12222_v10  ;;  %v12223_v35 = vld [vmem:[#allocation39_spill] sm:$0xff] }
 0xa09   : > { %v5084_v11 = vpop.permute.xlu1 %5083  ;;  %7034 = vtanh.f32 %v4496_v22 }
 0xa0a   : > { %5589 = vmatprep.subr.mxu1 %v5252_v2  ;;  %v5098_v52 = vpop.permute.xlu0 %5097 }
 0xa0b   : > { %v5120_v56 = vsel %vm1836_vm2, %v5098_v52, %v5100_v50  ;;  %5590 = vmatpush1.msra.mxu1 %v5251_v57  ;;  %5205 = vrot.lane.b32.xlu1 %v10796_v36, %s7084_s17  ;;  %v4415_v50 = vmul.f32 0.5, %v10686_v63  ;;  %v10824_v52 = vmul.f32 %v4526_v13, %v4414_v14 }
 0xa0c   : > { %v5153_v44 = vmul.f32 %v5120_v56, %v12223_v35  ;;  %5203 = vrot.lane.b32.xlu0 %v10798_v6, %s7084_s17 }
 0xa0d   : > { %v5184_v59 = vpop.permute.xlu1 %5183 }
 0xa0e   : > { %5523 = vmatpush1.msra.mxu0 %v5153_v44  ;;  %v10806_v21 = vpop.permute.xlu0 %5085  ;;  %v10817_v44 = vmul.f32 %v4527_v62, %v4415_v50  ;;  %v5211_v2 = vsel %vm1965_vm1, %v10751_v28, %v5184_v59 }
 0xa0f   : > { %v5114_v38 = vsel %vm1836_vm2, %v5084_v11, %v10806_v21  ;;  %5297 = vrot.lane.b32.xlu1 %v10566_v32, %s12157_s29  ;;  %v5243_v28 = vmul.f32 %v5211_v2, %v12221_v40 }
 0xa10   : > { %5295 = vrot.lane.b32.xlu0 %v10568_v12, %s12157_s29  ;;  %v5146_v27 = vmul.f32 %v5114_v38, %v12220_v25  ;;  %v7033_v62 = vpop.eup %7032 }
 0xa11   : > { %v5082_v57 = vpop.permute.xlu1 %5081 }
 0xa12   : > { %v5113_v26 = vsel %vm1836_vm2, %v5082_v57, %v5084_v11  ;;  %5524 = vmatprep.subr.mxu0 %v5146_v27  ;;  %v10822_v22 = vpop.permute.xlu0 %5185  ;;  %v4536_v57 = vadd.f32 1.0, %v7033_v62 }
 0xa13   : > { %v5145_v63 = vmul.f32 %v5113_v26, %v12223_v35  ;;  %v5212_v8 = vsel %vm1965_vm1, %v5184_v59, %v10822_v22  ;;  %5189 = vrot.lane.b32.xlu1 %v10817_v44, %s7084_s17  ;;  %v12224_v59 = vld [vmem:[#allocation44_spill] sm:$0xff] }
 0xa14   : > { %5187 = vrot.lane.b32.xlu0 %v10824_v52, %s7084_s17  ;;  %v5244_v51 = vmul.f32 %v5212_v8, %v12222_v10  ;;  %v12227_v10 = vld [vmem:[#allocation42_spill] sm:$0xff] }
 0xa15   : > { %v5006_v11 = vpop.permute.xlu1 %5005  ;;  %5525 = vmatpush1.msra.mxu0 %v5145_v63  ;;  %v12225_v63 = vld [vmem:[#allocation75_spill] sm:$0xff] }
 0xa16   : > { %5591 = vmatprep.subr.mxu1 %v5244_v51  ;;  %v5004_v56 = vpop.permute.xlu0 %5003  ;;  %v7035_v27 = vpop.eup %7034  ;;  %v12226_v51 = vld [vmem:[#allocation74_spill] sm:$0xff] }
 0xa17   : > { %v5025_v13 = vsel %vm1707_vm3, %v5004_v56, %v5006_v11  ;;  %5592 = vmatpush1.msra.mxu1 %v5243_v28  ;;  %5281 = vrot.lane.b32.xlu1 %v10586_v34, %s12157_s29  ;;  %v4528_v62 = vadd.f32 1.0, %v7035_v27 }
 0xa18   : > { %5279 = vrot.lane.b32.xlu0 %v10579_v39, %s12157_s29  ;;  %v5058_v38 = vmul.f32 %v5025_v13, %v12224_v59  ;;  %v4424_v13 = vmul.f32 0.5, %v10723_v48 }
 0xa19   : > { %v10841_v50 = vpop.permute.xlu1 %5105 }
 0xa1a   : > { %5526 = vmatprep.subr.mxu0 %v5058_v38  ;;  %v5104_v14 = vpop.permute.xlu0 %5103 }
 0xa1b   : > { %v5122_v2 = vsel %vm1836_vm2, %v10767_v0, %v5104_v14  ;;  %v5123_v26 = vsel %vm1836_vm2, %v5104_v14, %v10841_v50  ;;  %5109 = vrot.lane.b32.xlu1 %v10796_v36, %s7085_s21  ;;  %v10854_v0 = vmul.f32 %v4536_v57, %v4424_v13 }
 0xa1c   : > { %v5155_v8 = vmul.f32 %v5122_v2, %v12225_v63  ;;  %5107 = vrot.lane.b32.xlu0 %v10798_v6, %s7085_s21  ;;  %v5156_v28 = vmul.f32 %v5123_v26, %v12226_v51  ;;  %v4416_v2 = vmul.f32 0.5, %v10731_v15 }
 0xa1d   : > { %v4988_v38 = vpop.permute.xlu1 %4987 }
 0xa1e   : > { %5593 = vmatprep.subr.mxu1 %v5156_v28  ;;  %v5002_v40 = vpop.permute.xlu0 %5001  ;;  %v10863_v26 = vmul.f32 %v4528_v62, %v4416_v2 }
 0xa1f   : > { %v5024_v14 = vsel %vm1707_vm3, %v5002_v40, %v5004_v56  ;;  %5594 = vmatpush1.msra.mxu1 %v5155_v8  ;;  %5091 = vrot.lane.b32.xlu1 %v10824_v52, %s7085_s21 }
 0xa20   : > { %v5057_v35 = vmul.f32 %v5024_v14, %v12227_v10  ;;  %5207 = vrot.lane.b32.xlu0 %v10854_v0, %s7084_s17  ;;  %v12228_v14 = vld [vmem:[#allocation45_spill] sm:$0xff] }
 0xa21   : > { %v5088_v48 = vpop.permute.xlu1 %5087 }
 0xa22   : > { %5527 = vmatpush1.msra.mxu0 %v5057_v35  ;;  %v4990_v27 = vpop.permute.xlu0 %4989  ;;  %v5115_v56 = vsel %vm1836_vm2, %v10806_v21, %v5088_v48  ;;  %v4962_v21 = vmul.f32 %v10533_v4, %v12228_v14  ;;  %v4954_v4 = vmul.f32 %v10542_v41, %v12228_v14 }
 0xa23   : > { %v5018_v57 = vsel %vm1707_vm3, %v4988_v38, %v4990_v27  ;;  %5191 = vrot.lane.b32.xlu1 %v10863_v26, %s7084_s17 }
 0xa24   : > { %5093 = vrot.lane.b32.xlu0 %v10817_v44, %s7085_s21  ;;  %v5050_v15 = vmul.f32 %v5018_v57, %v12224_v59 }
 0xa25   : > { %v4986_v40 = vpop.permute.xlu1 %4985 }
 0xa26   : > { %v5017_v8 = vsel %vm1707_vm3, %v4986_v40, %v4988_v38  ;;  %5528 = vmatprep.subr.mxu0 %v5050_v15  ;;  %v10874_v28 = vpop.permute.xlu0 %5089  ;;  %v5147_v38 = vmul.f32 %v5115_v56, %v12225_v63  ;;  %v12230_v56 = vld [vmem:[#allocation77_spill] sm:$0xff] }
 0xa27   : > { %v5049_v35 = vmul.f32 %v5017_v8, %v12227_v10  ;;  %v5116_v13 = vsel %vm1836_vm2, %v5088_v48, %v10874_v28  ;;  %5013 = vrot.lane.b32.xlu1 %v10796_v36, %s7086_s22  ;;  %v12229_v48 = vld [vmem:[#allocation46_spill] sm:$0xff] }
 0xa28   : > { %5011 = vrot.lane.b32.xlu0 %v10798_v6, %s7086_s22  ;;  %v5148_v62 = vmul.f32 %v5116_v13, %v12226_v51  ;;  %v4961_v15 = vmul.f32 %v10544_v18, %v12229_v48  ;;  %v12231_v13 = vld [vmem:[#allocation76_spill] sm:$0xff] }
 0xa29   : > { %v10887_v2 = vpop.permute.xlu1 %5009  ;;  %5529 = vmatpush1.msra.mxu0 %v5049_v35 }
 0xa2a   : > { %5595 = vmatprep.subr.mxu1 %v5148_v62  ;;  %v5008_v57 = vpop.permute.xlu0 %5007  ;;  %5530 = vmatprep.subr.mxu0 %v4962_v21 }
 0xa2b   : > { %v5026_v40 = vsel %vm1707_vm3, %v5006_v11, %v5008_v57  ;;  %v5027_v8 = vsel %vm1707_vm3, %v5008_v57, %v10887_v2  ;;  %5596 = vmatpush1.msra.mxu1 %v5147_v38  ;;  %4995 = vrot.lane.b32.xlu1 %v10824_v52, %s7086_s22  ;;  %v4953_v11 = vmul.f32 %v10552_v54, %v12229_v48 }
 0xa2c   : > { %v5059_v35 = vmul.f32 %v5026_v40, %v12230_v56  ;;  %5111 = vrot.lane.b32.xlu0 %v10854_v0, %s7085_s21  ;;  %5531 = vmatpush1.msra.mxu0 %v4961_v15  ;;  %v5060_v18 = vmul.f32 %v5027_v8, %v12231_v13  ;;  %v12232_v8 = vld [vmem:[#allocation78_spill] sm:$0xff] }
 0xa2d   : > { %5532 = vmatprep.subr.mxu0 %v4954_v4  ;;  %v10904_v62 = vpop.permute.xlu1 %4993 }
 0xa2e   : > { %5597 = vmatprep.subr.mxu1 %v5060_v18  ;;  %v4992_v21 = vpop.permute.xlu0 %4991  ;;  %5533 = vmatpush1.msra.mxu0 %v4953_v11  ;;  %v12233_v18 = vld [vmem:[#allocation79_spill] sm:$0xff] }
 0xa2f   : > { %v5019_v38 = vsel %vm1707_vm3, %v4990_v27, %v4992_v21  ;;  %v5020_v41 = vsel %vm1707_vm3, %v4992_v21, %v10904_v62  ;;  %5598 = vmatpush1.msra.mxu1 %v5059_v35  ;;  %5095 = vrot.lane.b32.xlu1 %v10863_v26, %s7085_s21  ;;  %v4964_v27 = vmul.f32 %v10568_v12, %v12232_v8  ;;  %v12234_v21 = vld [vmem:[#allocation49_spill] sm:$0xff] }
 0xa30   : > { %v5051_v57 = vmul.f32 %v5019_v38, %v12230_v56  ;;  %4997 = vrot.lane.b32.xlu0 %v10817_v44, %s7086_s22  ;;  %v5052_v54 = vmul.f32 %v5020_v41, %v12231_v13  ;;  %v4963_v11 = vmul.f32 %v10531_v19, %v12233_v18  ;;  %v4956_v12 = vmul.f32 %v10579_v39, %v12232_v8  ;;  %v12235_v41 = vld [vmem:[#allocation48_spill] sm:$0xff] }
 0xa31   : > { %v4876_v15 = vpop.permute.xlu1 %4875 }
 0xa32   : > { %5599 = vmatprep.subr.mxu1 %v5052_v54  ;;  %v4874_v40 = vpop.permute.xlu0 %4873 }
 0xa33   : > { %v4896_v4 = vsel %vm1514_vm4, %v4874_v40, %v4876_v15  ;;  %v4920_v35 = vsel %vm1514_vm4, 0.0, %v4874_v40  ;;  %5600 = vmatpush1.msra.mxu1 %v5051_v57  ;;  %4999 = vrot.lane.b32.xlu1 %v10863_v26, %s7086_s22  ;;  %v4955_v57 = vmul.f32 %v10554_v37, %v12233_v18  ;;  %v12239_v18 = vld [vmem:[#allocation80_spill] sm:$0xff] }
 0xa34   : > { %v4929_v38 = vmul.f32 %v4920_v35, %v12234_v21  ;;  %5015 = vrot.lane.b32.xlu0 %v10854_v0, %s7086_s22  ;;  %5601 = vmatprep.subr.mxu1 %v4964_v27  ;;  %v4930_v54 = vmul.f32 %v4896_v4, %v12235_v41 }
 0xa35   : > { %5602 = vmatpush1.msra.mxu1 %v4963_v11  ;;  %v4860_v40 = vpop.permute.xlu1 %4859 }
 0xa36   : > { %5603 = vmatprep.subr.mxu1 %v4956_v12  ;;  %v4858_v13 = vpop.permute.xlu0 %4857  ;;  %5534 = vmatprep.subr.mxu0 %v4930_v54  ;;  %v12237_v54 = vld [vmem:[#allocation50_spill] sm:$0xff] }
 0xa37   : > { %v4889_v19 = vsel %vm1514_vm4, %v4858_v13, %v4860_v40  ;;  %v4919_v35 = vsel %vm1514_vm4, 0.0, %v4858_v13  ;;  %5535 = vmatpush1.msra.mxu0 %v4929_v38  ;;  %5604 = vmatpush1.msra.mxu1 %v4955_v57  ;;  %v12236_v13 = vld [vmem:[#allocation51_spill] sm:$0xff] }
 0xa38   : > { %v4921_v27 = vmul.f32 %v4919_v35, %v12234_v21  ;;  %4883 = vrot.lane.b32.xlu1 %v10798_v6, %s7087_s23  ;;  %4881 = vrot.lane.b32.xlu0 %v10566_v32, %s7087_s23  ;;  %v4922_v39 = vmul.f32 %v4889_v19, %v12235_v41 }
 0xa39   : > { %v4780_v37 = vpop.permute.xlu1 %4779 }
 0xa3a   : > { %v4778_v4 = vpop.permute.xlu0 %4777  ;;  %5536 = vmatprep.subr.mxu0 %v4922_v39 }
 0xa3b   : > { %v4800_v11 = vsel %vm1385_vm5, %v4778_v4, %v4780_v37  ;;  %v4824_v12 = vsel %vm1385_vm5, 0.0, %v4778_v4  ;;  %5537 = vmatpush1.msra.mxu0 %v4921_v27  ;;  %v12238_v27 = vld [vmem:[#allocation81_spill] sm:$0xff] }
 0xa3c   : > { %v4833_v38 = vmul.f32 %v4824_v12, %v12236_v13  ;;  %4867 = vrot.lane.b32.xlu1 %v10824_v52, %s7087_s23  ;;  %4865 = vrot.lane.b32.xlu0 %v10586_v34, %s7087_s23  ;;  %v4834_v57 = vmul.f32 %v4800_v11, %v12237_v54 }
 0xa3d   : > { %v10947_v35 = vpop.permute.xlu1 %4879 }
 0xa3e   : > { %v4878_v19 = vpop.permute.xlu0 %4877  ;;  %5538 = vmatprep.subr.mxu0 %v4834_v57 }
 0xa3f   : > { %v4897_v39 = vsel %vm1514_vm4, %v4876_v15, %v4878_v19  ;;  %v4898_v4 = vsel %vm1514_vm4, %v4878_v19, %v10947_v35  ;;  %5539 = vmatpush1.msra.mxu0 %v4833_v38 }
 0xa40   : > { %v4931_v12 = vmul.f32 %v4897_v39, %v12238_v27  ;;  %4787 = vrot.lane.b32.xlu1 %v10798_v6, %s12211_s20  ;;  %4785 = vrot.lane.b32.xlu0 %v10566_v32, %s12211_s20  ;;  %v4932_v11 = vmul.f32 %v4898_v4, %v12239_v18 }
 0xa41   : > { %v4764_v8 = vpop.permute.xlu1 %4763 }
 0xa42   : > { %5605 = vmatprep.subr.mxu1 %v4932_v11  ;;  %v4762_v56 = vpop.permute.xlu0 %4761 }
 0xa43   : > { %v4793_v57 = vsel %vm1385_vm5, %v4762_v56, %v4764_v8  ;;  %v4823_v15 = vsel %vm1385_vm5, 0.0, %v4762_v56  ;;  %5606 = vmatpush1.msra.mxu1 %v4931_v12 }
 0xa44   : > { %v4825_v38 = vmul.f32 %v4823_v15, %v12236_v13  ;;  %4887 = vrot.lane.b32.xlu1 %v10854_v0, %s7087_s23  ;;  %4885 = vrot.lane.b32.xlu0 %v10796_v36, %s7087_s23  ;;  %v4826_v19 = vmul.f32 %v4793_v57, %v12237_v54 }
 0xa45   : > { %v10966_v39 = vpop.permute.xlu1 %4863 }
 0xa46   : > { %v4862_v4 = vpop.permute.xlu0 %4861  ;;  %5540 = vmatprep.subr.mxu0 %v4826_v19 }
 0xa47   : > { %v4890_v11 = vsel %vm1514_vm4, %v4860_v40, %v4862_v4  ;;  %v4891_v56 = vsel %vm1514_vm4, %v4862_v4, %v10966_v39  ;;  %5541 = vmatpush1.msra.mxu0 %v4825_v38  ;;  %v12240_v4 = vld [vmem:[#allocation54_spill] sm:$0xff] }
 0xa48   : > { %v4923_v12 = vmul.f32 %v4890_v11, %v12238_v27  ;;  %4771 = vrot.lane.b32.xlu1 %v10824_v52, %s12211_s20  ;;  %4769 = vrot.lane.b32.xlu0 %v10586_v34, %s12211_s20  ;;  %v4924_v57 = vmul.f32 %v4891_v56, %v12239_v18  ;;  %v12241_v11 = vld [vmem:[#allocation53_spill] sm:$0xff]  ;;  %v12243_v18 = vld [vmem:[#allocation30_spill] sm:$0xff] }
 0xa49   : > { %v4684_v15 = vpop.permute.xlu1 %4683 }
 0xa4a   : > { %5607 = vmatprep.subr.mxu1 %v4924_v57  ;;  %v4682_v54 = vpop.permute.xlu0 %4681 }
 0xa4b   : > { %v4704_v19 = vsel %vm1256_vm6, %v4682_v54, %v4684_v15  ;;  %v4728_v40 = vsel %vm1256_vm6, 0.0, %v4682_v54  ;;  %5608 = vmatpush1.msra.mxu1 %v4923_v12  ;;  %v12242_v12 = vld [vmem:[#allocation82_spill] sm:$0xff] }
 0xa4c   : > { %v4737_v38 = vmul.f32 %v4728_v40, %v12240_v4  ;;  %4871 = vrot.lane.b32.xlu1 %v10863_v26, %s7087_s23  ;;  %4869 = vrot.lane.b32.xlu0 %v10817_v44, %s7087_s23  ;;  %v4738_v27 = vmul.f32 %v4704_v19, %v12241_v11 }
 0xa4d   : > { %v10985_v13 = vpop.permute.xlu1 %4783 }
 0xa4e   : > { %v4782_v56 = vpop.permute.xlu0 %4781  ;;  %5542 = vmatprep.subr.mxu0 %v4738_v27 }
 0xa4f   : > { %v4801_v57 = vsel %vm1385_vm5, %v4780_v37, %v4782_v56  ;;  %v4802_v54 = vsel %vm1385_vm5, %v4782_v56, %v10985_v13  ;;  %5543 = vmatpush1.msra.mxu0 %v4737_v38 }
 0xa50   : > { %v4835_v40 = vmul.f32 %v4801_v57, %v12242_v12  ;;  %4691 = vrot.lane.b32.xlu1 %v10798_v6, %s12154_s26  ;;  %4689 = vrot.lane.b32.xlu0 %v10566_v32, %s12154_s26  ;;  %v4836_v19 = vmul.f32 %v4802_v54, %v12243_v18 }
 0xa51   : > { %v4668_v41 = vpop.permute.xlu1 %4667 }
 0xa52   : > { %5609 = vmatprep.subr.mxu1 %v4836_v19  ;;  %v4666_v21 = vpop.permute.xlu0 %4665 }
 0xa53   : > { %v4697_v27 = vsel %vm1256_vm6, %v4666_v21, %v4668_v41  ;;  %v4727_v37 = vsel %vm1256_vm6, 0.0, %v4666_v21  ;;  %5610 = vmatpush1.msra.mxu1 %v4835_v40 }
 0xa54   : > { %v4729_v38 = vmul.f32 %v4727_v37, %v12240_v4  ;;  %4791 = vrot.lane.b32.xlu1 %v10854_v0, %s12211_s20  ;;  %4789 = vrot.lane.b32.xlu0 %v10796_v36, %s12211_s20  ;;  %v4730_v56 = vmul.f32 %v4697_v27, %v12241_v11 }
 0xa55   : > { %v11004_v57 = vpop.permute.xlu1 %4767 }
 0xa56   : > { %v4766_v54 = vpop.permute.xlu0 %4765  ;;  %5544 = vmatprep.subr.mxu0 %v4730_v56 }
 0xa57   : > { %v4794_v19 = vsel %vm1385_vm5, %v4764_v8, %v4766_v54  ;;  %v4795_v21 = vsel %vm1385_vm5, %v4766_v54, %v11004_v57  ;;  %5545 = vmatpush1.msra.mxu0 %v4729_v38  ;;  %v12244_v54 = vld [vmem:[#allocation56_spill] sm:$0xff] }
 0xa58   : > { %v4827_v40 = vmul.f32 %v4794_v19, %v12242_v12  ;;  %4675 = vrot.lane.b32.xlu1 %v10824_v52, %s12154_s26  ;;  %4673 = vrot.lane.b32.xlu0 %v10586_v34, %s12154_s26  ;;  %v4828_v27 = vmul.f32 %v4795_v21, %v12243_v18  ;;  %v12245_v19 = vld [vmem:[#allocation55_spill] sm:$0xff]  ;;  %v12247_v18 = vld [vmem:[#allocation84_spill] sm:$0xff] }
 0xa59   : > { %v4588_v37 = vpop.permute.xlu1 %4587 }
 0xa5a   : > { %5611 = vmatprep.subr.mxu1 %v4828_v27  ;;  %v4586_v11 = vpop.permute.xlu0 %4585 }
 0xa5b   : > { %v4608_v56 = vsel %vm1127_vm7, %v4586_v11, %v4588_v37  ;;  %v4632_v8 = vsel %vm1127_vm7, 0.0, %v4586_v11  ;;  %5612 = vmatpush1.msra.mxu1 %v4827_v40  ;;  %v12246_v40 = vld [vmem:[#allocation86_spill] sm:$0xff] }
 0xa5c   : > { %v4641_v38 = vmul.f32 %v4632_v8, %v12244_v54  ;;  %4775 = vrot.lane.b32.xlu1 %v10863_v26, %s12211_s20  ;;  %4773 = vrot.lane.b32.xlu0 %v10817_v44, %s12211_s20  ;;  %v4642_v12 = vmul.f32 %v4608_v56, %v12245_v19 }
 0xa5d   : > { %v11023_v4 = vpop.permute.xlu1 %4687 }
 0xa5e   : > { %v4686_v21 = vpop.permute.xlu0 %4685  ;;  %5546 = vmatprep.subr.mxu0 %v4642_v12 }
 0xa5f   : > { %v4705_v27 = vsel %vm1256_vm6, %v4684_v15, %v4686_v21  ;;  %v4706_v11 = vsel %vm1256_vm6, %v4686_v21, %v11023_v4  ;;  %5547 = vmatpush1.msra.mxu0 %v4641_v38 }
 0xa60   : > { %v4739_v8 = vmul.f32 %v4705_v27, %v12246_v40  ;;  %4595 = vrot.lane.b32.xlu1 %v10798_v6, %s12155_s27  ;;  %4593 = vrot.lane.b32.xlu0 %v10566_v32, %s12155_s27  ;;  %v4740_v56 = vmul.f32 %v4706_v11, %v12247_v18 }
 0xa61   : > { %v4572_v51 = vpop.permute.xlu1 %4571 }
 0xa62   : > { %5613 = vmatprep.subr.mxu1 %v4740_v56  ;;  %v4570_v63 = vpop.permute.xlu0 %4569 }
 0xa63   : > { %v4601_v12 = vsel %vm1127_vm7, %v4570_v63, %v4572_v51  ;;  %v4631_v15 = vsel %vm1127_vm7, 0.0, %v4570_v63  ;;  %5614 = vmatpush1.msra.mxu1 %v4739_v8 }
 0xa64   : > { %v4633_v38 = vmul.f32 %v4631_v15, %v12244_v54  ;;  %4695 = vrot.lane.b32.xlu1 %v10854_v0, %s12154_s26  ;;  %4693 = vrot.lane.b32.xlu0 %v10796_v36, %s12154_s26  ;;  %v4634_v21 = vmul.f32 %v4601_v12, %v12245_v19 }
 0xa65   : > { %v11042_v27 = vpop.permute.xlu1 %4671 }
 0xa66   : > { %v4670_v11 = vpop.permute.xlu0 %4669  ;;  %5548 = vmatprep.subr.mxu0 %v4634_v21 }
 0xa67   : > { %v4698_v56 = vsel %vm1256_vm6, %v4668_v41, %v4670_v11  ;;  %v4699_v63 = vsel %vm1256_vm6, %v4670_v11, %v11042_v27  ;;  %5549 = vmatpush1.msra.mxu0 %v4633_v38  ;;  %v12248_v38 = vld [vmem:[#allocation87_spill] sm:$0xff] }
 0xa68   : > { %v4731_v8 = vmul.f32 %v4698_v56, %v12246_v40  ;;  %4579 = vrot.lane.b32.xlu1 %v10824_v52, %s12155_s27  ;;  %4577 = vrot.lane.b32.xlu0 %v10586_v34, %s12155_s27  ;;  %v4732_v12 = vmul.f32 %v4699_v63, %v12247_v18  ;;  %v12249_v40 = vld [vmem:[#allocation88_spill] sm:$0xff] }
 0xa69   : > { %v11053_v15 = vpop.permute.xlu1 %4591 }
 0xa6a   : > { %5615 = vmatprep.subr.mxu1 %v4732_v12  ;;  %v4590_v21 = vpop.permute.xlu0 %4589 }
 0xa6b   : > { %v4609_v41 = vsel %vm1127_vm7, %v4588_v37, %v4590_v21  ;;  %v4610_v11 = vsel %vm1127_vm7, %v4590_v21, %v11053_v15  ;;  %5616 = vmatpush1.msra.mxu1 %v4731_v8  ;;  %v7064_v37 = vld [vmem:[%s11721_s2 + $0x48] ss:$0 sm:$0xff] }
 0xa6c   : > { %v4643_v56 = vmul.f32 %v4609_v41, %v12248_v38  ;;  %4679 = vrot.lane.b32.xlu1 %v10863_v26, %s12154_s26  ;;  %4677 = vrot.lane.b32.xlu0 %v10817_v44, %s12154_s26  ;;  %v4644_v63 = vmul.f32 %v4610_v11, %v12249_v40 }
 0xa6d   : > { %v5294_v18 = vpop.permute.xlu1 %5293 }
 0xa6e   : > { %5617 = vmatprep.subr.mxu1 %v4644_v63  ;;  %v5292_v12 = vpop.permute.xlu0 %5291 }
 0xa6f   : > { %v5313_v19 = vsel %vm2094_vm8, %v5292_v12, %v5294_v18  ;;  %5618 = vmatpush1.msra.mxu1 %v4643_v56  ;;  %v7065_v56 = vld [vmem:[%s11721_s2 + $0x40] ss:$0 sm:$0xff] }
 0xa70   : > { %4599 = vrot.lane.b32.xlu1 %v10854_v0, %s12155_s27  ;;  %4597 = vrot.lane.b32.xlu0 %v10796_v36, %s12155_s27  ;;  %v5346_v8 = vmul.f32 %v7064_v37, %v5313_v19 }
 0xa71   : > { %v4574_v21 = vpop.permute.xlu1 %4573 }
 0xa72   : > { %v5290_v41 = vpop.permute.xlu0 %5289  ;;  %5578 = vmatprep.subr.mxu0 %v5346_v8  ;;  %v4602_v48 = vsel %vm1127_vm7, %v4572_v51, %v4574_v21 }
 0xa73   : > { %v5312_v11 = vsel %vm2094_vm8, %v5290_v41, %v5292_v12  ;;  %v4635_v41 = vmul.f32 %v4602_v48, %v12248_v38  ;;  %v11100_v48 = vld [vmem:[%s11728_s9] sm:$0xff] }
 0xa74   : > { %v5345_v63 = vmul.f32 %v7065_v56, %v5312_v11  ;;  %5301 = vrot.lane.b32.xlu1 %v10796_v36, %s12157_s29  ;;  %5299 = vrot.lane.b32.xlu0 %v10798_v6, %s12157_s29 }
 0xa75   : > { %v5276_v54 = vpop.permute.xlu1 %5275 }
 0xa76   : > { %v11081_v19 = vpop.permute.xlu0 %4575  ;;  %5579 = vmatpush2.msra.mxu0 %v5345_v63 }
 0xa77   : > { %12250 = vst [vmem:[#allocation22_spill] sm:$0xff] %v11081_v19  ;;  %v4603_v12 = vsel %vm1127_vm7, %v4574_v21, %v11081_v19 }
 0xa78   : > { %4583 = vrot.lane.b32.xlu1 %v10863_v26, %s12155_s27  ;;  %4581 = vrot.lane.b32.xlu0 %v10817_v44, %s12155_s27  ;;  %v4636_v8 = vmul.f32 %v4603_v12, %v12249_v40 }
 0xa79   : > { %v5274_v11 = vpop.permute.xlu1 %5273 }
 0xa7a   : > { %v5305_v14 = vsel %vm2094_vm8, %v5274_v11, %v5276_v54  ;;  %5619 = vmatprep.subr.mxu1 %v4636_v8  ;;  %v5278_v51 = vpop.permute.xlu0 %5277 }
 0xa7b   : > { %v5337_v10 = vmul.f32 %v7065_v56, %v5305_v14  ;;  %v5306_v63 = vsel %vm2094_vm8, %v5276_v54, %v5278_v51  ;;  %5620 = vmatpush1.msra.mxu1 %v4635_v41  ;;  %v12251_v56 = vld [vmem:[#allocation21_spill] sm:$0xff] }
 0xa7c   : > { %5285 = vrot.lane.b32.xlu1 %v10817_v44, %s12157_s29  ;;  %5283 = vrot.lane.b32.xlu0 %v10824_v52, %s12157_s29  ;;  %v5338_v21 = vmul.f32 %v7064_v37, %v5306_v63  ;;  %v12252_v37 = vld [vmem:[#allocation13_spill] sm:$0xff] }
 0xa7d   : > { %v5206_v59 = vpop.permute.xlu1 %5205 }
 0xa7e   : > { %v5204_v12 = vpop.permute.xlu0 %5203  ;;  %5580 = vmatprep.subr.mxu0 %v5338_v21  ;;  %v7066_v21 = vld [vmem:[%s11721_s2 + $0x50] ss:$0 sm:$0xff] }
 0xa7f   : > { %v5220_v14 = vsel %vm1965_vm1, %v10782_v30, %v5204_v12  ;;  %v5221_v54 = vsel %vm1965_vm1, %v5204_v12, %v5206_v59  ;;  %5581 = vmatpush2.msra.mxu0 %v5337_v10 }
 0xa80   : > { %v5253_v8 = vmul.f32 %v5220_v14, %v12251_v56  ;;  %5287 = vrot.lane.b32.xlu1 %v10863_v26, %s12157_s29  ;;  %5303 = vrot.lane.b32.xlu0 %v10854_v0, %s12157_s29  ;;  %v5254_v41 = vmul.f32 %v5221_v54, %v12252_v37  ;;  %v7067_v14 = vld [vmem:[%s11721_s2 + $0x58] ss:$0 sm:$0xff] }
 0xa81   : > { %v11111_v11 = vpop.permute.xlu1 %5297  ;;  %5583 = vmatmul.mubr.f32.vlgmr.msra.gmra.mxu0 %v11100_v48 }
 0xa82   : > { %12253 = vst [vmem:[#allocation60_spill] sm:$0xff] %v11111_v11  ;;  %v5296_v63 = vpop.permute.xlu0 %5295  ;;  %5660 = vmatprep.subr.mxu0 %v5254_v41  ;;  %6922 = vmatprep.mubr.msk.f32.mxu0 %vm2339_vm0, %v10765_v61 }
 0xa83   : > { %v5314_v30 = vsel %vm2094_vm8, %v5294_v18, %v5296_v63  ;;  %v5315_v10 = vsel %vm2094_vm8, %v5296_v63, %v11111_v11  ;;  %5661 = vmatpush1.msra.mxu0 %v5253_v8 }
 0xa84   : > { %v5347_v12 = vmul.f32 %v7066_v21, %v5314_v30  ;;  %v5348_v54 = vmul.f32 %v7067_v14, %v5315_v10 }
 0xa85   : > { %v5190_v41 = vpop.permute.xlu1 %5189 }
 0xa86   : > { %5649 = vmatprep.subr.mxu1 %v5348_v54  ;;  %v5188_v40 = vpop.permute.xlu0 %5187 }
 0xa87   : > { %v5213_v18 = vsel %vm1965_vm1, %v10822_v22, %v5188_v40  ;;  %v5214_v38 = vsel %vm1965_vm1, %v5188_v40, %v5190_v41  ;;  %5650 = vmatpush2.msra.mxu1 %v5347_v12 }
 0xa88   : > { %v5245_v8 = vmul.f32 %v5213_v18, %v12251_v56  ;;  %v5246_v63 = vmul.f32 %v5214_v38, %v12252_v37 }
 0xa89   : > { %v11130_v25 = vpop.permute.xlu1 %5281 }
 0xa8a   : > { %v5280_v30 = vpop.permute.xlu0 %5279  ;;  %5662 = vmatprep.subr.mxu0 %v5246_v63 }
 0xa8b   : > { %v5307_v11 = vsel %vm2094_vm8, %v5278_v51, %v5280_v30  ;;  %v5308_v10 = vsel %vm2094_vm8, %v5280_v30, %v11130_v25  ;;  %5663 = vmatpush1.msra.mxu0 %v5245_v8 }
 0xa8c   : > { %v5339_v54 = vmul.f32 %v7066_v21, %v5307_v11  ;;  %v5340_v19 = vmul.f32 %v7067_v14, %v5308_v10 }
 0xa8d   : > { %v5110_v22 = vpop.permute.xlu1 %5109 }
 0xa8e   : > { %5651 = vmatprep.subr.mxu1 %v5340_v19  ;;  %v5108_v40 = vpop.permute.xlu0 %5107 }
 0xa8f   : > { %v5124_v12 = vsel %vm1836_vm2, %v10841_v50, %v5108_v40  ;;  %v5125_v38 = vsel %vm1836_vm2, %v5108_v40, %v5110_v22  ;;  %5652 = vmatpush2.msra.mxu1 %v5339_v54 }
 0xa90   : > { %v5157_v18 = vmul.f32 %v5124_v12, %v12191_v24  ;;  %v5158_v63 = vmul.f32 %v5125_v38, %v12190_v47  ;;  %5654 = vmatmul.mubr.f32.vlgmr.msra.gmra.mxu1 %v11100_v48 }
 0xa91   : > { %v5092_v51 = vpop.permute.xlu1 %5091  ;;  %6923 = vmatprep.mubr.msk.f32.mxu1 %vm2339_vm0, %v10765_v61 }
 0xa92   : > { %v5208_v11 = vpop.permute.xlu0 %5207  ;;  %5664 = vmatprep.subr.mxu0 %v5158_v63  ;;  %v5117_v30 = vsel %vm1836_vm2, %v10874_v28, %v5092_v51 }
 0xa93   : > { %v5222_v19 = vsel %vm1965_vm1, %v5206_v59, %v5208_v11  ;;  %v5240_v21 = vsel %vm1965_vm1, %v5208_v11, 0.0  ;;  %5665 = vmatpush1.msra.mxu0 %v5157_v18  ;;  %v5149_v18 = vmul.f32 %v5117_v30, %v12191_v24 }
 0xa94   : > { %v5255_v50 = vmul.f32 %v5222_v19, %v12189_v42  ;;  %v5256_v14 = vmul.f32 %v5240_v21, %v12188_v53 }
 0xa95   : > { %v5192_v8 = vpop.permute.xlu1 %5191 }
 0xa96   : > { %v5215_v10 = vsel %vm1965_vm1, %v5190_v41, %v5192_v8  ;;  %v5239_v54 = vsel %vm1965_vm1, %v5192_v8, 0.0  ;;  %5731 = vmatprep.subr.mxu1 %v5256_v14  ;;  %v5094_v61 = vpop.permute.xlu0 %5093 }
 0xa97   : > { %v5247_v40 = vmul.f32 %v5215_v10, %v12189_v42  ;;  %v5118_v59 = vsel %vm1836_vm2, %v5092_v51, %v5094_v61  ;;  %5732 = vmatpush1.msra.mxu1 %v5255_v50  ;;  %v5248_v12 = vmul.f32 %v5239_v54, %v12188_v53 }
 0xa98   : > { %v5150_v38 = vmul.f32 %v5118_v59, %v12190_v47 }
 0xa99   : > { %v5014_v63 = vpop.permute.xlu1 %5013  ;;  %5733 = vmatprep.subr.mxu1 %v5248_v12 }
 0xa9a   : > { %v5012_v28 = vpop.permute.xlu0 %5011  ;;  %5666 = vmatprep.subr.mxu0 %v5150_v38  ;;  %5734 = vmatpush1.msra.mxu1 %v5247_v40 }
 0xa9b   : > { %v5028_v41 = vsel %vm1707_vm3, %v10887_v2, %v5012_v28  ;;  %v5029_v11 = vsel %vm1707_vm3, %v5012_v28, %v5014_v63  ;;  %5667 = vmatpush1.msra.mxu0 %v5149_v18 }
 0xa9c   : > { %v5061_v51 = vmul.f32 %v5028_v41, %v12195_v23  ;;  %v5062_v19 = vmul.f32 %v5029_v11, %v12194_v9 }
 0xa9d   : > { %v4996_v21 = vpop.permute.xlu1 %4995 }
 0xa9e   : > { %v5112_v50 = vpop.permute.xlu0 %5111  ;;  %5668 = vmatprep.subr.mxu0 %v5062_v19  ;;  %v5021_v54 = vsel %vm1707_vm3, %v10904_v62, %v4996_v21 }
 0xa9f   : > { %v5126_v14 = vsel %vm1836_vm2, %v5110_v22, %v5112_v50  ;;  %v5144_v8 = vsel %vm1836_vm2, %v5112_v50, 0.0  ;;  %5669 = vmatpush1.msra.mxu0 %v5061_v51  ;;  %v5053_v41 = vmul.f32 %v5021_v54, %v12195_v23  ;;  %v4965_v50 = vmul.f32 %v10566_v32, %v12197_v16 }
 0xaa0   : > { %v5159_v30 = vmul.f32 %v5126_v14, %v12193_v58  ;;  %v5160_v10 = vmul.f32 %v5144_v8, %v12192_v3 }
 0xaa1   : > { %v5096_v2 = vpop.permute.xlu1 %5095 }
 0xaa2   : > { %v5119_v40 = vsel %vm1836_vm2, %v5094_v61, %v5096_v2  ;;  %v5143_v59 = vsel %vm1836_vm2, %v5096_v2, 0.0  ;;  %5735 = vmatprep.subr.mxu1 %v5160_v10  ;;  %v4998_v12 = vpop.permute.xlu0 %4997  ;;  %v4966_v61 = vmul.f32 %v10798_v6, %v12196_v7  ;;  %v4958_v6 = vmul.f32 %v10824_v52, %v12196_v7 }
 0xaa3   : > { %v5151_v38 = vmul.f32 %v5119_v40, %v12193_v58  ;;  %v5022_v22 = vsel %vm1707_vm3, %v4996_v21, %v4998_v12  ;;  %5736 = vmatpush1.msra.mxu1 %v5159_v30  ;;  %v5152_v18 = vmul.f32 %v5143_v59, %v12192_v3 }
 0xaa4   : > { %v5054_v28 = vmul.f32 %v5022_v22, %v12194_v9 }
 0xaa5   : > { %v5000_v11 = vpop.permute.xlu1 %4999  ;;  %5737 = vmatprep.subr.mxu1 %v5152_v18 }
 0xaa6   : > { %v5016_v62 = vpop.permute.xlu0 %5015  ;;  %5670 = vmatprep.subr.mxu0 %v5054_v28  ;;  %5738 = vmatpush1.msra.mxu1 %v5151_v38  ;;  %v5047_v51 = vsel %vm1707_vm3, %v5000_v11, 0.0  ;;  %v5023_v14 = vsel %vm1707_vm3, %v4998_v12, %v5000_v11  ;;  %v4967_v38 = vmul.f32 %v10796_v36, %v12199_v55 }
 0xaa7   : > { %v5030_v19 = vsel %vm1707_vm3, %v5014_v63, %v5016_v62  ;;  %v5048_v21 = vsel %vm1707_vm3, %v5016_v62, 0.0  ;;  %5671 = vmatpush1.msra.mxu0 %v5053_v41  ;;  %v4957_v63 = vmul.f32 %v10586_v34, %v12197_v16  ;;  %v5056_v32 = vmul.f32 %v5047_v51, %v9110_v29 }
 0xaa8   : > { %v5063_v8 = vmul.f32 %v5030_v19, %v9096_v49  ;;  %5672 = vmatprep.subr.mxu0 %v4966_v61  ;;  %v5064_v30 = vmul.f32 %v5048_v21, %v9110_v29  ;;  %v5055_v54 = vmul.f32 %v5023_v14, %v9096_v49  ;;  %v4968_v34 = vmul.f32 %v10854_v0, %v12198_v5 }
 0xaa9   : > { %5673 = vmatpush1.msra.mxu0 %v4965_v50  ;;  %v4959_v0 = vmul.f32 %v10817_v44, %v12199_v55 }
 0xaaa   : > { %v4884_v10 = vpop.permute.xlu1 %4883  ;;  %5739 = vmatprep.subr.mxu1 %v5064_v30  ;;  %v4882_v2 = vpop.permute.xlu0 %4881  ;;  %5674 = vmatprep.subr.mxu0 %v4958_v6 }
 0xaab   : > { %v4899_v40 = vsel %vm1514_vm4, %v10947_v35, %v4882_v2  ;;  %v4900_v59 = vsel %vm1514_vm4, %v4882_v2, %v4884_v10  ;;  %5675 = vmatpush1.msra.mxu0 %v4957_v63  ;;  %5740 = vmatpush1.msra.mxu1 %v5063_v8  ;;  %v4960_v35 = vmul.f32 %v10863_v26, %v12198_v5 }
 0xaac   : > { %v4933_v52 = vmul.f32 %v4899_v40, %v9102_v1  ;;  %5741 = vmatprep.subr.mxu1 %v5056_v32  ;;  %v4934_v12 = vmul.f32 %v4900_v59, %v9114_v43 }
 0xaad   : > { %5742 = vmatpush1.msra.mxu1 %v5055_v54 }
 0xaae   : > { %v4868_v22 = vpop.permute.xlu1 %4867  ;;  %5743 = vmatprep.subr.mxu1 %v4968_v34  ;;  %v4866_v18 = vpop.permute.xlu0 %4865  ;;  %5676 = vmatprep.subr.mxu0 %v4934_v12 }
 0xaaf   : > { %v4892_v28 = vsel %vm1514_vm4, %v10966_v39, %v4866_v18  ;;  %v4893_v41 = vsel %vm1514_vm4, %v4866_v18, %v4868_v22  ;;  %5677 = vmatpush1.msra.mxu0 %v4933_v52  ;;  %5744 = vmatpush1.msra.mxu1 %v4967_v38 }
 0xab0   : > { %v4925_v11 = vmul.f32 %v4892_v28, %v9102_v1  ;;  %5745 = vmatprep.subr.mxu1 %v4960_v35  ;;  %v4926_v36 = vmul.f32 %v4893_v41, %v9114_v43 }
 0xab1   : > { %5746 = vmatpush1.msra.mxu1 %v4959_v0 }
 0xab2   : > { %v4788_v62 = vpop.permute.xlu1 %4787  ;;  %v4786_v61 = vpop.permute.xlu0 %4785  ;;  %5678 = vmatprep.subr.mxu0 %v4926_v36 }
 0xab3   : > { %v4803_v26 = vsel %vm1385_vm5, %v10985_v13, %v4786_v61  ;;  %v4804_v39 = vsel %vm1385_vm5, %v4786_v61, %v4788_v62  ;;  %5679 = vmatpush1.msra.mxu0 %v4925_v11 }
 0xab4   : > { %v4837_v51 = vmul.f32 %v4803_v26, %v12200_v20  ;;  %v4838_v19 = vmul.f32 %v4804_v39, %v9125_v45  ;;  %v12254_v26 = vld [vmem:[#allocation52_spill] sm:$0xff] }
 0xab6   : > { %v4888_v44 = vpop.permute.xlu1 %4887  ;;  %v4886_v21 = vpop.permute.xlu0 %4885  ;;  %5680 = vmatprep.subr.mxu0 %v4838_v19 }
 0xab7   : > { %v4901_v50 = vsel %vm1514_vm4, %v4884_v10, %v4886_v21  ;;  %v4902_v14 = vsel %vm1514_vm4, %v4886_v21, %v4888_v44  ;;  %5681 = vmatpush1.msra.mxu0 %v4837_v51 }
 0xab8   : > { %v4935_v8 = vmul.f32 %v4901_v50, %v9141_v31  ;;  %v4936_v30 = vmul.f32 %v4902_v14, %v9147_v46 }
 0xaba   : > { %v4772_v13 = vpop.permute.xlu1 %4771  ;;  %5747 = vmatprep.subr.mxu1 %v4936_v30  ;;  %v4770_v6 = vpop.permute.xlu0 %4769 }
 0xabb   : > { %v4796_v63 = vsel %vm1385_vm5, %v11004_v57, %v4770_v6  ;;  %v4797_v2 = vsel %vm1385_vm5, %v4770_v6, %v4772_v13  ;;  %5748 = vmatpush1.msra.mxu1 %v4935_v8 }
 0xabc   : > { %v4829_v32 = vmul.f32 %v4796_v63, %v12200_v20  ;;  %v4830_v10 = vmul.f32 %v4797_v2, %v9125_v45 }
 0xabe   : > { %v4872_v54 = vpop.permute.xlu1 %4871  ;;  %v4870_v40 = vpop.permute.xlu0 %4869  ;;  %5682 = vmatprep.subr.mxu0 %v4830_v10 }
 0xabf   : > { %v4894_v59 = vsel %vm1514_vm4, %v4868_v22, %v4870_v40  ;;  %v4895_v52 = vsel %vm1514_vm4, %v4870_v40, %v4872_v54  ;;  %5683 = vmatpush1.msra.mxu0 %v4829_v32  ;;  %v12255_v54 = vld [vmem:[#allocation29_spill] sm:$0xff] }
 0xac0   : > { %v4927_v34 = vmul.f32 %v4894_v59, %v9141_v31  ;;  %v4928_v12 = vmul.f32 %v4895_v52, %v9147_v46  ;;  %v12256_v59 = vld [vmem:[#allocation58_spill] sm:$0xff] }
 0xac2   : > { %v4692_v57 = vpop.permute.xlu1 %4691  ;;  %5749 = vmatprep.subr.mxu1 %v4928_v12  ;;  %v4690_v38 = vpop.permute.xlu0 %4689 }
 0xac3   : > { %v4707_v18 = vsel %vm1256_vm6, %v11023_v4, %v4690_v38  ;;  %v4708_v35 = vsel %vm1256_vm6, %v4690_v38, %v4692_v57  ;;  %5750 = vmatpush1.msra.mxu1 %v4927_v34 }
 0xac4   : > { %v4741_v28 = vmul.f32 %v4707_v18, %v9151_v60  ;;  %v4742_v22 = vmul.f32 %v4708_v35, %v9155_v17  ;;  %v12257_v18 = vld [vmem:[#allocation57_spill] sm:$0xff] }
 0xac6   : > { %v4792_v41 = vpop.permute.xlu1 %4791  ;;  %v4790_v0 = vpop.permute.xlu0 %4789  ;;  %5684 = vmatprep.subr.mxu0 %v4742_v22 }
 0xac7   : > { %v4805_v11 = vsel %vm1385_vm5, %v4788_v62, %v4790_v0  ;;  %v4806_v36 = vsel %vm1385_vm5, %v4790_v0, %v4792_v41  ;;  %5685 = vmatpush1.msra.mxu0 %v4741_v28  ;;  %v12258_v28 = vld [vmem:[#allocation73_spill] sm:$0xff]  ;;  %v12259_v0 = vld [vmem:[#allocation22_spill] sm:$0xff] }
 0xac8   : > { %v4839_v61 = vmul.f32 %v4805_v11, %v9161_v33  ;;  %v4840_v39 = vmul.f32 %v4806_v36, %v12254_v26 }
 0xaca   : > { %v4676_v4 = vpop.permute.xlu1 %4675  ;;  %5751 = vmatprep.subr.mxu1 %v4840_v39  ;;  %v4674_v51 = vpop.permute.xlu0 %4673 }
 0xacb   : > { %v4700_v19 = vsel %vm1256_vm6, %v11042_v27, %v4674_v51  ;;  %v4701_v44 = vsel %vm1256_vm6, %v4674_v51, %v4676_v4  ;;  %5752 = vmatpush1.msra.mxu1 %v4839_v61 }
 0xacc   : > { %v4733_v21 = vmul.f32 %v4700_v19, %v9151_v60  ;;  %v4734_v62 = vmul.f32 %v4701_v44, %v9155_v17 }
 0xace   : > { %v4776_v50 = vpop.permute.xlu1 %4775  ;;  %v4774_v14 = vpop.permute.xlu0 %4773  ;;  %5686 = vmatprep.subr.mxu0 %v4734_v62 }
 0xacf   : > { %v4798_v8 = vsel %vm1385_vm5, %v4772_v13, %v4774_v14  ;;  %v4799_v30 = vsel %vm1385_vm5, %v4774_v14, %v4776_v50  ;;  %5687 = vmatpush1.msra.mxu0 %v4733_v21 }
 0xad0   : > { %v4831_v6 = vmul.f32 %v4798_v8, %v9161_v33  ;;  %v4832_v63 = vmul.f32 %v4799_v30, %v12254_v26 }
 0xad2   : > { %v4596_v27 = vpop.permute.xlu1 %4595  ;;  %5753 = vmatprep.subr.mxu1 %v4832_v63  ;;  %v4594_v2 = vpop.permute.xlu0 %4593 }
 0xad3   : > { %v4611_v32 = vsel %vm1127_vm7, %v11053_v15, %v4594_v2  ;;  %v4612_v10 = vsel %vm1127_vm7, %v4594_v2, %v4596_v27  ;;  %5754 = vmatpush1.msra.mxu1 %v4831_v6  ;;  %v12260_v6 = vld [vmem:[#allocation34_spill] sm:$0xff]  ;;  %v12261_v2 = vld [vmem:[#allocation59_spill] sm:$0xff] }
 0xad4   : > { %v4645_v40 = vmul.f32 %v4611_v32, %v12255_v54  ;;  %v4646_v13 = vmul.f32 %v4612_v10, %v12256_v59 }
 0xad6   : > { %v4696_v52 = vpop.permute.xlu1 %4695  ;;  %v4694_v34 = vpop.permute.xlu0 %4693  ;;  %5688 = vmatprep.subr.mxu0 %v4646_v13 }
 0xad7   : > { %v4709_v12 = vsel %vm1256_vm6, %v4692_v57, %v4694_v34  ;;  %v4710_v38 = vsel %vm1256_vm6, %v4694_v34, %v4696_v52  ;;  %5689 = vmatpush1.msra.mxu0 %v4645_v40  ;;  %v12262_v40 = vld [vmem:[#allocation60_spill] sm:$0xff] }
 0xad8   : > { %v4743_v35 = vmul.f32 %v4709_v12, %v12257_v18  ;;  %v4744_v22 = vmul.f32 %v4710_v38, %v12258_v28  ;;  %v11278_v12 = vld [vmem:[%s11721_s2 + $0x68] ss:$0 sm:$0xff] }
 0xada   : > { %v4580_v15 = vpop.permute.xlu1 %4579  ;;  %5755 = vmatprep.subr.mxu1 %v4744_v22  ;;  %v4578_v41 = vpop.permute.xlu0 %4577 }
 0xadb   : > { %v4604_v11 = vsel %vm1127_vm7, %v12259_v0, %v4578_v41  ;;  %v4605_v36 = vsel %vm1127_vm7, %v4578_v41, %v4580_v15  ;;  %5756 = vmatpush1.msra.mxu1 %v4743_v35 }
 0xadc   : > { %v4637_v61 = vmul.f32 %v4604_v11, %v12255_v54  ;;  %v4638_v57 = vmul.f32 %v4605_v36, %v12256_v59 }
 0xade   : > { %v4680_v39 = vpop.permute.xlu1 %4679  ;;  %v4678_v51 = vpop.permute.xlu0 %4677  ;;  %5690 = vmatprep.subr.mxu0 %v4638_v57 }
 0xadf   : > { %v4702_v19 = vsel %vm1256_vm6, %v4676_v4, %v4678_v51  ;;  %v4703_v44 = vsel %vm1256_vm6, %v4678_v51, %v4680_v39  ;;  %5691 = vmatpush1.msra.mxu0 %v4637_v61 }
 0xae0   : > { %v4735_v21 = vmul.f32 %v4702_v19, %v12257_v18  ;;  %v4736_v62 = vmul.f32 %v4703_v44, %v12258_v28 }
 0xae2   : > { %v4600_v50 = vpop.permute.xlu1 %4599  ;;  %5757 = vmatprep.subr.mxu1 %v4736_v62  ;;  %v4598_v14 = vpop.permute.xlu0 %4597 }
 0xae3   : > { %v4613_v8 = vsel %vm1127_vm7, %v4596_v27, %v4598_v14  ;;  %v4614_v30 = vsel %vm1127_vm7, %v4598_v14, %v4600_v50  ;;  %5758 = vmatpush1.msra.mxu1 %v4735_v21  ;;  %v11272_v27 = vld [vmem:[%s11721_s2 + $0x60] ss:$0 sm:$0xff] }
 0xae4   : > { %v4647_v63 = vmul.f32 %v4613_v8, %v12260_v6  ;;  %v4648_v32 = vmul.f32 %v4614_v30, %v12261_v2 }
 0xae6   : > { %v5302_v4 = vpop.permute.xlu1 %5301  ;;  %5759 = vmatprep.subr.mxu1 %v4648_v32  ;;  %v5300_v10 = vpop.permute.xlu0 %5299 }
 0xae7   : > { %v5316_v13 = vsel %vm2094_vm8, %v12262_v40, %v5300_v10  ;;  %v5317_v52 = vsel %vm2094_vm8, %v5300_v10, %v5302_v4  ;;  %5760 = vmatpush1.msra.mxu1 %v4647_v63  ;;  %v11303_v63 = vld [vmem:[%s11721_s2 + $0x78] ss:$0 sm:$0xff] }
 0xae8   : > { %v5349_v34 = vmul.f32 %v11272_v27, %v5316_v13  ;;  %v5350_v38 = vmul.f32 %v11278_v12, %v5317_v52 }
 0xaea   : > { %v4584_v35 = vpop.permute.xlu1 %4583  ;;  %v4582_v22 = vpop.permute.xlu0 %4581  ;;  %5720 = vmatprep.subr.mxu0 %v5350_v38 }
 0xaeb   : > { %v4606_v41 = vsel %vm1127_vm7, %v4580_v15, %v4582_v22  ;;  %v4607_v0 = vsel %vm1127_vm7, %v4582_v22, %v4584_v35  ;;  %5721 = vmatpush2.msra.mxu0 %v5349_v34 }
 0xaec   : > { %v4639_v11 = vmul.f32 %v4606_v41, %v12260_v6  ;;  %v4640_v36 = vmul.f32 %v4607_v0, %v12261_v2 }
 0xaee   : > { %v5286_v61 = vpop.permute.xlu1 %5285  ;;  %5761 = vmatprep.subr.mxu1 %v4640_v36  ;;  %v5284_v57 = vpop.permute.xlu0 %5283 }
 0xaef   : > { %v5309_v39 = vsel %vm2094_vm8, %v11130_v25, %v5284_v57  ;;  %v5310_v51 = vsel %vm2094_vm8, %v5284_v57, %v5286_v61  ;;  %5762 = vmatpush1.msra.mxu1 %v4639_v11  ;;  %v11297_v25 = vld [vmem:[%s11721_s2 + $0x70] ss:$0 sm:$0xff] }
 0xaf0   : > { %v5341_v19 = vmul.f32 %v11272_v27, %v5309_v39  ;;  %v5342_v15 = vmul.f32 %v11278_v12, %v5310_v51 }
 0xaf2   : > { %v5288_v44 = vpop.permute.xlu1 %5287  ;;  %v5304_v21 = vpop.permute.xlu0 %5303  ;;  %5722 = vmatprep.subr.mxu0 %v5342_v15 }
 0xaf3   : > { %v5335_v62 = vsel %vm2094_vm8, %v5288_v44, 0.0  ;;  %v5318_v50 = vsel %vm2094_vm8, %v5302_v4, %v5304_v21  ;;  %v5336_v14 = vsel %vm2094_vm8, %v5304_v21, 0.0  ;;  %5723 = vmatpush2.msra.mxu0 %v5341_v19  ;;  %v5311_v8 = vsel %vm2094_vm8, %v5286_v61, %v5288_v44 }
 0xaf4   : > { %v5351_v30 = vmul.f32 %v11297_v25, %v5318_v50  ;;  %v5352_v32 = vmul.f32 %v11303_v63, %v5336_v14  ;;  %5725 = vmatmul.mubr.f32.vlgmr.msra.gmra.mxu0 %v11100_v48  ;;  %v5344_v4 = vmul.f32 %v11303_v63, %v5335_v62  ;;  %v5343_v10 = vmul.f32 %v11297_v25, %v5311_v8 }
 0xaf6   : > { %5791 = vmatprep.subr.mxu1 %v5352_v32 }
 0xaf7   : > { %5792 = vmatpush2.msra.mxu1 %v5351_v30 }
 0xaf8   : > { %5793 = vmatprep.subr.mxu1 %v5344_v4 }
 0xaf9   : > { %5794 = vmatpush2.msra.mxu1 %v5343_v10 }
 0xafa   : > { %5796 = vmatmul.mubr.f32.vlgmr.msra.gmra.mxu1 %v11100_v48  ;;  %v5865_v48 = vld [vmem:[%s11729_s10] sm:$0xff] }
 0xb41   : > { %v5584_v40 = vpop.f32.mrf.mxu0 }
 0xb43   : > { %v5586_v13 = vpop.f32.mrf.mxu0 }
 0xb44   : > { %v5802_v52 = vadd.f32 %v5586_v13, %v5584_v40 }
 0xb50   : > { %v5655_v34 = vpop.f32.mrf.mxu1 }
 0xb51   : > { %v5803_v38 = vadd.f32 %v5802_v52, %v5655_v34 }
 0xb52   : > { %v5657_v35 = vpop.f32.mrf.mxu1 }
 0xb53   : > { %v5804_v22 = vadd.f32 %v5803_v38, %v5657_v35 }
 0xbb4   : > { %v5726_v41 = vpop.f32.mrf.mxu0 }
 0xbb5   : > { %v5805_v0 = vadd.f32 %v5804_v22, %v5726_v41 }
 0xbb6   : > { %v5728_v11 = vpop.f32.mrf.mxu0 }
 0xbb7   : > { %v5806_v36 = vadd.f32 %v5805_v0, %v5728_v11 }
 0xbba   : > { %v5797_v61 = vpop.f32.mrf.mxu1 }
 0xbbb   : > { %v5807_v57 = vadd.f32 %v5806_v36, %v5797_v61 }
 0xbbc   : > { %v5799_v39 = vpop.f32.mrf.mxu1 }
 0xbbd   : > { %v5808_v51 = vadd.f32 %v5807_v57, %v5799_v39 }
 0xbbf   : > { %5809 = vadd.xlane.f32.xlu0 %v5808_v51 }
 0xbd5   : > { %5868 = vperm.xlu0 %6966, %v5865_v48  }
 0xc48   : > { %v5810_v19 = vpop.xlane.xlu0 %5809 }
 0xc49   : > { %v5811_v15 = vrot.slane %v5810_v19, 4 }
 0xc4b   : > { %v5812_v44 = vadd.f32 %v5811_v15, %v5810_v19 }
 0xc4d   : > { %v5813_v21 = vrot.slane %v5812_v44, 2 }
 0xc4f   : > { %v5814_v62 = vadd.f32 %v5813_v21, %v5812_v44 }
 0xc51   : > { %v5815_v50 = vrot.slane %v5814_v62, 1 }
 0xc53   : > { %v5816_v14 = vadd.f32 %v5815_v50, %v5814_v62 }
 0xc55   : > { %6940 = vpush %v5816_v14 }
 0xc86   : > { %s6941_s28 = spop %6940 }
 0xc87   : > { %v5818_v8 = vstv %s6941_s28 }
 0xc88   : > { %v5820_v30 = vmul.f32 0.00012207031, %v5818_v8 }
 0xc8a   : > { %v5821_v32 = vsub.f32 %v5584_v40, %v5820_v30  ;;  %v5822_v4 = vsub.f32 %v5586_v13, %v5820_v30  ;;  %v5823_v10 = vsub.f32 %v5655_v34, %v5820_v30  ;;  %v5824_v52 = vsub.f32 %v5657_v35, %v5820_v30 }
 0xc8b   : > { %v5825_v0 = vsub.f32 %v5726_v41, %v5820_v30  ;;  %v11313_v51 = vsub.f32 %v5728_v11, %v5820_v30  ;;  %v11315_v15 = vsub.f32 %v5797_v61, %v5820_v30  ;;  %v11317_v62 = vsub.f32 %v5799_v39, %v5820_v30  ;;  %v5879_v61 = vld [vmem:[%s11730_s11] sm:$0xff] }
 0xc8c   : > { %v5829_v38 = vmul.f32 %v5821_v32, %v5821_v32  ;;  %v5830_v22 = vmul.f32 %v5822_v4, %v5822_v4  ;;  %v5831_v36 = vmul.f32 %v5823_v10, %v5823_v10  ;;  %v5832_v48 = vmul.f32 %v5824_v52, %v5824_v52 }
 0xc8d   : > { %v5833_v44 = vmul.f32 %v5825_v0, %v5825_v0  ;;  %v5834_v40 = vmul.f32 %v11313_v51, %v11313_v51  ;;  %v5835_v34 = vmul.f32 %v11315_v15, %v11315_v15  ;;  %v5836_v41 = vmul.f32 %v11317_v62, %v11317_v62 }
 0xc8e   : > { %v5837_v57 = vadd.f32 %v5830_v22, %v5829_v38 }
 0xc90   : > { %v5838_v19 = vadd.f32 %v5837_v57, %v5831_v36 }
 0xc92   : > { %v5839_v21 = vadd.f32 %v5838_v19, %v5832_v48 }
 0xc94   : > { %v5840_v13 = vadd.f32 %v5839_v21, %v5833_v44 }
 0xc96   : > { %v5841_v35 = vadd.f32 %v5840_v13, %v5834_v40 }
 0xc98   : > { %v5842_v11 = vadd.f32 %v5841_v35, %v5835_v34  ;;  %v11334_v35 = vpop.permute.xlu0 %5868 }
 0xc9a   : > { %v5843_v50 = vadd.f32 %v5842_v11, %v5836_v41 }
 0xc9c   : > { %5844 = vadd.xlane.f32.xlu1 %v5843_v50 }
 0xcad   : > { %5882 = vperm.xlu1 %6967, %v5879_v61  }
 0xd25   : > { %v5845_v39 = vpop.xlane.xlu1 %5844 }
 0xd26   : > { %v5846_v14 = vrot.slane %v5845_v39, 4 }
 0xd28   : > { %v5847_v8 = vadd.f32 %v5846_v14, %v5845_v39 }
 0xd29   : > { %v11341_v14 = vpop.permute.xlu1 %5882 }
 0xd2a   : > { %v5848_v30 = vrot.slane %v5847_v8, 2 }
 0xd2c   : > { %v5849_v38 = vadd.f32 %v5848_v30, %v5847_v8 }
 0xd2e   : > { %v5850_v22 = vrot.slane %v5849_v38, 1 }
 0xd30   : > { %v5851_v36 = vadd.f32 %v5850_v22, %v5849_v38 }
 0xd32   : > { %6942 = vpush %v5851_v36 }
 0xd63   : > { %s6943_s30 = spop %6942 }
 0xd64   : > { %v5853_v57 = vstv %s6943_s30 }
 0xd65   : > { %v5854_v48 = vmul.f32 0.00012207031, %v5853_v57 }
 0xd67   : > { %v5855_v19 = vadd.f32 1e-05, %v5854_v48 }
 0xd69   : > { %7036 = vrsqrt.f32 %v5855_v19 }
 0xd76   : > { %v11328_v44 = vpop.eup %7036 }
 0xd77   : > { %v5859_v21 = vmul.f32 %v11328_v44, %v5823_v10  ;;  %v5858_v40 = vmul.f32 %v11328_v44, %v5822_v4  ;;  %v5857_v13 = vmul.f32 %v11328_v44, %v5821_v32  ;;  %v5861_v34 = vmul.f32 %v11328_v44, %v5825_v0 }
 0xd78   : > { %v5860_v41 = vmul.f32 %v11328_v44, %v5824_v52 }
 0xd79   : > { %v5873_v11 = vmul.f32 %v11334_v35, %v5859_v21  ;;  %v5872_v50 = vmul.f32 %v11334_v35, %v5858_v40  ;;  %v5871_v61 = vmul.f32 %v11334_v35, %v5857_v13  ;;  %v5875_v39 = vmul.f32 %v11334_v35, %v5861_v34 }
 0xd7a   : > { %v5874_v4 = vmul.f32 %v11334_v35, %v5860_v41 }
 0xd7b   : > { %v5887_v32 = vadd.f32 %v11341_v14, %v5873_v11  ;;  %v5886_v10 = vadd.f32 %v11341_v14, %v5872_v50  ;;  %v5885_v0 = vadd.f32 %v11341_v14, %v5871_v61  ;;  %v5889_v52 = vadd.f32 %v11341_v14, %v5875_v39 }
 0xd7c   : > { %v5888_v8 = vadd.f32 %v11341_v14, %v5874_v4 }
 0xd7d   : > { %v5903_v30 = vmul.f32 0.044715, %v5887_v32  ;;  %v5902_v38 = vmul.f32 0.044715, %v5886_v10  ;;  %v5901_v22 = vmul.f32 0.044715, %v5885_v0 }
 0xd7e   : > { %v5905_v48 = vmul.f32 0.044715, %v5889_v52  ;;  %v5904_v21 = vmul.f32 0.044715, %v5888_v8 }
 0xd7f   : > { %v5911_v36 = vmul.f32 %v5903_v30, %v5887_v32  ;;  %v5910_v57 = vmul.f32 %v5902_v38, %v5886_v10  ;;  %v5909_v19 = vmul.f32 %v5901_v22, %v5885_v0 }
 0xd80   : > { %v5913_v50 = vmul.f32 %v5905_v48, %v5889_v52  ;;  %v5912_v61 = vmul.f32 %v5904_v21, %v5888_v8  ;;  %v5894_v21 = vmul.f32 0.5, %v5886_v10 }
 0xd81   : > { %v5919_v40 = vmul.f32 %v5911_v36, %v5887_v32  ;;  %v5918_v13 = vmul.f32 %v5910_v57, %v5886_v10  ;;  %v5917_v34 = vmul.f32 %v5909_v19, %v5885_v0  ;;  %v5895_v19 = vmul.f32 0.5, %v5887_v32 }
 0xd82   : > { %v5921_v4 = vmul.f32 %v5913_v50, %v5889_v52  ;;  %v5920_v18 = vmul.f32 %v5912_v61, %v5888_v8  ;;  %v5863_v61 = vmul.f32 %v11328_v44, %v11315_v15 }
 0xd83   : > { %v5927_v41 = vadd.f32 %v5919_v40, %v5887_v32  ;;  %v5926_v11 = vadd.f32 %v5918_v13, %v5886_v10  ;;  %v5925_v2 = vadd.f32 %v5917_v34, %v5885_v0 }
 0xd84   : > { %v5929_v30 = vadd.f32 %v5921_v4, %v5889_v52  ;;  %v5928_v38 = vadd.f32 %v5920_v18, %v5888_v8  ;;  %v5893_v18 = vmul.f32 0.5, %v5885_v0  ;;  %v5897_v0 = vmul.f32 0.5, %v5889_v52 }
 0xd85   : > { %v5935_v6 = vmul.f32 0.7978846, %v5927_v41  ;;  %v5934_v39 = vmul.f32 0.7978846, %v5926_v11  ;;  %v5933_v28 = vmul.f32 0.7978846, %v5925_v2  ;;  %v5862_v4 = vmul.f32 %v11328_v44, %v11313_v51 }
 0xd86   : > { %v5937_v22 = vmul.f32 0.7978846, %v5929_v30  ;;  %v5936_v26 = vmul.f32 0.7978846, %v5928_v38  ;;  %v5896_v11 = vmul.f32 0.5, %v5888_v8  ;;  %v5877_v52 = vmul.f32 %v11334_v35, %v5863_v61 }
 0xd87   : > { %7038 = vtanh.f32 %v5935_v6  ;;  %v5876_v8 = vmul.f32 %v11334_v35, %v5862_v4 }
 0xd88   : > { %7040 = vtanh.f32 %v5934_v39  ;;  %v5891_v15 = vadd.f32 %v11341_v14, %v5877_v52 }
 0xd89   : > { %7042 = vtanh.f32 %v5933_v28  ;;  %v5890_v51 = vadd.f32 %v11341_v14, %v5876_v8 }
 0xd8a   : > { %7044 = vtanh.f32 %v5937_v22  ;;  %v5907_v30 = vmul.f32 0.044715, %v5891_v15  ;;  %v5899_v4 = vmul.f32 0.5, %v5891_v15 }
 0xd8b   : > { %7046 = vtanh.f32 %v5936_v26  ;;  %v5906_v38 = vmul.f32 0.044715, %v5890_v51  ;;  %v5898_v52 = vmul.f32 0.5, %v5890_v51 }
 0xd8c   : > { %v5915_v22 = vmul.f32 %v5907_v30, %v5891_v15 }
 0xd94   : > { %v7039_v36 = vpop.eup %7038 }
 0xd95   : > { %v7041_v57 = vpop.eup %7040  ;;  %v5951_v48 = vadd.f32 1.0, %v7039_v36  ;;  %v5914_v36 = vmul.f32 %v5906_v38, %v5890_v51 }
 0xd96   : > { %v7043_v40 = vpop.eup %7042  ;;  %v5950_v13 = vadd.f32 1.0, %v7041_v57  ;;  %v5864_v57 = vmul.f32 %v11328_v44, %v11317_v62 }
 0xd97   : > { %v11349_v34 = vmul.f32 %v5951_v48, %v5895_v19  ;;  %v5949_v2 = vadd.f32 1.0, %v7043_v40  ;;  %v7045_v26 = vpop.eup %7044  ;;  %v5923_v19 = vmul.f32 %v5915_v22, %v5891_v15  ;;  %v5922_v48 = vmul.f32 %v5914_v36, %v5890_v51 }
 0xd98   : > { %v11351_v6 = vmul.f32 %v5950_v13, %v5894_v21  ;;  %v7047_v32 = vpop.eup %7046  ;;  %v5953_v10 = vadd.f32 1.0, %v7045_v26  ;;  %v5878_v40 = vmul.f32 %v11334_v35, %v5864_v57 }
 0xd99   : > { %6329 = vrot.lane.b32.xlu1 %v11349_v34, %s12157_s29  ;;  %v11357_v28 = vmul.f32 %v5949_v2, %v5893_v18  ;;  %v5952_v41 = vadd.f32 1.0, %v7047_v32  ;;  %v5931_v21 = vadd.f32 %v5923_v19, %v5891_v15  ;;  %v5930_v13 = vadd.f32 %v5922_v48, %v5890_v51  ;;  %v7072_v48 = vld [vmem:[%s11721_s2 + $0x48] ss:$0 sm:$0xff] }
 0xd9a   : > { %6327 = vrot.lane.b32.xlu0 %v11351_v6, %s12157_s29  ;;  %v11371_v50 = vmul.f32 %v5953_v10, %v5897_v0  ;;  %v5892_v62 = vadd.f32 %v11341_v14, %v5878_v40  ;;  %v7093_v32 = vmov 0.0  }
 0xd9b   : > { %v11375_v39 = vmul.f32 %v5952_v41, %v5896_v11  ;;  %v5939_v44 = vmul.f32 0.7978846, %v5931_v21  ;;  %v5938_v2 = vmul.f32 0.7978846, %v5930_v13  ;;  %6514 = vmatprep.mubr.f32.mxu0 %v7093_v32  ;;  %6585 = vmatprep.mubr.f32.mxu1 %v7093_v32 }
 0xd9c   : > { %v5908_v18 = vmul.f32 0.044715, %v5892_v62  ;;  %v5900_v38 = vmul.f32 0.5, %v5892_v62 }
 0xd9d   : > { %6279 = vrot.lane.b32.xlu1 %v11351_v6, %s7084_s17  ;;  %7048 = vtanh.f32 %v5939_v44  ;;  %v7073_v44 = vld [vmem:[%s11721_s2 + $0x40] ss:$0 sm:$0xff] }
 0xd9e   : > { %6325 = vrot.lane.b32.xlu0 %v11357_v28, %s12157_s29  ;;  %7050 = vtanh.f32 %v5938_v2  ;;  %v5916_v35 = vmul.f32 %v5908_v18, %v5892_v62 }
 0xda0   : > { %v5924_v14 = vmul.f32 %v5916_v35, %v5892_v62 }
 0xda1   : > { %6277 = vrot.lane.b32.xlu1 %v11357_v28, %s7084_s17 }
 0xda2   : > { %6281 = vrot.lane.b32.xlu0 %v11349_v34, %s7084_s17  ;;  %v5932_v26 = vadd.f32 %v5924_v14, %v5892_v62 }
 0xda4   : > { %v5940_v41 = vmul.f32 0.7978846, %v5932_v26  ;;  %v12263_v26 = vld [vmem:[#allocation36_spill] sm:$0xff] }
 0xda5   : > { %6233 = vrot.lane.b32.xlu1 %v11349_v34, %s7085_s21 }
 0xda6   : > { %6231 = vrot.lane.b32.xlu0 %v11351_v6, %s7085_s21  ;;  %7052 = vtanh.f32 %v5940_v41 }
 0xda9   : > { %6333 = vrot.lane.b32.xlu1 %v11371_v50, %s12157_s29 }
 0xdaa   : > { %6331 = vrot.lane.b32.xlu0 %v11375_v39, %s12157_s29  ;;  %v7049_v10 = vpop.eup %7048 }
 0xdab   : > { %v7051_v0 = vpop.eup %7050  ;;  %v5955_v11 = vadd.f32 1.0, %v7049_v10 }
 0xdac   : > { %v5954_v61 = vadd.f32 1.0, %v7051_v0  ;;  %v12264_v0 = vld [vmem:[#allocation38_spill] sm:$0xff] }
 0xdad   : > { %6183 = vrot.lane.b32.xlu1 %v11351_v6, %s7086_s22  ;;  %v11441_v8 = vmul.f32 %v5955_v11, %v5899_v4 }
 0xdae   : > { %6229 = vrot.lane.b32.xlu0 %v11357_v28, %s7085_s21  ;;  %v11443_v30 = vmul.f32 %v5954_v61, %v5898_v52 }
 0xdb1   : > { %6283 = vrot.lane.b32.xlu1 %v11375_v39, %s7084_s17 }
 0xdb2   : > { %6185 = vrot.lane.b32.xlu0 %v11349_v34, %s7086_s22 }
 0xdb3   : > { %v7053_v15 = vpop.eup %7052 }
 0xdb4   : > { %v5956_v51 = vadd.f32 1.0, %v7053_v15  ;;  %v12265_v15 = vld [vmem:[#allocation40_spill] sm:$0xff] }
 0xdb5   : > { %6181 = vrot.lane.b32.xlu1 %v11357_v28, %s7086_s22 }
 0xdb6   : > { %6285 = vrot.lane.b32.xlu0 %v11371_v50, %s7084_s17  ;;  %v11461_v22 = vmul.f32 %v5956_v51, %v5900_v38 }
 0xdb9   : > { %6237 = vrot.lane.b32.xlu1 %v11371_v50, %s7085_s21 }
 0xdba   : > { %6235 = vrot.lane.b32.xlu0 %v11375_v39, %s7085_s21 }
 0xdbd   : > { %6119 = vrot.lane.b32.xlu1 %v11351_v6, %s7087_s23 }
 0xdbe   : > { %6117 = vrot.lane.b32.xlu0 %v11357_v28, %s7087_s23 }
 0xdc1   : > { %6189 = vrot.lane.b32.xlu1 %v11371_v50, %s7086_s22 }
 0xdc2   : > { %6187 = vrot.lane.b32.xlu0 %v11375_v39, %s7086_s22 }
 0xdc5   : > { %6071 = vrot.lane.b32.xlu1 %v11351_v6, %s12211_s20 }
 0xdc6   : > { %6069 = vrot.lane.b32.xlu0 %v11357_v28, %s12211_s20 }
 0xdc9   : > { %6023 = vrot.lane.b32.xlu1 %v11351_v6, %s12154_s26 }
 0xdca   : > { %6021 = vrot.lane.b32.xlu0 %v11357_v28, %s12154_s26 }
 0xdcd   : > { %6123 = vrot.lane.b32.xlu1 %v11375_v39, %s7087_s23 }
 0xdce   : > { %6121 = vrot.lane.b32.xlu0 %v11349_v34, %s7087_s23 }
 0xdd1   : > { %5975 = vrot.lane.b32.xlu1 %v11351_v6, %s12155_s27 }
 0xdd2   : > { %5973 = vrot.lane.b32.xlu0 %v11357_v28, %s12155_s27 }
 0xdd5   : > { %6075 = vrot.lane.b32.xlu1 %v11375_v39, %s12211_s20 }
 0xdd6   : > { %6073 = vrot.lane.b32.xlu0 %v11349_v34, %s12211_s20 }
 0xdd9   : > { %6027 = vrot.lane.b32.xlu1 %v11375_v39, %s12154_s26 }
 0xdda   : > { %6025 = vrot.lane.b32.xlu0 %v11349_v34, %s12154_s26 }
 0xddd   : > { %6337 = vrot.lane.b32.xlu1 %v11441_v8, %s12157_s29 }
 0xdde   : > { %6335 = vrot.lane.b32.xlu0 %v11443_v30, %s12157_s29 }
 0xde1   : > { %5979 = vrot.lane.b32.xlu1 %v11375_v39, %s12155_s27 }
 0xde2   : > { %5977 = vrot.lane.b32.xlu0 %v11349_v34, %s12155_s27 }
 0xde5   : > { %6289 = vrot.lane.b32.xlu1 %v11441_v8, %s7084_s17 }
 0xde6   : > { %6287 = vrot.lane.b32.xlu0 %v11443_v30, %s7084_s17 }
 0xde9   : > { %6241 = vrot.lane.b32.xlu1 %v11441_v8, %s7085_s21 }
 0xdea   : > { %6239 = vrot.lane.b32.xlu0 %v11443_v30, %s7085_s21 }
 0xded   : > { %6191 = vrot.lane.b32.xlu1 %v11443_v30, %s7086_s22 }
 0xdee   : > { %6339 = vrot.lane.b32.xlu0 %v11461_v22, %s12157_s29 }
 0xdf1   : > { %6291 = vrot.lane.b32.xlu1 %v11461_v22, %s7084_s17 }
 0xdf2   : > { %6193 = vrot.lane.b32.xlu0 %v11441_v8, %s7086_s22 }
 0xdf5   : > { %6125 = vrot.lane.b32.xlu1 %v11371_v50, %s7087_s23 }
 0xdf6   : > { %6243 = vrot.lane.b32.xlu0 %v11461_v22, %s7085_s21 }
 0xdf9   : > { %6195 = vrot.lane.b32.xlu1 %v11461_v22, %s7086_s22 }
 0xdfa   : > { %6127 = vrot.lane.b32.xlu0 %v11443_v30, %s7087_s23 }
 0xdfd   : > { %6079 = vrot.lane.b32.xlu1 %v11443_v30, %s12211_s20 }
 0xdfe   : > { %6077 = vrot.lane.b32.xlu0 %v11371_v50, %s12211_s20 }
 0xe01   : > { %6031 = vrot.lane.b32.xlu1 %v11443_v30, %s12154_s26 }
 0xe02   : > { %6029 = vrot.lane.b32.xlu0 %v11371_v50, %s12154_s26 }
 0xe05   : > { %6131 = vrot.lane.b32.xlu1 %v11461_v22, %s7087_s23 }
 0xe06   : > { %6129 = vrot.lane.b32.xlu0 %v11441_v8, %s7087_s23  ;;  %s6931_s23 = sshll.u32 %s12301_s19, 6 }
 0xe09   : > { %5983 = vrot.lane.b32.xlu1 %v11443_v30, %s12155_s27 }
 0xe0a   : > { %5981 = vrot.lane.b32.xlu0 %v11371_v50, %s12155_s27 }
 0xe0b   : > { %v6330_v36 = vpop.permute.xlu1 %6329 }
 0xe0c   : > { %v6328_v57 = vpop.permute.xlu0 %6327 }
 0xe0d   : > { %v6342_v19 = vsel %vm2094_vm8, %v6328_v57, %v6330_v36  ;;  %6083 = vrot.lane.b32.xlu1 %v11461_v22, %s12211_s20 }
 0xe0e   : > { %v6358_v40 = vmul.f32 %v7072_v48, %v6342_v19  ;;  %6081 = vrot.lane.b32.xlu0 %v11441_v8, %s12211_s20 }
 0xe0f   : > { %v6280_v21 = vpop.permute.xlu1 %6279 }
 0xe10   : > { %6464 = vmatprep.subr.mxu0 %v6358_v40  ;;  %v6326_v13 = vpop.permute.xlu0 %6325  ;;  %v7074_v40 = vld [vmem:[%s11721_s2 + $0x50] ss:$0 sm:$0xff] }
 0xe11   : > { %v6341_v62 = vsel %vm2094_vm8, %v6326_v13, %v6328_v57  ;;  %6035 = vrot.lane.b32.xlu1 %v11461_v22, %s12154_s26  ;;  %v7075_v13 = vld [vmem:[%s11721_s2 + $0x58] ss:$0 sm:$0xff] }
 0xe12   : > { %v6357_v2 = vmul.f32 %v7073_v44, %v6341_v62  ;;  %6033 = vrot.lane.b32.xlu0 %v11441_v8, %s12154_s26 }
 0xe13   : > { %v6278_v18 = vpop.permute.xlu1 %6277 }
 0xe14   : > { %v6293_v35 = vsel %vm1965_vm1, %v6278_v18, %v6280_v21  ;;  %6465 = vmatpush1.msra.mxu0 %v6357_v2  ;;  %v6282_v14 = vpop.permute.xlu0 %6281 }
 0xe15   : > { %v6309_v10 = vmul.f32 %v6293_v35, %v12263_v26  ;;  %v6294_v41 = vsel %vm1965_vm1, %v6280_v21, %v6282_v14  ;;  %5987 = vrot.lane.b32.xlu1 %v11461_v22, %s12155_s27 }
 0xe16   : > { %v6310_v11 = vmul.f32 %v6294_v41, %v12264_v0  ;;  %5985 = vrot.lane.b32.xlu0 %v11441_v8, %s12155_s27  ;;  %v12267_v0 = vld [vmem:[#allocation44_spill] sm:$0xff]  ;;  %s494_s27 = scalar_lea.vmem %s11734_s15, %s6931_s23 }
 0xe17   : > { %v6234_v61 = vpop.permute.xlu1 %6233 }
 0xe18   : > { %6466 = vmatprep.subr.mxu0 %v6310_v11  ;;  %v6232_v4 = vpop.permute.xlu0 %6231 }
 0xe19   : > { %v6246_v52 = vsel %vm1836_vm2, %v6232_v4, %v6234_v61  ;;  %6467 = vmatpush1.msra.mxu0 %v6309_v10 }
 0xe1a   : > { %v6262_v51 = vmul.f32 %v6246_v52, %v12265_v15 }
 0xe1b   : > { %v11521_v38 = vpop.permute.xlu1 %6333 }
 0xe1c   : > { %6468 = vmatprep.subr.mxu0 %v6262_v51  ;;  %v6332_v57 = vpop.permute.xlu0 %6331 }
 0xe1d   : > { %v6343_v19 = vsel %vm2094_vm8, %v6330_v36, %v6332_v57  ;;  %v6344_v48 = vsel %vm2094_vm8, %v6332_v57, %v11521_v38  ;;  %v12266_v36 = vld [vmem:[#allocation39_spill] sm:$0xff] }
 0xe1e   : > { %v6359_v21 = vmul.f32 %v7074_v40, %v6343_v19  ;;  %v6360_v62 = vmul.f32 %v7075_v13, %v6344_v48  ;;  %v12268_v19 = vld [vmem:[#allocation42_spill] sm:$0xff]  ;;  %v12269_v40 = vld [vmem:[#allocation71_spill] sm:$0xff]  ;;  %v12270_v13 = vld [vmem:[#allocation45_spill] sm:$0xff] }
 0xe1f   : > { %v6184_v44 = vpop.permute.xlu1 %6183 }
 0xe20   : > { %6535 = vmatprep.subr.mxu1 %v6360_v62  ;;  %v6230_v2 = vpop.permute.xlu0 %6229  ;;  %v6166_v62 = vmul.f32 %v11351_v6, %v12270_v13 }
 0xe21   : > { %v6245_v18 = vsel %vm1836_vm2, %v6230_v2, %v6232_v4  ;;  %6536 = vmatpush1.msra.mxu1 %v6359_v21  ;;  %v12271_v2 = vld [vmem:[#allocation72_spill] sm:$0xff] }
 0xe22   : > { %v6261_v35 = vmul.f32 %v6245_v18, %v12266_v36 }
 0xe23   : > { %v6284_v26 = vpop.permute.xlu1 %6283 }
 0xe24   : > { %6469 = vmatpush1.msra.mxu0 %v6261_v35  ;;  %v6186_v10 = vpop.permute.xlu0 %6185  ;;  %v6295_v15 = vsel %vm1965_vm1, %v6282_v14, %v6284_v26  ;;  %v12272_v14 = vld [vmem:[#allocation46_spill] sm:$0xff] }
 0xe25   : > { %v6198_v41 = vsel %vm1707_vm3, %v6184_v44, %v6186_v10  ;;  %v6311_v18 = vmul.f32 %v6295_v15, %v12271_v2 }
 0xe26   : > { %v6214_v11 = vmul.f32 %v6198_v41, %v12267_v0  ;;  %v12273_v0 = vld [vmem:[#allocation75_spill] sm:$0xff] }
 0xe27   : > { %v6182_v52 = vpop.permute.xlu1 %6181 }
 0xe28   : > { %v6197_v51 = vsel %vm1707_vm3, %v6182_v52, %v6184_v44  ;;  %6470 = vmatprep.subr.mxu0 %v6214_v11  ;;  %v11538_v57 = vpop.permute.xlu0 %6285  ;;  %v6165_v44 = vmul.f32 %v11357_v28, %v12272_v14  ;;  %v12274_v11 = vld [vmem:[#allocation74_spill] sm:$0xff] }
 0xe29   : > { %v6213_v4 = vmul.f32 %v6197_v51, %v12268_v19  ;;  %v6296_v48 = vsel %vm1965_vm1, %v6284_v26, %v11538_v57 }
 0xe2a   : > { %v6312_v21 = vmul.f32 %v6296_v48, %v12269_v40 }
 0xe2b   : > { %v11547_v36 = vpop.permute.xlu1 %6237  ;;  %6471 = vmatpush1.msra.mxu0 %v6213_v4  ;;  %v12275_v4 = vld [vmem:[#allocation49_spill] sm:$0xff] }
 0xe2c   : > { %6537 = vmatprep.subr.mxu1 %v6312_v21  ;;  %v6236_v35 = vpop.permute.xlu0 %6235  ;;  %6472 = vmatprep.subr.mxu0 %v6166_v62 }
 0xe2d   : > { %v6247_v41 = vsel %vm1836_vm2, %v6234_v61, %v6236_v35  ;;  %v6248_v26 = vsel %vm1836_vm2, %v6236_v35, %v11547_v36  ;;  %6538 = vmatpush1.msra.mxu1 %v6311_v18  ;;  %6473 = vmatpush1.msra.mxu0 %v6165_v44  ;;  %v12276_v61 = vld [vmem:[#allocation48_spill] sm:$0xff]  ;;  %v12277_v18 = vld [vmem:[#allocation77_spill] sm:$0xff] }
 0xe2e   : > { %v6263_v6 = vmul.f32 %v6247_v41, %v12273_v0  ;;  %v6264_v52 = vmul.f32 %v6248_v26, %v12274_v11  ;;  %v12278_v44 = vld [vmem:[#allocation76_spill] sm:$0xff]  ;;  %v12279_v0 = vld [vmem:[#allocation78_spill] sm:$0xff] }
 0xe2f   : > { %v6120_v15 = vpop.permute.xlu1 %6119 }
 0xe30   : > { %6539 = vmatprep.subr.mxu1 %v6264_v52  ;;  %v6118_v51 = vpop.permute.xlu0 %6117 }
 0xe31   : > { %v6133_v19 = vsel %vm1514_vm4, %v6118_v51, %v6120_v15  ;;  %v6148_v28 = vsel %vm1514_vm4, 0.0, %v6118_v51  ;;  %6540 = vmatpush1.msra.mxu1 %v6263_v6  ;;  %v6168_v6 = vmul.f32 %v11375_v39, %v12279_v0  ;;  %v12285_v0 = vld [vmem:[#allocation81_spill] sm:$0xff] }
 0xe32   : > { %v6149_v48 = vmul.f32 %v6148_v28, %v12275_v4  ;;  %v6150_v40 = vmul.f32 %v6133_v19, %v12276_v61  ;;  %v12281_v19 = vld [vmem:[#allocation51_spill] sm:$0xff]  ;;  %v12282_v4 = vld [vmem:[#allocation50_spill] sm:$0xff] }
 0xe33   : > { %v11560_v21 = vpop.permute.xlu1 %6189 }
 0xe34   : > { %v6188_v13 = vpop.permute.xlu0 %6187  ;;  %6474 = vmatprep.subr.mxu0 %v6150_v40 }
 0xe35   : > { %v6199_v62 = vsel %vm1707_vm3, %v6186_v10, %v6188_v13  ;;  %v6200_v2 = vsel %vm1707_vm3, %v6188_v13, %v11560_v21  ;;  %6475 = vmatpush1.msra.mxu0 %v6149_v48  ;;  %v12280_v10 = vld [vmem:[#allocation79_spill] sm:$0xff] }
 0xe36   : > { %v6215_v14 = vmul.f32 %v6199_v62, %v12277_v18  ;;  %v6216_v35 = vmul.f32 %v6200_v2, %v12278_v44  ;;  %v6167_v51 = vmul.f32 %v11349_v34, %v12280_v10  ;;  %v12283_v62 = vld [vmem:[#allocation54_spill] sm:$0xff]  ;;  %v12284_v18 = vld [vmem:[#allocation53_spill] sm:$0xff] }
 0xe37   : > { %v6072_v41 = vpop.permute.xlu1 %6071 }
 0xe38   : > { %6541 = vmatprep.subr.mxu1 %v6216_v35  ;;  %v6070_v26 = vpop.permute.xlu0 %6069 }
 0xe39   : > { %v6085_v11 = vsel %vm1385_vm5, %v6070_v26, %v6072_v41  ;;  %v6100_v52 = vsel %vm1385_vm5, 0.0, %v6070_v26  ;;  %6542 = vmatpush1.msra.mxu1 %v6215_v14 }
 0xe3a   : > { %v6101_v28 = vmul.f32 %v6100_v52, %v12281_v19  ;;  %v6102_v48 = vmul.f32 %v6085_v11, %v12282_v4  ;;  %6543 = vmatprep.subr.mxu1 %v6168_v6  ;;  %v12286_v11 = vld [vmem:[#allocation80_spill] sm:$0xff] }
 0xe3b   : > { %6544 = vmatpush1.msra.mxu1 %v6167_v51  ;;  %v6024_v61 = vpop.permute.xlu1 %6023  ;;  %v12287_v4 = vld [vmem:[#allocation56_spill] sm:$0xff] }
 0xe3c   : > { %v6022_v40 = vpop.permute.xlu0 %6021  ;;  %6476 = vmatprep.subr.mxu0 %v6102_v48 }
 0xe3d   : > { %v6037_v13 = vsel %vm1256_vm6, %v6022_v40, %v6024_v61  ;;  %v6052_v39 = vsel %vm1256_vm6, 0.0, %v6022_v40  ;;  %6477 = vmatpush1.msra.mxu0 %v6101_v28  ;;  %v12288_v40 = vld [vmem:[#allocation55_spill] sm:$0xff] }
 0xe3e   : > { %v6053_v2 = vmul.f32 %v6052_v39, %v12283_v62  ;;  %v6054_v14 = vmul.f32 %v6037_v13, %v12284_v18  ;;  %v11595_v39 = vld [vmem:[%s11731_s12] sm:$0xff] }
 0xe3f   : > { %v11579_v44 = vpop.permute.xlu1 %6123 }
 0xe40   : > { %v6122_v34 = vpop.permute.xlu0 %6121  ;;  %6478 = vmatprep.subr.mxu0 %v6054_v14  ;;  %v12289_v14 = vld [vmem:[#allocation82_spill] sm:$0xff] }
 0xe41   : > { %v6134_v35 = vsel %vm1514_vm4, %v6120_v15, %v6122_v34  ;;  %v6135_v26 = vsel %vm1514_vm4, %v6122_v34, %v11579_v44  ;;  %6479 = vmatpush1.msra.mxu0 %v6053_v2 }
 0xe42   : > { %v6151_v6 = vmul.f32 %v6134_v35, %v12285_v0  ;;  %v6152_v52 = vmul.f32 %v6135_v26, %v12286_v11  ;;  %v12290_v35 = vld [vmem:[#allocation30_spill] sm:$0xff] }
 0xe43   : > { %v5976_v10 = vpop.permute.xlu1 %5975 }
 0xe44   : > { %6545 = vmatprep.subr.mxu1 %v6152_v52  ;;  %v5974_v51 = vpop.permute.xlu0 %5973  ;;  %v12291_v52 = vld [vmem:[#allocation86_spill] sm:$0xff] }
 0xe45   : > { %v5989_v19 = vsel %vm1127_vm7, %v5974_v51, %v5976_v10  ;;  %v6004_v28 = vsel %vm1127_vm7, 0.0, %v5974_v51  ;;  %6546 = vmatpush1.msra.mxu1 %v6151_v6 }
 0xe46   : > { %v6005_v48 = vmul.f32 %v6004_v28, %v12287_v4  ;;  %v6006_v15 = vmul.f32 %v5989_v19, %v12288_v40  ;;  %v12292_v19 = vld [vmem:[#allocation84_spill] sm:$0xff] }
 0xe47   : > { %v11590_v13 = vpop.permute.xlu1 %6075 }
 0xe48   : > { %v6074_v62 = vpop.permute.xlu0 %6073  ;;  %6480 = vmatprep.subr.mxu0 %v6006_v15 }
 0xe49   : > { %v6086_v2 = vsel %vm1385_vm5, %v6072_v41, %v6074_v62  ;;  %v6087_v18 = vsel %vm1385_vm5, %v6074_v62, %v11590_v13  ;;  %6481 = vmatpush1.msra.mxu0 %v6005_v48 }
 0xe4a   : > { %v6103_v34 = vmul.f32 %v6086_v2, %v12289_v14  ;;  %v6104_v26 = vmul.f32 %v6087_v18, %v12290_v35  ;;  %6924 = vmatmul.mubr.msk.f32.vlgmr.msra.gmra.mxu0 %vm6446_vm9, %v11595_v39  ;;  %v12293_v35 = vld [vmem:[#allocation87_spill] sm:$0xff] }
 0xe4b   : > { %v11604_v0 = vpop.permute.xlu1 %6027  ;;  %6656 = vmatprep.mubr.f32.mxu0 %v7093_v32 }
 0xe4c   : > { %6547 = vmatprep.subr.mxu1 %v6104_v26  ;;  %v6026_v6 = vpop.permute.xlu0 %6025 }
 0xe4d   : > { %v6038_v11 = vsel %vm1256_vm6, %v6024_v61, %v6026_v6  ;;  %v6039_v41 = vsel %vm1256_vm6, %v6026_v6, %v11604_v0  ;;  %6548 = vmatpush1.msra.mxu1 %v6103_v34 }
 0xe4e   : > { %v6055_v51 = vmul.f32 %v6038_v11, %v12291_v52  ;;  %v6056_v28 = vmul.f32 %v6039_v41, %v12292_v19 }
 0xe4f   : > { %v6338_v4 = vpop.permute.xlu1 %6337 }
 0xe50   : > { %6549 = vmatprep.subr.mxu1 %v6056_v28  ;;  %v6336_v48 = vpop.permute.xlu0 %6335 }
 0xe51   : > { %v6345_v40 = vsel %vm2094_vm8, %v11521_v38, %v6336_v48  ;;  %v6346_v15 = vsel %vm2094_vm8, %v6336_v48, %v6338_v4  ;;  %6550 = vmatpush1.msra.mxu1 %v6055_v51  ;;  %v12294_v38 = vld [vmem:[#allocation88_spill] sm:$0xff] }
 0xe52   : > { %v6361_v62 = vmul.f32 %v11272_v27, %v6345_v40  ;;  %v6362_v61 = vmul.f32 %v11278_v12, %v6346_v15 }
 0xe53   : > { %v11617_v2 = vpop.permute.xlu1 %5979 }
 0xe54   : > { %v5978_v18 = vpop.permute.xlu0 %5977  ;;  %6606 = vmatprep.subr.mxu0 %v6362_v61 }
 0xe55   : > { %v5990_v14 = vsel %vm1127_vm7, %v5976_v10, %v5978_v18  ;;  %v5991_v34 = vsel %vm1127_vm7, %v5978_v18, %v11617_v2  ;;  %6607 = vmatpush1.msra.mxu0 %v6361_v62 }
 0xe56   : > { %v6007_v26 = vmul.f32 %v5990_v14, %v12293_v35  ;;  %v6008_v6 = vmul.f32 %v5991_v34, %v12294_v38  ;;  %v6170_v38 = vmul.f32 %v11443_v30, %v12196_v7 }
 0xe57   : > { %v6290_v11 = vpop.permute.xlu1 %6289 }
 0xe58   : > { %6551 = vmatprep.subr.mxu1 %v6008_v6  ;;  %v6288_v41 = vpop.permute.xlu0 %6287 }
 0xe59   : > { %v6297_v27 = vsel %vm1965_vm1, %v11538_v57, %v6288_v41  ;;  %v6298_v12 = vsel %vm1965_vm1, %v6288_v41, %v6290_v11  ;;  %6552 = vmatpush1.msra.mxu1 %v6007_v26 }
 0xe5a   : > { %v6313_v52 = vmul.f32 %v6297_v27, %v12251_v56  ;;  %v6314_v10 = vmul.f32 %v6298_v12, %v12252_v37  ;;  %6925 = vmatmul.mubr.msk.f32.vlgmr.msra.gmra.mxu1 %vm6446_vm9, %v11595_v39 }
 0xe5b   : > { %v6242_v51 = vpop.permute.xlu1 %6241  ;;  %6727 = vmatprep.mubr.f32.mxu1 %v7093_v32 }
 0xe5c   : > { %v6240_v19 = vpop.permute.xlu0 %6239  ;;  %6608 = vmatprep.subr.mxu0 %v6314_v10 }
 0xe5d   : > { %v6249_v28 = vsel %vm1836_vm2, %v11547_v36, %v6240_v19  ;;  %v6250_v57 = vsel %vm1836_vm2, %v6240_v19, %v6242_v51  ;;  %6609 = vmatpush1.msra.mxu0 %v6313_v52 }
 0xe5e   : > { %v6265_v48 = vmul.f32 %v6249_v28, %v12191_v24  ;;  %v6266_v56 = vmul.f32 %v6250_v57, %v12190_v47 }
 0xe5f   : > { %v6192_v40 = vpop.permute.xlu1 %6191 }
 0xe60   : > { %v6340_v37 = vpop.permute.xlu0 %6339  ;;  %6610 = vmatprep.subr.mxu0 %v6266_v56  ;;  %v6201_v18 = vsel %vm1707_vm3, %v11560_v21, %v6192_v40 }
 0xe61   : > { %v6347_v15 = vsel %vm2094_vm8, %v6338_v4, %v6340_v37  ;;  %v6356_v62 = vsel %vm2094_vm8, %v6340_v37, 0.0  ;;  %6611 = vmatpush1.msra.mxu0 %v6265_v48 }
 0xe62   : > { %v6363_v32 = vmul.f32 %v11297_v25, %v6347_v15  ;;  %v6364_v61 = vmul.f32 %v11303_v63, %v6356_v62  ;;  %v6217_v63 = vmul.f32 %v6201_v18, %v12195_v23 }
 0xe63   : > { %v6292_v36 = vpop.permute.xlu1 %6291 }
 0xe64   : > { %v6299_v24 = vsel %vm1965_vm1, %v6290_v11, %v6292_v36  ;;  %v6308_v47 = vsel %vm1965_vm1, %v6292_v36, 0.0  ;;  %6677 = vmatprep.subr.mxu1 %v6364_v61  ;;  %v6194_v14 = vpop.permute.xlu0 %6193  ;;  %v12295_v36 = vld [vmem:[#allocation52_spill] sm:$0xff] }
 0xe65   : > { %v6315_v34 = vmul.f32 %v6299_v24, %v12189_v42  ;;  %v6316_v4 = vmul.f32 %v6308_v47, %v12188_v53  ;;  %v6202_v35 = vsel %vm1707_vm3, %v6192_v40, %v6194_v14  ;;  %6678 = vmatpush1.msra.mxu1 %v6363_v32  ;;  %v6169_v53 = vmul.f32 %v11371_v50, %v12197_v16  ;;  %v12296_v47 = vld [vmem:[#allocation57_spill] sm:$0xff] }
 0xe66   : > { %v6218_v25 = vmul.f32 %v6202_v35, %v12194_v9 }
 0xe67   : > { %v6126_v26 = vpop.permute.xlu1 %6125  ;;  %6679 = vmatprep.subr.mxu1 %v6316_v4 }
 0xe68   : > { %v6244_v21 = vpop.permute.xlu0 %6243  ;;  %6612 = vmatprep.subr.mxu0 %v6218_v25  ;;  %6680 = vmatpush1.msra.mxu1 %v6315_v34  ;;  %v6136_v41 = vsel %vm1514_vm4, %v11579_v44, %v6126_v26  ;;  %v6172_v44 = vmul.f32 %v11461_v22, %v12198_v5  ;;  %v12297_v34 = vld [vmem:[#allocation73_spill] sm:$0xff] }
 0xe69   : > { %v6251_v6 = vsel %vm1836_vm2, %v6242_v51, %v6244_v21  ;;  %v6260_v42 = vsel %vm1836_vm2, %v6244_v21, 0.0  ;;  %6613 = vmatpush1.msra.mxu0 %v6217_v63  ;;  %v6153_v50 = vmul.f32 %v6136_v41, %v9102_v1 }
 0xe6a   : > { %v6267_v9 = vmul.f32 %v6251_v6, %v12193_v58  ;;  %v6268_v23 = vmul.f32 %v6260_v42, %v12192_v3  ;;  %6614 = vmatprep.subr.mxu0 %v6170_v38  ;;  %v12299_v38 = vld [vmem:[#allocation59_spill] sm:$0xff] }
 0xe6b   : > { %6615 = vmatpush1.msra.mxu0 %v6169_v53  ;;  %v6196_v11 = vpop.permute.xlu1 %6195 }
 0xe6c   : > { %v6203_v7 = vsel %vm1707_vm3, %v6194_v14, %v6196_v11  ;;  %v6212_v30 = vsel %vm1707_vm3, %v6196_v11, 0.0  ;;  %6681 = vmatprep.subr.mxu1 %v6268_v23  ;;  %v6128_v27 = vpop.permute.xlu0 %6127 }
 0xe6d   : > { %v6219_v12 = vmul.f32 %v6203_v7, %v9096_v49  ;;  %v6220_v16 = vmul.f32 %v6212_v30, %v9110_v29  ;;  %v6137_v58 = vsel %vm1514_vm4, %v6126_v26, %v6128_v27  ;;  %6682 = vmatpush1.msra.mxu1 %v6267_v9  ;;  %v6171_v49 = vmul.f32 %v11441_v8, %v12199_v55  ;;  %v12298_v26 = vld [vmem:[#allocation34_spill] sm:$0xff] }
 0xe6e   : > { %v6154_v3 = vmul.f32 %v6137_v58, %v9114_v43 }
 0xe6f   : > { %v6080_v52 = vpop.permute.xlu1 %6079  ;;  %6683 = vmatprep.subr.mxu1 %v6220_v16 }
 0xe70   : > { %v6078_v10 = vpop.permute.xlu0 %6077  ;;  %6616 = vmatprep.subr.mxu0 %v6154_v3  ;;  %6684 = vmatpush1.msra.mxu1 %v6219_v12 }
 0xe71   : > { %v6088_v29 = vsel %vm1385_vm5, %v11590_v13, %v6078_v10  ;;  %v6089_v51 = vsel %vm1385_vm5, %v6078_v10, %v6080_v52  ;;  %6617 = vmatpush1.msra.mxu0 %v6153_v50  ;;  %6685 = vmatprep.subr.mxu1 %v6172_v44 }
 0xe72   : > { %v6105_v1 = vmul.f32 %v6088_v29, %v12200_v20  ;;  %v6106_v43 = vmul.f32 %v6089_v51, %v9125_v45  ;;  %6686 = vmatpush1.msra.mxu1 %v6171_v49 }
 0xe73   : > { %v6032_v19 = vpop.permute.xlu1 %6031 }
 0xe74   : > { %v6030_v5 = vpop.permute.xlu0 %6029  ;;  %6618 = vmatprep.subr.mxu0 %v6106_v43 }
 0xe75   : > { %v6040_v22 = vsel %vm1256_vm6, %v11604_v0, %v6030_v5  ;;  %v6041_v55 = vsel %vm1256_vm6, %v6030_v5, %v6032_v19  ;;  %6619 = vmatpush1.msra.mxu0 %v6105_v1 }
 0xe76   : > { %v6057_v8 = vmul.f32 %v6040_v22, %v9151_v60  ;;  %v6058_v13 = vmul.f32 %v6041_v55, %v9155_v17 }
 0xe77   : > { %v6132_v28 = vpop.permute.xlu1 %6131 }
 0xe78   : > { %v6130_v57 = vpop.permute.xlu0 %6129  ;;  %6620 = vmatprep.subr.mxu0 %v6058_v13 }
 0xe79   : > { %v6138_v20 = vsel %vm1514_vm4, %v6128_v27, %v6130_v57  ;;  %v6139_v45 = vsel %vm1514_vm4, %v6130_v57, %v6132_v28  ;;  %6621 = vmatpush1.msra.mxu0 %v6057_v8 }
 0xe7a   : > { %v6155_v48 = vmul.f32 %v6138_v20, %v9141_v31  ;;  %v6156_v56 = vmul.f32 %v6139_v45, %v9147_v46 }
 0xe7b   : > { %v5984_v0 = vpop.permute.xlu1 %5983 }
 0xe7c   : > { %6687 = vmatprep.subr.mxu1 %v6156_v56  ;;  %v5982_v40 = vpop.permute.xlu0 %5981 }
 0xe7d   : > { %v5992_v60 = vsel %vm1127_vm7, %v11617_v2, %v5982_v40  ;;  %v5993_v17 = vsel %vm1127_vm7, %v5982_v40, %v5984_v0  ;;  %6688 = vmatpush1.msra.mxu1 %v6155_v48 }
 0xe7e   : > { %v6009_v37 = vmul.f32 %v5992_v60, %v12255_v54  ;;  %v6010_v15 = vmul.f32 %v5993_v17, %v12256_v59 }
 0xe7f   : > { %v6084_v62 = vpop.permute.xlu1 %6083 }
 0xe80   : > { %v6082_v32 = vpop.permute.xlu0 %6081  ;;  %6622 = vmatprep.subr.mxu0 %v6010_v15 }
 0xe81   : > { %v6090_v31 = vsel %vm1385_vm5, %v6080_v52, %v6082_v32  ;;  %v6091_v46 = vsel %vm1385_vm5, %v6082_v32, %v6084_v62  ;;  %6623 = vmatpush1.msra.mxu0 %v6009_v37 }
 0xe82   : > { %v6107_v61 = vmul.f32 %v6090_v31, %v9161_v33  ;;  %v6108_v18 = vmul.f32 %v6091_v46, %v12295_v36  ;;  %6926 = vmatmul.mubr.msk.f32.vlgmr.msra.gmra.mxu0 %vm6446_vm9, %v11595_v39 }
 0xe83   : > { %v6036_v2 = vpop.permute.xlu1 %6035 }
 0xe84   : > { %6689 = vmatprep.subr.mxu1 %v6108_v18  ;;  %v6034_v54 = vpop.permute.xlu0 %6033 }
 0xe85   : > { %v6042_v59 = vsel %vm1256_vm6, %v6032_v19, %v6034_v54  ;;  %v6043_v24 = vsel %vm1256_vm6, %v6034_v54, %v6036_v2  ;;  %6690 = vmatpush1.msra.mxu1 %v6107_v61  ;;  %v6810_v2 = vld [vmem:[%s11733_s14] sm:$0xff] }
 0xe86   : > { %v6059_v14 = vmul.f32 %v6042_v59, %v12296_v47  ;;  %v6060_v4 = vmul.f32 %v6043_v24, %v12297_v34 }
 0xe87   : > { %v5988_v35 = vpop.permute.xlu1 %5987 }
 0xe88   : > { %6691 = vmatprep.subr.mxu1 %v6060_v4  ;;  %v5986_v33 = vpop.permute.xlu0 %5985 }
 0xe89   : > { %v5994_v25 = vsel %vm1127_vm7, %v5984_v0, %v5986_v33  ;;  %v5995_v63 = vsel %vm1127_vm7, %v5986_v33, %v5988_v35  ;;  %6692 = vmatpush1.msra.mxu1 %v6059_v14 }
 0xe8a   : > { %v6011_v21 = vmul.f32 %v5994_v25, %v12298_v26  ;;  %v6012_v6 = vmul.f32 %v5995_v63, %v12299_v38 }
 0xe8c   : > { %6693 = vmatprep.subr.mxu1 %v6012_v6 }
 0xe8d   : > { %6694 = vmatpush1.msra.mxu1 %v6011_v21 }
 0xe8e   : > { %6927 = vmatmul.mubr.msk.f32.vlgmr.msra.gmra.mxu1 %vm6446_vm9, %v11595_v39  ;;  %v6796_v39 = vld [vmem:[%s11732_s13] sm:$0xff] }
 0xf0a   : > { %v6516_v42 = vpop.f32.mrf.mxu0 }
 0xf0c   : > { %v6518_v53 = vpop.f32.mrf.mxu0 }
 0xf0d   : > { %v6734_v9 = vadd.f32 %v6518_v53, %v6516_v42 }
 0xf1a   : > { %v6587_v23 = vpop.f32.mrf.mxu1 }
 0xf1b   : > { %v6735_v11 = vadd.f32 %v6734_v9, %v6587_v23 }
 0xf1c   : > { %v6589_v41 = vpop.f32.mrf.mxu1 }
 0xf1d   : > { %v6736_v30 = vadd.f32 %v6735_v11, %v6589_v41 }
 0xf42   : > { %v6658_v7 = vpop.f32.mrf.mxu0 }
 0xf43   : > { %v6737_v27 = vadd.f32 %v6736_v30, %v6658_v7 }
 0xf44   : > { %v6660_v12 = vpop.f32.mrf.mxu0 }
 0xf45   : > { %v6738_v16 = vadd.f32 %v6737_v27, %v6660_v12 }
 0xf4e   : > { %v6729_v58 = vpop.f32.mrf.mxu1 }
 0xf4f   : > { %v6739_v3 = vadd.f32 %v6738_v16, %v6729_v58 }
 0xf50   : > { %v6731_v50 = vpop.f32.mrf.mxu1 }
 0xf51   : > { %v6740_v52 = vadd.f32 %v6739_v3, %v6731_v50 }
 0xf53   : > { %6741 = vadd.xlane.f32.xlu0 %v6740_v52 }
 0xf69   : > { %6799 = vperm.xlu0 %6966, %v6796_v39  }
 0xfdc   : > { %v6742_v44 = vpop.xlane.xlu0 %6741 }
 0xfdd   : > { %v6743_v10 = vrot.slane %v6742_v44, 4 }
 0xfdf   : > { %v6744_v49 = vadd.f32 %v6743_v10, %v6742_v44 }
 0xfe1   : > { %v6745_v29 = vrot.slane %v6744_v49, 2 }
 0xfe3   : > { %v6746_v51 = vadd.f32 %v6745_v29, %v6744_v49 }
 0xfe5   : > { %v6747_v1 = vrot.slane %v6746_v51, 1 }
 0xfe7   : > { %v6748_v43 = vadd.f32 %v6747_v1, %v6746_v51 }
 0xfe9   : > { %6944 = vpush %v6748_v43 }
0x101a   : > { %s6945_s30 = spop %6944 }
0x101b   : > { %v6750_v19 = vstv %s6945_s30 }
0x101c   : > { %v6751_v5 = vmul.f32 0.00012207031, %v6750_v19 }
0x101e   : > { %v6752_v22 = vsub.f32 %v6516_v42, %v6751_v5  ;;  %v6753_v55 = vsub.f32 %v6518_v53, %v6751_v5  ;;  %v6754_v8 = vsub.f32 %v6587_v23, %v6751_v5  ;;  %v6755_v13 = vsub.f32 %v6589_v41, %v6751_v5  ;;  %v6800_v42 = vpop.permute.xlu0 %6799 }
0x101f   : > { %v6756_v20 = vsub.f32 %v6658_v7, %v6751_v5  ;;  %v6757_v56 = vsub.f32 %v6660_v12, %v6751_v5  ;;  %v6758_v60 = vsub.f32 %v6729_v58, %v6751_v5  ;;  %v6759_v15 = vsub.f32 %v6731_v50, %v6751_v5 }
0x1020   : > { %v6760_v28 = vmul.f32 %v6752_v22, %v6752_v22  ;;  %v6761_v57 = vmul.f32 %v6753_v55, %v6753_v55  ;;  %v6762_v45 = vmul.f32 %v6754_v8, %v6754_v8  ;;  %v6763_v0 = vmul.f32 %v6755_v13, %v6755_v13 }
0x1021   : > { %v6764_v17 = vmul.f32 %v6756_v20, %v6756_v20  ;;  %v6765_v62 = vmul.f32 %v6757_v56, %v6757_v56  ;;  %v6766_v31 = vmul.f32 %v6758_v60, %v6758_v60  ;;  %v6767_v61 = vmul.f32 %v6759_v15, %v6759_v15 }
0x1022   : > { %v6768_v48 = vadd.f32 %v6761_v57, %v6760_v28 }
0x1024   : > { %v6769_v40 = vadd.f32 %v6768_v48, %v6762_v45 }
0x1026   : > { %v6770_v37 = vadd.f32 %v6769_v40, %v6763_v0 }
0x1028   : > { %v6771_v32 = vadd.f32 %v6770_v37, %v6764_v17 }
0x102a   : > { %v6772_v46 = vadd.f32 %v6771_v32, %v6765_v62 }
0x102c   : > { %v6773_v36 = vadd.f32 %v6772_v46, %v6766_v31 }
0x102e   : > { %v6774_v18 = vadd.f32 %v6773_v36, %v6767_v61 }
0x1030   : > { %6775 = vadd.xlane.f32.xlu1 %v6774_v18 }
0x1041   : > { %6813 = vperm.xlu1 %6967, %v6810_v2  }
0x10b9   : > { %v6776_v54 = vpop.xlane.xlu1 %6775 }
0x10ba   : > { %v6777_v59 = vrot.slane %v6776_v54, 4 }
0x10bc   : > { %v6778_v24 = vadd.f32 %v6777_v59, %v6776_v54 }
0x10bd   : > { %v6814_v12 = vpop.permute.xlu1 %6813 }
0x10be   : > { %v6779_v47 = vrot.slane %v6778_v24, 2 }
0x10c0   : > { %v6780_v14 = vadd.f32 %v6779_v47, %v6778_v24 }
0x10c2   : > { %v6781_v34 = vrot.slane %v6780_v14, 1 }
0x10c4   : > { %v6782_v4 = vadd.f32 %v6781_v34, %v6780_v14 }
0x10c6   : > { %6946 = vpush %v6782_v4 }
0x10f7   : > { %s6947_s22 = spop %6946 }
0x10f8   : > { %v6784_v35 = vstv %s6947_s22 }
0x10f9   : > { %v6785_v33 = vmul.f32 0.00012207031, %v6784_v35 }
0x10fb   : > { %v6786_v25 = vadd.f32 1e-05, %v6785_v33 }
0x10fd   : > { %7054 = vrsqrt.f32 %v6786_v25 }
0x110a   : > { %v7055_v63 = vpop.eup %7054 }
0x110b   : > { %v6788_v26 = vmul.f32 %v7055_v63, %v6752_v22  ;;  %v6789_v21 = vmul.f32 %v7055_v63, %v6753_v55  ;;  %v6790_v38 = vmul.f32 %v7055_v63, %v6754_v8  ;;  %v6791_v6 = vmul.f32 %v7055_v63, %v6755_v13 }
0x110c   : > { %v6792_v53 = vmul.f32 %v7055_v63, %v6756_v20  ;;  %v6793_v9 = vmul.f32 %v7055_v63, %v6757_v56  ;;  %v6794_v23 = vmul.f32 %v7055_v63, %v6758_v60  ;;  %v6795_v11 = vmul.f32 %v7055_v63, %v6759_v15 }
0x110d   : > { %v6802_v41 = vmul.f32 %v6800_v42, %v6788_v26  ;;  %v6803_v7 = vmul.f32 %v6800_v42, %v6789_v21  ;;  %v6804_v30 = vmul.f32 %v6800_v42, %v6790_v38  ;;  %v6805_v27 = vmul.f32 %v6800_v42, %v6791_v6 }
0x110e   : > { %v6806_v16 = vmul.f32 %v6800_v42, %v6792_v53  ;;  %v6807_v58 = vmul.f32 %v6800_v42, %v6793_v9  ;;  %v6808_v3 = vmul.f32 %v6800_v42, %v6794_v23  ;;  %v6809_v50 = vmul.f32 %v6800_v42, %v6795_v11 }
0x110f   : > { %v6816_v52 = vadd.f32 %v6814_v12, %v6802_v41  ;;  %v6817_v39 = vadd.f32 %v6814_v12, %v6803_v7  ;;  %v6818_v44 = vadd.f32 %v6814_v12, %v6804_v30  ;;  %v6819_v10 = vadd.f32 %v6814_v12, %v6805_v27 }
0x1110   : > { %v6820_v49 = vadd.f32 %v6814_v12, %v6806_v16  ;;  %v6821_v29 = vadd.f32 %v6814_v12, %v6807_v58  ;;  %v6822_v51 = vadd.f32 %v6814_v12, %v6808_v3  ;;  %v6823_v1 = vadd.f32 %v6814_v12, %v6809_v50 }
0x1111   : > { %6824 = vst [vmem:[%s494_s27] sm:$0xff] %v6816_v52  ;;  %6825 = vst [vmem:[%s494_s27 + $0x8] sm:$0xff] %v6817_v39 }
0x1112   : > { %6826 = vst [vmem:[%s494_s27 + $0x10] sm:$0xff] %v6818_v44  ;;  %6827 = vst [vmem:[%s494_s27 + $0x18] sm:$0xff] %v6819_v10 }
0x1113   : > { %6828 = vst [vmem:[%s494_s27 + $0x20] sm:$0xff] %v6820_v49  ;;  %6829 = vst [vmem:[%s494_s27 + $0x28] sm:$0xff] %v6821_v29 }
0x1114   : > { %6830 = vst [vmem:[%s494_s27 + $0x30] sm:$0xff] %v6822_v51  ;;  %6831 = vst [vmem:[%s494_s27 + $0x38] sm:$0xff] %v6823_v1 }
0x1115 PF: > { %s25_s18 = sadd.s32 1, %s7082_s18  }
0x1116   : > { %p22_p4 = scmp.ge.s32.totalorder %s25_s18, 4  }
0x1118   :  { %24 = sbr.rel (!%p22_p4) target bundleno = 1 (0x1), region = 110 }

</bundles_post_ra>
